<compile_context>
chip_gen: v6e
topology: v6e:2x2x1
jax: 0.10.0
libtpu: 0.0.40
codegen_flags: <defaults>
</compile_context>

<pallas_src>
import numpy as np
import jax
import jax.numpy as jnp
from jax.experimental import pallas as pl
from jax.experimental.pallas import tpu as pltpu

EPS = 1e-5
VMEM_SPEC = pl.BlockSpec(memory_space=pltpu.MemorySpace.VMEM)

DOWN_CH = [(1, 2), (2, 4), (4, 8), (8, 16), (16, 32)]
UP_CH = [(32, 16), (16, 8), (8, 4), (4, 2), (2, 2)]


# ---------------------------------------------------------------------------
# host-side (trace-time) constants
# ---------------------------------------------------------------------------
def _make_sel(n, ho, wo):
    """0/1 gather matrix: prev-layer raster (n, 2ho, 2wo, C) -> 9 row-stacked conv
    taps (kh-major), each tap in raster order over the (n, ho, wo) output grid.
    Out-of-bounds taps (the implicit pad=1 ring) are all-zero rows."""
    hi, wi = 2 * ho, 2 * wo
    m, mp = n * ho * wo, n * hi * wi
    sel = np.zeros((9 * m, mp), np.float32)
    for kh in range(3):
        for kw in range(3):
            k = kh * 3 + kw
            for b in range(n):
                for i in range(ho):
                    r = 2 * i + kh - 1
                    if r < 0 or r >= hi:
                        continue
                    for j in range(wo):
                        s = 2 * j + kw - 1
                        if s < 0 or s >= wi:
                            continue
                        sel[k * m + (b * ho + i) * wo + j,
                            (b * hi + r) * wi + s] = 1.0
    return sel


def _final_index(n, cout, levels):
    """Flat indices into the kernel's (4**(levels-1)*n, 4*cout) output slab that
    realize the (N*C, H, W) depth-to-space layout of the 5 transposed convs."""
    h = w = 2 ** levels
    idx = np.empty((n * cout, h, w), np.int32)
    for b in range(n):
        for c in range(cout):
            for hh in range(h):
                for ww in range(w):
                    r, stride = b, n
                    for lvl in range(1, levels):
                        dh = (hh >> (levels - lvl)) & 1
                        dw = (ww >> (levels - lvl)) & 1
                        r += (dh * 2 + dw) * stride
                        stride *= 4
                    col = ((hh & 1) * 2 + (ww & 1)) * cout + c
                    idx[b * cout + c, hh, ww] = r * (4 * cout) + col
    return idx


# ---------------------------------------------------------------------------
# the fused kernel (entire forward pass, VMEM resident)
# ---------------------------------------------------------------------------
def colorizer_kernel(p1, dw1, dv1, s2, dw2, dv2, s3, dw3, dv3,
                     s4, dw4, dv4, s5, dw5, dv5,
                     uw1, ug1, uw2, ug2, uw3, ug3, uw4, ug4, uw5, ub5,
                     o_ref, sc1, sc2, sc3, sc4):

    def conv_epilogue(y_pre, vec, m_rows):
        # bias -> ReLU -> training-mode BatchNorm (biased stats, two-pass variance)
        b, gamma, beta = vec[0:1, :], vec[1:2, :], vec[2:3, :]
        y = jnp.maximum(y_pre + b, 0.0)
        inv_m = 1.0 / float(m_rows)
        mean = jnp.sum(y, axis=0, keepdims=True) * inv_m
        d = y - mean
        var = jnp.sum(d * d, axis=0, keepdims=True) * inv_m
        scale = gamma * jax.lax.rsqrt(var + EPS)          # hoisted scale/shift
        return d * scale + beta

    # ---------------- down path: Conv3x3(s2, p1) + ReLU + BN ----------------
    # layer 1: the (M, 9) im2col patch matrix of the raw input comes from the host.
    x = jnp.dot(p1[...], dw1[...], preferred_element_type=jnp.float32)
    x = conv_epilogue(x, dv1[...], p1.shape[0])

    # layers 2..5: in-kernel im2col = one gather-as-matmul with a constant 0/1
    # selection matrix, then 9 accumulating MXU dots against the tap weights.
    def down_layer(prev, sel_ref, w_ref, vec_ref, cin):
        taps = jnp.dot(sel_ref[...], prev, preferred_element_type=jnp.float32)
        m = sel_ref.shape[0] // 9
        w9 = w_ref[...]
        acc = jnp.dot(taps[0:m, :], w9[0:cin, :],
                      preferred_element_type=jnp.float32)
        for k in range(1, 9):
            acc = acc + jnp.dot(taps[k * m:(k + 1) * m, :],
                                w9[k * cin:(k + 1) * cin, :],
                                preferred_element_type=jnp.float32)
        return conv_epilogue(acc, vec_ref[...], m)

    x = down_layer(x, s2, dw2, dv2, DOWN_CH[1][0])
    x = down_layer(x, s3, dw3, dv3, DOWN_CH[2][0])
    x = down_layer(x, s4, dw4, dv4, DOWN_CH[3][0])
    x = down_layer(x, s5, dw5, dv5, DOWN_CH[4][0])

    # ---------------- up path: ConvTranspose2x2(s2) + BN ----------------
    # One lane-packed (M, 4*Cout) dot per layer; BN pools the 4 offset groups.
    # The ConvTranspose bias cancels exactly under batch-stat BN -> omitted here.
    def up_layer_bn(xin, w_ref, gb_ref, scratch):
        slab = jnp.dot(xin, w_ref[...], preferred_element_type=jnp.float32)
        m, c4 = slab.shape
        c = c4 // 4
        gb = gb_ref[...]
        gamma, beta = gb[0:1, :], gb[1:2, :]
        inv_cnt = 1.0 / float(4 * m)
        colsum = jnp.sum(slab, axis=0, keepdims=True)
        mean = (colsum[:, 0:c] + colsum[:, c:2 * c]
                + colsum[:, 2 * c:3 * c] + colsum[:, 3 * c:4 * c]) * inv_cnt
        d = [slab[:, p * c:(p + 1) * c] - mean for p in range(4)]
        sq = d[0] * d[0] + d[1] * d[1] + d[2] * d[2] + d[3] * d[3]
        var = jnp.sum(sq, axis=0, keepdims=True) * inv_cnt
        scale = gamma * jax.lax.rsqrt(var + EPS)
        # fused 2x2 depth-to-space (offset-major row order) via VMEM scratch.
        for p in range(4):
            scratch[p * m:(p + 1) * m, :] = d[p] * scale + beta
        return scratch[...]

    x = up_layer_bn(x, uw1, ug1, sc1)
    x = up_layer_bn(x, uw2, ug2, sc2)
    x = up_layer_bn(x, uw3, ug3, sc3)
    x = up_layer_bn(x, uw4, ug4, sc4)

    # up5: ConvTranspose + bias, no BN; emit the lane-packed (M, 4*Cout) slab.
    o_ref[...] = (jnp.dot(x, uw5[...], preferred_element_type=jnp.float32)
                  + ub5[...])


# ---------------------------------------------------------------------------
# wrapper
# ---------------------------------------------------------------------------
def colorizer_forward(x_nchw, params):
    x = x_nchw.astype(jnp.float32)
    n, cin0, h, w = x.shape
    assert cin0 == 1 and h == 32 and w == 32

    # boundary glue (input only, ~2 KiB): im2col for the first conv.
    xh = jnp.transpose(x, (0, 2, 3, 1))                       # NHWC
    xp = jnp.pad(xh, ((0, 0), (1, 1), (1, 1), (0, 0)))
    span = 2 * (h // 2) - 1
    taps0 = [xp[:, kh:kh + span:2, kw:kw + span:2, :]
             for kh in range(3) for kw in range(3)]
    patches1 = jnp.concatenate(taps0, axis=3).reshape(n * (h // 2) * (w // 2), 9)

    inputs = [patches1]
    for li, (wt, b, g, be) in enumerate(params["down"]):
        cout, cin = wt.shape[0], wt.shape[1]
        if li > 0:
            ho = h >> (li + 1)
            inputs.append(jnp.asarray(_make_sel(n, ho, ho)))
        inputs.append(jnp.transpose(wt, (2, 3, 1, 0)).reshape(9 * cin, cout))
        inputs.append(jnp.stack([b, g, be], axis=0))          # (3, cout)

    for li, p in enumerate(params["up"]):
        if li < 4:
            wt, b, g, be = p                                  # bias cancels under BN
            cin, cout = wt.shape[0], wt.shape[1]
            inputs.append(jnp.transpose(wt, (0, 2, 3, 1)).reshape(cin, 4 * cout))
            inputs.append(jnp.stack([g, be], axis=0))         # (2, cout)
        else:
            wt, b = p
            cin, cout = wt.shape[0], wt.shape[1]
            inputs.append(jnp.transpose(wt, (0, 2, 3, 1)).reshape(cin, 4 * cout))
            inputs.append(jnp.tile(b, 4).reshape(1, 4 * cout))

    scratch_shapes = []
    m = n
    for (_, cout) in UP_CH[:4]:
        scratch_shapes.append(pltpu.VMEM((4 * m, cout), jnp.float32))
        m *= 4
    c_last = UP_CH[-1][1]

    slab = pl.pallas_call(
        colorizer_kernel,
        out_shape=jax.ShapeDtypeStruct((m, 4 * c_last), jnp.float32),
        in_specs=[VMEM_SPEC] * len(inputs),
        out_specs=VMEM_SPEC,
        scratch_shapes=scratch_shapes,
        compiler_params=pltpu.CompilerParams(vmem_limit_bytes=32 * 1024 * 1024),
    )(*inputs)

    # boundary glue (output only, ~16 KiB): constant-index depth-to-space to
    # (N*C, H, W) == torch.flatten(out, 0, 1).
    idx = jnp.asarray(_final_index(n, c_last, levels=5))
    return jnp.take(slab.reshape(-1), idx)


# ---------------------------------------------------------------------------
# parameters (deterministic synthetic init; BN gamma=1, beta=0 like torch)
# ---------------------------------------------------------------------------
def init_params(key):
    params = {"down": [], "up": []}
    for (cin, cout) in DOWN_CH:
        key, k1, k2 = jax.random.split(key, 3)
        wt = jax.random.normal(k1, (cout, cin, 3, 3), jnp.float32) * 0.1
        b = jax.random.normal(k2, (cout,), jnp.float32) * 0.1
        params["down"].append((wt, b, jnp.ones((cout,), jnp.float32),
                               jnp.zeros((cout,), jnp.float32)))
    for i, (cin, cout) in enumerate(UP_CH):
        key, k1, k2 = jax.random.split(key, 3)
        wt = jax.random.normal(k1, (cin, cout, 2, 2), jnp.float32) * 0.1
        b = jax.random.normal(k2, (cout,), jnp.float32) * 0.1
        if i < 4:
            params["up"].append((wt, b, jnp.ones((cout,), jnp.float32),
                                 jnp.zeros((cout,), jnp.float32)))
        else:
            params["up"].append((wt, b))
    return params


if __name__ == "__main__":
    key = jax.random.PRNGKey(0)
    x = jax.random.normal(key, (2, 1, 32, 32), dtype=jnp.float32)
    params = init_params(jax.random.PRNGKey(1))
    out = jax.jit(colorizer_forward)(x, params)
    out = jax.block_until_ready(out)
    assert out.shape == (4, 32, 32), out.shape
    assert bool(jnp.all(jnp.isfinite(out)))
    print("KERNEL_OK")
</pallas_src>

<mosaic_0001>
module attributes {stable_mosaic.version = 11 : i64} {
  func.func @colorizer_kernel(%arg0: memref<512x9xf32, #tpu.memory_space<vmem>>, %arg1: memref<9x2xf32, #tpu.memory_space<vmem>>, %arg2: memref<3x2xf32, #tpu.memory_space<vmem>>, %arg3: memref<1152x512xf32, #tpu.memory_space<vmem>>, %arg4: memref<18x4xf32, #tpu.memory_space<vmem>>, %arg5: memref<3x4xf32, #tpu.memory_space<vmem>>, %arg6: memref<288x128xf32, #tpu.memory_space<vmem>>, %arg7: memref<36x8xf32, #tpu.memory_space<vmem>>, %arg8: memref<3x8xf32, #tpu.memory_space<vmem>>, %arg9: memref<72x32xf32, #tpu.memory_space<vmem>>, %arg10: memref<72x16xf32, #tpu.memory_space<vmem>>, %arg11: memref<3x16xf32, #tpu.memory_space<vmem>>, %arg12: memref<18x8xf32, #tpu.memory_space<vmem>>, %arg13: memref<144x32xf32, #tpu.memory_space<vmem>>, %arg14: memref<3x32xf32, #tpu.memory_space<vmem>>, %arg15: memref<32x64xf32, #tpu.memory_space<vmem>>, %arg16: memref<2x16xf32, #tpu.memory_space<vmem>>, %arg17: memref<16x32xf32, #tpu.memory_space<vmem>>, %arg18: memref<2x8xf32, #tpu.memory_space<vmem>>, %arg19: memref<8x16xf32, #tpu.memory_space<vmem>>, %arg20: memref<2x4xf32, #tpu.memory_space<vmem>>, %arg21: memref<4x8xf32, #tpu.memory_space<vmem>>, %arg22: memref<2x2xf32, #tpu.memory_space<vmem>>, %arg23: memref<2x8xf32, #tpu.memory_space<vmem>>, %arg24: memref<1x8xf32, #tpu.memory_space<vmem>>, %arg25: memref<512x8xf32, #tpu.memory_space<vmem>>, %arg26: memref<8x16xf32, #tpu.memory_space<vmem>>, %arg27: memref<32x8xf32, #tpu.memory_space<vmem>>, %arg28: memref<128x4xf32, #tpu.memory_space<vmem>>, %arg29: memref<512x2xf32, #tpu.memory_space<vmem>>) attributes {dimension_semantics = [], scalar_prefetch = 0 : i64, scratch_operands = 4 : i64, tpu.core_type = #tpu.core_type<tc>} {
    %c0 = arith.constant 0 : index
    %c0_0 = arith.constant 0 : index
    %0 = vector.load %arg0[%c0, %c0_0] : memref<512x9xf32, #tpu.memory_space<vmem>>, vector<512x9xf32>
    %c0_1 = arith.constant 0 : index
    %c0_2 = arith.constant 0 : index
    %1 = vector.load %arg1[%c0_1, %c0_2] : memref<9x2xf32, #tpu.memory_space<vmem>>, vector<9x2xf32>
    %cst = arith.constant dense<0.000000e+00> : vector<512x2xf32>
    %2 = tpu.matmul %0, %1, %cst {dimension_numbers = #tpu.dot_dimension_numbers<[1], [0], [0], [1], [0, 0, 1, 1], [], []>} : vector<512x9xf32>, vector<9x2xf32>, vector<512x2xf32> -> vector<512x2xf32>
    %c0_3 = arith.constant 0 : index
    %c0_4 = arith.constant 0 : index
    %3 = vector.load %arg2[%c0_3, %c0_4] : memref<3x2xf32, #tpu.memory_space<vmem>>, vector<3x2xf32>
    %4 = vector.extract_strided_slice %3 {offsets = [0, 0], sizes = [1, 2], strides = [1, 1]} : vector<3x2xf32> to vector<1x2xf32>
    %5 = vector.extract_strided_slice %3 {offsets = [1, 0], sizes = [1, 2], strides = [1, 1]} : vector<3x2xf32> to vector<1x2xf32>
    %6 = vector.extract_strided_slice %3 {offsets = [2, 0], sizes = [1, 2], strides = [1, 1]} : vector<3x2xf32> to vector<1x2xf32>
    %7 = vector.broadcast %4 : vector<1x2xf32> to vector<512x2xf32>
    %8 = arith.addf %2, %7 : vector<512x2xf32>
    %cst_5 = arith.constant 0.000000e+00 : f32
    %9 = vector.broadcast %cst_5 : f32 to vector<512x2xf32>
    %10 = arith.maximumf %8, %9 : vector<512x2xf32>
    %cst_6 = arith.constant dense<0.000000e+00> : vector<2xf32>
    %11 = vector.multi_reduction <add>, %10, %cst_6 [0] : vector<512x2xf32> to vector<2xf32>
    %12 = vector.shape_cast %11 : vector<2xf32> to vector<1x2xf32>
    %cst_7 = arith.constant 0.001953125 : f32
    %13 = vector.broadcast %cst_7 : f32 to vector<1x2xf32>
    %14 = arith.mulf %12, %13 : vector<1x2xf32>
    %15 = vector.broadcast %14 : vector<1x2xf32> to vector<512x2xf32>
    %16 = arith.subf %10, %15 : vector<512x2xf32>
    %17 = arith.mulf %16, %16 : vector<512x2xf32>
    %cst_8 = arith.constant dense<0.000000e+00> : vector<2xf32>
    %18 = vector.multi_reduction <add>, %17, %cst_8 [0] : vector<512x2xf32> to vector<2xf32>
    %19 = vector.shape_cast %18 : vector<2xf32> to vector<1x2xf32>
    %cst_9 = arith.constant 0.001953125 : f32
    %20 = vector.broadcast %cst_9 : f32 to vector<1x2xf32>
    %21 = arith.mulf %19, %20 : vector<1x2xf32>
    %cst_10 = arith.constant 9.99999974E-6 : f32
    %22 = vector.broadcast %cst_10 : f32 to vector<1x2xf32>
    %23 = arith.addf %21, %22 : vector<1x2xf32>
    %24 = math.rsqrt %23 : vector<1x2xf32>
    %25 = arith.mulf %5, %24 : vector<1x2xf32>
    %26 = vector.broadcast %25 : vector<1x2xf32> to vector<512x2xf32>
    %27 = arith.mulf %16, %26 : vector<512x2xf32>
    %28 = vector.broadcast %6 : vector<1x2xf32> to vector<512x2xf32>
    %29 = arith.addf %27, %28 : vector<512x2xf32>
    %c0_11 = arith.constant 0 : index
    %c0_12 = arith.constant 0 : index
    %30 = vector.load %arg3[%c0_11, %c0_12] : memref<1152x512xf32, #tpu.memory_space<vmem>>, vector<1152x512xf32>
    %cst_13 = arith.constant dense<0.000000e+00> : vector<1152x2xf32>
    %31 = tpu.matmul %30, %29, %cst_13 {dimension_numbers = #tpu.dot_dimension_numbers<[1], [0], [0], [1], [0, 0, 1, 1], [], []>} : vector<1152x512xf32>, vector<512x2xf32>, vector<1152x2xf32> -> vector<1152x2xf32>
    %c0_14 = arith.constant 0 : index
    %c0_15 = arith.constant 0 : index
    %32 = vector.load %arg4[%c0_14, %c0_15] : memref<18x4xf32, #tpu.memory_space<vmem>>, vector<18x4xf32>
    %33 = vector.extract_strided_slice %31 {offsets = [0, 0], sizes = [128, 2], strides = [1, 1]} : vector<1152x2xf32> to vector<128x2xf32>
    %34 = vector.extract_strided_slice %32 {offsets = [0, 0], sizes = [2, 4], strides = [1, 1]} : vector<18x4xf32> to vector<2x4xf32>
    %cst_16 = arith.constant dense<0.000000e+00> : vector<128x4xf32>
    %35 = tpu.matmul %33, %34, %cst_16 {dimension_numbers = #tpu.dot_dimension_numbers<[1], [0], [0], [1], [0, 0, 1, 1], [], []>} : vector<128x2xf32>, vector<2x4xf32>, vector<128x4xf32> -> vector<128x4xf32>
    %36 = vector.extract_strided_slice %31 {offsets = [128, 0], sizes = [128, 2], strides = [1, 1]} : vector<1152x2xf32> to vector<128x2xf32>
    %37 = vector.extract_strided_slice %32 {offsets = [2, 0], sizes = [2, 4], strides = [1, 1]} : vector<18x4xf32> to vector<2x4xf32>
    %cst_17 = arith.constant dense<0.000000e+00> : vector<128x4xf32>
    %38 = tpu.matmul %36, %37, %cst_17 {dimension_numbers = #tpu.dot_dimension_numbers<[1], [0], [0], [1], [0, 0, 1, 1], [], []>} : vector<128x2xf32>, vector<2x4xf32>, vector<128x4xf32> -> vector<128x4xf32>
    %39 = arith.addf %35, %38 : vector<128x4xf32>
    %40 = vector.extract_strided_slice %31 {offsets = [256, 0], sizes = [128, 2], strides = [1, 1]} : vector<1152x2xf32> to vector<128x2xf32>
    %41 = vector.extract_strided_slice %32 {offsets = [4, 0], sizes = [2, 4], strides = [1, 1]} : vector<18x4xf32> to vector<2x4xf32>
    %cst_18 = arith.constant dense<0.000000e+00> : vector<128x4xf32>
    %42 = tpu.matmul %40, %41, %cst_18 {dimension_numbers = #tpu.dot_dimension_numbers<[1], [0], [0], [1], [0, 0, 1, 1], [], []>} : vector<128x2xf32>, vector<2x4xf32>, vector<128x4xf32> -> vector<128x4xf32>
    %43 = arith.addf %39, %42 : vector<128x4xf32>
    %44 = vector.extract_strided_slice %31 {offsets = [384, 0], sizes = [128, 2], strides = [1, 1]} : vector<1152x2xf32> to vector<128x2xf32>
    %45 = vector.extract_strided_slice %32 {offsets = [6, 0], sizes = [2, 4], strides = [1, 1]} : vector<18x4xf32> to vector<2x4xf32>
    %cst_19 = arith.constant dense<0.000000e+00> : vector<128x4xf32>
    %46 = tpu.matmul %44, %45, %cst_19 {dimension_numbers = #tpu.dot_dimension_numbers<[1], [0], [0], [1], [0, 0, 1, 1], [], []>} : vector<128x2xf32>, vector<2x4xf32>, vector<128x4xf32> -> vector<128x4xf32>
    %47 = arith.addf %43, %46 : vector<128x4xf32>
    %48 = vector.extract_strided_slice %31 {offsets = [512, 0], sizes = [128, 2], strides = [1, 1]} : vector<1152x2xf32> to vector<128x2xf32>
    %49 = vector.extract_strided_slice %32 {offsets = [8, 0], sizes = [2, 4], strides = [1, 1]} : vector<18x4xf32> to vector<2x4xf32>
    %cst_20 = arith.constant dense<0.000000e+00> : vector<128x4xf32>
    %50 = tpu.matmul %48, %49, %cst_20 {dimension_numbers = #tpu.dot_dimension_numbers<[1], [0], [0], [1], [0, 0, 1, 1], [], []>} : vector<128x2xf32>, vector<2x4xf32>, vector<128x4xf32> -> vector<128x4xf32>
    %51 = arith.addf %47, %50 : vector<128x4xf32>
    %52 = vector.extract_strided_slice %31 {offsets = [640, 0], sizes = [128, 2], strides = [1, 1]} : vector<1152x2xf32> to vector<128x2xf32>
    %53 = vector.extract_strided_slice %32 {offsets = [10, 0], sizes = [2, 4], strides = [1, 1]} : vector<18x4xf32> to vector<2x4xf32>
    %cst_21 = arith.constant dense<0.000000e+00> : vector<128x4xf32>
    %54 = tpu.matmul %52, %53, %cst_21 {dimension_numbers = #tpu.dot_dimension_numbers<[1], [0], [0], [1], [0, 0, 1, 1], [], []>} : vector<128x2xf32>, vector<2x4xf32>, vector<128x4xf32> -> vector<128x4xf32>
    %55 = arith.addf %51, %54 : vector<128x4xf32>
    %56 = vector.extract_strided_slice %31 {offsets = [768, 0], sizes = [128, 2], strides = [1, 1]} : vector<1152x2xf32> to vector<128x2xf32>
    %57 = vector.extract_strided_slice %32 {offsets = [12, 0], sizes = [2, 4], strides = [1, 1]} : vector<18x4xf32> to vector<2x4xf32>
    %cst_22 = arith.constant dense<0.000000e+00> : vector<128x4xf32>
    %58 = tpu.matmul %56, %57, %cst_22 {dimension_numbers = #tpu.dot_dimension_numbers<[1], [0], [0], [1], [0, 0, 1, 1], [], []>} : vector<128x2xf32>, vector<2x4xf32>, vector<128x4xf32> -> vector<128x4xf32>
    %59 = arith.addf %55, %58 : vector<128x4xf32>
    %60 = vector.extract_strided_slice %31 {offsets = [896, 0], sizes = [128, 2], strides = [1, 1]} : vector<1152x2xf32> to vector<128x2xf32>
    %61 = vector.extract_strided_slice %32 {offsets = [14, 0], sizes = [2, 4], strides = [1, 1]} : vector<18x4xf32> to vector<2x4xf32>
    %cst_23 = arith.constant dense<0.000000e+00> : vector<128x4xf32>
    %62 = tpu.matmul %60, %61, %cst_23 {dimension_numbers = #tpu.dot_dimension_numbers<[1], [0], [0], [1], [0, 0, 1, 1], [], []>} : vector<128x2xf32>, vector<2x4xf32>, vector<128x4xf32> -> vector<128x4xf32>
    %63 = arith.addf %59, %62 : vector<128x4xf32>
    %64 = vector.extract_strided_slice %31 {offsets = [1024, 0], sizes = [128, 2], strides = [1, 1]} : vector<1152x2xf32> to vector<128x2xf32>
    %65 = vector.extract_strided_slice %32 {offsets = [16, 0], sizes = [2, 4], strides = [1, 1]} : vector<18x4xf32> to vector<2x4xf32>
    %cst_24 = arith.constant dense<0.000000e+00> : vector<128x4xf32>
    %66 = tpu.matmul %64, %65, %cst_24 {dimension_numbers = #tpu.dot_dimension_numbers<[1], [0], [0], [1], [0, 0, 1, 1], [], []>} : vector<128x2xf32>, vector<2x4xf32>, vector<128x4xf32> -> vector<128x4xf32>
    %67 = arith.addf %63, %66 : vector<128x4xf32>
    %c0_25 = arith.constant 0 : index
    %c0_26 = arith.constant 0 : index
    %68 = vector.load %arg5[%c0_25, %c0_26] : memref<3x4xf32, #tpu.memory_space<vmem>>, vector<3x4xf32>
    %69 = vector.extract_strided_slice %68 {offsets = [0, 0], sizes = [1, 4], strides = [1, 1]} : vector<3x4xf32> to vector<1x4xf32>
    %70 = vector.extract_strided_slice %68 {offsets = [1, 0], sizes = [1, 4], strides = [1, 1]} : vector<3x4xf32> to vector<1x4xf32>
    %71 = vector.extract_strided_slice %68 {offsets = [2, 0], sizes = [1, 4], strides = [1, 1]} : vector<3x4xf32> to vector<1x4xf32>
    %72 = vector.broadcast %69 : vector<1x4xf32> to vector<128x4xf32>
    %73 = arith.addf %67, %72 : vector<128x4xf32>
    %cst_27 = arith.constant 0.000000e+00 : f32
    %74 = vector.broadcast %cst_27 : f32 to vector<128x4xf32>
    %75 = arith.maximumf %73, %74 : vector<128x4xf32>
    %cst_28 = arith.constant dense<0.000000e+00> : vector<4xf32>
    %76 = vector.multi_reduction <add>, %75, %cst_28 [0] : vector<128x4xf32> to vector<4xf32>
    %77 = vector.shape_cast %76 : vector<4xf32> to vector<1x4xf32>
    %cst_29 = arith.constant 7.812500e-03 : f32
    %78 = vector.broadcast %cst_29 : f32 to vector<1x4xf32>
    %79 = arith.mulf %77, %78 : vector<1x4xf32>
    %80 = vector.broadcast %79 : vector<1x4xf32> to vector<128x4xf32>
    %81 = arith.subf %75, %80 : vector<128x4xf32>
    %82 = arith.mulf %81, %81 : vector<128x4xf32>
    %cst_30 = arith.constant dense<0.000000e+00> : vector<4xf32>
    %83 = vector.multi_reduction <add>, %82, %cst_30 [0] : vector<128x4xf32> to vector<4xf32>
    %84 = vector.shape_cast %83 : vector<4xf32> to vector<1x4xf32>
    %cst_31 = arith.constant 7.812500e-03 : f32
    %85 = vector.broadcast %cst_31 : f32 to vector<1x4xf32>
    %86 = arith.mulf %84, %85 : vector<1x4xf32>
    %cst_32 = arith.constant 9.99999974E-6 : f32
    %87 = vector.broadcast %cst_32 : f32 to vector<1x4xf32>
    %88 = arith.addf %86, %87 : vector<1x4xf32>
    %89 = math.rsqrt %88 : vector<1x4xf32>
    %90 = arith.mulf %70, %89 : vector<1x4xf32>
    %91 = vector.broadcast %90 : vector<1x4xf32> to vector<128x4xf32>
    %92 = arith.mulf %81, %91 : vector<128x4xf32>
    %93 = vector.broadcast %71 : vector<1x4xf32> to vector<128x4xf32>
    %94 = arith.addf %92, %93 : vector<128x4xf32>
    %c0_33 = arith.constant 0 : index
    %c0_34 = arith.constant 0 : index
    %95 = vector.load %arg6[%c0_33, %c0_34] : memref<288x128xf32, #tpu.memory_space<vmem>>, vector<288x128xf32>
    %cst_35 = arith.constant dense<0.000000e+00> : vector<288x4xf32>
    %96 = tpu.matmul %95, %94, %cst_35 {dimension_numbers = #tpu.dot_dimension_numbers<[1], [0], [0], [1], [0, 0, 1, 1], [], []>} : vector<288x128xf32>, vector<128x4xf32>, vector<288x4xf32> -> vector<288x4xf32>
    %c0_36 = arith.constant 0 : index
    %c0_37 = arith.constant 0 : index
    %97 = vector.load %arg7[%c0_36, %c0_37] : memref<36x8xf32, #tpu.memory_space<vmem>>, vector<36x8xf32>
    %98 = vector.extract_strided_slice %96 {offsets = [0, 0], sizes = [32, 4], strides = [1, 1]} : vector<288x4xf32> to vector<32x4xf32>
    %99 = vector.extract_strided_slice %97 {offsets = [0, 0], sizes = [4, 8], strides = [1, 1]} : vector<36x8xf32> to vector<4x8xf32>
    %cst_38 = arith.constant dense<0.000000e+00> : vector<32x8xf32>
    %100 = tpu.matmul %98, %99, %cst_38 {dimension_numbers = #tpu.dot_dimension_numbers<[1], [0], [0], [1], [0, 0, 1, 1], [], []>} : vector<32x4xf32>, vector<4x8xf32>, vector<32x8xf32> -> vector<32x8xf32>
    %101 = vector.extract_strided_slice %96 {offsets = [32, 0], sizes = [32, 4], strides = [1, 1]} : vector<288x4xf32> to vector<32x4xf32>
    %102 = vector.extract_strided_slice %97 {offsets = [4, 0], sizes = [4, 8], strides = [1, 1]} : vector<36x8xf32> to vector<4x8xf32>
    %cst_39 = arith.constant dense<0.000000e+00> : vector<32x8xf32>
    %103 = tpu.matmul %101, %102, %cst_39 {dimension_numbers = #tpu.dot_dimension_numbers<[1], [0], [0], [1], [0, 0, 1, 1], [], []>} : vector<32x4xf32>, vector<4x8xf32>, vector<32x8xf32> -> vector<32x8xf32>
    %104 = arith.addf %100, %103 : vector<32x8xf32>
    %105 = vector.extract_strided_slice %96 {offsets = [64, 0], sizes = [32, 4], strides = [1, 1]} : vector<288x4xf32> to vector<32x4xf32>
    %106 = vector.extract_strided_slice %97 {offsets = [8, 0], sizes = [4, 8], strides = [1, 1]} : vector<36x8xf32> to vector<4x8xf32>
    %cst_40 = arith.constant dense<0.000000e+00> : vector<32x8xf32>
    %107 = tpu.matmul %105, %106, %cst_40 {dimension_numbers = #tpu.dot_dimension_numbers<[1], [0], [0], [1], [0, 0, 1, 1], [], []>} : vector<32x4xf32>, vector<4x8xf32>, vector<32x8xf32> -> vector<32x8xf32>
    %108 = arith.addf %104, %107 : vector<32x8xf32>
    %109 = vector.extract_strided_slice %96 {offsets = [96, 0], sizes = [32, 4], strides = [1, 1]} : vector<288x4xf32> to vector<32x4xf32>
    %110 = vector.extract_strided_slice %97 {offsets = [12, 0], sizes = [4, 8], strides = [1, 1]} : vector<36x8xf32> to vector<4x8xf32>
    %cst_41 = arith.constant dense<0.000000e+00> : vector<32x8xf32>
    %111 = tpu.matmul %109, %110, %cst_41 {dimension_numbers = #tpu.dot_dimension_numbers<[1], [0], [0], [1], [0, 0, 1, 1], [], []>} : vector<32x4xf32>, vector<4x8xf32>, vector<32x8xf32> -> vector<32x8xf32>
    %112 = arith.addf %108, %111 : vector<32x8xf32>
    %113 = vector.extract_strided_slice %96 {offsets = [128, 0], sizes = [32, 4], strides = [1, 1]} : vector<288x4xf32> to vector<32x4xf32>
    %114 = vector.extract_strided_slice %97 {offsets = [16, 0], sizes = [4, 8], strides = [1, 1]} : vector<36x8xf32> to vector<4x8xf32>
    %cst_42 = arith.constant dense<0.000000e+00> : vector<32x8xf32>
    %115 = tpu.matmul %113, %114, %cst_42 {dimension_numbers = #tpu.dot_dimension_numbers<[1], [0], [0], [1], [0, 0, 1, 1], [], []>} : vector<32x4xf32>, vector<4x8xf32>, vector<32x8xf32> -> vector<32x8xf32>
    %116 = arith.addf %112, %115 : vector<32x8xf32>
    %117 = vector.extract_strided_slice %96 {offsets = [160, 0], sizes = [32, 4], strides = [1, 1]} : vector<288x4xf32> to vector<32x4xf32>
    %118 = vector.extract_strided_slice %97 {offsets = [20, 0], sizes = [4, 8], strides = [1, 1]} : vector<36x8xf32> to vector<4x8xf32>
    %cst_43 = arith.constant dense<0.000000e+00> : vector<32x8xf32>
    %119 = tpu.matmul %117, %118, %cst_43 {dimension_numbers = #tpu.dot_dimension_numbers<[1], [0], [0], [1], [0, 0, 1, 1], [], []>} : vector<32x4xf32>, vector<4x8xf32>, vector<32x8xf32> -> vector<32x8xf32>
    %120 = arith.addf %116, %119 : vector<32x8xf32>
    %121 = vector.extract_strided_slice %96 {offsets = [192, 0], sizes = [32, 4], strides = [1, 1]} : vector<288x4xf32> to vector<32x4xf32>
    %122 = vector.extract_strided_slice %97 {offsets = [24, 0], sizes = [4, 8], strides = [1, 1]} : vector<36x8xf32> to vector<4x8xf32>
    %cst_44 = arith.constant dense<0.000000e+00> : vector<32x8xf32>
    %123 = tpu.matmul %121, %122, %cst_44 {dimension_numbers = #tpu.dot_dimension_numbers<[1], [0], [0], [1], [0, 0, 1, 1], [], []>} : vector<32x4xf32>, vector<4x8xf32>, vector<32x8xf32> -> vector<32x8xf32>
    %124 = arith.addf %120, %123 : vector<32x8xf32>
    %125 = vector.extract_strided_slice %96 {offsets = [224, 0], sizes = [32, 4], strides = [1, 1]} : vector<288x4xf32> to vector<32x4xf32>
    %126 = vector.extract_strided_slice %97 {offsets = [28, 0], sizes = [4, 8], strides = [1, 1]} : vector<36x8xf32> to vector<4x8xf32>
    %cst_45 = arith.constant dense<0.000000e+00> : vector<32x8xf32>
    %127 = tpu.matmul %125, %126, %cst_45 {dimension_numbers = #tpu.dot_dimension_numbers<[1], [0], [0], [1], [0, 0, 1, 1], [], []>} : vector<32x4xf32>, vector<4x8xf32>, vector<32x8xf32> -> vector<32x8xf32>
    %128 = arith.addf %124, %127 : vector<32x8xf32>
    %129 = vector.extract_strided_slice %96 {offsets = [256, 0], sizes = [32, 4], strides = [1, 1]} : vector<288x4xf32> to vector<32x4xf32>
    %130 = vector.extract_strided_slice %97 {offsets = [32, 0], sizes = [4, 8], strides = [1, 1]} : vector<36x8xf32> to vector<4x8xf32>
    %cst_46 = arith.constant dense<0.000000e+00> : vector<32x8xf32>
    %131 = tpu.matmul %129, %130, %cst_46 {dimension_numbers = #tpu.dot_dimension_numbers<[1], [0], [0], [1], [0, 0, 1, 1], [], []>} : vector<32x4xf32>, vector<4x8xf32>, vector<32x8xf32> -> vector<32x8xf32>
    %132 = arith.addf %128, %131 : vector<32x8xf32>
    %c0_47 = arith.constant 0 : index
    %c0_48 = arith.constant 0 : index
    %133 = vector.load %arg8[%c0_47, %c0_48] : memref<3x8xf32, #tpu.memory_space<vmem>>, vector<3x8xf32>
    %134 = vector.extract_strided_slice %133 {offsets = [0, 0], sizes = [1, 8], strides = [1, 1]} : vector<3x8xf32> to vector<1x8xf32>
    %135 = vector.extract_strided_slice %133 {offsets = [1, 0], sizes = [1, 8], strides = [1, 1]} : vector<3x8xf32> to vector<1x8xf32>
    %136 = vector.extract_strided_slice %133 {offsets = [2, 0], sizes = [1, 8], strides = [1, 1]} : vector<3x8xf32> to vector<1x8xf32>
    %137 = vector.broadcast %134 : vector<1x8xf32> to vector<32x8xf32>
    %138 = arith.addf %132, %137 : vector<32x8xf32>
    %cst_49 = arith.constant 0.000000e+00 : f32
    %139 = vector.broadcast %cst_49 : f32 to vector<32x8xf32>
    %140 = arith.maximumf %138, %139 : vector<32x8xf32>
    %cst_50 = arith.constant dense<0.000000e+00> : vector<8xf32>
    %141 = vector.multi_reduction <add>, %140, %cst_50 [0] : vector<32x8xf32> to vector<8xf32>
    %142 = vector.shape_cast %141 : vector<8xf32> to vector<1x8xf32>
    %cst_51 = arith.constant 3.125000e-02 : f32
    %143 = vector.broadcast %cst_51 : f32 to vector<1x8xf32>
    %144 = arith.mulf %142, %143 : vector<1x8xf32>
    %145 = vector.broadcast %144 : vector<1x8xf32> to vector<32x8xf32>
    %146 = arith.subf %140, %145 : vector<32x8xf32>
    %147 = arith.mulf %146, %146 : vector<32x8xf32>
    %cst_52 = arith.constant dense<0.000000e+00> : vector<8xf32>
    %148 = vector.multi_reduction <add>, %147, %cst_52 [0] : vector<32x8xf32> to vector<8xf32>
    %149 = vector.shape_cast %148 : vector<8xf32> to vector<1x8xf32>
    %cst_53 = arith.constant 3.125000e-02 : f32
    %150 = vector.broadcast %cst_53 : f32 to vector<1x8xf32>
    %151 = arith.mulf %149, %150 : vector<1x8xf32>
    %cst_54 = arith.constant 9.99999974E-6 : f32
    %152 = vector.broadcast %cst_54 : f32 to vector<1x8xf32>
    %153 = arith.addf %151, %152 : vector<1x8xf32>
    %154 = math.rsqrt %153 : vector<1x8xf32>
    %155 = arith.mulf %135, %154 : vector<1x8xf32>
    %156 = vector.broadcast %155 : vector<1x8xf32> to vector<32x8xf32>
    %157 = arith.mulf %146, %156 : vector<32x8xf32>
    %158 = vector.broadcast %136 : vector<1x8xf32> to vector<32x8xf32>
    %159 = arith.addf %157, %158 : vector<32x8xf32>
    %c0_55 = arith.constant 0 : index
    %c0_56 = arith.constant 0 : index
    %160 = vector.load %arg9[%c0_55, %c0_56] : memref<72x32xf32, #tpu.memory_space<vmem>>, vector<72x32xf32>
    %cst_57 = arith.constant dense<0.000000e+00> : vector<72x8xf32>
    %161 = tpu.matmul %160, %159, %cst_57 {dimension_numbers = #tpu.dot_dimension_numbers<[1], [0], [0], [1], [0, 0, 1, 1], [], []>} : vector<72x32xf32>, vector<32x8xf32>, vector<72x8xf32> -> vector<72x8xf32>
    %c0_58 = arith.constant 0 : index
    %c0_59 = arith.constant 0 : index
    %162 = vector.load %arg10[%c0_58, %c0_59] : memref<72x16xf32, #tpu.memory_space<vmem>>, vector<72x16xf32>
    %163 = vector.extract_strided_slice %161 {offsets = [0, 0], sizes = [8, 8], strides = [1, 1]} : vector<72x8xf32> to vector<8x8xf32>
    %164 = vector.extract_strided_slice %162 {offsets = [0, 0], sizes = [8, 16], strides = [1, 1]} : vector<72x16xf32> to vector<8x16xf32>
    %cst_60 = arith.constant dense<0.000000e+00> : vector<8x16xf32>
    %165 = tpu.matmul %163, %164, %cst_60 {dimension_numbers = #tpu.dot_dimension_numbers<[1], [0], [0], [1], [0, 0, 1, 1], [], []>} : vector<8x8xf32>, vector<8x16xf32>, vector<8x16xf32> -> vector<8x16xf32>
    %166 = vector.extract_strided_slice %161 {offsets = [8, 0], sizes = [8, 8], strides = [1, 1]} : vector<72x8xf32> to vector<8x8xf32>
    %167 = vector.extract_strided_slice %162 {offsets = [8, 0], sizes = [8, 16], strides = [1, 1]} : vector<72x16xf32> to vector<8x16xf32>
    %cst_61 = arith.constant dense<0.000000e+00> : vector<8x16xf32>
    %168 = tpu.matmul %166, %167, %cst_61 {dimension_numbers = #tpu.dot_dimension_numbers<[1], [0], [0], [1], [0, 0, 1, 1], [], []>} : vector<8x8xf32>, vector<8x16xf32>, vector<8x16xf32> -> vector<8x16xf32>
    %169 = arith.addf %165, %168 : vector<8x16xf32>
    %170 = vector.extract_strided_slice %161 {offsets = [16, 0], sizes = [8, 8], strides = [1, 1]} : vector<72x8xf32> to vector<8x8xf32>
    %171 = vector.extract_strided_slice %162 {offsets = [16, 0], sizes = [8, 16], strides = [1, 1]} : vector<72x16xf32> to vector<8x16xf32>
    %cst_62 = arith.constant dense<0.000000e+00> : vector<8x16xf32>
    %172 = tpu.matmul %170, %171, %cst_62 {dimension_numbers = #tpu.dot_dimension_numbers<[1], [0], [0], [1], [0, 0, 1, 1], [], []>} : vector<8x8xf32>, vector<8x16xf32>, vector<8x16xf32> -> vector<8x16xf32>
    %173 = arith.addf %169, %172 : vector<8x16xf32>
    %174 = vector.extract_strided_slice %161 {offsets = [24, 0], sizes = [8, 8], strides = [1, 1]} : vector<72x8xf32> to vector<8x8xf32>
    %175 = vector.extract_strided_slice %162 {offsets = [24, 0], sizes = [8, 16], strides = [1, 1]} : vector<72x16xf32> to vector<8x16xf32>
    %cst_63 = arith.constant dense<0.000000e+00> : vector<8x16xf32>
    %176 = tpu.matmul %174, %175, %cst_63 {dimension_numbers = #tpu.dot_dimension_numbers<[1], [0], [0], [1], [0, 0, 1, 1], [], []>} : vector<8x8xf32>, vector<8x16xf32>, vector<8x16xf32> -> vector<8x16xf32>
    %177 = arith.addf %173, %176 : vector<8x16xf32>
    %178 = vector.extract_strided_slice %161 {offsets = [32, 0], sizes = [8, 8], strides = [1, 1]} : vector<72x8xf32> to vector<8x8xf32>
    %179 = vector.extract_strided_slice %162 {offsets = [32, 0], sizes = [8, 16], strides = [1, 1]} : vector<72x16xf32> to vector<8x16xf32>
    %cst_64 = arith.constant dense<0.000000e+00> : vector<8x16xf32>
    %180 = tpu.matmul %178, %179, %cst_64 {dimension_numbers = #tpu.dot_dimension_numbers<[1], [0], [0], [1], [0, 0, 1, 1], [], []>} : vector<8x8xf32>, vector<8x16xf32>, vector<8x16xf32> -> vector<8x16xf32>
    %181 = arith.addf %177, %180 : vector<8x16xf32>
    %182 = vector.extract_strided_slice %161 {offsets = [40, 0], sizes = [8, 8], strides = [1, 1]} : vector<72x8xf32> to vector<8x8xf32>
    %183 = vector.extract_strided_slice %162 {offsets = [40, 0], sizes = [8, 16], strides = [1, 1]} : vector<72x16xf32> to vector<8x16xf32>
    %cst_65 = arith.constant dense<0.000000e+00> : vector<8x16xf32>
    %184 = tpu.matmul %182, %183, %cst_65 {dimension_numbers = #tpu.dot_dimension_numbers<[1], [0], [0], [1], [0, 0, 1, 1], [], []>} : vector<8x8xf32>, vector<8x16xf32>, vector<8x16xf32> -> vector<8x16xf32>
    %185 = arith.addf %181, %184 : vector<8x16xf32>
    %186 = vector.extract_strided_slice %161 {offsets = [48, 0], sizes = [8, 8], strides = [1, 1]} : vector<72x8xf32> to vector<8x8xf32>
    %187 = vector.extract_strided_slice %162 {offsets = [48, 0], sizes = [8, 16], strides = [1, 1]} : vector<72x16xf32> to vector<8x16xf32>
    %cst_66 = arith.constant dense<0.000000e+00> : vector<8x16xf32>
    %188 = tpu.matmul %186, %187, %cst_66 {dimension_numbers = #tpu.dot_dimension_numbers<[1], [0], [0], [1], [0, 0, 1, 1], [], []>} : vector<8x8xf32>, vector<8x16xf32>, vector<8x16xf32> -> vector<8x16xf32>
    %189 = arith.addf %185, %188 : vector<8x16xf32>
    %190 = vector.extract_strided_slice %161 {offsets = [56, 0], sizes = [8, 8], strides = [1, 1]} : vector<72x8xf32> to vector<8x8xf32>
    %191 = vector.extract_strided_slice %162 {offsets = [56, 0], sizes = [8, 16], strides = [1, 1]} : vector<72x16xf32> to vector<8x16xf32>
    %cst_67 = arith.constant dense<0.000000e+00> : vector<8x16xf32>
    %192 = tpu.matmul %190, %191, %cst_67 {dimension_numbers = #tpu.dot_dimension_numbers<[1], [0], [0], [1], [0, 0, 1, 1], [], []>} : vector<8x8xf32>, vector<8x16xf32>, vector<8x16xf32> -> vector<8x16xf32>
    %193 = arith.addf %189, %192 : vector<8x16xf32>
    %194 = vector.extract_strided_slice %161 {offsets = [64, 0], sizes = [8, 8], strides = [1, 1]} : vector<72x8xf32> to vector<8x8xf32>
    %195 = vector.extract_strided_slice %162 {offsets = [64, 0], sizes = [8, 16], strides = [1, 1]} : vector<72x16xf32> to vector<8x16xf32>
    %cst_68 = arith.constant dense<0.000000e+00> : vector<8x16xf32>
    %196 = tpu.matmul %194, %195, %cst_68 {dimension_numbers = #tpu.dot_dimension_numbers<[1], [0], [0], [1], [0, 0, 1, 1], [], []>} : vector<8x8xf32>, vector<8x16xf32>, vector<8x16xf32> -> vector<8x16xf32>
    %197 = arith.addf %193, %196 : vector<8x16xf32>
    %c0_69 = arith.constant 0 : index
    %c0_70 = arith.constant 0 : index
    %198 = vector.load %arg11[%c0_69, %c0_70] : memref<3x16xf32, #tpu.memory_space<vmem>>, vector<3x16xf32>
    %199 = vector.extract_strided_slice %198 {offsets = [0, 0], sizes = [1, 16], strides = [1, 1]} : vector<3x16xf32> to vector<1x16xf32>
    %200 = vector.extract_strided_slice %198 {offsets = [1, 0], sizes = [1, 16], strides = [1, 1]} : vector<3x16xf32> to vector<1x16xf32>
    %201 = vector.extract_strided_slice %198 {offsets = [2, 0], sizes = [1, 16], strides = [1, 1]} : vector<3x16xf32> to vector<1x16xf32>
    %202 = vector.broadcast %199 : vector<1x16xf32> to vector<8x16xf32>
    %203 = arith.addf %197, %202 : vector<8x16xf32>
    %cst_71 = arith.constant 0.000000e+00 : f32
    %204 = vector.broadcast %cst_71 : f32 to vector<8x16xf32>
    %205 = arith.maximumf %203, %204 : vector<8x16xf32>
    %cst_72 = arith.constant dense<0.000000e+00> : vector<16xf32>
    %206 = vector.multi_reduction <add>, %205, %cst_72 [0] : vector<8x16xf32> to vector<16xf32>
    %207 = vector.shape_cast %206 : vector<16xf32> to vector<1x16xf32>
    %cst_73 = arith.constant 1.250000e-01 : f32
    %208 = vector.broadcast %cst_73 : f32 to vector<1x16xf32>
    %209 = arith.mulf %207, %208 : vector<1x16xf32>
    %210 = vector.broadcast %209 : vector<1x16xf32> to vector<8x16xf32>
    %211 = arith.subf %205, %210 : vector<8x16xf32>
    %212 = arith.mulf %211, %211 : vector<8x16xf32>
    %cst_74 = arith.constant dense<0.000000e+00> : vector<16xf32>
    %213 = vector.multi_reduction <add>, %212, %cst_74 [0] : vector<8x16xf32> to vector<16xf32>
    %214 = vector.shape_cast %213 : vector<16xf32> to vector<1x16xf32>
    %cst_75 = arith.constant 1.250000e-01 : f32
    %215 = vector.broadcast %cst_75 : f32 to vector<1x16xf32>
    %216 = arith.mulf %214, %215 : vector<1x16xf32>
    %cst_76 = arith.constant 9.99999974E-6 : f32
    %217 = vector.broadcast %cst_76 : f32 to vector<1x16xf32>
    %218 = arith.addf %216, %217 : vector<1x16xf32>
    %219 = math.rsqrt %218 : vector<1x16xf32>
    %220 = arith.mulf %200, %219 : vector<1x16xf32>
    %221 = vector.broadcast %220 : vector<1x16xf32> to vector<8x16xf32>
    %222 = arith.mulf %211, %221 : vector<8x16xf32>
    %223 = vector.broadcast %201 : vector<1x16xf32> to vector<8x16xf32>
    %224 = arith.addf %222, %223 : vector<8x16xf32>
    %c0_77 = arith.constant 0 : index
    %c0_78 = arith.constant 0 : index
    %225 = vector.load %arg12[%c0_77, %c0_78] : memref<18x8xf32, #tpu.memory_space<vmem>>, vector<18x8xf32>
    %cst_79 = arith.constant dense<0.000000e+00> : vector<18x16xf32>
    %226 = tpu.matmul %225, %224, %cst_79 {dimension_numbers = #tpu.dot_dimension_numbers<[1], [0], [0], [1], [0, 0, 1, 1], [], []>} : vector<18x8xf32>, vector<8x16xf32>, vector<18x16xf32> -> vector<18x16xf32>
    %c0_80 = arith.constant 0 : index
    %c0_81 = arith.constant 0 : index
    %227 = vector.load %arg13[%c0_80, %c0_81] : memref<144x32xf32, #tpu.memory_space<vmem>>, vector<144x32xf32>
    %228 = vector.extract_strided_slice %226 {offsets = [0, 0], sizes = [2, 16], strides = [1, 1]} : vector<18x16xf32> to vector<2x16xf32>
    %229 = vector.extract_strided_slice %227 {offsets = [0, 0], sizes = [16, 32], strides = [1, 1]} : vector<144x32xf32> to vector<16x32xf32>
    %cst_82 = arith.constant dense<0.000000e+00> : vector<2x32xf32>
    %230 = tpu.matmul %228, %229, %cst_82 {dimension_numbers = #tpu.dot_dimension_numbers<[1], [0], [0], [1], [0, 0, 1, 1], [], []>} : vector<2x16xf32>, vector<16x32xf32>, vector<2x32xf32> -> vector<2x32xf32>
    %231 = vector.extract_strided_slice %226 {offsets = [2, 0], sizes = [2, 16], strides = [1, 1]} : vector<18x16xf32> to vector<2x16xf32>
    %232 = vector.extract_strided_slice %227 {offsets = [16, 0], sizes = [16, 32], strides = [1, 1]} : vector<144x32xf32> to vector<16x32xf32>
    %cst_83 = arith.constant dense<0.000000e+00> : vector<2x32xf32>
    %233 = tpu.matmul %231, %232, %cst_83 {dimension_numbers = #tpu.dot_dimension_numbers<[1], [0], [0], [1], [0, 0, 1, 1], [], []>} : vector<2x16xf32>, vector<16x32xf32>, vector<2x32xf32> -> vector<2x32xf32>
    %234 = arith.addf %230, %233 : vector<2x32xf32>
    %235 = vector.extract_strided_slice %226 {offsets = [4, 0], sizes = [2, 16], strides = [1, 1]} : vector<18x16xf32> to vector<2x16xf32>
    %236 = vector.extract_strided_slice %227 {offsets = [32, 0], sizes = [16, 32], strides = [1, 1]} : vector<144x32xf32> to vector<16x32xf32>
    %cst_84 = arith.constant dense<0.000000e+00> : vector<2x32xf32>
    %237 = tpu.matmul %235, %236, %cst_84 {dimension_numbers = #tpu.dot_dimension_numbers<[1], [0], [0], [1], [0, 0, 1, 1], [], []>} : vector<2x16xf32>, vector<16x32xf32>, vector<2x32xf32> -> vector<2x32xf32>
    %238 = arith.addf %234, %237 : vector<2x32xf32>
    %239 = vector.extract_strided_slice %226 {offsets = [6, 0], sizes = [2, 16], strides = [1, 1]} : vector<18x16xf32> to vector<2x16xf32>
    %240 = vector.extract_strided_slice %227 {offsets = [48, 0], sizes = [16, 32], strides = [1, 1]} : vector<144x32xf32> to vector<16x32xf32>
    %cst_85 = arith.constant dense<0.000000e+00> : vector<2x32xf32>
    %241 = tpu.matmul %239, %240, %cst_85 {dimension_numbers = #tpu.dot_dimension_numbers<[1], [0], [0], [1], [0, 0, 1, 1], [], []>} : vector<2x16xf32>, vector<16x32xf32>, vector<2x32xf32> -> vector<2x32xf32>
    %242 = arith.addf %238, %241 : vector<2x32xf32>
    %243 = vector.extract_strided_slice %226 {offsets = [8, 0], sizes = [2, 16], strides = [1, 1]} : vector<18x16xf32> to vector<2x16xf32>
    %244 = vector.extract_strided_slice %227 {offsets = [64, 0], sizes = [16, 32], strides = [1, 1]} : vector<144x32xf32> to vector<16x32xf32>
    %cst_86 = arith.constant dense<0.000000e+00> : vector<2x32xf32>
    %245 = tpu.matmul %243, %244, %cst_86 {dimension_numbers = #tpu.dot_dimension_numbers<[1], [0], [0], [1], [0, 0, 1, 1], [], []>} : vector<2x16xf32>, vector<16x32xf32>, vector<2x32xf32> -> vector<2x32xf32>
    %246 = arith.addf %242, %245 : vector<2x32xf32>
    %247 = vector.extract_strided_slice %226 {offsets = [10, 0], sizes = [2, 16], strides = [1, 1]} : vector<18x16xf32> to vector<2x16xf32>
    %248 = vector.extract_strided_slice %227 {offsets = [80, 0], sizes = [16, 32], strides = [1, 1]} : vector<144x32xf32> to vector<16x32xf32>
    %cst_87 = arith.constant dense<0.000000e+00> : vector<2x32xf32>
    %249 = tpu.matmul %247, %248, %cst_87 {dimension_numbers = #tpu.dot_dimension_numbers<[1], [0], [0], [1], [0, 0, 1, 1], [], []>} : vector<2x16xf32>, vector<16x32xf32>, vector<2x32xf32> -> vector<2x32xf32>
    %250 = arith.addf %246, %249 : vector<2x32xf32>
    %251 = vector.extract_strided_slice %226 {offsets = [12, 0], sizes = [2, 16], strides = [1, 1]} : vector<18x16xf32> to vector<2x16xf32>
    %252 = vector.extract_strided_slice %227 {offsets = [96, 0], sizes = [16, 32], strides = [1, 1]} : vector<144x32xf32> to vector<16x32xf32>
    %cst_88 = arith.constant dense<0.000000e+00> : vector<2x32xf32>
    %253 = tpu.matmul %251, %252, %cst_88 {dimension_numbers = #tpu.dot_dimension_numbers<[1], [0], [0], [1], [0, 0, 1, 1], [], []>} : vector<2x16xf32>, vector<16x32xf32>, vector<2x32xf32> -> vector<2x32xf32>
    %254 = arith.addf %250, %253 : vector<2x32xf32>
    %255 = vector.extract_strided_slice %226 {offsets = [14, 0], sizes = [2, 16], strides = [1, 1]} : vector<18x16xf32> to vector<2x16xf32>
    %256 = vector.extract_strided_slice %227 {offsets = [112, 0], sizes = [16, 32], strides = [1, 1]} : vector<144x32xf32> to vector<16x32xf32>
    %cst_89 = arith.constant dense<0.000000e+00> : vector<2x32xf32>
    %257 = tpu.matmul %255, %256, %cst_89 {dimension_numbers = #tpu.dot_dimension_numbers<[1], [0], [0], [1], [0, 0, 1, 1], [], []>} : vector<2x16xf32>, vector<16x32xf32>, vector<2x32xf32> -> vector<2x32xf32>
    %258 = arith.addf %254, %257 : vector<2x32xf32>
    %259 = vector.extract_strided_slice %226 {offsets = [16, 0], sizes = [2, 16], strides = [1, 1]} : vector<18x16xf32> to vector<2x16xf32>
    %260 = vector.extract_strided_slice %227 {offsets = [128, 0], sizes = [16, 32], strides = [1, 1]} : vector<144x32xf32> to vector<16x32xf32>
    %cst_90 = arith.constant dense<0.000000e+00> : vector<2x32xf32>
    %261 = tpu.matmul %259, %260, %cst_90 {dimension_numbers = #tpu.dot_dimension_numbers<[1], [0], [0], [1], [0, 0, 1, 1], [], []>} : vector<2x16xf32>, vector<16x32xf32>, vector<2x32xf32> -> vector<2x32xf32>
    %262 = arith.addf %258, %261 : vector<2x32xf32>
    %c0_91 = arith.constant 0 : index
    %c0_92 = arith.constant 0 : index
    %263 = vector.load %arg14[%c0_91, %c0_92] : memref<3x32xf32, #tpu.memory_space<vmem>>, vector<3x32xf32>
    %264 = vector.extract_strided_slice %263 {offsets = [0, 0], sizes = [1, 32], strides = [1, 1]} : vector<3x32xf32> to vector<1x32xf32>
    %265 = vector.extract_strided_slice %263 {offsets = [1, 0], sizes = [1, 32], strides = [1, 1]} : vector<3x32xf32> to vector<1x32xf32>
    %266 = vector.extract_strided_slice %263 {offsets = [2, 0], sizes = [1, 32], strides = [1, 1]} : vector<3x32xf32> to vector<1x32xf32>
    %267 = vector.broadcast %264 : vector<1x32xf32> to vector<2x32xf32>
    %268 = arith.addf %262, %267 : vector<2x32xf32>
    %cst_93 = arith.constant 0.000000e+00 : f32
    %269 = vector.broadcast %cst_93 : f32 to vector<2x32xf32>
    %270 = arith.maximumf %268, %269 : vector<2x32xf32>
    %cst_94 = arith.constant dense<0.000000e+00> : vector<32xf32>
    %271 = vector.multi_reduction <add>, %270, %cst_94 [0] : vector<2x32xf32> to vector<32xf32>
    %272 = vector.shape_cast %271 : vector<32xf32> to vector<1x32xf32>
    %cst_95 = arith.constant 5.000000e-01 : f32
    %273 = vector.broadcast %cst_95 : f32 to vector<1x32xf32>
    %274 = arith.mulf %272, %273 : vector<1x32xf32>
    %275 = vector.broadcast %274 : vector<1x32xf32> to vector<2x32xf32>
    %276 = arith.subf %270, %275 : vector<2x32xf32>
    %277 = arith.mulf %276, %276 : vector<2x32xf32>
    %cst_96 = arith.constant dense<0.000000e+00> : vector<32xf32>
    %278 = vector.multi_reduction <add>, %277, %cst_96 [0] : vector<2x32xf32> to vector<32xf32>
    %279 = vector.shape_cast %278 : vector<32xf32> to vector<1x32xf32>
    %cst_97 = arith.constant 5.000000e-01 : f32
    %280 = vector.broadcast %cst_97 : f32 to vector<1x32xf32>
    %281 = arith.mulf %279, %280 : vector<1x32xf32>
    %cst_98 = arith.constant 9.99999974E-6 : f32
    %282 = vector.broadcast %cst_98 : f32 to vector<1x32xf32>
    %283 = arith.addf %281, %282 : vector<1x32xf32>
    %284 = math.rsqrt %283 : vector<1x32xf32>
    %285 = arith.mulf %265, %284 : vector<1x32xf32>
    %286 = vector.broadcast %285 : vector<1x32xf32> to vector<2x32xf32>
    %287 = arith.mulf %276, %286 : vector<2x32xf32>
    %288 = vector.broadcast %266 : vector<1x32xf32> to vector<2x32xf32>
    %289 = arith.addf %287, %288 : vector<2x32xf32>
    %c0_99 = arith.constant 0 : index
    %c0_100 = arith.constant 0 : index
    %290 = vector.load %arg15[%c0_99, %c0_100] : memref<32x64xf32, #tpu.memory_space<vmem>>, vector<32x64xf32>
    %cst_101 = arith.constant dense<0.000000e+00> : vector<2x64xf32>
    %291 = tpu.matmul %289, %290, %cst_101 {dimension_numbers = #tpu.dot_dimension_numbers<[1], [0], [0], [1], [0, 0, 1, 1], [], []>} : vector<2x32xf32>, vector<32x64xf32>, vector<2x64xf32> -> vector<2x64xf32>
    %c0_102 = arith.constant 0 : index
    %c0_103 = arith.constant 0 : index
    %292 = vector.load %arg16[%c0_102, %c0_103] : memref<2x16xf32, #tpu.memory_space<vmem>>, vector<2x16xf32>
    %293 = vector.extract_strided_slice %292 {offsets = [0, 0], sizes = [1, 16], strides = [1, 1]} : vector<2x16xf32> to vector<1x16xf32>
    %294 = vector.extract_strided_slice %292 {offsets = [1, 0], sizes = [1, 16], strides = [1, 1]} : vector<2x16xf32> to vector<1x16xf32>
    %cst_104 = arith.constant dense<0.000000e+00> : vector<64xf32>
    %295 = vector.multi_reduction <add>, %291, %cst_104 [0] : vector<2x64xf32> to vector<64xf32>
    %296 = vector.shape_cast %295 : vector<64xf32> to vector<1x64xf32>
    %297 = vector.extract_strided_slice %296 {offsets = [0, 0], sizes = [1, 16], strides = [1, 1]} : vector<1x64xf32> to vector<1x16xf32>
    %298 = vector.extract_strided_slice %296 {offsets = [0, 16], sizes = [1, 16], strides = [1, 1]} : vector<1x64xf32> to vector<1x16xf32>
    %299 = arith.addf %297, %298 : vector<1x16xf32>
    %300 = vector.extract_strided_slice %296 {offsets = [0, 32], sizes = [1, 16], strides = [1, 1]} : vector<1x64xf32> to vector<1x16xf32>
    %301 = arith.addf %299, %300 : vector<1x16xf32>
    %302 = vector.extract_strided_slice %296 {offsets = [0, 48], sizes = [1, 16], strides = [1, 1]} : vector<1x64xf32> to vector<1x16xf32>
    %303 = arith.addf %301, %302 : vector<1x16xf32>
    %cst_105 = arith.constant 1.250000e-01 : f32
    %304 = vector.broadcast %cst_105 : f32 to vector<1x16xf32>
    %305 = arith.mulf %303, %304 : vector<1x16xf32>
    %306 = vector.extract_strided_slice %291 {offsets = [0, 0], sizes = [2, 16], strides = [1, 1]} : vector<2x64xf32> to vector<2x16xf32>
    %307 = vector.broadcast %305 : vector<1x16xf32> to vector<2x16xf32>
    %308 = arith.subf %306, %307 : vector<2x16xf32>
    %309 = vector.extract_strided_slice %291 {offsets = [0, 16], sizes = [2, 16], strides = [1, 1]} : vector<2x64xf32> to vector<2x16xf32>
    %310 = vector.broadcast %305 : vector<1x16xf32> to vector<2x16xf32>
    %311 = arith.subf %309, %310 : vector<2x16xf32>
    %312 = vector.extract_strided_slice %291 {offsets = [0, 32], sizes = [2, 16], strides = [1, 1]} : vector<2x64xf32> to vector<2x16xf32>
    %313 = vector.broadcast %305 : vector<1x16xf32> to vector<2x16xf32>
    %314 = arith.subf %312, %313 : vector<2x16xf32>
    %315 = vector.extract_strided_slice %291 {offsets = [0, 48], sizes = [2, 16], strides = [1, 1]} : vector<2x64xf32> to vector<2x16xf32>
    %316 = vector.broadcast %305 : vector<1x16xf32> to vector<2x16xf32>
    %317 = arith.subf %315, %316 : vector<2x16xf32>
    %318 = arith.mulf %308, %308 : vector<2x16xf32>
    %319 = arith.mulf %311, %311 : vector<2x16xf32>
    %320 = arith.addf %318, %319 : vector<2x16xf32>
    %321 = arith.mulf %314, %314 : vector<2x16xf32>
    %322 = arith.addf %320, %321 : vector<2x16xf32>
    %323 = arith.mulf %317, %317 : vector<2x16xf32>
    %324 = arith.addf %322, %323 : vector<2x16xf32>
    %cst_106 = arith.constant dense<0.000000e+00> : vector<16xf32>
    %325 = vector.multi_reduction <add>, %324, %cst_106 [0] : vector<2x16xf32> to vector<16xf32>
    %326 = vector.shape_cast %325 : vector<16xf32> to vector<1x16xf32>
    %cst_107 = arith.constant 1.250000e-01 : f32
    %327 = vector.broadcast %cst_107 : f32 to vector<1x16xf32>
    %328 = arith.mulf %326, %327 : vector<1x16xf32>
    %cst_108 = arith.constant 9.99999974E-6 : f32
    %329 = vector.broadcast %cst_108 : f32 to vector<1x16xf32>
    %330 = arith.addf %328, %329 : vector<1x16xf32>
    %331 = math.rsqrt %330 : vector<1x16xf32>
    %332 = arith.mulf %293, %331 : vector<1x16xf32>
    %333 = vector.broadcast %332 : vector<1x16xf32> to vector<2x16xf32>
    %334 = arith.mulf %308, %333 : vector<2x16xf32>
    %335 = vector.broadcast %294 : vector<1x16xf32> to vector<2x16xf32>
    %336 = arith.addf %334, %335 : vector<2x16xf32>
    %c0_109 = arith.constant 0 : index
    %c0_110 = arith.constant 0 : index
    %337 = vector.load %arg26[%c0_109, %c0_110] : memref<8x16xf32, #tpu.memory_space<vmem>>, vector<2x16xf32>
    tpu.vector_store %arg26[%c0_109, %c0_110], %336 {strides = array<i32>} : memref<8x16xf32, #tpu.memory_space<vmem>>, vector<2x16xf32>,
    %338 = vector.broadcast %332 : vector<1x16xf32> to vector<2x16xf32>
    %339 = arith.mulf %311, %338 : vector<2x16xf32>
    %340 = vector.broadcast %294 : vector<1x16xf32> to vector<2x16xf32>
    %341 = arith.addf %339, %340 : vector<2x16xf32>
    %c2 = arith.constant 2 : index
    %c0_111 = arith.constant 0 : index
    %342 = vector.load %arg26[%c2, %c0_111] : memref<8x16xf32, #tpu.memory_space<vmem>>, vector<2x16xf32>
    tpu.vector_store %arg26[%c2, %c0_111], %341 {strides = array<i32>} : memref<8x16xf32, #tpu.memory_space<vmem>>, vector<2x16xf32>,
    %343 = vector.broadcast %332 : vector<1x16xf32> to vector<2x16xf32>
    %344 = arith.mulf %314, %343 : vector<2x16xf32>
    %345 = vector.broadcast %294 : vector<1x16xf32> to vector<2x16xf32>
    %346 = arith.addf %344, %345 : vector<2x16xf32>
    %c4 = arith.constant 4 : index
    %c0_112 = arith.constant 0 : index
    %347 = vector.load %arg26[%c4, %c0_112] : memref<8x16xf32, #tpu.memory_space<vmem>>, vector<2x16xf32>
    tpu.vector_store %arg26[%c4, %c0_112], %346 {strides = array<i32>} : memref<8x16xf32, #tpu.memory_space<vmem>>, vector<2x16xf32>,
    %348 = vector.broadcast %332 : vector<1x16xf32> to vector<2x16xf32>
    %349 = arith.mulf %317, %348 : vector<2x16xf32>
    %350 = vector.broadcast %294 : vector<1x16xf32> to vector<2x16xf32>
    %351 = arith.addf %349, %350 : vector<2x16xf32>
    %c6 = arith.constant 6 : index
    %c0_113 = arith.constant 0 : index
    %352 = vector.load %arg26[%c6, %c0_113] : memref<8x16xf32, #tpu.memory_space<vmem>>, vector<2x16xf32>
    tpu.vector_store %arg26[%c6, %c0_113], %351 {strides = array<i32>} : memref<8x16xf32, #tpu.memory_space<vmem>>, vector<2x16xf32>,
    %c0_114 = arith.constant 0 : index
    %c0_115 = arith.constant 0 : index
    %353 = vector.load %arg26[%c0_114, %c0_115] : memref<8x16xf32, #tpu.memory_space<vmem>>, vector<8x16xf32>
    %c0_116 = arith.constant 0 : index
    %c0_117 = arith.constant 0 : index
    %354 = vector.load %arg17[%c0_116, %c0_117] : memref<16x32xf32, #tpu.memory_space<vmem>>, vector<16x32xf32>
    %cst_118 = arith.constant dense<0.000000e+00> : vector<8x32xf32>
    %355 = tpu.matmul %353, %354, %cst_118 {dimension_numbers = #tpu.dot_dimension_numbers<[1], [0], [0], [1], [0, 0, 1, 1], [], []>} : vector<8x16xf32>, vector<16x32xf32>, vector<8x32xf32> -> vector<8x32xf32>
    %c0_119 = arith.constant 0 : index
    %c0_120 = arith.constant 0 : index
    %356 = vector.load %arg18[%c0_119, %c0_120] : memref<2x8xf32, #tpu.memory_space<vmem>>, vector<2x8xf32>
    %357 = vector.extract_strided_slice %356 {offsets = [0, 0], sizes = [1, 8], strides = [1, 1]} : vector<2x8xf32> to vector<1x8xf32>
    %358 = vector.extract_strided_slice %356 {offsets = [1, 0], sizes = [1, 8], strides = [1, 1]} : vector<2x8xf32> to vector<1x8xf32>
    %cst_121 = arith.constant dense<0.000000e+00> : vector<32xf32>
    %359 = vector.multi_reduction <add>, %355, %cst_121 [0] : vector<8x32xf32> to vector<32xf32>
    %360 = vector.shape_cast %359 : vector<32xf32> to vector<1x32xf32>
    %361 = vector.extract_strided_slice %360 {offsets = [0, 0], sizes = [1, 8], strides = [1, 1]} : vector<1x32xf32> to vector<1x8xf32>
    %362 = vector.extract_strided_slice %360 {offsets = [0, 8], sizes = [1, 8], strides = [1, 1]} : vector<1x32xf32> to vector<1x8xf32>
    %363 = arith.addf %361, %362 : vector<1x8xf32>
    %364 = vector.extract_strided_slice %360 {offsets = [0, 16], sizes = [1, 8], strides = [1, 1]} : vector<1x32xf32> to vector<1x8xf32>
    %365 = arith.addf %363, %364 : vector<1x8xf32>
    %366 = vector.extract_strided_slice %360 {offsets = [0, 24], sizes = [1, 8], strides = [1, 1]} : vector<1x32xf32> to vector<1x8xf32>
    %367 = arith.addf %365, %366 : vector<1x8xf32>
    %cst_122 = arith.constant 3.125000e-02 : f32
    %368 = vector.broadcast %cst_122 : f32 to vector<1x8xf32>
    %369 = arith.mulf %367, %368 : vector<1x8xf32>
    %370 = vector.extract_strided_slice %355 {offsets = [0, 0], sizes = [8, 8], strides = [1, 1]} : vector<8x32xf32> to vector<8x8xf32>
    %371 = vector.broadcast %369 : vector<1x8xf32> to vector<8x8xf32>
    %372 = arith.subf %370, %371 : vector<8x8xf32>
    %373 = vector.extract_strided_slice %355 {offsets = [0, 8], sizes = [8, 8], strides = [1, 1]} : vector<8x32xf32> to vector<8x8xf32>
    %374 = vector.broadcast %369 : vector<1x8xf32> to vector<8x8xf32>
    %375 = arith.subf %373, %374 : vector<8x8xf32>
    %376 = vector.extract_strided_slice %355 {offsets = [0, 16], sizes = [8, 8], strides = [1, 1]} : vector<8x32xf32> to vector<8x8xf32>
    %377 = vector.broadcast %369 : vector<1x8xf32> to vector<8x8xf32>
    %378 = arith.subf %376, %377 : vector<8x8xf32>
    %379 = vector.extract_strided_slice %355 {offsets = [0, 24], sizes = [8, 8], strides = [1, 1]} : vector<8x32xf32> to vector<8x8xf32>
    %380 = vector.broadcast %369 : vector<1x8xf32> to vector<8x8xf32>
    %381 = arith.subf %379, %380 : vector<8x8xf32>
    %382 = arith.mulf %372, %372 : vector<8x8xf32>
    %383 = arith.mulf %375, %375 : vector<8x8xf32>
    %384 = arith.addf %382, %383 : vector<8x8xf32>
    %385 = arith.mulf %378, %378 : vector<8x8xf32>
    %386 = arith.addf %384, %385 : vector<8x8xf32>
    %387 = arith.mulf %381, %381 : vector<8x8xf32>
    %388 = arith.addf %386, %387 : vector<8x8xf32>
    %cst_123 = arith.constant dense<0.000000e+00> : vector<8xf32>
    %389 = vector.multi_reduction <add>, %388, %cst_123 [0] : vector<8x8xf32> to vector<8xf32>
    %390 = vector.shape_cast %389 : vector<8xf32> to vector<1x8xf32>
    %cst_124 = arith.constant 3.125000e-02 : f32
    %391 = vector.broadcast %cst_124 : f32 to vector<1x8xf32>
    %392 = arith.mulf %390, %391 : vector<1x8xf32>
    %cst_125 = arith.constant 9.99999974E-6 : f32
    %393 = vector.broadcast %cst_125 : f32 to vector<1x8xf32>
    %394 = arith.addf %392, %393 : vector<1x8xf32>
    %395 = math.rsqrt %394 : vector<1x8xf32>
    %396 = arith.mulf %357, %395 : vector<1x8xf32>
    %397 = vector.broadcast %396 : vector<1x8xf32> to vector<8x8xf32>
    %398 = arith.mulf %372, %397 : vector<8x8xf32>
    %399 = vector.broadcast %358 : vector<1x8xf32> to vector<8x8xf32>
    %400 = arith.addf %398, %399 : vector<8x8xf32>
    %c0_126 = arith.constant 0 : index
    %c0_127 = arith.constant 0 : index
    %401 = vector.load %arg27[%c0_126, %c0_127] : memref<32x8xf32, #tpu.memory_space<vmem>>, vector<8x8xf32>
    tpu.vector_store %arg27[%c0_126, %c0_127], %400 {strides = array<i32>} : memref<32x8xf32, #tpu.memory_space<vmem>>, vector<8x8xf32>,
    %402 = vector.broadcast %396 : vector<1x8xf32> to vector<8x8xf32>
    %403 = arith.mulf %375, %402 : vector<8x8xf32>
    %404 = vector.broadcast %358 : vector<1x8xf32> to vector<8x8xf32>
    %405 = arith.addf %403, %404 : vector<8x8xf32>
    %c8 = arith.constant 8 : index
    %c0_128 = arith.constant 0 : index
    %406 = vector.load %arg27[%c8, %c0_128] : memref<32x8xf32, #tpu.memory_space<vmem>>, vector<8x8xf32>
    tpu.vector_store %arg27[%c8, %c0_128], %405 {strides = array<i32>} : memref<32x8xf32, #tpu.memory_space<vmem>>, vector<8x8xf32>,
    %407 = vector.broadcast %396 : vector<1x8xf32> to vector<8x8xf32>
    %408 = arith.mulf %378, %407 : vector<8x8xf32>
    %409 = vector.broadcast %358 : vector<1x8xf32> to vector<8x8xf32>
    %410 = arith.addf %408, %409 : vector<8x8xf32>
    %c16 = arith.constant 16 : index
    %c0_129 = arith.constant 0 : index
    %411 = vector.load %arg27[%c16, %c0_129] : memref<32x8xf32, #tpu.memory_space<vmem>>, vector<8x8xf32>
    tpu.vector_store %arg27[%c16, %c0_129], %410 {strides = array<i32>} : memref<32x8xf32, #tpu.memory_space<vmem>>, vector<8x8xf32>,
    %412 = vector.broadcast %396 : vector<1x8xf32> to vector<8x8xf32>
    %413 = arith.mulf %381, %412 : vector<8x8xf32>
    %414 = vector.broadcast %358 : vector<1x8xf32> to vector<8x8xf32>
    %415 = arith.addf %413, %414 : vector<8x8xf32>
    %c24 = arith.constant 24 : index
    %c0_130 = arith.constant 0 : index
    %416 = vector.load %arg27[%c24, %c0_130] : memref<32x8xf32, #tpu.memory_space<vmem>>, vector<8x8xf32>
    tpu.vector_store %arg27[%c24, %c0_130], %415 {strides = array<i32>} : memref<32x8xf32, #tpu.memory_space<vmem>>, vector<8x8xf32>,
    %c0_131 = arith.constant 0 : index
    %c0_132 = arith.constant 0 : index
    %417 = vector.load %arg27[%c0_131, %c0_132] : memref<32x8xf32, #tpu.memory_space<vmem>>, vector<32x8xf32>
    %c0_133 = arith.constant 0 : index
    %c0_134 = arith.constant 0 : index
    %418 = vector.load %arg19[%c0_133, %c0_134] : memref<8x16xf32, #tpu.memory_space<vmem>>, vector<8x16xf32>
    %cst_135 = arith.constant dense<0.000000e+00> : vector<32x16xf32>
    %419 = tpu.matmul %417, %418, %cst_135 {dimension_numbers = #tpu.dot_dimension_numbers<[1], [0], [0], [1], [0, 0, 1, 1], [], []>} : vector<32x8xf32>, vector<8x16xf32>, vector<32x16xf32> -> vector<32x16xf32>
    %c0_136 = arith.constant 0 : index
    %c0_137 = arith.constant 0 : index
    %420 = vector.load %arg20[%c0_136, %c0_137] : memref<2x4xf32, #tpu.memory_space<vmem>>, vector<2x4xf32>
    %421 = vector.extract_strided_slice %420 {offsets = [0, 0], sizes = [1, 4], strides = [1, 1]} : vector<2x4xf32> to vector<1x4xf32>
    %422 = vector.extract_strided_slice %420 {offsets = [1, 0], sizes = [1, 4], strides = [1, 1]} : vector<2x4xf32> to vector<1x4xf32>
    %cst_138 = arith.constant dense<0.000000e+00> : vector<16xf32>
    %423 = vector.multi_reduction <add>, %419, %cst_138 [0] : vector<32x16xf32> to vector<16xf32>
    %424 = vector.shape_cast %423 : vector<16xf32> to vector<1x16xf32>
    %425 = vector.extract_strided_slice %424 {offsets = [0, 0], sizes = [1, 4], strides = [1, 1]} : vector<1x16xf32> to vector<1x4xf32>
    %426 = vector.extract_strided_slice %424 {offsets = [0, 4], sizes = [1, 4], strides = [1, 1]} : vector<1x16xf32> to vector<1x4xf32>
    %427 = arith.addf %425, %426 : vector<1x4xf32>
    %428 = vector.extract_strided_slice %424 {offsets = [0, 8], sizes = [1, 4], strides = [1, 1]} : vector<1x16xf32> to vector<1x4xf32>
    %429 = arith.addf %427, %428 : vector<1x4xf32>
    %430 = vector.extract_strided_slice %424 {offsets = [0, 12], sizes = [1, 4], strides = [1, 1]} : vector<1x16xf32> to vector<1x4xf32>
    %431 = arith.addf %429, %430 : vector<1x4xf32>
    %cst_139 = arith.constant 7.812500e-03 : f32
    %432 = vector.broadcast %cst_139 : f32 to vector<1x4xf32>
    %433 = arith.mulf %431, %432 : vector<1x4xf32>
    %434 = vector.extract_strided_slice %419 {offsets = [0, 0], sizes = [32, 4], strides = [1, 1]} : vector<32x16xf32> to vector<32x4xf32>
    %435 = vector.broadcast %433 : vector<1x4xf32> to vector<32x4xf32>
    %436 = arith.subf %434, %435 : vector<32x4xf32>
    %437 = vector.extract_strided_slice %419 {offsets = [0, 4], sizes = [32, 4], strides = [1, 1]} : vector<32x16xf32> to vector<32x4xf32>
    %438 = vector.broadcast %433 : vector<1x4xf32> to vector<32x4xf32>
    %439 = arith.subf %437, %438 : vector<32x4xf32>
    %440 = vector.extract_strided_slice %419 {offsets = [0, 8], sizes = [32, 4], strides = [1, 1]} : vector<32x16xf32> to vector<32x4xf32>
    %441 = vector.broadcast %433 : vector<1x4xf32> to vector<32x4xf32>
    %442 = arith.subf %440, %441 : vector<32x4xf32>
    %443 = vector.extract_strided_slice %419 {offsets = [0, 12], sizes = [32, 4], strides = [1, 1]} : vector<32x16xf32> to vector<32x4xf32>
    %444 = vector.broadcast %433 : vector<1x4xf32> to vector<32x4xf32>
    %445 = arith.subf %443, %444 : vector<32x4xf32>
    %446 = arith.mulf %436, %436 : vector<32x4xf32>
    %447 = arith.mulf %439, %439 : vector<32x4xf32>
    %448 = arith.addf %446, %447 : vector<32x4xf32>
    %449 = arith.mulf %442, %442 : vector<32x4xf32>
    %450 = arith.addf %448, %449 : vector<32x4xf32>
    %451 = arith.mulf %445, %445 : vector<32x4xf32>
    %452 = arith.addf %450, %451 : vector<32x4xf32>
    %cst_140 = arith.constant dense<0.000000e+00> : vector<4xf32>
    %453 = vector.multi_reduction <add>, %452, %cst_140 [0] : vector<32x4xf32> to vector<4xf32>
    %454 = vector.shape_cast %453 : vector<4xf32> to vector<1x4xf32>
    %cst_141 = arith.constant 7.812500e-03 : f32
    %455 = vector.broadcast %cst_141 : f32 to vector<1x4xf32>
    %456 = arith.mulf %454, %455 : vector<1x4xf32>
    %cst_142 = arith.constant 9.99999974E-6 : f32
    %457 = vector.broadcast %cst_142 : f32 to vector<1x4xf32>
    %458 = arith.addf %456, %457 : vector<1x4xf32>
    %459 = math.rsqrt %458 : vector<1x4xf32>
    %460 = arith.mulf %421, %459 : vector<1x4xf32>
    %461 = vector.broadcast %460 : vector<1x4xf32> to vector<32x4xf32>
    %462 = arith.mulf %436, %461 : vector<32x4xf32>
    %463 = vector.broadcast %422 : vector<1x4xf32> to vector<32x4xf32>
    %464 = arith.addf %462, %463 : vector<32x4xf32>
    %c0_143 = arith.constant 0 : index
    %c0_144 = arith.constant 0 : index
    %465 = vector.load %arg28[%c0_143, %c0_144] : memref<128x4xf32, #tpu.memory_space<vmem>>, vector<32x4xf32>
    tpu.vector_store %arg28[%c0_143, %c0_144], %464 {strides = array<i32>} : memref<128x4xf32, #tpu.memory_space<vmem>>, vector<32x4xf32>,
    %466 = vector.broadcast %460 : vector<1x4xf32> to vector<32x4xf32>
    %467 = arith.mulf %439, %466 : vector<32x4xf32>
    %468 = vector.broadcast %422 : vector<1x4xf32> to vector<32x4xf32>
    %469 = arith.addf %467, %468 : vector<32x4xf32>
    %c32 = arith.constant 32 : index
    %c0_145 = arith.constant 0 : index
    %470 = vector.load %arg28[%c32, %c0_145] : memref<128x4xf32, #tpu.memory_space<vmem>>, vector<32x4xf32>
    tpu.vector_store %arg28[%c32, %c0_145], %469 {strides = array<i32>} : memref<128x4xf32, #tpu.memory_space<vmem>>, vector<32x4xf32>,
    %471 = vector.broadcast %460 : vector<1x4xf32> to vector<32x4xf32>
    %472 = arith.mulf %442, %471 : vector<32x4xf32>
    %473 = vector.broadcast %422 : vector<1x4xf32> to vector<32x4xf32>
    %474 = arith.addf %472, %473 : vector<32x4xf32>
    %c64 = arith.constant 64 : index
    %c0_146 = arith.constant 0 : index
    %475 = vector.load %arg28[%c64, %c0_146] : memref<128x4xf32, #tpu.memory_space<vmem>>, vector<32x4xf32>
    tpu.vector_store %arg28[%c64, %c0_146], %474 {strides = array<i32>} : memref<128x4xf32, #tpu.memory_space<vmem>>, vector<32x4xf32>,
    %476 = vector.broadcast %460 : vector<1x4xf32> to vector<32x4xf32>
    %477 = arith.mulf %445, %476 : vector<32x4xf32>
    %478 = vector.broadcast %422 : vector<1x4xf32> to vector<32x4xf32>
    %479 = arith.addf %477, %478 : vector<32x4xf32>
    %c96 = arith.constant 96 : index
    %c0_147 = arith.constant 0 : index
    %480 = vector.load %arg28[%c96, %c0_147] : memref<128x4xf32, #tpu.memory_space<vmem>>, vector<32x4xf32>
    tpu.vector_store %arg28[%c96, %c0_147], %479 {strides = array<i32>} : memref<128x4xf32, #tpu.memory_space<vmem>>, vector<32x4xf32>,
    %c0_148 = arith.constant 0 : index
    %c0_149 = arith.constant 0 : index
    %481 = vector.load %arg28[%c0_148, %c0_149] : memref<128x4xf32, #tpu.memory_space<vmem>>, vector<128x4xf32>
    %c0_150 = arith.constant 0 : index
    %c0_151 = arith.constant 0 : index
    %482 = vector.load %arg21[%c0_150, %c0_151] : memref<4x8xf32, #tpu.memory_space<vmem>>, vector<4x8xf32>
    %cst_152 = arith.constant dense<0.000000e+00> : vector<128x8xf32>
    %483 = tpu.matmul %481, %482, %cst_152 {dimension_numbers = #tpu.dot_dimension_numbers<[1], [0], [0], [1], [0, 0, 1, 1], [], []>} : vector<128x4xf32>, vector<4x8xf32>, vector<128x8xf32> -> vector<128x8xf32>
    %c0_153 = arith.constant 0 : index
    %c0_154 = arith.constant 0 : index
    %484 = vector.load %arg22[%c0_153, %c0_154] : memref<2x2xf32, #tpu.memory_space<vmem>>, vector<2x2xf32>
    %485 = vector.extract_strided_slice %484 {offsets = [0, 0], sizes = [1, 2], strides = [1, 1]} : vector<2x2xf32> to vector<1x2xf32>
    %486 = vector.extract_strided_slice %484 {offsets = [1, 0], sizes = [1, 2], strides = [1, 1]} : vector<2x2xf32> to vector<1x2xf32>
    %cst_155 = arith.constant dense<0.000000e+00> : vector<8xf32>
    %487 = vector.multi_reduction <add>, %483, %cst_155 [0] : vector<128x8xf32> to vector<8xf32>
    %488 = vector.shape_cast %487 : vector<8xf32> to vector<1x8xf32>
    %489 = vector.extract_strided_slice %488 {offsets = [0, 0], sizes = [1, 2], strides = [1, 1]} : vector<1x8xf32> to vector<1x2xf32>
    %490 = vector.extract_strided_slice %488 {offsets = [0, 2], sizes = [1, 2], strides = [1, 1]} : vector<1x8xf32> to vector<1x2xf32>
    %491 = arith.addf %489, %490 : vector<1x2xf32>
    %492 = vector.extract_strided_slice %488 {offsets = [0, 4], sizes = [1, 2], strides = [1, 1]} : vector<1x8xf32> to vector<1x2xf32>
    %493 = arith.addf %491, %492 : vector<1x2xf32>
    %494 = vector.extract_strided_slice %488 {offsets = [0, 6], sizes = [1, 2], strides = [1, 1]} : vector<1x8xf32> to vector<1x2xf32>
    %495 = arith.addf %493, %494 : vector<1x2xf32>
    %cst_156 = arith.constant 0.001953125 : f32
    %496 = vector.broadcast %cst_156 : f32 to vector<1x2xf32>
    %497 = arith.mulf %495, %496 : vector<1x2xf32>
    %498 = vector.extract_strided_slice %483 {offsets = [0, 0], sizes = [128, 2], strides = [1, 1]} : vector<128x8xf32> to vector<128x2xf32>
    %499 = vector.broadcast %497 : vector<1x2xf32> to vector<128x2xf32>
    %500 = arith.subf %498, %499 : vector<128x2xf32>
    %501 = vector.extract_strided_slice %483 {offsets = [0, 2], sizes = [128, 2], strides = [1, 1]} : vector<128x8xf32> to vector<128x2xf32>
    %502 = vector.broadcast %497 : vector<1x2xf32> to vector<128x2xf32>
    %503 = arith.subf %501, %502 : vector<128x2xf32>
    %504 = vector.extract_strided_slice %483 {offsets = [0, 4], sizes = [128, 2], strides = [1, 1]} : vector<128x8xf32> to vector<128x2xf32>
    %505 = vector.broadcast %497 : vector<1x2xf32> to vector<128x2xf32>
    %506 = arith.subf %504, %505 : vector<128x2xf32>
    %507 = vector.extract_strided_slice %483 {offsets = [0, 6], sizes = [128, 2], strides = [1, 1]} : vector<128x8xf32> to vector<128x2xf32>
    %508 = vector.broadcast %497 : vector<1x2xf32> to vector<128x2xf32>
    %509 = arith.subf %507, %508 : vector<128x2xf32>
    %510 = arith.mulf %500, %500 : vector<128x2xf32>
    %511 = arith.mulf %503, %503 : vector<128x2xf32>
    %512 = arith.addf %510, %511 : vector<128x2xf32>
    %513 = arith.mulf %506, %506 : vector<128x2xf32>
    %514 = arith.addf %512, %513 : vector<128x2xf32>
    %515 = arith.mulf %509, %509 : vector<128x2xf32>
    %516 = arith.addf %514, %515 : vector<128x2xf32>
    %cst_157 = arith.constant dense<0.000000e+00> : vector<2xf32>
    %517 = vector.multi_reduction <add>, %516, %cst_157 [0] : vector<128x2xf32> to vector<2xf32>
    %518 = vector.shape_cast %517 : vector<2xf32> to vector<1x2xf32>
    %cst_158 = arith.constant 0.001953125 : f32
    %519 = vector.broadcast %cst_158 : f32 to vector<1x2xf32>
    %520 = arith.mulf %518, %519 : vector<1x2xf32>
    %cst_159 = arith.constant 9.99999974E-6 : f32
    %521 = vector.broadcast %cst_159 : f32 to vector<1x2xf32>
    %522 = arith.addf %520, %521 : vector<1x2xf32>
    %523 = math.rsqrt %522 : vector<1x2xf32>
    %524 = arith.mulf %485, %523 : vector<1x2xf32>
    %525 = vector.broadcast %524 : vector<1x2xf32> to vector<128x2xf32>
    %526 = arith.mulf %500, %525 : vector<128x2xf32>
    %527 = vector.broadcast %486 : vector<1x2xf32> to vector<128x2xf32>
    %528 = arith.addf %526, %527 : vector<128x2xf32>
    %c0_160 = arith.constant 0 : index
    %c0_161 = arith.constant 0 : index
    %529 = vector.load %arg29[%c0_160, %c0_161] : memref<512x2xf32, #tpu.memory_space<vmem>>, vector<128x2xf32>
    tpu.vector_store %arg29[%c0_160, %c0_161], %528 {strides = array<i32>} : memref<512x2xf32, #tpu.memory_space<vmem>>, vector<128x2xf32>,
    %530 = vector.broadcast %524 : vector<1x2xf32> to vector<128x2xf32>
    %531 = arith.mulf %503, %530 : vector<128x2xf32>
    %532 = vector.broadcast %486 : vector<1x2xf32> to vector<128x2xf32>
    %533 = arith.addf %531, %532 : vector<128x2xf32>
    %c128 = arith.constant 128 : index
    %c0_162 = arith.constant 0 : index
    %534 = vector.load %arg29[%c128, %c0_162] : memref<512x2xf32, #tpu.memory_space<vmem>>, vector<128x2xf32>
    tpu.vector_store %arg29[%c128, %c0_162], %533 {strides = array<i32>} : memref<512x2xf32, #tpu.memory_space<vmem>>, vector<128x2xf32>,
    %535 = vector.broadcast %524 : vector<1x2xf32> to vector<128x2xf32>
    %536 = arith.mulf %506, %535 : vector<128x2xf32>
    %537 = vector.broadcast %486 : vector<1x2xf32> to vector<128x2xf32>
    %538 = arith.addf %536, %537 : vector<128x2xf32>
    %c256 = arith.constant 256 : index
    %c0_163 = arith.constant 0 : index
    %539 = vector.load %arg29[%c256, %c0_163] : memref<512x2xf32, #tpu.memory_space<vmem>>, vector<128x2xf32>
    tpu.vector_store %arg29[%c256, %c0_163], %538 {strides = array<i32>} : memref<512x2xf32, #tpu.memory_space<vmem>>, vector<128x2xf32>,
    %540 = vector.broadcast %524 : vector<1x2xf32> to vector<128x2xf32>
    %541 = arith.mulf %509, %540 : vector<128x2xf32>
    %542 = vector.broadcast %486 : vector<1x2xf32> to vector<128x2xf32>
    %543 = arith.addf %541, %542 : vector<128x2xf32>
    %c384 = arith.constant 384 : index
    %c0_164 = arith.constant 0 : index
    %544 = vector.load %arg29[%c384, %c0_164] : memref<512x2xf32, #tpu.memory_space<vmem>>, vector<128x2xf32>
    tpu.vector_store %arg29[%c384, %c0_164], %543 {strides = array<i32>} : memref<512x2xf32, #tpu.memory_space<vmem>>, vector<128x2xf32>,
    %c0_165 = arith.constant 0 : index
    %c0_166 = arith.constant 0 : index
    %545 = vector.load %arg29[%c0_165, %c0_166] : memref<512x2xf32, #tpu.memory_space<vmem>>, vector<512x2xf32>
    %c0_167 = arith.constant 0 : index
    %c0_168 = arith.constant 0 : index
    %546 = vector.load %arg23[%c0_167, %c0_168] : memref<2x8xf32, #tpu.memory_space<vmem>>, vector<2x8xf32>
    %cst_169 = arith.constant dense<0.000000e+00> : vector<512x8xf32>
    %547 = tpu.matmul %545, %546, %cst_169 {dimension_numbers = #tpu.dot_dimension_numbers<[1], [0], [0], [1], [0, 0, 1, 1], [], []>} : vector<512x2xf32>, vector<2x8xf32>, vector<512x8xf32> -> vector<512x8xf32>
    %c0_170 = arith.constant 0 : index
    %c0_171 = arith.constant 0 : index
    %548 = vector.load %arg24[%c0_170, %c0_171] : memref<1x8xf32, #tpu.memory_space<vmem>>, vector<1x8xf32>
    %549 = vector.broadcast %548 : vector<1x8xf32> to vector<512x8xf32>
    %550 = arith.addf %547, %549 : vector<512x8xf32>
    %c0_172 = arith.constant 0 : index
    %c0_173 = arith.constant 0 : index
    %551 = vector.load %arg25[%c0_172, %c0_173] : memref<512x8xf32, #tpu.memory_space<vmem>>, vector<512x8xf32>
    tpu.vector_store %arg25[%c0_172, %c0_173], %550 {strides = array<i32>} : memref<512x8xf32, #tpu.memory_space<vmem>>, vector<512x8xf32>,
    return
  }
}

</mosaic_0001>

<bundles_post_ra>
// kernel: tile.8
= control target key start
LH: loop header
LB: loop body
LE: loop exit
PB: predicated region body
PF: predicated region fallthrough
CT: control target
= control target key end

     0   :  { %2 = vsyncpa [#allocation1], 0  ;;  %s42_s6 = smov [#allocation0]   ;;  %s59_s0 = inlined_call_operand.hbm [shape: f32[2], index: 0, kind: input, shape index: {}]   ;;  %s60_s1 = inlined_call_operand.vmem [shape: f32[4,2], index: 1, kind: output, shape index: {}]  }
   0x1   :  { %s9_s7 = sshll.u32 %s42_s6, 4  ;;  %s10_s7 = int_to_ptr.vmem [resolvable:$true] %s9_s7 }
   0x2   :  { %s28_s8 = scalar_lea.vmem %s10_s7, 16  ;;  %s32_s9 = scalar_lea.vmem %s10_s7, 32 }
   0x3   :  { %p29_p0 = scmp.ne.s32.totalorder %s10_s7, %s28_s8  ;;  %p33_p1 = scmp.lt.s32.totalorder %s10_s7, %s10_s7 }
   0x4   :  { %p34_p2 = scmp.lt.s32.totalorder %s32_s9, %s28_s8 }
   0x6   :  { %p35_p3 = por %p34_p2, %p33_p1 }
   0x8   :  { %p36_p4 = pnand %p35_p3, %p29_p0 }
   0xa   :  { %39 = shalt.err (!%p36_p4)
}
   0xb   :  { %12 = dma.hbm_to_vmem [thread:$0]  %s59_s0, 16, %s10_s7, [#allocation1]  }
   0xc   :  { %40 = dma.done.wait [#allocation1], 16  }
   0xd   :  { %41 = vsyncadd [#allocation1], 4294967280  ;;  %v16_v0 = vld [vmem:[#allocation0] ss:$0 sm:$0xff] }
   0xe   :  { %17 = vst [vmem:[%s60_s1] sm:$0xf] %v16_v0 }
   0xf   :  { %18 = vsyncpa [#allocation1], 1 }

// kernel: tile.9
= control target key start
LH: loop header
LB: loop body
LE: loop exit
PB: predicated region body
PF: predicated region fallthrough
CT: control target
= control target key end

     0   :  { %vm8_vm0 = vcmask 15360   ;;  %s40_s8 = smov 2   ;;  %s41_s9 = smov 4   ;;  %vm14_vm1 = vcmask 64560   ;;  %vm20_vm2 = vcmask 48160   ;;  %vm26_vm3 = vcmask 31760   ;;  %s58_s0 = inlined_call_operand.vmem [shape: f32[4,2], index: 0, kind: input, shape index: {}]   ;;  %s59_s1 = inlined_call_operand.vmem [shape: f32[1,8], index: 1, kind: output, shape index: {}]  }
   0x1   :  { %v5_v0 = vld [vmem:[%s58_s0] sm:$0xf]  ;;  %s39_s0 = smov 6  }
   0x2   :  { %6 = vst [vmem:[#allocation1] sm:$0xf] %v5_v0 }
   0x9   :  { %v11_v1 = vld [vmem:[#allocation1 + $0x3] sm:$0x1]   ;;  %v23_v2 = vld [vmem:[#allocation1 + $0x1] sm:$0x1]   ;;  %v7_v3 = vld [vmem:[#allocation1] sm:$0x1]  }
   0xa   :  { %12 = vrot.lane.b32.xlu0 %v11_v1, %s39_s0  ;;  %24 = vrot.lane.b32.xlu1 %v23_v2, %s40_s8  ;;  %v17_v4 = vld [vmem:[#allocation1 + $0x2] sm:$0x1]   ;;  %9 = vst.msk [vmem:[#allocation0] sm:$0x1] %vm8_vm0, %v7_v3  }
   0xe   :  { %18 = vrot.lane.b32.xlu0 %v17_v4, %s41_s9 }
  0x7c   :  { %v13_v5 = vpop.permute.xlu0 %12   ;;  %v25_v6 = vpop.permute.xlu1 %24  }
  0x7d   :  { %15 = vst.msk [vmem:[#allocation0] sm:$0x1] %vm14_vm1, %v13_v5  }
  0x80   :  { %v19_v7 = vpop.permute.xlu0 %18  }
  0x81   :  { %21 = vst.msk [vmem:[#allocation0] sm:$0x1] %vm20_vm2, %v19_v7  }
  0x82   :  { %27 = vst.msk [vmem:[#allocation0] sm:$0x1] %vm26_vm3, %v25_v6  }
  0x89   :  { %v32_v8 = vld [vmem:[#allocation0] sm:$0x1] }
  0x8a   :  { %35 = vst [vmem:[%s59_s1] sm:$0x1] %v32_v8 }

// kernel: colorizer_forward.1
= control target key start
LH: loop header
LB: loop body
LE: loop exit
PB: predicated region body
PF: predicated region fallthrough
CT: control target
= control target key end

     0   :  { %s17808_s0 = inlined_call_operand.vmem [shape: f32[512,9], index: 0, kind: input, shape index: {}]   ;;  %s17809_s1 = inlined_call_operand.vmem [shape: f32[9,2], index: 1, kind: input, shape index: {}]   ;;  %s17810_s2 = inlined_call_operand.vmem [shape: f32[3,2], index: 2, kind: input, shape index: {}]   ;;  %s17811_s3 = inlined_call_operand.hbm [shape: f32[1152,512], index: 3, kind: input, shape index: {}]   ;;  %s17812_s4 = inlined_call_operand.vmem [shape: f32[18,4], index: 4, kind: input, shape index: {}]   ;;  %s17813_s5 = inlined_call_operand.vmem [shape: f32[3,4], index: 5, kind: input, shape index: {}]   ;;  %s17814_s6 = inlined_call_operand.hbm [shape: f32[288,128], index: 6, kind: input, shape index: {}]   ;;  %s17815_s7 = inlined_call_operand.vmem [shape: f32[36,8], index: 7, kind: input, shape index: {}]   ;;  %s17816_s8 = inlined_call_operand.vmem [shape: f32[3,8], index: 8, kind: input, shape index: {}]   ;;  %s17817_s9 = inlined_call_operand.hbm [shape: f32[72,32], index: 9, kind: input, shape index: {}]   ;;  %s17818_s10 = inlined_call_operand.hbm [shape: f32[72,16], index: 10, kind: input, shape index: {}]   ;;  %s17819_s11 = inlined_call_operand.vmem [shape: f32[3,16], index: 11, kind: input, shape index: {}]   ;;  %s17820_s12 = inlined_call_operand.hbm [shape: f32[18,8], index: 12, kind: input, shape index: {}]   ;;  %s17821_s13 = inlined_call_operand.hbm [shape: f32[144,32], index: 13, kind: input, shape index: {}]   ;;  %s17822_s14 = inlined_call_operand.vmem [shape: f32[3,32], index: 14, kind: input, shape index: {}]   ;;  %s17823_s15 = inlined_call_operand.vmem [shape: f32[32,64], index: 15, kind: input, shape index: {}]   ;;  %s17824_s16 = inlined_call_operand.vmem [shape: f32[2,16], index: 16, kind: input, shape index: {}]   ;;  %s17825_s17 = inlined_call_operand.vmem [shape: f32[16,32], index: 17, kind: input, shape index: {}]   ;;  %s17826_s18 = inlined_call_operand.vmem [shape: f32[2,8], index: 18, kind: input, shape index: {}]   ;;  %s17827_s19 = inlined_call_operand.vmem [shape: f32[8,16], index: 19, kind: input, shape index: {}]   ;;  %s17828_s20 = inlined_call_operand.vmem [shape: f32[2,4], index: 20, kind: input, shape index: {}]   ;;  %s17829_s21 = inlined_call_operand.vmem [shape: f32[4,8], index: 21, kind: input, shape index: {}]   ;;  %s17830_s22 = inlined_call_operand.vmem [shape: f32[2,2], index: 22, kind: input, shape index: {}]   ;;  %s17831_s23 = inlined_call_operand.vmem [shape: f32[2,8], index: 23, kind: input, shape index: {}]   ;;  %s17832_s24 = inlined_call_operand.vmem [shape: f32[1,8], index: 24, kind: input, shape index: {}]   ;;  %s17833_s25 = inlined_call_operand.vmem [shape: f32[512,8], index: 25, kind: output, shape index: {}]  }
   0x1   :  { %18001 = sst [smem:[#allocation70_spill]] %s17808_s0 }
   0x2   :  { %18002 = sst [smem:[#allocation71_spill]] %s17809_s1 }
   0x3   :  { %18003 = sst [smem:[#allocation72_spill]] %s17810_s2 }
   0x4   :  { %18004 = sst [smem:[#allocation73_spill]] %s17811_s3 }
   0x5   :  { %18005 = sst [smem:[#allocation74_spill]] %s17812_s4 }
   0x6   :  { %18006 = sst [smem:[#allocation75_spill]] %s17813_s5 }
   0x7   :  { %18007 = sst [smem:[#allocation76_spill]] %s17814_s6 }
   0x8   :  { %18008 = sst [smem:[#allocation77_spill]] %s17815_s7 }
   0x9   :  { %18009 = sst [smem:[#allocation78_spill]] %s17816_s8 }
   0xa   :  { %18010 = sst [smem:[#allocation79_spill]] %s17817_s9 }
   0xb   :  { %30 = vsyncpa [#allocation7], 0 }
   0xc   :  { %31 = vsyncpa [#allocation9], 0 }
   0xd   :  { %32 = vsyncpa [#allocation12], 0 }
   0xe   :  { %33 = vsyncpa [#allocation15], 0  ;;  %s13082_s29 = smov [#allocation8]  }
   0xf   :  { %s61_s2 = sshll.u32 %s13082_s29, 4  ;;  %s62_s2 = int_to_ptr.vmem [resolvable:$true] %s61_s2 }
  0x10   :  { %s12962_s6 = scalar_lea.vmem %s62_s2, 4608  ;;  %p12967_p1 = scmp.lt.s32.totalorder %s62_s2, %s62_s2 }
  0x11   :  { %p12963_p0 = scmp.ne.s32.totalorder %s62_s2, %s12962_s6  ;;  %p12968_p2 = scmp.lt.s32.totalorder %s12962_s6, %s12962_s6 }
  0x13   :  { %p12969_p3 = por %p12968_p2, %p12967_p1 }
  0x15   :  { %p12970_p4 = pnand %p12969_p3, %p12963_p0 }
  0x17   :  { %12973 = shalt.err (!%p12970_p4)
}
  0x18   :  { %s13083_s30 = smov 128   ;;  %s13084_s7 = smov 8  }
  0x19   :  { %s18011_s1 = sld [smem:[#allocation76_spill]]  ;;  %s13085_s8 = smov [#allocation11]  }
  0x1a   :  { %s89_s27 = sshll.u32 %s13085_s8, 4  ;;  %s13086_s4 = smov [#allocation6]   ;;  %s90_s27 = int_to_ptr.vmem [resolvable:$true] %s89_s27 }
  0x1b   :  { %s45_s28 = sshll.u32 %s13086_s4, 4  ;;  %s12982_s9 = scalar_lea.vmem %s90_s27, 1152  ;;  %s46_s28 = int_to_ptr.vmem [resolvable:$true] %s45_s28 }
  0x1c   :  { %p12983_p5 = scmp.ne.s32.totalorder %s90_s27, %s12982_s9  ;;  %p12987_p6 = scmp.lt.s32.totalorder %s90_s27, %s90_s27 }
  0x1d   :  { %p12988_p7 = scmp.lt.s32.totalorder %s12982_s9, %s12982_s9 }
  0x1f   :  { %67 = dma.hbm_to_vmem [thread:$0]  %s18011_s1, 4608, %s62_s2, [#allocation9], %s13083_s30, %s13083_s30, %s13084_s7  }
  0x20   :  { %p12989_p8 = por %p12988_p7, %p12987_p6 }
  0x22   :  { %p12990_p9 = pnand %p12989_p8, %p12983_p5 }
  0x24   :  { %12993 = shalt.err (!%p12990_p9)
}
  0x25   :  { %95 = dma.hbm_to_vmem [thread:$0]  %s17818_s10, 1152, %s90_s27, [#allocation12], %s13083_s30, %s13083_s30, %s13084_s7  }
  0x26   :  { %s13002_s29 = scalar_lea.vmem %s46_s28, 73728  ;;  %p13007_p11 = scmp.lt.s32.totalorder %s46_s28, %s46_s28 }
  0x27   :  { %p13003_p10 = scmp.ne.s32.totalorder %s46_s28, %s13002_s29  ;;  %p13008_p12 = scmp.lt.s32.totalorder %s13002_s29, %s13002_s29 }
  0x29   :  { %p13009_p13 = por %p13008_p12, %p13007_p11 }
  0x2b   :  { %p13010_p0 = pnand %p13009_p13, %p13003_p10 }
  0x2d   :  { %13013 = shalt.err (!%p13010_p0)
}
  0x2e   :  { %s13087_s2 = smov 512   ;;  %s13088_s6 = smov 32  }
  0x2f   :  { %s18012_s1 = sld [smem:[#allocation73_spill]]  ;;  %s13089_s8 = smov [#allocation10]  }
  0x30   :  { %s77_s4 = sshll.u32 %s13089_s8, 4  ;;  %s13090_s9 = smov [#allocation13]   ;;  %s78_s4 = int_to_ptr.vmem [resolvable:$true] %s77_s4 }
  0x31   :  { %s103_s10 = sshll.u32 %s13090_s9, 4  ;;  %s13022_s27 = scalar_lea.vmem %s78_s4, 1152  ;;  %s104_s10 = int_to_ptr.vmem [resolvable:$true] %s103_s10 }
  0x32   :  { %p13023_p1 = scmp.ne.s32.totalorder %s78_s4, %s13022_s27  ;;  %p13027_p2 = scmp.lt.s32.totalorder %s78_s4, %s78_s4 }
  0x33   :  { %p13028_p3 = scmp.lt.s32.totalorder %s13022_s27, %s13022_s27 }
  0x35   :  { %51 = dma.hbm_to_vmem [thread:$0]  %s18012_s1, 73728, %s46_s28, [#allocation7], %s13087_s2, %s13087_s2, %s13088_s6  }
  0x36   :  { %p13029_p4 = por %p13028_p3, %p13027_p2 }
  0x38   :  { %p13030_p5 = pnand %p13029_p4, %p13023_p1 }
  0x3a   :  { %13033 = shalt.err (!%p13030_p5)
}
  0x3b   :  { %s18013_s29 = sld [smem:[#allocation79_spill]]  ;;  %s13042_s28 = scalar_lea.vmem %s104_s10, 384 }
  0x3c   :  { %p13043_p6 = scmp.ne.s32.totalorder %s104_s10, %s13042_s28  ;;  %p13047_p7 = scmp.lt.s32.totalorder %s104_s10, %s104_s10 }
  0x3d   :  { %p13048_p8 = scmp.lt.s32.totalorder %s13042_s28, %s13042_s28 }
  0x3f   :  { %p13049_p9 = por %p13048_p8, %p13047_p7 }
  0x41   :  { %83 = dma.hbm_to_vmem [thread:$0]  %s18013_s29, 1152, %s78_s4, [#allocation9], %s13083_s30, %s13083_s30, %s13084_s7  }
  0x42   :  { %p13050_p10 = pnand %p13049_p9, %p13043_p6 }
  0x44   :  { %13053 = shalt.err (!%p13050_p10)
}
  0x45   :  { %109 = dma.hbm_to_vmem [thread:$0]  %s17820_s12, 384, %s104_s10, [#allocation12], %s13083_s30, %s13083_s30, %s13084_s7  }
  0x46   :  { %s13091_s26 = smov [#allocation14]  }
  0x47   :  { %s115_s1 = sshll.u32 %s13091_s26, 4  ;;  %s116_s1 = int_to_ptr.vmem [resolvable:$true] %s115_s1 }
  0x48   :  { %s13062_s8 = scalar_lea.vmem %s116_s1, 2304  ;;  %p13067_p12 = scmp.lt.s32.totalorder %s116_s1, %s116_s1 }
  0x49   :  { %p13063_p11 = scmp.ne.s32.totalorder %s116_s1, %s13062_s8  ;;  %p13068_p13 = scmp.lt.s32.totalorder %s13062_s8, %s13062_s8 }
  0x4b   :  { %p13069_p0 = por %p13068_p13, %p13067_p12 }
  0x4d   :  { %p13070_p1 = pnand %p13069_p0, %p13063_p11 }
  0x4f   :  { %13073 = shalt.err (!%p13070_p1)
}
  0x50   :  { %121 = dma.hbm_to_vmem [thread:$0]  %s17821_s13, 2304, %s116_s1, [#allocation15], %s13083_s30, %s13083_s30, %s13084_s7  }
  0x51   :  { %13074 = dma.done.wait [#allocation7], 73728  }
  0x52   :  { %13075 = vsyncadd [#allocation7], 4294893568 }
  0x53   :  { %13076 = dma.done.wait [#allocation9], 5760  }
  0x54   :  { %13077 = vsyncadd [#allocation9], 4294961536 }
  0x55   :  { %13078 = dma.done.wait [#allocation12], 1536  }
  0x56   :  { %13079 = vsyncadd [#allocation12], 4294965760 }
  0x57   :  { %13080 = dma.done.wait [#allocation15], 2304  }
  0x58   :  { %13081 = vsyncadd [#allocation15], 4294964992  ;;  %vm426_vm0 = vcmask 1040384   ;;  %vm233_vm1 = vcmask 72704   ;;  %s18014_s27 = sld [smem:[#allocation71_spill]]  ;;  %vm879_vm2 = vcmask 15360  }
  0x59   :  { %s18015_s30 = sld [smem:[#allocation70_spill]]  ;;  %vm3614_vm3 = vcmask 1041408   ;;  %vm5478_vm4 = vcmask 31744   ;;  %vm5930_vm5 = vcmask 1043456   ;;  %vm13093_vm6 = vmmov 0   ;;  %s13095_s2 = smov 112  }
  0x5a   :  { %s18018_s12 = sld [smem:[#allocation72_spill]]  ;;  %vm6858_vm7 = vcmask 64512   ;;  %vm6923_vm8 = vcmask 261120   ;;  %vm7741_vm9 = vcmask 130048   ;;  %vm8554_vm10 = vcmask 254976   ;;  %s13096_s3 = smov 96  }
  0x5b   :  { %s18161_s0 = sld [smem:[#allocation74_spill]]  ;;  %vm8664_vm11 = vcmask 517120   ;;  %s13097_s26 = smov 16   ;;  %vm8723_vm12 = vcmask 123904  }
  0x5c   :  { %s18334_s4 = sld [smem:[#allocation78_spill]]  ;;  %s13098_s1 = smov 48  }
  0x5d   :  { %s13104_s29 = smov 4   ;;  %s13105_s13 = smov 12  }
  0x5e   :  { %v227_v0 = vld [vmem:[%s18014_s27 + $0x8] sm:$0x1]  ;;  %v226_v1 = vld [vmem:[%s18014_s27] sm:$0xff]  ;;  %s18332_s27 = sld [smem:[#allocation77_spill]] }
  0x5f   :  { %v162_v2 = vld [vmem:[%s18015_s30] sm:$0xff]  ;;  %12041 = vmatprep.subr.msk.mxu0 %vm426_vm0, %v227_v0  ;;  %v163_v3 = vld [vmem:[%s18015_s30 + $0x8] sm:$0xff]  ;;  %12837 = vmatprep.subr.msk.mxu1 %vm426_vm0, %v227_v0  ;;  %v164_v4 = vld [vmem:[%s18015_s30 + $0x10] sm:$0xff] }
  0x60   :  { %12045 = vmatprep.mubr.msk.f32.mxu0 %vm233_vm1, %v162_v2  ;;  %12042 = vmatpush3.msk.msra.mxu0 %vm426_vm0, %v227_v0  ;;  %v165_v5 = vld [vmem:[%s18015_s30 + $0x18] sm:$0xff]  ;;  %v166_v6 = vld [vmem:[%s18015_s30 + $0x20] sm:$0xff]  ;;  %v167_v7 = vld [vmem:[%s18015_s30 + $0x28] sm:$0xff]  ;;  %v229_v2 = vlaneseq }
  0x61   :  { %12043 = vmatprep.subr.mxu0 %v226_v1  ;;  %12839 = vmatpush3.msk.msra.mxu1 %vm426_vm0, %v227_v0  ;;  %v168_v8 = vld [vmem:[%s18015_s30 + $0x30] sm:$0xff]  ;;  %v194_v9 = vld [vmem:[%s18015_s30 + $0x100] sm:$0xff]  ;;  %v195_v10 = vld [vmem:[%s18015_s30 + $0x108] sm:$0xff] }
  0x62   :  { %12044 = vmatpush3.msra.mxu0 %v226_v1  ;;  %12838 = vmatprep.subr.mxu1 %v226_v1  ;;  %v196_v11 = vld [vmem:[%s18015_s30 + $0x110] sm:$0xff]  ;;  %v169_v12 = vld [vmem:[%s18015_s30 + $0x38] sm:$0xff]  ;;  %v170_v14 = vld [vmem:[%s18015_s30 + $0x40] sm:$0xff] }
  0x63   :  { %12046 = vmatmul.mubr.msk.f32.vlgmr.msra.gmra.mxu0 %vm233_vm1, %v163_v3  ;;  %12840 = vmatpush3.msra.mxu1 %v226_v1  ;;  %v197_v13 = vld [vmem:[%s18015_s30 + $0x118] sm:$0xff]  ;;  %v198_v15 = vld [vmem:[%s18015_s30 + $0x120] sm:$0xff]  ;;  %v171_v16 = vld [vmem:[%s18015_s30 + $0x48] sm:$0xff]  ;;  %v13536_v3 = vshrl.u32 %v229_v2, 7 }
  0x64   :  { %12048 = vmatprep.mubr.msk.f32.mxu0 %vm233_vm1, %v164_v4  ;;  %12093 = vmatprep.mubr.msk.f32.mxu1 %vm233_vm1, %v194_v9  ;;  %v199_v17 = vld [vmem:[%s18015_s30 + $0x128] sm:$0xff]  ;;  %v172_v18 = vld [vmem:[%s18015_s30 + $0x50] sm:$0xff]  ;;  %v173_v20 = vld [vmem:[%s18015_s30 + $0x58] sm:$0xff] }
  0x65   :  { %12094 = vmatmul.mubr.msk.f32.vlgmr.msra.gmra.mxu1 %vm233_vm1, %v195_v10  ;;  %v200_v19 = vld [vmem:[%s18015_s30 + $0x130] sm:$0xff]  ;;  %v201_v21 = vld [vmem:[%s18015_s30 + $0x138] sm:$0xff]  ;;  %v174_v22 = vld [vmem:[%s18015_s30 + $0x60] sm:$0xff]  ;;  %18016 = vst [vmem:[#allocation20_spill] sm:$0xff] %v13536_v3  ;;  %v13539_v4 = vsub.s32 0, %v13536_v3 }
  0x66   :  { %12096 = vmatprep.mubr.msk.f32.mxu1 %vm233_vm1, %v196_v11  ;;  %v202_v23 = vld [vmem:[%s18015_s30 + $0x140] sm:$0xff]  ;;  %v175_v24 = vld [vmem:[%s18015_s30 + $0x68] sm:$0xff]  ;;  %v176_v26 = vld [vmem:[%s18015_s30 + $0x70] sm:$0xff] }
  0x67   :  { %12049 = vmatmul.mubr.msk.f32.gmra.mxu0 %vm233_vm1, %v165_v5  ;;  %v203_v25 = vld [vmem:[%s18015_s30 + $0x148] sm:$0xff]  ;;  %v204_v27 = vld [vmem:[%s18015_s30 + $0x150] sm:$0xff]  ;;  %v177_v28 = vld [vmem:[%s18015_s30 + $0x78] sm:$0xff]  ;;  %18017 = vst [vmem:[#allocation21_spill] sm:$0xff] %v13539_v4 }
  0x68   :  { %12051 = vmatprep.mubr.msk.f32.mxu0 %vm233_vm1, %v166_v6  ;;  %v205_v29 = vld [vmem:[%s18015_s30 + $0x158] sm:$0xff]  ;;  %v178_v30 = vld [vmem:[%s18015_s30 + $0x80] sm:$0xff]  ;;  %v179_v32 = vld [vmem:[%s18015_s30 + $0x88] sm:$0xff] }
  0x69   :  { %12097 = vmatmul.mubr.msk.f32.gmra.mxu1 %vm233_vm1, %v197_v13  ;;  %v206_v31 = vld [vmem:[%s18015_s30 + $0x160] sm:$0xff]  ;;  %v207_v33 = vld [vmem:[%s18015_s30 + $0x168] sm:$0xff]  ;;  %v180_v34 = vld [vmem:[%s18015_s30 + $0x90] sm:$0xff] }
  0x6a   :  { %12099 = vmatprep.mubr.msk.f32.mxu1 %vm233_vm1, %v198_v15  ;;  %v208_v35 = vld [vmem:[%s18015_s30 + $0x170] sm:$0xff]  ;;  %v181_v36 = vld [vmem:[%s18015_s30 + $0x98] sm:$0xff]  ;;  %v182_v38 = vld [vmem:[%s18015_s30 + $0xa0] sm:$0xff] }
  0x6b   :  { %12052 = vmatmul.mubr.msk.f32.gmra.mxu0 %vm233_vm1, %v167_v7  ;;  %v209_v37 = vld [vmem:[%s18015_s30 + $0x178] sm:$0xff]  ;;  %v210_v39 = vld [vmem:[%s18015_s30 + $0x180] sm:$0xff]  ;;  %v183_v40 = vld [vmem:[%s18015_s30 + $0xa8] sm:$0xff] }
  0x6c   :  { %12054 = vmatprep.mubr.msk.f32.mxu0 %vm233_vm1, %v168_v8  ;;  %v211_v41 = vld [vmem:[%s18015_s30 + $0x188] sm:$0xff]  ;;  %v184_v42 = vld [vmem:[%s18015_s30 + $0xb0] sm:$0xff]  ;;  %v185_v44 = vld [vmem:[%s18015_s30 + $0xb8] sm:$0xff] }
  0x6d   :  { %12100 = vmatmul.mubr.msk.f32.gmra.mxu1 %vm233_vm1, %v199_v17  ;;  %v212_v43 = vld [vmem:[%s18015_s30 + $0x190] sm:$0xff]  ;;  %v213_v45 = vld [vmem:[%s18015_s30 + $0x198] sm:$0xff]  ;;  %v186_v46 = vld [vmem:[%s18015_s30 + $0xc0] sm:$0xff] }
  0x6e   :  { %12102 = vmatprep.mubr.msk.f32.mxu1 %vm233_vm1, %v200_v19  ;;  %v214_v47 = vld [vmem:[%s18015_s30 + $0x1a0] sm:$0xff]  ;;  %v187_v48 = vld [vmem:[%s18015_s30 + $0xc8] sm:$0xff]  ;;  %v188_v50 = vld [vmem:[%s18015_s30 + $0xd0] sm:$0xff] }
  0x6f   :  { %12055 = vmatmul.mubr.msk.f32.gmra.mxu0 %vm233_vm1, %v169_v12  ;;  %v215_v49 = vld [vmem:[%s18015_s30 + $0x1a8] sm:$0xff]  ;;  %v216_v51 = vld [vmem:[%s18015_s30 + $0x1b0] sm:$0xff]  ;;  %v189_v52 = vld [vmem:[%s18015_s30 + $0xd8] sm:$0xff] }
  0x70   :  { %12057 = vmatprep.mubr.msk.f32.mxu0 %vm233_vm1, %v170_v14  ;;  %v217_v53 = vld [vmem:[%s18015_s30 + $0x1b8] sm:$0xff]  ;;  %v190_v54 = vld [vmem:[%s18015_s30 + $0xe0] sm:$0xff]  ;;  %v191_v56 = vld [vmem:[%s18015_s30 + $0xe8] sm:$0xff] }
  0x71   :  { %12103 = vmatmul.mubr.msk.f32.gmra.mxu1 %vm233_vm1, %v201_v21  ;;  %v218_v55 = vld [vmem:[%s18015_s30 + $0x1c0] sm:$0xff]  ;;  %v219_v57 = vld [vmem:[%s18015_s30 + $0x1c8] sm:$0xff]  ;;  %v192_v58 = vld [vmem:[%s18015_s30 + $0xf0] sm:$0xff] }
  0x72   :  { %12105 = vmatprep.mubr.msk.f32.mxu1 %vm233_vm1, %v202_v23  ;;  %v220_v59 = vld [vmem:[%s18015_s30 + $0x1d0] sm:$0xff]  ;;  %v193_v60 = vld [vmem:[%s18015_s30 + $0xf8] sm:$0xff]  ;;  %v222_v62 = vld [vmem:[%s18015_s30 + $0x1e0] sm:$0xff] }
  0x73   :  { %12058 = vmatmul.mubr.msk.f32.gmra.mxu0 %vm233_vm1, %v171_v16  ;;  %v221_v61 = vld [vmem:[%s18015_s30 + $0x1d8] sm:$0xff]  ;;  %v223_v63 = vld [vmem:[%s18015_s30 + $0x1e8] sm:$0xff]  ;;  %v224_v0 = vld [vmem:[%s18015_s30 + $0x1f0] sm:$0xff] }
  0x74   :  { %12060 = vmatprep.mubr.msk.f32.mxu0 %vm233_vm1, %v172_v18  ;;  %v225_v1 = vld [vmem:[%s18015_s30 + $0x1f8] sm:$0xff]  ;;  %v228_v5 = vld [vmem:[%s18018_s12] sm:$0x7]  ;;  %s13101_s30 = smov 24  }
  0x75   :  { %12106 = vmatmul.mubr.msk.f32.gmra.mxu1 %vm233_vm1, %v203_v25  ;;  %v13545_v6 = vrot.slane %v228_v5, %v13539_v4 }
  0x76   :  { %12108 = vmatprep.mubr.msk.f32.mxu1 %vm233_vm1, %v204_v27 }
  0x77   :  { %12061 = vmatmul.mubr.msk.f32.gmra.mxu0 %vm233_vm1, %v173_v20 }
  0x78   :  { %12063 = vmatprep.mubr.msk.f32.mxu0 %vm233_vm1, %v174_v22 }
  0x79   :  { %12109 = vmatmul.mubr.msk.f32.gmra.mxu1 %vm233_vm1, %v205_v29 }
  0x7a   :  { %12111 = vmatprep.mubr.msk.f32.mxu1 %vm233_vm1, %v206_v31 }
  0x7b   :  { %12064 = vmatmul.mubr.msk.f32.gmra.mxu0 %vm233_vm1, %v175_v24 }
  0x7c   :  { %12066 = vmatprep.mubr.msk.f32.mxu0 %vm233_vm1, %v176_v26 }
  0x7d   :  { %12112 = vmatmul.mubr.msk.f32.gmra.mxu1 %vm233_vm1, %v207_v33 }
  0x7e   :  { %12114 = vmatprep.mubr.msk.f32.mxu1 %vm233_vm1, %v208_v35 }
  0x7f   :  { %12067 = vmatmul.mubr.msk.f32.gmra.mxu0 %vm233_vm1, %v177_v28 }
  0x80   :  { %12069 = vmatprep.mubr.msk.f32.mxu0 %vm233_vm1, %v178_v30 }
  0x81   :  { %12115 = vmatmul.mubr.msk.f32.gmra.mxu1 %vm233_vm1, %v209_v37 }
  0x82   :  { %12117 = vmatprep.mubr.msk.f32.mxu1 %vm233_vm1, %v210_v39 }
  0x83   :  { %12070 = vmatmul.mubr.msk.f32.gmra.mxu0 %vm233_vm1, %v179_v32 }
  0x84   :  { %12072 = vmatprep.mubr.msk.f32.mxu0 %vm233_vm1, %v180_v34 }
  0x85   :  { %12118 = vmatmul.mubr.msk.f32.gmra.mxu1 %vm233_vm1, %v211_v41 }
  0x86   :  { %12120 = vmatprep.mubr.msk.f32.mxu1 %vm233_vm1, %v212_v43 }
  0x87   :  { %12073 = vmatmul.mubr.msk.f32.gmra.mxu0 %vm233_vm1, %v181_v36 }
  0x88   :  { %12075 = vmatprep.mubr.msk.f32.mxu0 %vm233_vm1, %v182_v38 }
  0x89   :  { %12121 = vmatmul.mubr.msk.f32.gmra.mxu1 %vm233_vm1, %v213_v45 }
  0x8a   :  { %12123 = vmatprep.mubr.msk.f32.mxu1 %vm233_vm1, %v214_v47 }
  0x8b   :  { %12076 = vmatmul.mubr.msk.f32.gmra.mxu0 %vm233_vm1, %v183_v40 }
  0x8c   :  { %12078 = vmatprep.mubr.msk.f32.mxu0 %vm233_vm1, %v184_v42 }
  0x8d   :  { %12124 = vmatmul.mubr.msk.f32.gmra.mxu1 %vm233_vm1, %v215_v49 }
  0x8e   :  { %12126 = vmatprep.mubr.msk.f32.mxu1 %vm233_vm1, %v216_v51 }
  0x8f   :  { %12079 = vmatmul.mubr.msk.f32.gmra.mxu0 %vm233_vm1, %v185_v44 }
  0x90   :  { %12081 = vmatprep.mubr.msk.f32.mxu0 %vm233_vm1, %v186_v46 }
  0x91   :  { %12127 = vmatmul.mubr.msk.f32.gmra.mxu1 %vm233_vm1, %v217_v53 }
  0x92   :  { %12129 = vmatprep.mubr.msk.f32.mxu1 %vm233_vm1, %v218_v55 }
  0x93   :  { %12082 = vmatmul.mubr.msk.f32.gmra.mxu0 %vm233_vm1, %v187_v48 }
  0x94   :  { %12084 = vmatprep.mubr.msk.f32.mxu0 %vm233_vm1, %v188_v50 }
  0x95   :  { %12130 = vmatmul.mubr.msk.f32.gmra.mxu1 %vm233_vm1, %v219_v57 }
  0x96   :  { %12132 = vmatprep.mubr.msk.f32.mxu1 %vm233_vm1, %v220_v59 }
  0x97   :  { %12085 = vmatmul.mubr.msk.f32.gmra.mxu0 %vm233_vm1, %v189_v52 }
  0x98   :  { %12087 = vmatprep.mubr.msk.f32.mxu0 %vm233_vm1, %v190_v54 }
  0x99   :  { %12133 = vmatmul.mubr.msk.f32.gmra.mxu1 %vm233_vm1, %v221_v61 }
  0x9a   :  { %12135 = vmatprep.mubr.msk.f32.mxu1 %vm233_vm1, %v222_v62 }
  0x9b   :  { %12088 = vmatmul.mubr.msk.f32.gmra.mxu0 %vm233_vm1, %v191_v56 }
  0x9c   :  { %12090 = vmatprep.mubr.msk.f32.mxu0 %vm233_vm1, %v192_v58 }
  0x9d   :  { %12136 = vmatmul.mubr.msk.f32.gmra.mxu1 %vm233_vm1, %v223_v63 }
  0x9e   :  { %12138 = vmatprep.mubr.msk.f32.mxu1 %vm233_vm1, %v224_v0 }
  0x9f   :  { %12091 = vmatmul.mubr.msk.f32.gmra.mxu0 %vm233_vm1, %v193_v60 }
  0xa1   :  { %12139 = vmatmul.mubr.msk.f32.gmra.mxu1 %vm233_vm1, %v225_v1 }
 0x123   :  { %v12047_v7 = vpop.f32.mrf.mxu0 }
 0x124   :  { %v13548_v8 = vadd.f32 %v12047_v7, %v13545_v6 }
 0x125   :  { %v496_v9 = vpop.f32.mrf.mxu0  ;;  %v13564_v19 = vpop.f32.mrf.mxu1 }
 0x126   :  { %v13551_v10 = vadd.f32 %v496_v9, %v13545_v6  ;;  %v17867_v12 = vmax.f32 %v13548_v8, 0.0 }
 0x127   :  { %v12050_v11 = vpop.f32.mrf.mxu0  ;;  %v13574_v26 = vpop.f32.mrf.mxu1 }
 0x128   :  { %v17868_v13 = vmax.f32 %v13551_v10, 0.0  ;;  %v13556_v14 = vadd.f32 %v12050_v11, %v13545_v6  ;;  %v881_v20 = vsel %vm879_vm2, %v17867_v12, 0.0 }
 0x129   :  { %v506_v15 = vpop.f32.mrf.mxu0  ;;  %v13582_v31 = vpop.f32.mrf.mxu1 }
 0x12a   :  { %v880_v16 = vsel %vm879_vm2, %v17868_v13, 0.0  ;;  %v13562_v17 = vadd.f32 %v506_v15, %v13545_v6  ;;  %v17861_v21 = vmax.f32 %v13556_v14, 0.0 }
 0x12b   :  { %v12053_v18 = vpop.f32.mrf.mxu0  ;;  %v882_v24 = vadd.f32 %v881_v20, %v880_v16  ;;  %v13592_v38 = vpop.f32.mrf.mxu1 }
 0x12c   :  { %v17862_v22 = vmax.f32 %v13562_v17, 0.0  ;;  %v13572_v23 = vadd.f32 %v12053_v18, %v13545_v6  ;;  %v885_v32 = vsel %vm879_vm2, %v17861_v21, 0.0 }
 0x12d   :  { %v516_v25 = vpop.f32.mrf.mxu0  ;;  %v13608_v49 = vpop.f32.mrf.mxu1 }
 0x12e   :  { %v883_v27 = vsel %vm879_vm2, %v17862_v22, 0.0  ;;  %v13580_v28 = vadd.f32 %v516_v25, %v13545_v6  ;;  %v17857_v33 = vmax.f32 %v13572_v23, 0.0 }
 0x12f   :  { %v884_v29 = vadd.f32 %v883_v27, %v882_v24  ;;  %v12056_v30 = vpop.f32.mrf.mxu0  ;;  %v13624_v60 = vpop.f32.mrf.mxu1 }
 0x130   :  { %v17860_v34 = vmax.f32 %v13580_v28, 0.0  ;;  %v13590_v35 = vadd.f32 %v12056_v30, %v13545_v6  ;;  %v889_v43 = vsel %vm879_vm2, %v17857_v33, 0.0 }
 0x131   :  { %v886_v36 = vadd.f32 %v885_v32, %v884_v29  ;;  %v526_v37 = vpop.f32.mrf.mxu0  ;;  %v13640_v15 = vpop.f32.mrf.mxu1 }
 0x132   :  { %v887_v39 = vsel %vm879_vm2, %v17860_v34, 0.0  ;;  %v13598_v40 = vadd.f32 %v526_v37, %v13545_v6  ;;  %v17855_v44 = vmax.f32 %v13590_v35, 0.0 }
 0x133   :  { %v888_v41 = vadd.f32 %v887_v39, %v886_v36  ;;  %v12059_v42 = vpop.f32.mrf.mxu0  ;;  %v13656_v37 = vpop.f32.mrf.mxu1 }
 0x134   :  { %v17856_v45 = vmax.f32 %v13598_v40, 0.0  ;;  %v13606_v46 = vadd.f32 %v12059_v42, %v13545_v6  ;;  %v893_v54 = vsel %vm879_vm2, %v17855_v44, 0.0 }
 0x135   :  { %v890_v47 = vadd.f32 %v889_v43, %v888_v41  ;;  %v536_v48 = vpop.f32.mrf.mxu0 }
 0x136   :  { %v891_v50 = vsel %vm879_vm2, %v17856_v45, 0.0  ;;  %v13614_v51 = vadd.f32 %v536_v48, %v13545_v6  ;;  %v17851_v55 = vmax.f32 %v13606_v46, 0.0 }
 0x137   :  { %v892_v52 = vadd.f32 %v891_v50, %v890_v47  ;;  %v12062_v53 = vpop.f32.mrf.mxu0 }
 0x138   :  { %v17852_v56 = vmax.f32 %v13614_v51, 0.0  ;;  %v13622_v57 = vadd.f32 %v12062_v53, %v13545_v6  ;;  %v897_v1 = vsel %vm879_vm2, %v17851_v55, 0.0 }
 0x139   :  { %v894_v58 = vadd.f32 %v893_v54, %v892_v52  ;;  %v546_v59 = vpop.f32.mrf.mxu0 }
 0x13a   :  { %v895_v61 = vsel %vm879_vm2, %v17852_v56, 0.0  ;;  %v13630_v62 = vadd.f32 %v546_v59, %v13545_v6  ;;  %v17847_v2 = vmax.f32 %v13622_v57, 0.0 }
 0x13b   :  { %v896_v63 = vadd.f32 %v895_v61, %v894_v58  ;;  %v12065_v0 = vpop.f32.mrf.mxu0  ;;  %v13672_v58 = vpop.f32.mrf.mxu1 }
 0x13c   :  { %v17850_v5 = vmax.f32 %v13630_v62, 0.0  ;;  %v13638_v7 = vadd.f32 %v12065_v0, %v13545_v6  ;;  %v901_v25 = vsel %vm879_vm2, %v17847_v2, 0.0 }
 0x13d   :  { %v898_v9 = vadd.f32 %v897_v1, %v896_v63  ;;  %v556_v11 = vpop.f32.mrf.mxu0 }
 0x13e   :  { %v899_v16 = vsel %vm879_vm2, %v17850_v5, 0.0  ;;  %v13646_v18 = vadd.f32 %v556_v11, %v13545_v6  ;;  %v17845_v27 = vmax.f32 %v13638_v7, 0.0 }
 0x13f   :  { %v900_v20 = vadd.f32 %v899_v16, %v898_v9  ;;  %v12068_v24 = vpop.f32.mrf.mxu0 }
 0x140   :  { %v17846_v29 = vmax.f32 %v13646_v18, 0.0  ;;  %v13654_v30 = vadd.f32 %v12068_v24, %v13545_v6  ;;  %v905_v47 = vsel %vm879_vm2, %v17845_v27, 0.0 }
 0x141   :  { %v902_v32 = vadd.f32 %v901_v25, %v900_v20  ;;  %v566_v36 = vpop.f32.mrf.mxu0  ;;  %v13688_v25 = vpop.f32.mrf.mxu1 }
 0x142   :  { %v903_v39 = vsel %vm879_vm2, %v17846_v29, 0.0  ;;  %v13662_v41 = vadd.f32 %v566_v36, %v13545_v6  ;;  %v17841_v48 = vmax.f32 %v13654_v30, 0.0 }
 0x143   :  { %v904_v42 = vadd.f32 %v903_v39, %v902_v32  ;;  %v12071_v43 = vpop.f32.mrf.mxu0 }
 0x144   :  { %v17842_v50 = vmax.f32 %v13662_v41, 0.0  ;;  %v13670_v52 = vadd.f32 %v12071_v43, %v13545_v6  ;;  %v909_v1 = vsel %vm879_vm2, %v17841_v48, 0.0 }
 0x145   :  { %v906_v53 = vadd.f32 %v905_v47, %v904_v42  ;;  %v576_v54 = vpop.f32.mrf.mxu0 }
 0x146   :  { %v907_v59 = vsel %vm879_vm2, %v17842_v50, 0.0  ;;  %v13678_v61 = vadd.f32 %v576_v54, %v13545_v6  ;;  %v17839_v9 = vmax.f32 %v13670_v52, 0.0 }
 0x147   :  { %v908_v63 = vadd.f32 %v907_v59, %v906_v53  ;;  %v12074_v0 = vpop.f32.mrf.mxu0 }
 0x148   :  { %v17840_v11 = vmax.f32 %v13678_v61, 0.0  ;;  %v13686_v16 = vadd.f32 %v12074_v0, %v13545_v6  ;;  %v913_v43 = vsel %vm879_vm2, %v17839_v9, 0.0  ;;  %v13704_v0 = vpop.f32.mrf.mxu1 }
 0x149   :  { %v910_v20 = vadd.f32 %v909_v1, %v908_v63  ;;  %v586_v24 = vpop.f32.mrf.mxu0 }
 0x14a   :  { %v911_v32 = vsel %vm879_vm2, %v17840_v11, 0.0  ;;  %v13694_v36 = vadd.f32 %v586_v24, %v13545_v6  ;;  %v17843_v47 = vmax.f32 %v13686_v16, 0.0  ;;  %v13720_v50 = vpop.f32.mrf.mxu1 }
 0x14b   :  { %v912_v39 = vadd.f32 %v911_v32, %v910_v20  ;;  %v12077_v42 = vpop.f32.mrf.mxu0 }
 0x14c   :  { %v17844_v53 = vmax.f32 %v13694_v36, 0.0  ;;  %v13702_v54 = vadd.f32 %v12077_v42, %v13545_v6  ;;  %v917_v9 = vsel %vm879_vm2, %v17843_v47, 0.0  ;;  %v13736_v2 = vpop.f32.mrf.mxu1 }
 0x14d   :  { %v914_v59 = vadd.f32 %v913_v43, %v912_v39  ;;  %v596_v63 = vpop.f32.mrf.mxu0 }
 0x14e   :  { %v915_v1 = vsel %vm879_vm2, %v17844_v53, 0.0  ;;  %v13710_v20 = vadd.f32 %v596_v63, %v13545_v6  ;;  %v17848_v42 = vmax.f32 %v13702_v54, 0.0  ;;  %v13752_v56 = vpop.f32.mrf.mxu1 }
 0x14f   :  { %v916_v24 = vadd.f32 %v915_v1, %v914_v59  ;;  %v12080_v32 = vpop.f32.mrf.mxu0 }
 0x150   :  { %v17849_v39 = vmax.f32 %v13710_v20, 0.0  ;;  %v13718_v43 = vadd.f32 %v12080_v32, %v13545_v6  ;;  %v921_v53 = vsel %vm879_vm2, %v17848_v42, 0.0  ;;  %v13768_v33 = vpop.f32.mrf.mxu1 }
 0x151   :  { %v918_v11 = vadd.f32 %v917_v9, %v916_v24  ;;  %v606_v48 = vpop.f32.mrf.mxu0 }
 0x152   :  { %v919_v59 = vsel %vm879_vm2, %v17849_v39, 0.0  ;;  %v13726_v63 = vadd.f32 %v606_v48, %v13545_v6  ;;  %v17853_v32 = vmax.f32 %v13718_v43, 0.0  ;;  %v13784_v22 = vpop.f32.mrf.mxu1 }
 0x153   :  { %v920_v1 = vadd.f32 %v919_v59, %v918_v11  ;;  %v12083_v47 = vpop.f32.mrf.mxu0 }
 0x154   :  { %v17854_v9 = vmax.f32 %v13726_v63, 0.0  ;;  %v13734_v24 = vadd.f32 %v12083_v47, %v13545_v6  ;;  %v925_v39 = vsel %vm879_vm2, %v17853_v32, 0.0 }
 0x155   :  { %v922_v27 = vadd.f32 %v921_v53, %v920_v1  ;;  %v616_v29 = vpop.f32.mrf.mxu0 }
 0x156   :  { %v923_v48 = vsel %vm879_vm2, %v17854_v9, 0.0  ;;  %v13742_v11 = vadd.f32 %v616_v29, %v13545_v6  ;;  %v17858_v47 = vmax.f32 %v13734_v24, 0.0 }
 0x157   :  { %v924_v59 = vadd.f32 %v923_v48, %v922_v27  ;;  %v12086_v42 = vpop.f32.mrf.mxu0 }
 0x158   :  { %v17859_v53 = vmax.f32 %v13742_v11, 0.0  ;;  %v13750_v1 = vadd.f32 %v12086_v42, %v13545_v6  ;;  %v929_v9 = vsel %vm879_vm2, %v17858_v47, 0.0 }
 0x159   :  { %v926_v5 = vadd.f32 %v925_v39, %v924_v59  ;;  %v626_v55 = vpop.f32.mrf.mxu0 }
 0x15a   :  { %v927_v27 = vsel %vm879_vm2, %v17859_v53, 0.0  ;;  %v13758_v29 = vadd.f32 %v626_v55, %v13545_v6  ;;  %v17863_v42 = vmax.f32 %v13750_v1, 0.0 }
 0x15b   :  { %v928_v48 = vadd.f32 %v927_v27, %v926_v5  ;;  %v12089_v32 = vpop.f32.mrf.mxu0 }
 0x15c   :  { %v17864_v39 = vmax.f32 %v13758_v29, 0.0  ;;  %v13766_v59 = vadd.f32 %v12089_v32, %v13545_v6  ;;  %v933_v53 = vsel %vm879_vm2, %v17863_v42, 0.0 }
 0x15d   :  { %v930_v44 = vadd.f32 %v929_v9, %v928_v48  ;;  %v636_v45 = vpop.f32.mrf.mxu0 }
 0x15e   :  { %v931_v55 = vsel %vm879_vm2, %v17864_v39, 0.0  ;;  %v13774_v5 = vadd.f32 %v636_v45, %v13545_v6  ;;  %v17866_v32 = vmax.f32 %v13766_v59, 0.0  ;;  %v13803_v39 = vadd.f32 %v13564_v19, %v13545_v6 }
 0x15f   :  { %v932_v27 = vadd.f32 %v931_v55, %v930_v44  ;;  %v12092_v47 = vpop.f32.mrf.mxu0  ;;  %v13794_v55 = vadd.f32 %v13574_v26, %v13545_v6 }
 0x160   :  { %v17865_v9 = vmax.f32 %v13774_v5, 0.0  ;;  %v13782_v48 = vadd.f32 %v12092_v47, %v13545_v6  ;;  %v937_v47 = vsel %vm879_vm2, %v17866_v32, 0.0  ;;  %v17874_v19 = vmax.f32 %v13803_v39, 0.0 }
 0x161   :  { %v934_v34 = vadd.f32 %v933_v53, %v932_v27  ;;  %v646_v21 = vpop.f32.mrf.mxu0 }
 0x162   :  { %v935_v44 = vsel %vm879_vm2, %v17865_v9, 0.0  ;;  %v13790_v45 = vadd.f32 %v646_v21, %v13545_v6  ;;  %v17870_v53 = vmax.f32 %v13782_v48, 0.0  ;;  %v13805_v21 = vpop.f32.mrf.mxu1 }
 0x163   :  { %v936_v42 = vadd.f32 %v935_v44, %v934_v34  ;;  %v17873_v34 = vmax.f32 %v13794_v55, 0.0  ;;  %v13813_v44 = vadd.f32 %v13592_v38, %v13545_v6 }
 0x164   :  { %v17869_v27 = vmax.f32 %v13790_v45, 0.0  ;;  %v941_v12 = vsel %vm879_vm2, %v17870_v53, 0.0  ;;  %v736_v13 = vpop.f32.mrf.mxu1  ;;  %v945_v53 = vsel %vm879_vm2, %v17874_v19, 0.0 }
 0x165   :  { %v938_v9 = vadd.f32 %v937_v47, %v936_v42  ;;  %v13821_v42 = vadd.f32 %v13582_v31, %v13545_v6  ;;  %v17877_v38 = vmax.f32 %v13813_v44, 0.0 }
 0x166   :  { %v939_v26 = vsel %vm879_vm2, %v17869_v27, 0.0  ;;  %v943_v27 = vsel %vm879_vm2, %v17873_v34, 0.0  ;;  %v12122_v4 = vpop.f32.mrf.mxu1 }
 0x167   :  { %v940_v32 = vadd.f32 %v939_v26, %v938_v9  ;;  %v13829_v9 = vadd.f32 %v13624_v60, %v13545_v6  ;;  %v17878_v31 = vmax.f32 %v13821_v42, 0.0  ;;  %v947_v34 = vsel %vm879_vm2, %v17877_v38, 0.0 }
 0x168   :  { %v746_v3 = vpop.f32.mrf.mxu1 }
 0x169   :  { %v942_v47 = vadd.f32 %v941_v12, %v940_v32  ;;  %18019 = vst [vmem:[#allocation22_spill] sm:$0xff] %v13829_v9  ;;  %v13837_v12 = vadd.f32 %v13608_v49, %v13545_v6  ;;  %v17880_v60 = vmax.f32 %v13829_v9, 0.0  ;;  %v949_v19 = vsel %vm879_vm2, %v17878_v31, 0.0 }
 0x16a   :  { %v12125_v9 = vpop.f32.mrf.mxu1 }
 0x16b   :  { %v944_v26 = vadd.f32 %v943_v27, %v942_v47  ;;  %v13845_v27 = vadd.f32 %v13656_v37, %v13545_v6  ;;  %v17881_v49 = vmax.f32 %v13837_v12, 0.0  ;;  %v951_v38 = vsel %vm879_vm2, %v17880_v60, 0.0 }
 0x16d   :  { %v946_v32 = vadd.f32 %v945_v53, %v944_v26  ;;  %18020 = vst [vmem:[#allocation23_spill] sm:$0xff] %v13845_v27  ;;  %v13853_v53 = vadd.f32 %v13640_v15, %v13545_v6  ;;  %v17883_v37 = vmax.f32 %v13845_v27, 0.0  ;;  %v953_v31 = vsel %vm879_vm2, %v17881_v49, 0.0  ;;  %v756_v27 = vpop.f32.mrf.mxu1 }
 0x16f   :  { %v948_v47 = vadd.f32 %v947_v34, %v946_v32  ;;  %v13861_v34 = vadd.f32 %v13688_v25, %v13545_v6  ;;  %v17884_v15 = vmax.f32 %v13853_v53, 0.0  ;;  %v955_v60 = vsel %vm879_vm2, %v17883_v37, 0.0 }
 0x171   :  { %v950_v26 = vadd.f32 %v949_v19, %v948_v47  ;;  %18021 = vst [vmem:[#allocation24_spill] sm:$0xff] %v13861_v34  ;;  %v13869_v19 = vadd.f32 %v13672_v58, %v13545_v6  ;;  %v17886_v25 = vmax.f32 %v13861_v34, 0.0  ;;  %v957_v49 = vsel %vm879_vm2, %v17884_v15, 0.0  ;;  %v12128_v34 = vpop.f32.mrf.mxu1 }
 0x173   :  { %v952_v32 = vadd.f32 %v951_v38, %v950_v26  ;;  %v13877_v38 = vadd.f32 %v13720_v50, %v13545_v6  ;;  %v17887_v58 = vmax.f32 %v13869_v19, 0.0  ;;  %v959_v37 = vsel %vm879_vm2, %v17886_v25, 0.0 }
 0x175   :  { %v954_v47 = vadd.f32 %v953_v31, %v952_v32  ;;  %18022 = vst [vmem:[#allocation25_spill] sm:$0xff] %v13877_v38  ;;  %v13885_v31 = vadd.f32 %v13704_v0, %v13545_v6  ;;  %v17889_v50 = vmax.f32 %v13877_v38, 0.0  ;;  %v961_v15 = vsel %vm879_vm2, %v17887_v58, 0.0  ;;  %v766_v38 = vpop.f32.mrf.mxu1 }
 0x177   :  { %v956_v26 = vadd.f32 %v955_v60, %v954_v47  ;;  %18023 = vst [vmem:[#allocation26_spill] sm:$0xff] %v13885_v31  ;;  %v13893_v60 = vadd.f32 %v13752_v56, %v13545_v6  ;;  %v17890_v0 = vmax.f32 %v13885_v31, 0.0  ;;  %v963_v25 = vsel %vm879_vm2, %v17889_v50, 0.0 }
 0x179   :  { %v958_v32 = vadd.f32 %v957_v49, %v956_v26  ;;  %v13901_v49 = vadd.f32 %v13736_v2, %v13545_v6  ;;  %v17892_v56 = vmax.f32 %v13893_v60, 0.0  ;;  %v965_v58 = vsel %vm879_vm2, %v17890_v0, 0.0 }
 0x17b   :  { %v960_v47 = vadd.f32 %v959_v37, %v958_v32  ;;  %18024 = vst [vmem:[#allocation27_spill] sm:$0xff] %v13901_v49  ;;  %v13909_v37 = vadd.f32 %v13784_v22, %v13545_v6  ;;  %v17893_v2 = vmax.f32 %v13901_v49, 0.0  ;;  %v967_v50 = vsel %vm879_vm2, %v17892_v56, 0.0 }
 0x17d   :  { %v962_v26 = vadd.f32 %v961_v15, %v960_v47  ;;  %18025 = vst [vmem:[#allocation28_spill] sm:$0xff] %v13909_v37  ;;  %v13917_v15 = vadd.f32 %v13768_v33, %v13545_v6  ;;  %v17895_v22 = vmax.f32 %v13909_v37, 0.0  ;;  %v969_v0 = vsel %vm879_vm2, %v17893_v2, 0.0 }
 0x17e   :  { %v13932_v33 = vadd.f32 %v13805_v21, %v13545_v6  ;;  %v13946_v21 = vadd.f32 %v12122_v4, %v13545_v6  ;;  %v13960_v4 = vadd.f32 %v12125_v9, %v13545_v6  ;;  %v13974_v9 = vadd.f32 %v12128_v34, %v13545_v6 }
 0x17f   :  { %v964_v32 = vadd.f32 %v963_v25, %v962_v26  ;;  %v13924_v25 = vadd.f32 %v736_v13, %v13545_v6  ;;  %v17897_v31 = vmax.f32 %v13917_v15, 0.0  ;;  %v971_v56 = vsel %vm879_vm2, %v17895_v22, 0.0 }
 0x180   :  { %v17900_v49 = vmax.f32 %v13932_v33, 0.0  ;;  %18030 = vst [vmem:[#allocation33_spill] sm:$0xff] %v13974_v9 }
 0x181   :  { %v966_v47 = vadd.f32 %v965_v58, %v964_v32  ;;  %18026 = vst [vmem:[#allocation29_spill] sm:$0xff] %v13924_v25  ;;  %v12131_v32 = vpop.f32.mrf.mxu1  ;;  %v17898_v13 = vmax.f32 %v13924_v25, 0.0  ;;  %v973_v2 = vsel %vm879_vm2, %v17897_v31, 0.0  ;;  %v17903_v31 = vmax.f32 %v13946_v21, 0.0 }
 0x182   :  { %v13988_v34 = vadd.f32 %v12131_v32, %v13545_v6 }
 0x183   :  { %v968_v26 = vadd.f32 %v967_v50, %v966_v47  ;;  %v13939_v50 = vadd.f32 %v746_v3, %v13545_v6  ;;  %v975_v22 = vsel %vm879_vm2, %v17898_v13, 0.0  ;;  %v13953_v3 = vadd.f32 %v756_v27, %v13545_v6 }
 0x184   :  { %v13967_v27 = vadd.f32 %v766_v38, %v13545_v6  ;;  %18031 = vst [vmem:[#allocation34_spill] sm:$0xff] %v13988_v34 }
 0x185   :  { %v970_v58 = vadd.f32 %v969_v0, %v968_v26  ;;  %18027 = vst [vmem:[#allocation30_spill] sm:$0xff] %v13939_v50  ;;  %v776_v26 = vpop.f32.mrf.mxu1  ;;  %v17901_v37 = vmax.f32 %v13939_v50, 0.0  ;;  %18028 = vst [vmem:[#allocation31_spill] sm:$0xff] %v13953_v3  ;;  %v17904_v25 = vmax.f32 %v13953_v3, 0.0 }
 0x186   :  { %18029 = vst [vmem:[#allocation32_spill] sm:$0xff] %v13967_v27  ;;  %v17907_v50 = vmax.f32 %v13967_v27, 0.0  ;;  %v13981_v38 = vadd.f32 %v776_v26, %v13545_v6 }
 0x187   :  { %v972_v47 = vadd.f32 %v971_v56, %v970_v58  ;;  %v977_v58 = vsel %vm879_vm2, %v17900_v49, 0.0  ;;  %v979_v13 = vsel %vm879_vm2, %v17901_v37, 0.0  ;;  %v17906_v49 = vmax.f32 %v13960_v4, 0.0 }
 0x188   :  { %v983_v37 = vsel %vm879_vm2, %v17904_v25, 0.0  ;;  %v987_v25 = vsel %vm879_vm2, %v17907_v50, 0.0  ;;  %v17912_v3 = vmax.f32 %v13981_v38, 0.0 }
 0x189   :  { %v974_v0 = vadd.f32 %v973_v2, %v972_v47  ;;  %v12134_v47 = vpop.f32.mrf.mxu1 }
 0x18a   :  { %v14002_v32 = vadd.f32 %v12134_v47, %v13545_v6  ;;  %v991_v50 = vsel %vm879_vm2, %v17912_v3, 0.0 }
 0x18b   :  { %v976_v56 = vadd.f32 %v975_v22, %v974_v0  ;;  %v981_v0 = vsel %vm879_vm2, %v17903_v31, 0.0  ;;  %v17909_v31 = vmax.f32 %v13974_v9, 0.0 }
 0x18c   :  { %18032 = vst [vmem:[#allocation35_spill] sm:$0xff] %v14002_v32 }
 0x18d   :  { %v978_v2 = vadd.f32 %v977_v58, %v976_v56  ;;  %v786_v58 = vpop.f32.mrf.mxu1 }
 0x18e   :  { %v13995_v26 = vadd.f32 %v786_v58, %v13545_v6 }
 0x18f   :  { %v980_v22 = vadd.f32 %v979_v13, %v978_v2  ;;  %v985_v2 = vsel %vm879_vm2, %v17906_v49, 0.0  ;;  %v17911_v49 = vmax.f32 %v13988_v34, 0.0 }
 0x190   :  { %v17916_v27 = vmax.f32 %v13995_v26, 0.0 }
 0x191   :  { %v982_v56 = vadd.f32 %v981_v0, %v980_v22  ;;  %v12137_v0 = vpop.f32.mrf.mxu1 }
 0x193   :  { %v984_v13 = vadd.f32 %v983_v37, %v982_v56  ;;  %v989_v56 = vsel %vm879_vm2, %v17909_v31, 0.0 }
 0x195   :  { %v986_v22 = vadd.f32 %v985_v2, %v984_v13  ;;  %v796_v2 = vpop.f32.mrf.mxu1 }
 0x196   :  { %v14013_v31 = vadd.f32 %v796_v2, %v13545_v6 }
 0x197   :  { %v988_v37 = vadd.f32 %v987_v25, %v986_v22  ;;  %v993_v25 = vsel %vm879_vm2, %v17911_v49, 0.0  ;;  %v17914_v22 = vmax.f32 %v14002_v32, 0.0  ;;  %v12140_v9 = vpop.f32.mrf.mxu1 }
 0x198   :  { %18033 = vst [vmem:[#allocation36_spill] sm:$0xff] %v14013_v31  ;;  %v17915_v49 = vmax.f32 %v14013_v31, 0.0 }
 0x199   :  { %v990_v13 = vadd.f32 %v989_v56, %v988_v37  ;;  %v995_v37 = vsel %vm879_vm2, %v17916_v27, 0.0  ;;  %v806_v34 = vpop.f32.mrf.mxu1 }
 0x19b   :  { %v992_v58 = vadd.f32 %v991_v50, %v990_v13  ;;  %v997_v50 = vsel %vm879_vm2, %v17914_v22, 0.0  ;;  %v14022_v13 = vadd.f32 %v12137_v0, %v13545_v6  ;;  %v14036_v0 = vadd.f32 %v12140_v9, %v13545_v6 }
 0x19d   :  { %v994_v47 = vadd.f32 %v993_v25, %v992_v58  ;;  %18034 = vst [vmem:[#allocation37_spill] sm:$0xff] %v14022_v13  ;;  %v17917_v2 = vmax.f32 %v14022_v13, 0.0  ;;  %v999_v58 = vsel %vm879_vm2, %v17915_v49, 0.0  ;;  %v14030_v25 = vadd.f32 %v806_v34, %v13545_v6 }
 0x19e   :  { %v17921_v22 = vmax.f32 %v14036_v0, 0.0 }
 0x19f   :  { %v996_v56 = vadd.f32 %v995_v37, %v994_v47  ;;  %v1001_v37 = vsel %vm879_vm2, %v17917_v2, 0.0 }
 0x1a1   :  { %v998_v3 = vadd.f32 %v997_v50, %v996_v56  ;;  %v17924_v56 = vmax.f32 %v14030_v25, 0.0 }
 0x1a3   :  { %v1000_v47 = vadd.f32 %v999_v58, %v998_v3  ;;  %v1003_v49 = vsel %vm879_vm2, %v17924_v56, 0.0  ;;  %v1005_v3 = vsel %vm879_vm2, %v17921_v22, 0.0 }
 0x1a5   :  { %v1002_v50 = vadd.f32 %v1001_v37, %v1000_v47  ;;  %v18035_v47 = vmax.f32 %v13551_v10, 0.0 }
 0x1a7   :  { %v1004_v27 = vadd.f32 %v1003_v49, %v1002_v50  ;;  %v18036_v49 = vmax.f32 %v13548_v8, 0.0  ;;  %v18039_v8 = vmax.f32 %v13580_v28, 0.0  ;;  %v18041_v28 = vmax.f32 %v13598_v40, 0.0 }
 0x1a8   :  { %v18043_v40 = vmax.f32 %v13614_v51, 0.0  ;;  %v18045_v51 = vmax.f32 %v13630_v62, 0.0  ;;  %v18047_v62 = vmax.f32 %v13646_v18, 0.0  ;;  %v18049_v18 = vmax.f32 %v13662_v41, 0.0 }
 0x1a9   :  { %v1006_v34 = vadd.f32 %v1005_v3, %v1004_v27  ;;  %v18037_v27 = vmax.f32 %v13562_v17, 0.0  ;;  %v18051_v41 = vmax.f32 %v13678_v61, 0.0  ;;  %v18053_v61 = vmax.f32 %v13694_v36, 0.0 }
 0x1aa   :  { %v18056_v36 = vmax.f32 %v13710_v20, 0.0  ;;  %v18060_v20 = vmax.f32 %v13726_v63, 0.0  ;;  %v18064_v63 = vmax.f32 %v13742_v11, 0.0  ;;  %v18068_v11 = vmax.f32 %v13758_v29, 0.0 }
 0x1ab   :  { %v1007_v58 = vrot.slane %v1006_v34, 4  ;;  %v18072_v29 = vmax.f32 %v13774_v5, 0.0  ;;  %v18075_v5 = vmax.f32 %v13790_v45, 0.0  ;;  %v18077_v45 = vmax.f32 %v13794_v55, 0.0 }
 0x1ac   :  { %v17922_v55 = vmov 0.0  }
 0x1ad   :  { %v1008_v2 = vadd.f32 %v1007_v58, %v1006_v34  ;;  %v18040_v58 = vmax.f32 %v13572_v23, 0.0  ;;  %1991 = vmatprep.subr.mxu1 %v17922_v55  ;;  %2776 = vmatprep.subr.mxu0 %v17922_v55 }
 0x1af   :  { %v1009_v13 = vrot.slane %v1008_v2, 2 }
 0x1b1   :  { %v1010_v6 = vadd.f32 %v1009_v13, %v1008_v2  ;;  %v18038_v13 = vmax.f32 %v13556_v14, 0.0 }
 0x1b3   :  { %v1011_v9 = vrot.slane %v1010_v6, 1 }
 0x1b5   :  { %v1012_v31 = vadd.f32 %v1011_v9, %v1010_v6 }
 0x1b7   :  { %v14046_v32 = vmul.f32 0.001953125, %v1012_v31 }
 0x1b9   :  { %v14051_v37 = vsub.f32 %v18035_v47, %v14046_v32  ;;  %v14056_v50 = vsub.f32 %v18036_v49, %v14046_v32  ;;  %v14061_v3 = vsub.f32 %v18037_v27, %v14046_v32  ;;  %v14066_v31 = vsub.f32 %v18038_v13, %v14046_v32 }
 0x1ba   :  { %v14075_v34 = vsub.f32 %v18039_v8, %v14046_v32  ;;  %v14082_v14 = vsub.f32 %v18040_v58, %v14046_v32  ;;  %v14091_v27 = vsub.f32 %v18041_v28, %v14046_v32  ;;  %v18042_v58 = vmax.f32 %v13590_v35, 0.0 }
 0x1bb   :  { %v1078_v10 = vmul.f32 %v14051_v37, %v14051_v37  ;;  %v1079_v2 = vmul.f32 %v14056_v50, %v14056_v50  ;;  %v1080_v17 = vmul.f32 %v14061_v3, %v14061_v3  ;;  %v1081_v6 = vmul.f32 %v14066_v31, %v14066_v31 }
 0x1bc   :  { %v1082_v13 = vmul.f32 %v14075_v34, %v14075_v34  ;;  %v14099_v22 = vsub.f32 %v18042_v58, %v14046_v32  ;;  %v18044_v35 = vmax.f32 %v13606_v46, 0.0  ;;  %v18046_v46 = vmax.f32 %v13622_v57, 0.0 }
 0x1bd   :  { %v1142_v9 = vsel %vm879_vm2, %v1078_v10, 0.0  ;;  %v1143_v47 = vsel %vm879_vm2, %v1079_v2, 0.0  ;;  %v1145_v23 = vsel %vm879_vm2, %v1080_v17, 0.0  ;;  %v1083_v10 = vmul.f32 %v14082_v14, %v14082_v14 }
 0x1be   :  { %v1144_v49 = vadd.f32 %v1143_v47, %v1142_v9  ;;  %v1147_v2 = vsel %vm879_vm2, %v1081_v6, 0.0  ;;  %v14107_v47 = vsub.f32 %v18043_v40, %v14046_v32  ;;  %v1084_v17 = vmul.f32 %v14091_v27, %v14091_v27 }
 0x1bf   :  { %v1085_v6 = vmul.f32 %v14099_v22, %v14099_v22  ;;  %v18048_v57 = vmax.f32 %v13638_v7, 0.0  ;;  %v18050_v7 = vmax.f32 %v13654_v30, 0.0  ;;  %v18052_v30 = vmax.f32 %v13670_v52, 0.0 }
 0x1c0   :  { %v1146_v8 = vadd.f32 %v1145_v23, %v1144_v49  ;;  %v1149_v49 = vsel %vm879_vm2, %v1082_v13, 0.0  ;;  %v14115_v23 = vsub.f32 %v18044_v35, %v14046_v32  ;;  %v1086_v13 = vmul.f32 %v14107_v47, %v14107_v47 }
 0x1c1   :  { %v18054_v52 = vmax.f32 %v13686_v16, 0.0  ;;  %v18058_v16 = vmax.f32 %v13702_v54, 0.0  ;;  %v18062_v54 = vmax.f32 %v13718_v43, 0.0  ;;  %v18066_v43 = vmax.f32 %v13734_v24, 0.0 }
 0x1c2   :  { %v1148_v9 = vadd.f32 %v1147_v2, %v1146_v8  ;;  %v1151_v8 = vsel %vm879_vm2, %v1083_v10, 0.0  ;;  %v14123_v2 = vsub.f32 %v18045_v51, %v14046_v32  ;;  %v1087_v10 = vmul.f32 %v14115_v23, %v14115_v23 }
 0x1c3   :  { %v18070_v24 = vmax.f32 %v13750_v1, 0.0  ;;  %v18074_v1 = vmax.f32 %v13766_v59, 0.0  ;;  %v18076_v59 = vmax.f32 %v13782_v48, 0.0  ;;  %v18078_v48 = vmax.f32 %v13803_v39, 0.0 }
 0x1c4   :  { %v1150_v28 = vadd.f32 %v1149_v49, %v1148_v9  ;;  %v1153_v9 = vsel %vm879_vm2, %v1084_v17, 0.0  ;;  %v14131_v49 = vsub.f32 %v18046_v46, %v14046_v32  ;;  %v1088_v17 = vmul.f32 %v14123_v2, %v14123_v2 }
 0x1c6   :  { %v1152_v58 = vadd.f32 %v1151_v8, %v1150_v28  ;;  %v1155_v28 = vsel %vm879_vm2, %v1085_v6, 0.0  ;;  %v14139_v8 = vsub.f32 %v18047_v62, %v14046_v32  ;;  %v1089_v6 = vmul.f32 %v14131_v49, %v14131_v49 }
 0x1c8   :  { %v1154_v40 = vadd.f32 %v1153_v9, %v1152_v58  ;;  %v1157_v58 = vsel %vm879_vm2, %v1086_v13, 0.0  ;;  %v14147_v9 = vsub.f32 %v18048_v57, %v14046_v32  ;;  %v1090_v13 = vmul.f32 %v14139_v8, %v14139_v8 }
 0x1ca   :  { %v1156_v35 = vadd.f32 %v1155_v28, %v1154_v40  ;;  %v1159_v40 = vsel %vm879_vm2, %v1087_v10, 0.0  ;;  %v14155_v28 = vsub.f32 %v18049_v18, %v14046_v32  ;;  %v1091_v10 = vmul.f32 %v14147_v9, %v14147_v9 }
 0x1cc   :  { %v1158_v51 = vadd.f32 %v1157_v58, %v1156_v35  ;;  %v1161_v35 = vsel %vm879_vm2, %v1088_v17, 0.0  ;;  %v14163_v58 = vsub.f32 %v18050_v7, %v14046_v32  ;;  %v1092_v17 = vmul.f32 %v14155_v28, %v14155_v28 }
 0x1ce   :  { %v1160_v46 = vadd.f32 %v1159_v40, %v1158_v51  ;;  %v1163_v51 = vsel %vm879_vm2, %v1089_v6, 0.0  ;;  %v14171_v40 = vsub.f32 %v18051_v41, %v14046_v32  ;;  %v1093_v6 = vmul.f32 %v14163_v58, %v14163_v58 }
 0x1d0   :  { %v1162_v62 = vadd.f32 %v1161_v35, %v1160_v46  ;;  %v1165_v46 = vsel %vm879_vm2, %v1090_v13, 0.0  ;;  %v14179_v35 = vsub.f32 %v18052_v30, %v14046_v32  ;;  %v1094_v13 = vmul.f32 %v14171_v40, %v14171_v40 }
 0x1d2   :  { %v1164_v57 = vadd.f32 %v1163_v51, %v1162_v62  ;;  %v1167_v62 = vsel %vm879_vm2, %v1091_v10, 0.0  ;;  %v14187_v51 = vsub.f32 %v18053_v61, %v14046_v32  ;;  %v1095_v10 = vmul.f32 %v14179_v35, %v14179_v35 }
 0x1d4   :  { %v1166_v18 = vadd.f32 %v1165_v46, %v1164_v57  ;;  %v1169_v57 = vsel %vm879_vm2, %v1092_v17, 0.0  ;;  %v14195_v46 = vsub.f32 %v18054_v52, %v14046_v32  ;;  %v1096_v17 = vmul.f32 %v14187_v51, %v14187_v51 }
 0x1d6   :  { %v1168_v7 = vadd.f32 %v1167_v62, %v1166_v18  ;;  %18055 = vst [vmem:[#allocation38_spill] sm:$0xff] %v14195_v46  ;;  %v1171_v18 = vsel %vm879_vm2, %v1093_v6, 0.0  ;;  %v14203_v62 = vsub.f32 %v18056_v36, %v14046_v32  ;;  %v1097_v6 = vmul.f32 %v14195_v46, %v14195_v46 }
 0x1d8   :  { %v1170_v41 = vadd.f32 %v1169_v57, %v1168_v7  ;;  %18057 = vst [vmem:[#allocation39_spill] sm:$0xff] %v14203_v62  ;;  %v1173_v7 = vsel %vm879_vm2, %v1094_v13, 0.0  ;;  %v14211_v57 = vsub.f32 %v18058_v16, %v14046_v32  ;;  %v1098_v13 = vmul.f32 %v14203_v62, %v14203_v62 }
 0x1da   :  { %v1172_v30 = vadd.f32 %v1171_v18, %v1170_v41  ;;  %18059 = vst [vmem:[#allocation40_spill] sm:$0xff] %v14211_v57  ;;  %v1175_v41 = vsel %vm879_vm2, %v1095_v10, 0.0  ;;  %v14219_v18 = vsub.f32 %v18060_v20, %v14046_v32  ;;  %v1099_v10 = vmul.f32 %v14211_v57, %v14211_v57 }
 0x1dc   :  { %v1174_v61 = vadd.f32 %v1173_v7, %v1172_v30  ;;  %18061 = vst [vmem:[#allocation41_spill] sm:$0xff] %v14219_v18  ;;  %v1177_v30 = vsel %vm879_vm2, %v1096_v17, 0.0  ;;  %v14227_v7 = vsub.f32 %v18062_v54, %v14046_v32  ;;  %v1100_v17 = vmul.f32 %v14219_v18, %v14219_v18 }
 0x1de   :  { %v1176_v52 = vadd.f32 %v1175_v41, %v1174_v61  ;;  %18063 = vst [vmem:[#allocation42_spill] sm:$0xff] %v14227_v7  ;;  %v1179_v61 = vsel %vm879_vm2, %v1097_v6, 0.0  ;;  %v14235_v41 = vsub.f32 %v18064_v63, %v14046_v32  ;;  %v1101_v6 = vmul.f32 %v14227_v7, %v14227_v7 }
 0x1e0   :  { %v1178_v36 = vadd.f32 %v1177_v30, %v1176_v52  ;;  %18065 = vst [vmem:[#allocation43_spill] sm:$0xff] %v14235_v41  ;;  %v1181_v52 = vsel %vm879_vm2, %v1098_v13, 0.0  ;;  %v14243_v30 = vsub.f32 %v18066_v43, %v14046_v32  ;;  %v1102_v13 = vmul.f32 %v14235_v41, %v14235_v41 }
 0x1e2   :  { %v1180_v16 = vadd.f32 %v1179_v61, %v1178_v36  ;;  %18067 = vst [vmem:[#allocation44_spill] sm:$0xff] %v14243_v30  ;;  %v1183_v36 = vsel %vm879_vm2, %v1099_v10, 0.0  ;;  %v14251_v61 = vsub.f32 %v18068_v11, %v14046_v32  ;;  %v1103_v10 = vmul.f32 %v14243_v30, %v14243_v30 }
 0x1e4   :  { %v1182_v20 = vadd.f32 %v1181_v52, %v1180_v16  ;;  %18069 = vst [vmem:[#allocation45_spill] sm:$0xff] %v14251_v61  ;;  %v1185_v16 = vsel %vm879_vm2, %v1100_v17, 0.0  ;;  %v14259_v52 = vsub.f32 %v18070_v24, %v14046_v32  ;;  %v1104_v17 = vmul.f32 %v14251_v61, %v14251_v61 }
 0x1e6   :  { %v1184_v54 = vadd.f32 %v1183_v36, %v1182_v20  ;;  %18071 = vst [vmem:[#allocation46_spill] sm:$0xff] %v14259_v52  ;;  %v1187_v20 = vsel %vm879_vm2, %v1101_v6, 0.0  ;;  %v14267_v36 = vsub.f32 %v18072_v29, %v14046_v32  ;;  %v1105_v6 = vmul.f32 %v14259_v52, %v14259_v52 }
 0x1e8   :  { %v1186_v63 = vadd.f32 %v1185_v16, %v1184_v54  ;;  %18073 = vst [vmem:[#allocation47_spill] sm:$0xff] %v14267_v36  ;;  %v1189_v54 = vsel %vm879_vm2, %v1102_v13, 0.0  ;;  %v14275_v16 = vsub.f32 %v18074_v1, %v14046_v32  ;;  %v1106_v13 = vmul.f32 %v14267_v36, %v14267_v36 }
 0x1ea   :  { %v1188_v43 = vadd.f32 %v1187_v20, %v1186_v63  ;;  %v1191_v63 = vsel %vm879_vm2, %v1103_v10, 0.0  ;;  %v14283_v20 = vsub.f32 %v18075_v5, %v14046_v32  ;;  %v1107_v10 = vmul.f32 %v14275_v16, %v14275_v16 }
 0x1ec   :  { %v1190_v11 = vadd.f32 %v1189_v54, %v1188_v43  ;;  %v1193_v43 = vsel %vm879_vm2, %v1104_v17, 0.0  ;;  %v14291_v54 = vsub.f32 %v18076_v59, %v14046_v32  ;;  %v1108_v17 = vmul.f32 %v14283_v20, %v14283_v20 }
 0x1ee   :  { %v1192_v24 = vadd.f32 %v1191_v63, %v1190_v11  ;;  %v1195_v11 = vsel %vm879_vm2, %v1105_v6, 0.0  ;;  %v14299_v63 = vsub.f32 %v18077_v45, %v14046_v32  ;;  %v1109_v6 = vmul.f32 %v14291_v54, %v14291_v54 }
 0x1f0   :  { %v1194_v29 = vadd.f32 %v1193_v43, %v1192_v24  ;;  %v1197_v24 = vsel %vm879_vm2, %v1106_v13, 0.0  ;;  %v14307_v43 = vsub.f32 %v18078_v48, %v14046_v32  ;;  %v18079_v13 = vmax.f32 %v13813_v44, 0.0  ;;  %v18081_v44 = vld [vmem:[#allocation22_spill] sm:$0xff] }
 0x1f1   :  { %v1110_v39 = vmul.f32 %v14299_v63, %v14299_v63  ;;  %v1203_v48 = vsel %vm879_vm2, %v1109_v6, 0.0 }
 0x1f2   :  { %v1196_v1 = vadd.f32 %v1195_v11, %v1194_v29  ;;  %v1199_v29 = vsel %vm879_vm2, %v1107_v10, 0.0  ;;  %v14317_v11 = vsub.f32 %v18079_v13, %v14046_v32  ;;  %v18080_v10 = vmax.f32 %v13821_v42, 0.0 }
 0x1f3   :  { %v18082_v13 = vmax.f32 %v18081_v44, 0.0  ;;  %v18083_v42 = vmax.f32 %v13837_v12, 0.0  ;;  %v18084_v44 = vld [vmem:[#allocation23_spill] sm:$0xff]  ;;  %v18086_v12 = vmax.f32 %v13853_v53, 0.0  ;;  %v18089_v53 = vmax.f32 %v13869_v19, 0.0  ;;  %v18092_v19 = vld [vmem:[#allocation26_spill] sm:$0xff] }
 0x1f4   :  { %v1198_v5 = vadd.f32 %v1197_v24, %v1196_v1  ;;  %v1201_v1 = vsel %vm879_vm2, %v1108_v17, 0.0  ;;  %v14325_v24 = vsub.f32 %v18080_v10, %v14046_v32  ;;  %v1112_v17 = vmul.f32 %v14317_v11, %v14317_v11 }
 0x1f5   :  { %v14333_v55 = vsub.f32 %v18082_v13, %v14046_v32  ;;  %v14341_v10 = vsub.f32 %v18083_v42, %v14046_v32  ;;  %v18085_v13 = vmax.f32 %v18084_v44, 0.0  ;;  %v14357_v42 = vsub.f32 %v18086_v12, %v14046_v32  ;;  %v18087_v44 = vld [vmem:[#allocation24_spill] sm:$0xff] }
 0x1f6   :  { %v1200_v59 = vadd.f32 %v1199_v29, %v1198_v5  ;;  %v1111_v5 = vmul.f32 %v14307_v43, %v14307_v43  ;;  %v1113_v6 = vmul.f32 %v14325_v24, %v14325_v24  ;;  %v14373_v12 = vsub.f32 %v18089_v53, %v14046_v32 }
 0x1f7   :  { %v14349_v56 = vsub.f32 %v18085_v13, %v14046_v32  ;;  %v18088_v13 = vmax.f32 %v18087_v44, 0.0  ;;  %v18090_v44 = vld [vmem:[#allocation25_spill] sm:$0xff]  ;;  %v18093_v53 = vmax.f32 %v18092_v19, 0.0  ;;  %v18095_v19 = vld [vmem:[#allocation27_spill] sm:$0xff] }
 0x1f8   :  { %v1202_v45 = vadd.f32 %v1201_v1, %v1200_v59  ;;  %v1205_v59 = vsel %vm879_vm2, %v1110_v39, 0.0  ;;  %v1114_v39 = vmul.f32 %v14333_v55, %v14333_v55 }
 0x1f9   :  { %v14365_v46 = vsub.f32 %v18088_v13, %v14046_v32  ;;  %v18091_v13 = vmax.f32 %v18090_v44, 0.0  ;;  %v14389_v57 = vsub.f32 %v18093_v53, %v14046_v32  ;;  %v18094_v44 = vmax.f32 %v13893_v60, 0.0  ;;  %v18097_v60 = vld [vmem:[#allocation28_spill] sm:$0xff] }
 0x1fa   :  { %v1204_v29 = vadd.f32 %v1203_v48, %v1202_v45  ;;  %v1207_v45 = vsel %vm879_vm2, %v1111_v5, 0.0  ;;  %v1115_v5 = vmul.f32 %v14341_v10, %v14341_v10  ;;  %v18096_v53 = vmax.f32 %v18095_v19, 0.0 }
 0x1fb   :  { %v14381_v62 = vsub.f32 %v18091_v13, %v14046_v32  ;;  %v14397_v13 = vsub.f32 %v18094_v44, %v14046_v32  ;;  %v18098_v44 = vmax.f32 %v18097_v60, 0.0  ;;  %v18099_v19 = vmax.f32 %v13917_v15, 0.0  ;;  %v18100_v60 = vld [vmem:[#allocation29_spill] sm:$0xff] }
 0x1fc   :  { %v1206_v1 = vadd.f32 %v1205_v59, %v1204_v29  ;;  %v1209_v29 = vsel %vm879_vm2, %v1112_v17, 0.0  ;;  %v1116_v17 = vmul.f32 %v14349_v56, %v14349_v56  ;;  %v14405_v18 = vsub.f32 %v18096_v53, %v14046_v32 }
 0x1fd   :  { %v14413_v7 = vsub.f32 %v18098_v44, %v14046_v32  ;;  %v14421_v53 = vsub.f32 %v18099_v19, %v14046_v32  ;;  %v18101_v44 = vmax.f32 %v18100_v60, 0.0  ;;  %v18102_v15 = vmax.f32 %v13932_v33, 0.0  ;;  %v18103_v60 = vld [vmem:[#allocation30_spill] sm:$0xff] }
 0x1fe   :  { %v1208_v48 = vadd.f32 %v1207_v45, %v1206_v1  ;;  %v1211_v1 = vsel %vm879_vm2, %v1113_v6, 0.0  ;;  %v1117_v6 = vmul.f32 %v14357_v42, %v14357_v42  ;;  %v18105_v33 = vmax.f32 %v13946_v21, 0.0 }
 0x1ff   :  { %v14429_v41 = vsub.f32 %v18101_v44, %v14046_v32  ;;  %v14437_v19 = vsub.f32 %v18102_v15, %v14046_v32  ;;  %v18104_v44 = vmax.f32 %v18103_v60, 0.0  ;;  %v18107_v60 = vld [vmem:[#allocation31_spill] sm:$0xff]  ;;  %v18110_v21 = vmax.f32 %v13960_v4, 0.0  ;;  %v18115_v4 = vld [vmem:[#allocation33_spill] sm:$0xff] }
 0x200   :  { %v1210_v59 = vadd.f32 %v1209_v29, %v1208_v48  ;;  %v1213_v48 = vsel %vm879_vm2, %v1114_v39, 0.0  ;;  %v1118_v39 = vmul.f32 %v14365_v46, %v14365_v46  ;;  %v14453_v15 = vsub.f32 %v18105_v33, %v14046_v32 }
 0x201   :  { %v14445_v30 = vsub.f32 %v18104_v44, %v14046_v32  ;;  %v18108_v44 = vmax.f32 %v18107_v60, 0.0  ;;  %v14469_v33 = vsub.f32 %v18110_v21, %v14046_v32  ;;  %v18112_v60 = vld [vmem:[#allocation32_spill] sm:$0xff]  ;;  %v18116_v21 = vmax.f32 %v18115_v4, 0.0  ;;  %v18120_v4 = vld [vmem:[#allocation34_spill] sm:$0xff] }
 0x202   :  { %v1212_v45 = vadd.f32 %v1211_v1, %v1210_v59  ;;  %v1215_v59 = vsel %vm879_vm2, %v1115_v5, 0.0  ;;  %v1119_v5 = vmul.f32 %v14373_v12, %v14373_v12  ;;  %18106 = vst [vmem:[#allocation22_spill] sm:$0xff] %v14453_v15 }
 0x203   :  { %v14461_v61 = vsub.f32 %v18108_v44, %v14046_v32  ;;  %18111 = vst [vmem:[#allocation24_spill] sm:$0xff] %v14469_v33  ;;  %v18113_v44 = vmax.f32 %v18112_v60, 0.0  ;;  %v14485_v36 = vsub.f32 %v18116_v21, %v14046_v32  ;;  %v18118_v60 = vmax.f32 %v13981_v38, 0.0 }
 0x204   :  { %v1214_v29 = vadd.f32 %v1213_v48, %v1212_v45  ;;  %v1217_v45 = vsel %vm879_vm2, %v1116_v17, 0.0  ;;  %v1120_v17 = vmul.f32 %v14381_v62, %v14381_v62  ;;  %v18121_v21 = vmax.f32 %v18120_v4, 0.0  ;;  %v18125_v4 = vld [vmem:[#allocation35_spill] sm:$0xff] }
 0x205   :  { %18109 = vst [vmem:[#allocation23_spill] sm:$0xff] %v14461_v61  ;;  %v14477_v52 = vsub.f32 %v18113_v44, %v14046_v32  ;;  %18117 = vst [vmem:[#allocation26_spill] sm:$0xff] %v14485_v36  ;;  %v14493_v44 = vsub.f32 %v18118_v60, %v14046_v32  ;;  %v18123_v38 = vmax.f32 %v13995_v26, 0.0  ;;  %v18128_v26 = vld [vmem:[#allocation36_spill] sm:$0xff] }
 0x206   :  { %v1216_v1 = vadd.f32 %v1215_v59, %v1214_v29  ;;  %v1219_v29 = vsel %vm879_vm2, %v1117_v6, 0.0  ;;  %v1121_v6 = vmul.f32 %v14389_v57, %v14389_v57 }
 0x207   :  { %18114 = vst [vmem:[#allocation25_spill] sm:$0xff] %v14477_v52  ;;  %18119 = vst [vmem:[#allocation27_spill] sm:$0xff] %v14493_v44  ;;  %v14509_v60 = vsub.f32 %v18123_v38, %v14046_v32  ;;  %v18129_v38 = vmax.f32 %v18128_v26, 0.0  ;;  %v18134_v26 = vmax.f32 %v14030_v25, 0.0 }
 0x208   :  { %v1218_v48 = vadd.f32 %v1217_v45, %v1216_v1  ;;  %v1221_v1 = vsel %vm879_vm2, %v1118_v39, 0.0  ;;  %v1122_v39 = vmul.f32 %v14397_v13, %v14397_v13 }
 0x209   :  { %18124 = vst [vmem:[#allocation29_spill] sm:$0xff] %v14509_v60 }
 0x20a   :  { %v1220_v59 = vadd.f32 %v1219_v29, %v1218_v48  ;;  %v1223_v48 = vsel %vm879_vm2, %v1119_v5, 0.0  ;;  %v1123_v5 = vmul.f32 %v14405_v18, %v14405_v18 }
 0x20c   :  { %v1222_v45 = vadd.f32 %v1221_v1, %v1220_v59  ;;  %v1225_v59 = vsel %vm879_vm2, %v1120_v17, 0.0  ;;  %v1124_v17 = vmul.f32 %v14413_v7, %v14413_v7 }
 0x20e   :  { %v1224_v29 = vadd.f32 %v1223_v48, %v1222_v45  ;;  %v1227_v45 = vsel %vm879_vm2, %v1121_v6, 0.0  ;;  %v1125_v6 = vmul.f32 %v14421_v53, %v14421_v53 }
 0x210   :  { %v1226_v1 = vadd.f32 %v1225_v59, %v1224_v29  ;;  %v1229_v29 = vsel %vm879_vm2, %v1122_v39, 0.0  ;;  %v1126_v39 = vmul.f32 %v14429_v41, %v14429_v41 }
 0x212   :  { %v1228_v48 = vadd.f32 %v1227_v45, %v1226_v1  ;;  %v1231_v1 = vsel %vm879_vm2, %v1123_v5, 0.0  ;;  %v1127_v5 = vmul.f32 %v14437_v19, %v14437_v19 }
 0x214   :  { %v1230_v59 = vadd.f32 %v1229_v29, %v1228_v48  ;;  %v1233_v48 = vsel %vm879_vm2, %v1124_v17, 0.0  ;;  %v1128_v17 = vmul.f32 %v14445_v30, %v14445_v30 }
 0x216   :  { %v1232_v45 = vadd.f32 %v1231_v1, %v1230_v59  ;;  %v1235_v59 = vsel %vm879_vm2, %v1125_v6, 0.0  ;;  %v1129_v6 = vmul.f32 %v14453_v15, %v14453_v15  ;;  %v14501_v15 = vsub.f32 %v18121_v21, %v14046_v32 }
 0x217   :  { %v18126_v21 = vmax.f32 %v18125_v4, 0.0  ;;  %v18131_v4 = vld [vmem:[#allocation37_spill] sm:$0xff] }
 0x218   :  { %v1234_v29 = vadd.f32 %v1233_v48, %v1232_v45  ;;  %v1237_v45 = vsel %vm879_vm2, %v1126_v39, 0.0  ;;  %v1130_v39 = vmul.f32 %v14461_v61, %v14461_v61  ;;  %18122 = vst [vmem:[#allocation28_spill] sm:$0xff] %v14501_v15 }
 0x219   :  { %v14517_v61 = vsub.f32 %v18126_v21, %v14046_v32  ;;  %v18132_v21 = vmax.f32 %v18131_v4, 0.0  ;;  %v18135_v4 = vmax.f32 %v14036_v0, 0.0 }
 0x21a   :  { %v1236_v1 = vadd.f32 %v1235_v59, %v1234_v29  ;;  %v1239_v29 = vsel %vm879_vm2, %v1127_v5, 0.0  ;;  %v1131_v5 = vmul.f32 %v14469_v33, %v14469_v33  ;;  %v14525_v33 = vsub.f32 %v18129_v38, %v14046_v32 }
 0x21b   :  { %18127 = vst [vmem:[#allocation30_spill] sm:$0xff] %v14517_v61  ;;  %v14541_v38 = vsub.f32 %v18134_v26, %v14046_v32 }
 0x21c   :  { %v1238_v48 = vadd.f32 %v1237_v45, %v1236_v1  ;;  %v1241_v1 = vsel %vm879_vm2, %v1128_v17, 0.0  ;;  %v1132_v17 = vmul.f32 %v14477_v52, %v14477_v52  ;;  %18130 = vst [vmem:[#allocation31_spill] sm:$0xff] %v14525_v33  ;;  %v14533_v52 = vsub.f32 %v18132_v21, %v14046_v32 }
 0x21d   :  { %v14549_v21 = vsub.f32 %v18135_v4, %v14046_v32  ;;  %v1140_v25 = vmul.f32 %v14541_v38, %v14541_v38 }
 0x21e   :  { %v1240_v59 = vadd.f32 %v1239_v29, %v1238_v48  ;;  %v1243_v48 = vsel %vm879_vm2, %v1129_v6, 0.0  ;;  %v1133_v6 = vmul.f32 %v14485_v36, %v14485_v36  ;;  %18133 = vst [vmem:[#allocation32_spill] sm:$0xff] %v14533_v52 }
 0x220   :  { %v1242_v45 = vadd.f32 %v1241_v1, %v1240_v59  ;;  %v1245_v59 = vsel %vm879_vm2, %v1130_v39, 0.0  ;;  %v1134_v39 = vmul.f32 %v14493_v44, %v14493_v44  ;;  %v1416_v44 = vld [vmem:[#allocation6 + $0x8] sm:$0xff] }
 0x221   :  { %2055 = vmatprep.mubr.f32.mxu1 %v1416_v44 }
 0x222   :  { %v1244_v29 = vadd.f32 %v1243_v48, %v1242_v45  ;;  %v1247_v45 = vsel %vm879_vm2, %v1131_v5, 0.0  ;;  %v1135_v5 = vmul.f32 %v14501_v15, %v14501_v15 }
 0x224   :  { %v1246_v1 = vadd.f32 %v1245_v59, %v1244_v29  ;;  %v1249_v29 = vsel %vm879_vm2, %v1132_v17, 0.0  ;;  %v1136_v17 = vmul.f32 %v14509_v60, %v14509_v60 }
 0x226   :  { %v1248_v48 = vadd.f32 %v1247_v45, %v1246_v1  ;;  %v1251_v1 = vsel %vm879_vm2, %v1133_v6, 0.0  ;;  %v1137_v6 = vmul.f32 %v14517_v61, %v14517_v61 }
 0x228   :  { %v1250_v59 = vadd.f32 %v1249_v29, %v1248_v48  ;;  %v1253_v48 = vsel %vm879_vm2, %v1134_v39, 0.0  ;;  %v1138_v39 = vmul.f32 %v14525_v33, %v14525_v33 }
 0x22a   :  { %v1252_v45 = vadd.f32 %v1251_v1, %v1250_v59  ;;  %v1255_v59 = vsel %vm879_vm2, %v1135_v5, 0.0  ;;  %v1139_v5 = vmul.f32 %v14533_v52, %v14533_v52  ;;  %v1261_v26 = vsel %vm879_vm2, %v1138_v39, 0.0 }
 0x22c   :  { %v1254_v29 = vadd.f32 %v1253_v48, %v1252_v45  ;;  %v1257_v45 = vsel %vm879_vm2, %v1136_v17, 0.0  ;;  %v1418_v17 = vld [vmem:[#allocation6 + $0x18] sm:$0xff]  ;;  %v1263_v32 = vsel %vm879_vm2, %v1139_v5, 0.0 }
 0x22d   :  { %2840 = vmatprep.mubr.f32.mxu0 %v1418_v17  ;;  %v18136_v5 = vld [vmem:[#allocation20_spill] sm:$0xff] }
 0x22e   :  { %v1256_v1 = vadd.f32 %v1255_v59, %v1254_v29  ;;  %v1259_v29 = vsel %vm879_vm2, %v1137_v6, 0.0 }
 0x230   :  { %v1258_v48 = vadd.f32 %v1257_v45, %v1256_v1  ;;  %v1141_v1 = vmul.f32 %v14549_v21, %v14549_v21  ;;  %v1265_v45 = vsel %vm879_vm2, %v1140_v25, 0.0  ;;  %v14566_v25 = vsub.s32 1, %v18136_v5 }
 0x232   :  { %v1260_v59 = vadd.f32 %v1259_v29, %v1258_v48  ;;  %v1267_v48 = vsel %vm879_vm2, %v1141_v1, 0.0  ;;  %18137 = vst [vmem:[#allocation33_spill] sm:$0xff] %v14566_v25  ;;  %v14572_v1 = vsub.s32 2, %v18136_v5 }
 0x234   :  { %v1262_v36 = vadd.f32 %v1261_v26, %v1260_v59  ;;  %18138 = vst [vmem:[#allocation34_spill] sm:$0xff] %v14572_v1 }
 0x236   :  { %v1264_v0 = vadd.f32 %v1263_v32, %v1262_v36  ;;  %v12951_v36 = vld [vmem:[%s18018_s12] sm:$0x7]  ;;  %s18293_s12 = sld [smem:[#allocation75_spill]] }
 0x238   :  { %v1266_v6 = vadd.f32 %v1265_v45, %v1264_v0 }
 0x23a   :  { %v1268_v4 = vadd.f32 %v1267_v48, %v1266_v6  ;;  %v18139_v6 = vmov 0.0  }
 0x23c   :  { %v1269_v29 = vrot.slane %v1268_v4, 4 }
 0x23e   :  { %v1270_v15 = vadd.f32 %v1269_v29, %v1268_v4 }
 0x240   :  { %v1271_v39 = vrot.slane %v1270_v15, 2 }
 0x242   :  { %v1272_v59 = vadd.f32 %v1271_v39, %v1270_v15  ;;  %v14575_v15 = vrot.slane %v12951_v36, %v14572_v1 }
 0x244   :  { %v1273_v26 = vrot.slane %v1272_v59, 1 }
 0x246   :  { %v1274_v60 = vadd.f32 %v1273_v26, %v1272_v59 }
 0x248   :  { %v1275_v61 = vmul.f32 0.001953125, %v1274_v60 }
 0x24a   :  { %v1276_v33 = vadd.f32 1e-05, %v1275_v61 }
 0x24c   :  { %12933 = vrsqrt.f32 %v1276_v33 }
 0x259   :  { %v12934_v52 = vpop.eup %12933 }
 0x25a   :  { %v1278_v44 = vmul.f32 %v12951_v36, %v12934_v52 }
 0x25c   :  { %v14569_v17 = vrot.slane %v1278_v44, %v14566_v25 }
 0x25e   :  { %v1298_v61 = vmul.f32 %v14569_v17, %v14163_v58  ;;  %v1300_v33 = vmul.f32 %v14569_v17, %v14179_v35  ;;  %v1330_v52 = vmul.f32 %v14569_v17, %v14421_v53  ;;  %v1332_v32 = vmul.f32 %v14569_v17, %v14437_v19 }
 0x25f   :  { %v1297_v45 = vmul.f32 %v14569_v17, %v14155_v28  ;;  %v1329_v58 = vmul.f32 %v14569_v17, %v14413_v7  ;;  %v1296_v53 = vmul.f32 %v14569_v17, %v14147_v9  ;;  %v1328_v19 = vmul.f32 %v14569_v17, %v14405_v18 }
 0x260   :  { %v1366_v60 = vadd.f32 %v14575_v15, %v1298_v61  ;;  %v14587_v0 = vadd.f32 %v14575_v15, %v1300_v33  ;;  %v14595_v35 = vadd.f32 %v14575_v15, %v1330_v52  ;;  %v14602_v48 = vadd.f32 %v14575_v15, %v1332_v32 }
 0x261   :  { %v1295_v28 = vmul.f32 %v14569_v17, %v14139_v8  ;;  %v1327_v7 = vmul.f32 %v14569_v17, %v14397_v13  ;;  %v1365_v4 = vadd.f32 %v14575_v15, %v1297_v45  ;;  %v14612_v9 = vadd.f32 %v14575_v15, %v1329_v58 }
 0x262   :  { %1992 = vmatpush1.msra.mxu1 %v1366_v60  ;;  %2777 = vmatpush1.msra.mxu0 %v14595_v35  ;;  %v1294_v18 = vmul.f32 %v14569_v17, %v14131_v49  ;;  %v1326_v29 = vmul.f32 %v14569_v17, %v14389_v57  ;;  %v1364_v39 = vadd.f32 %v14575_v15, %v1296_v53 }
 0x263   :  { %1993 = vmatprep.subr.mxu1 %v18139_v6  ;;  %2778 = vmatprep.subr.mxu0 %v18139_v6  ;;  %v14620_v8 = vadd.f32 %v14575_v15, %v1328_v19  ;;  %v1292_v13 = vmul.f32 %v14569_v17, %v14115_v23  ;;  %v1293_v59 = vmul.f32 %v14569_v17, %v14123_v2 }
 0x264   :  { %1994 = vmatpush1.msra.mxu1 %v1365_v4  ;;  %2779 = vmatpush1.msra.mxu0 %v14612_v9  ;;  %v1301_v49 = vmul.f32 %v14569_v17, %v14187_v51  ;;  %v1325_v57 = vmul.f32 %v14569_v17, %v14381_v62  ;;  %v1363_v26 = vadd.f32 %v14575_v15, %v1295_v28 }
 0x265   :  { %1995 = vmatprep.subr.mxu1 %v18139_v6  ;;  %2780 = vmatprep.subr.mxu0 %v18139_v6  ;;  %v14636_v23 = vadd.f32 %v14575_v15, %v1327_v7  ;;  %v1299_v2 = vmul.f32 %v14569_v17, %v14171_v40  ;;  %v1331_v51 = vmul.f32 %v14569_v17, %v14429_v41 }
 0x266   :  { %1996 = vmatpush1.msra.mxu1 %v1364_v39  ;;  %2781 = vmatpush1.msra.mxu0 %v14620_v8  ;;  %v1333_v36 = vmul.f32 %v14569_v17, %v14445_v30  ;;  %v1324_v62 = vmul.f32 %v14569_v17, %v14373_v12  ;;  %v1362_v44 = vadd.f32 %v14575_v15, %v1294_v18 }
 0x267   :  { %1997 = vmatprep.subr.mxu1 %v18139_v6  ;;  %2782 = vmatprep.subr.mxu0 %v18139_v6  ;;  %v14650_v5 = vadd.f32 %v14575_v15, %v1326_v29  ;;  %v1290_v40 = vmul.f32 %v14569_v17, %v14099_v22  ;;  %v1291_v41 = vmul.f32 %v14569_v17, %v14107_v47 }
 0x268   :  { %1998 = vmatpush1.msra.mxu1 %v1363_v26  ;;  %2783 = vmatpush1.msra.mxu0 %v14636_v23  ;;  %v1323_v30 = vmul.f32 %v14569_v17, %v14365_v46  ;;  %v1361_v12 = vadd.f32 %v14575_v15, %v1293_v59  ;;  %v14664_v61 = vadd.f32 %v14575_v15, %v1325_v57 }
 0x269   :  { %1999 = vmatprep.subr.mxu1 %v18139_v6  ;;  %2784 = vmatprep.subr.mxu0 %v18139_v6  ;;  %v14667_v22 = vadd.f32 %v14575_v15, %v1301_v49  ;;  %v14672_v47 = vadd.f32 %v14575_v15, %v1333_v36  ;;  %v14675_v46 = vadd.f32 %v14575_v15, %v1299_v2 }
 0x26a   :  { %2000 = vmatpush1.msra.mxu1 %v1362_v44  ;;  %2785 = vmatpush1.msra.mxu0 %v14650_v5  ;;  %v14678_v33 = vadd.f32 %v14575_v15, %v1331_v51  ;;  %v1322_v52 = vmul.f32 %v14569_v17, %v14357_v42  ;;  %v1360_v60 = vadd.f32 %v14575_v15, %v1292_v13 }
 0x26b   :  { %2001 = vmatprep.subr.mxu1 %v18139_v6  ;;  %2786 = vmatprep.subr.mxu0 %v18139_v6  ;;  %v14684_v32 = vadd.f32 %v14575_v15, %v1324_v62  ;;  %v1289_v45 = vmul.f32 %v14569_v17, %v14091_v27  ;;  %v1321_v58 = vmul.f32 %v14569_v17, %v14349_v56 }
 0x26c   :  { %2002 = vmatpush1.msra.mxu1 %v1361_v12  ;;  %2787 = vmatpush1.msra.mxu0 %v14664_v61  ;;  %v1359_v42 = vadd.f32 %v14575_v15, %v1291_v41  ;;  %v14696_v53 = vadd.f32 %v14575_v15, %v1323_v30  ;;  %v1288_v19 = vmul.f32 %v14569_v17, %v14082_v14  ;;  %v18141_v30 = vld [vmem:[#allocation47_spill] sm:$0xff] }
 0x26d   :  { %2003 = vmatprep.subr.mxu1 %v18139_v6  ;;  %2788 = vmatprep.subr.mxu0 %v18139_v6  ;;  %v1320_v27 = vmul.f32 %v14569_v17, %v14341_v10  ;;  %v1358_v56 = vadd.f32 %v14575_v15, %v1290_v40  ;;  %v14706_v28 = vadd.f32 %v14575_v15, %v1322_v52 }
 0x26e   :  { %2004 = vmatpush1.msra.mxu1 %v1360_v60  ;;  %2789 = vmatpush1.msra.mxu0 %v14684_v32  ;;  %v1287_v7 = vmul.f32 %v14569_v17, %v14075_v34  ;;  %v1319_v14 = vmul.f32 %v14569_v17, %v14333_v55  ;;  %v1357_v10 = vadd.f32 %v14575_v15, %v1289_v45 }
 0x26f   :  { %2005 = vmatprep.subr.mxu1 %v18139_v6  ;;  %2790 = vmatprep.subr.mxu0 %v18139_v6  ;;  %v14718_v4 = vadd.f32 %v14575_v15, %v1321_v58  ;;  %v1286_v18 = vmul.f32 %v14569_v17, %v14066_v31  ;;  %v1318_v34 = vmul.f32 %v14569_v17, %v14325_v24  ;;  %v18143_v58 = vld [vmem:[#allocation46_spill] sm:$0xff] }
 0x270   :  { %2006 = vmatpush1.msra.mxu1 %v1359_v42  ;;  %2791 = vmatpush1.msra.mxu0 %v14696_v53  ;;  %v1356_v55 = vadd.f32 %v14575_v15, %v1288_v19  ;;  %v14728_v29 = vadd.f32 %v14575_v15, %v1320_v27  ;;  %v1285_v39 = vmul.f32 %v14569_v17, %v14061_v3  ;;  %v18144_v19 = vld [vmem:[#allocation30_spill] sm:$0xff] }
 0x271   :  { %2007 = vmatprep.subr.mxu1 %v18139_v6  ;;  %2792 = vmatprep.subr.mxu0 %v18139_v6  ;;  %v1317_v31 = vmul.f32 %v14569_v17, %v14317_v11  ;;  %v1355_v24 = vadd.f32 %v14575_v15, %v1287_v7  ;;  %v14740_v13 = vadd.f32 %v14575_v15, %v1319_v14  ;;  %v18145_v14 = vld [vmem:[#allocation45_spill] sm:$0xff] }
 0x272   :  { %2008 = vmatpush1.msra.mxu1 %v1358_v56  ;;  %2793 = vmatpush1.msra.mxu0 %v14706_v28  ;;  %v1284_v59 = vmul.f32 %v14569_v17, %v14056_v50  ;;  %v1316_v3 = vmul.f32 %v14569_v17, %v14307_v43  ;;  %v1354_v11 = vadd.f32 %v14575_v15, %v1286_v18  ;;  %v18146_v18 = vld [vmem:[#allocation29_spill] sm:$0xff] }
 0x273   :  { %2009 = vmatprep.subr.mxu1 %v18139_v6  ;;  %2794 = vmatprep.subr.mxu0 %v18139_v6  ;;  %v14750_v49 = vadd.f32 %v14575_v15, %v1318_v34  ;;  %v1283_v57 = vmul.f32 %v14569_v17, %v14051_v37  ;;  %v1315_v50 = vmul.f32 %v14569_v17, %v14299_v63 }
 0x274   :  { %2010 = vmatpush1.msra.mxu1 %v1357_v10  ;;  %2795 = vmatpush1.msra.mxu0 %v14718_v4  ;;  %v1353_v43 = vadd.f32 %v14575_v15, %v1285_v39  ;;  %v14762_v26 = vadd.f32 %v14575_v15, %v1317_v31  ;;  %v1314_v2 = vmul.f32 %v14569_v17, %v14291_v54  ;;  %v18147_v31 = vld [vmem:[#allocation44_spill] sm:$0xff] }
 0x275   :  { %2011 = vmatprep.subr.mxu1 %v18139_v6  ;;  %2796 = vmatprep.subr.mxu0 %v18139_v6  ;;  %v1346_v37 = vmul.f32 %v14569_v17, %v14549_v21  ;;  %v1352_v63 = vadd.f32 %v14575_v15, %v1284_v59  ;;  %v14772_v51 = vadd.f32 %v14575_v15, %v1316_v3  ;;  %v18148_v59 = vld [vmem:[#allocation28_spill] sm:$0xff] }
 0x276   :  { %2012 = vmatpush1.msra.mxu1 %v1356_v55  ;;  %2797 = vmatpush1.msra.mxu0 %v14728_v29  ;;  %v1345_v36 = vmul.f32 %v14569_v17, %v14541_v38  ;;  %v1313_v54 = vmul.f32 %v14569_v17, %v14283_v20  ;;  %v1351_v21 = vadd.f32 %v14575_v15, %v1283_v57  ;;  %v18140_v38 = vld [vmem:[#allocation32_spill] sm:$0xff] }
 0x277   :  { %2013 = vmatprep.subr.mxu1 %v18139_v6  ;;  %2798 = vmatprep.subr.mxu0 %v18139_v6  ;;  %v14784_v62 = vadd.f32 %v14575_v15, %v1315_v50  ;;  %v1312_v44 = vmul.f32 %v14569_v17, %v14275_v16  ;;  %v1344_v40 = vmul.f32 %v14569_v17, %v18140_v38  ;;  %v18142_v16 = vld [vmem:[#allocation31_spill] sm:$0xff] }
 0x278   :  { %2014 = vmatpush1.msra.mxu1 %v1355_v24  ;;  %2799 = vmatpush1.msra.mxu0 %v14740_v13  ;;  %v1382_v20 = vadd.f32 %v14575_v15, %v1314_v2  ;;  %v14794_v41 = vadd.f32 %v14575_v15, %v1346_v37  ;;  %v1311_v12 = vmul.f32 %v14569_v17, %v18141_v30  ;;  %v18149_v50 = vld [vmem:[#allocation43_spill] sm:$0xff]  ;;  %v18153_v30 = vld [vmem:[#allocation41_spill] sm:$0xff] }
 0x279   :  { %2015 = vmatprep.subr.mxu1 %v18139_v6  ;;  %2800 = vmatprep.subr.mxu0 %v18139_v6  ;;  %v1343_v52 = vmul.f32 %v14569_v17, %v18142_v16  ;;  %v1381_v60 = vadd.f32 %v14575_v15, %v1313_v54  ;;  %v14806_v45 = vadd.f32 %v14575_v15, %v1345_v36  ;;  %v18150_v2 = vld [vmem:[#allocation27_spill] sm:$0xff]  ;;  %v18151_v54 = vld [vmem:[#allocation42_spill] sm:$0xff]  ;;  %v18154_v16 = vld [vmem:[#allocation25_spill] sm:$0xff] }
 0x27a   :  { %2016 = vmatpush1.msra.mxu1 %v1354_v11  ;;  %2801 = vmatpush1.msra.mxu0 %v14750_v49  ;;  %v1310_v42 = vmul.f32 %v14569_v17, %v18143_v58  ;;  %v1342_v27 = vmul.f32 %v14569_v17, %v18144_v19  ;;  %v1380_v56 = vadd.f32 %v14575_v15, %v1312_v44  ;;  %v18152_v44 = vld [vmem:[#allocation26_spill] sm:$0xff] }
 0x27b   :  { %2017 = vmatprep.subr.mxu1 %v18139_v6  ;;  %2802 = vmatprep.subr.mxu0 %v18139_v6  ;;  %v14816_v7 = vadd.f32 %v14575_v15, %v1344_v40  ;;  %v1309_v10 = vmul.f32 %v14569_v17, %v18145_v14  ;;  %v1341_v34 = vmul.f32 %v14569_v17, %v18146_v18  ;;  %v18157_v18 = vld [vmem:[#allocation39_spill] sm:$0xff] }
 0x27c   :  { %2018 = vmatpush1.msra.mxu1 %v1353_v43  ;;  %2803 = vmatpush1.msra.mxu0 %v14762_v26  ;;  %v1379_v55 = vadd.f32 %v14575_v15, %v1311_v12  ;;  %v14828_v39 = vadd.f32 %v14575_v15, %v1343_v52  ;;  %v1308_v24 = vmul.f32 %v14569_v17, %v18147_v31 }
 0x27d   :  { %2019 = vmatprep.subr.mxu1 %v18139_v6  ;;  %2804 = vmatprep.subr.mxu0 %v18139_v6  ;;  %v1340_v3 = vmul.f32 %v14569_v17, %v18148_v59  ;;  %v1378_v11 = vadd.f32 %v14575_v15, %v1310_v42  ;;  %v14838_v57 = vadd.f32 %v14575_v15, %v1342_v27  ;;  %v18155_v42 = vld [vmem:[#allocation40_spill] sm:$0xff] }
 0x27e   :  { %2020 = vmatpush1.msra.mxu1 %v1352_v63  ;;  %2805 = vmatpush1.msra.mxu0 %v14772_v51  ;;  %v1307_v43 = vmul.f32 %v14569_v17, %v18149_v50  ;;  %v1339_v37 = vmul.f32 %v14569_v17, %v18150_v2  ;;  %v1377_v63 = vadd.f32 %v14575_v15, %v1309_v10  ;;  %v18156_v27 = vld [vmem:[#allocation24_spill] sm:$0xff]  ;;  %v18160_v50 = vld [vmem:[#allocation22_spill] sm:$0xff] }
 0x27f   :  { %2021 = vmatprep.subr.mxu1 %v18139_v6  ;;  %2806 = vmatprep.subr.mxu0 %v18139_v6  ;;  %v14850_v36 = vadd.f32 %v14575_v15, %v1341_v34  ;;  %v1338_v38 = vmul.f32 %v14569_v17, %v18152_v44  ;;  %v1376_v40 = vadd.f32 %v14575_v15, %v1308_v24  ;;  %v1417_v44 = vld [vmem:[#allocation6 + $0x10] sm:$0xff] }
 0x280   :  { %2022 = vmatpush1.msra.mxu1 %v1351_v21  ;;  %2807 = vmatpush1.msra.mxu0 %v14784_v62  ;;  %v1306_v21 = vmul.f32 %v14569_v17, %v18151_v54  ;;  %v1305_v12 = vmul.f32 %v14569_v17, %v18153_v30  ;;  %v1337_v52 = vmul.f32 %v14569_v17, %v18154_v16  ;;  %v1424_v30 = vld [vmem:[#allocation6 + $0x48] sm:$0xff] }
 0x281   :  { %2023 = vmatprep.subr.mxu1 %v18139_v6  ;;  %2808 = vmatprep.subr.mxu0 %v18139_v6  ;;  %v14872_v58 = vadd.f32 %v14575_v15, %v1339_v37  ;;  %v1304_v19 = vmul.f32 %v14569_v17, %v18155_v42  ;;  %v14882_v10 = vadd.f32 %v14575_v15, %v1338_v38  ;;  %v1422_v38 = vld [vmem:[#allocation6 + $0x38] sm:$0xff]  ;;  %v1428_v16 = vld [vmem:[#allocation6 + $0x68] sm:$0xff]  ;;  %v1431_v42 = vld [vmem:[#allocation6 + $0x80] sm:$0xff] }
 0x282   :  { %2024 = vmatpush2.msra.mxu1 %v1382_v20  ;;  %2809 = vmatpush2.msra.mxu0 %v14794_v41  ;;  %v14860_v20 = vadd.f32 %v14575_v15, %v1340_v3  ;;  %v1374_v14 = vadd.f32 %v14575_v15, %v1306_v21  ;;  %v1303_v34 = vmul.f32 %v14569_v17, %v18157_v18  ;;  %v18159_v3 = vld [vmem:[#allocation38_spill] sm:$0xff] }
 0x283   :  { %2025 = vmatprep.subr.mxu1 %v18139_v6  ;;  %2810 = vmatprep.subr.mxu0 %v18139_v6  ;;  %v1373_v24 = vadd.f32 %v14575_v15, %v1305_v12  ;;  %v14894_v59 = vadd.f32 %v14575_v15, %v1337_v52  ;;  %v1372_v2 = vadd.f32 %v14575_v15, %v1304_v19  ;;  %v1423_v12 = vld [vmem:[#allocation6 + $0x40] sm:$0xff]  ;;  %v1436_v19 = vld [vmem:[#allocation6 + $0xa8] sm:$0xff] }
 0x284   :  { %2026 = vmatpush2.msra.mxu1 %v1381_v60  ;;  %2811 = vmatpush2.msra.mxu0 %v14806_v45  ;;  %v1375_v60 = vadd.f32 %v14575_v15, %v1307_v43  ;;  %v1334_v43 = vmul.f32 %v14569_v17, %v18160_v50  ;;  %v1427_v52 = vld [vmem:[#allocation6 + $0x60] sm:$0xff]  ;;  %v1444_v18 = vld [vmem:[#allocation6 + $0xe8] sm:$0xff] }
 0x285   :  { %2027 = vmatprep.subr.mxu1 %v18139_v6  ;;  %2812 = vmatprep.subr.mxu0 %v18139_v6  ;;  %v1455_v50 = vld [vmem:[#allocation6 + $0x140] sm:$0xff] }
 0x286   :  { %2028 = vmatpush2.msra.mxu1 %v1380_v56  ;;  %2813 = vmatpush2.msra.mxu0 %v14816_v7  ;;  %v1336_v56 = vmul.f32 %v14569_v17, %v18156_v27  ;;  %v14918_v21 = vadd.f32 %v14575_v15, %v1334_v43  ;;  %v1435_v27 = vld [vmem:[#allocation6 + $0xa0] sm:$0xff]  ;;  %v1460_v43 = vld [vmem:[#allocation6 + $0x168] sm:$0xff] }
 0x287   :  { %2029 = vmatprep.subr.mxu1 %v18139_v6  ;;  %2814 = vmatprep.subr.mxu0 %v18139_v6 }
 0x288   :  { %2030 = vmatpush2.msra.mxu1 %v1379_v55  ;;  %2815 = vmatpush2.msra.mxu0 %v14828_v39  ;;  %v18158_v55 = vld [vmem:[#allocation23_spill] sm:$0xff]  ;;  %v14904_v37 = vadd.f32 %v14575_v15, %v1336_v56  ;;  %v1440_v56 = vld [vmem:[#allocation6 + $0xc8] sm:$0xff] }
 0x289   :  { %2031 = vmatprep.subr.mxu1 %v18139_v6  ;;  %2816 = vmatprep.subr.mxu0 %v18139_v6  ;;  %v1335_v31 = vmul.f32 %v14569_v17, %v18158_v55  ;;  %v1448_v55 = vld [vmem:[#allocation6 + $0x108] sm:$0xff] }
 0x28a   :  { %2032 = vmatpush2.msra.mxu1 %v1378_v11  ;;  %2817 = vmatpush2.msra.mxu0 %v14838_v57  ;;  %v1302_v11 = vmul.f32 %v14569_v17, %v18159_v3  ;;  %v1451_v3 = vld [vmem:[#allocation6 + $0x120] sm:$0xff] }
 0x28b   :  { %2033 = vmatprep.subr.mxu1 %v18139_v6  ;;  %2818 = vmatprep.subr.mxu0 %v18139_v6  ;;  %v14912_v54 = vadd.f32 %v14575_v15, %v1335_v31  ;;  %v1447_v31 = vld [vmem:[#allocation6 + $0x100] sm:$0xff] }
 0x28c   :  { %2034 = vmatpush2.msra.mxu1 %v1377_v63  ;;  %2819 = vmatpush2.msra.mxu0 %v14850_v36  ;;  %v1371_v63 = vadd.f32 %v14575_v15, %v1303_v34  ;;  %v1370_v17 = vadd.f32 %v14575_v15, %v1302_v11  ;;  %v1415_v15 = vld [vmem:[#allocation6] sm:$0xff]  ;;  %v1456_v11 = vld [vmem:[#allocation6 + $0x148] sm:$0xff] }
 0x28d   :  { %2035 = vmatprep.subr.mxu1 %v18139_v6  ;;  %2820 = vmatprep.subr.mxu0 %v18139_v6  ;;  %v1443_v34 = vld [vmem:[#allocation6 + $0xe0] sm:$0xff] }
 0x28e   :  { %2036 = vmatpush2.msra.mxu1 %v1376_v40  ;;  %2821 = vmatpush2.msra.mxu0 %v14860_v20  ;;  %v1421_v40 = vld [vmem:[#allocation6 + $0x30] sm:$0xff] }
 0x28f   :  { %2037 = vmatprep.subr.mxu1 %v18139_v6  ;;  %2822 = vmatprep.subr.mxu0 %v18139_v6 }
 0x290   :  { %2038 = vmatpush2.msra.mxu1 %v1375_v60  ;;  %2823 = vmatpush2.msra.mxu0 %v14872_v58  ;;  %v1432_v60 = vld [vmem:[#allocation6 + $0x88] sm:$0xff] }
 0x291   :  { %2039 = vmatprep.subr.mxu1 %v18139_v6  ;;  %2824 = vmatprep.subr.mxu0 %v18139_v6 }
 0x292   :  { %2040 = vmatpush2.msra.mxu1 %v1374_v14  ;;  %2825 = vmatpush2.msra.mxu0 %v14882_v10  ;;  %v1439_v14 = vld [vmem:[#allocation6 + $0xc0] sm:$0xff] }
 0x293   :  { %2041 = vmatprep.subr.mxu1 %v18139_v6  ;;  %2826 = vmatprep.subr.mxu0 %v18139_v6 }
 0x294   :  { %2042 = vmatpush2.msra.mxu1 %v1373_v24  ;;  %2827 = vmatpush2.msra.mxu0 %v14894_v59  ;;  %v1452_v24 = vld [vmem:[#allocation6 + $0x128] sm:$0xff] }
 0x295   :  { %2043 = vmatprep.subr.mxu1 %v18139_v6  ;;  %2828 = vmatprep.subr.mxu0 %v18139_v6 }
 0x296   :  { %2044 = vmatpush2.msra.mxu1 %v1372_v2  ;;  %2829 = vmatpush2.msra.mxu0 %v14904_v37  ;;  %v1459_v2 = vld [vmem:[#allocation6 + $0x160] sm:$0xff] }
 0x297   :  { %2045 = vmatprep.subr.mxu1 %v18139_v6  ;;  %2830 = vmatprep.subr.mxu0 %v18139_v6 }
 0x298   :  { %2046 = vmatpush2.msra.mxu1 %v1371_v63  ;;  %2831 = vmatpush2.msra.mxu0 %v14912_v54  ;;  %v1464_v63 = vld [vmem:[#allocation6 + $0x188] sm:$0xff] }
 0x299   :  { %2047 = vmatprep.subr.mxu1 %v18139_v6  ;;  %2832 = vmatprep.subr.mxu0 %v18139_v6 }
 0x29a   :  { %2048 = vmatpush2.msra.mxu1 %v1370_v17  ;;  %2833 = vmatpush2.msra.mxu0 %v14918_v21  ;;  %v1463_v17 = vld [vmem:[#allocation6 + $0x180] sm:$0xff] }
 0x29b   :  { %2049 = vmatprep.subr.mxu1 %v18139_v6  ;;  %2834 = vmatprep.subr.mxu0 %v18139_v6 }
 0x29c   :  { %2050 = vmatpush2.msra.mxu1 %v14667_v22  ;;  %2835 = vmatpush2.msra.mxu0 %v14672_v47  ;;  %v1420_v22 = vld [vmem:[#allocation6 + $0x28] sm:$0xff] }
 0x29d   :  { %2051 = vmatprep.subr.mxu1 %v18139_v6  ;;  %2836 = vmatprep.subr.mxu0 %v18139_v6 }
 0x29e   :  { %2052 = vmatpush2.msra.mxu1 %v14587_v0  ;;  %2837 = vmatpush2.msra.mxu0 %v14602_v48  ;;  %v1419_v0 = vld [vmem:[#allocation6 + $0x20] sm:$0xff] }
 0x29f   :  { %2053 = vmatprep.subr.mxu1 %v18139_v6  ;;  %2838 = vmatprep.subr.mxu0 %v18139_v6 }
 0x2a0   :  { %2054 = vmatpush2.msra.mxu1 %v14675_v46  ;;  %2839 = vmatpush2.msra.mxu0 %v14678_v33  ;;  %v1426_v46 = vld [vmem:[#allocation6 + $0x58] sm:$0xff] }
 0x2a1   :  { %2056 = vmatmul.mubr.f32.vlgmr.msra.gmra.mxu1 %v1415_v15  ;;  %12841 = vmatprep.subr.mxu1 %v18139_v6  ;;  %v1468_v15 = vld [vmem:[#allocation6 + $0x1a8] sm:$0xff] }
 0x2a2   :  { %2841 = vmatmul.mubr.f32.vlgmr.msra.gmra.mxu0 %v1417_v44  ;;  %12873 = vmatpush1.msra.mxu1 %v14595_v35  ;;  %v1425_v35 = vld [vmem:[#allocation6 + $0x50] sm:$0xff]  ;;  %v1467_v44 = vld [vmem:[#allocation6 + $0x1a0] sm:$0xff] }
 0x2a3   :  { %12842 = vmatprep.subr.mxu1 %v18139_v6  ;;  %2060 = vmatprep.mubr.f32.mxu1 %v1420_v22  ;;  %v1472_v22 = vld [vmem:[#allocation6 + $0x1c8] sm:$0xff] }
 0x2a4   :  { %12874 = vmatpush1.msra.mxu1 %v14612_v9  ;;  %2845 = vmatprep.mubr.f32.mxu0 %v1422_v38  ;;  %v1430_v9 = vld [vmem:[#allocation6 + $0x78] sm:$0xff]  ;;  %v1471_v38 = vld [vmem:[#allocation6 + $0x1c0] sm:$0xff] }
 0x2a5   :  { %2061 = vmatmul.mubr.f32.gmra.mxu1 %v1419_v0  ;;  %12843 = vmatprep.subr.mxu1 %v18139_v6  ;;  %v1476_v0 = vld [vmem:[#allocation6 + $0x1e8] sm:$0xff] }
 0x2a6   :  { %2846 = vmatmul.mubr.f32.gmra.mxu0 %v1421_v40  ;;  %12875 = vmatpush1.msra.mxu1 %v14620_v8  ;;  %v1429_v8 = vld [vmem:[#allocation6 + $0x70] sm:$0xff]  ;;  %v1475_v40 = vld [vmem:[#allocation6 + $0x1e0] sm:$0xff] }
 0x2a7   :  { %12844 = vmatprep.subr.mxu1 %v18139_v6  ;;  %2065 = vmatprep.mubr.f32.mxu1 %v1424_v30  ;;  %v1477_v30 = vld [vmem:[#allocation6 + $0x1f0] sm:$0xff] }
 0x2a8   :  { %12876 = vmatpush1.msra.mxu1 %v14636_v23  ;;  %2850 = vmatprep.mubr.f32.mxu0 %v1426_v46  ;;  %v1434_v23 = vld [vmem:[#allocation6 + $0x98] sm:$0xff] }
 0x2a9   :  { %2066 = vmatmul.mubr.f32.gmra.mxu1 %v1423_v12  ;;  %12845 = vmatprep.subr.mxu1 %v18139_v6  ;;  %v1482_v46 = vld [vmem:[#allocation6 + $0x218] sm:$0xff] }
 0x2aa   :  { %2851 = vmatmul.mubr.f32.gmra.mxu0 %v1425_v35  ;;  %12877 = vmatpush1.msra.mxu1 %v14650_v5  ;;  %v1433_v5 = vld [vmem:[#allocation6 + $0x90] sm:$0xff] }
 0x2ab   :  { %12846 = vmatprep.subr.mxu1 %v18139_v6  ;;  %2070 = vmatprep.mubr.f32.mxu1 %v1428_v16  ;;  %v1481_v35 = vld [vmem:[#allocation6 + $0x210] sm:$0xff]  ;;  %v1484_v16 = vld [vmem:[#allocation6 + $0x228] sm:$0xff] }
 0x2ac   :  { %12878 = vmatpush1.msra.mxu1 %v14664_v61  ;;  %2855 = vmatprep.mubr.f32.mxu0 %v1430_v9  ;;  %v1438_v61 = vld [vmem:[#allocation6 + $0xb8] sm:$0xff]  ;;  %v1483_v9 = vld [vmem:[#allocation6 + $0x220] sm:$0xff] }
 0x2ad   :  { %2071 = vmatmul.mubr.f32.gmra.mxu1 %v1427_v52  ;;  %12847 = vmatprep.subr.mxu1 %v18139_v6  ;;  %v1485_v52 = vld [vmem:[#allocation6 + $0x230] sm:$0xff] }
 0x2ae   :  { %2856 = vmatmul.mubr.f32.gmra.mxu0 %v1429_v8  ;;  %12879 = vmatpush1.msra.mxu1 %v14684_v32  ;;  %v1437_v32 = vld [vmem:[#allocation6 + $0xb0] sm:$0xff]  ;;  %v1490_v8 = vld [vmem:[#allocation6 + $0x258] sm:$0xff] }
 0x2af   :  { %12848 = vmatprep.subr.mxu1 %v18139_v6  ;;  %2075 = vmatprep.mubr.f32.mxu1 %v1432_v60  ;;  %v1487_v60 = vld [vmem:[#allocation6 + $0x240] sm:$0xff] }
 0x2b0   :  { %12880 = vmatpush1.msra.mxu1 %v14696_v53  ;;  %2860 = vmatprep.mubr.f32.mxu0 %v1434_v23  ;;  %v1442_v53 = vld [vmem:[#allocation6 + $0xd8] sm:$0xff]  ;;  %v1492_v23 = vld [vmem:[#allocation6 + $0x268] sm:$0xff] }
 0x2b1   :  { %2076 = vmatmul.mubr.f32.gmra.mxu1 %v1431_v42  ;;  %12849 = vmatprep.subr.mxu1 %v18139_v6  ;;  %v1494_v42 = vld [vmem:[#allocation6 + $0x278] sm:$0xff] }
 0x2b2   :  { %2861 = vmatmul.mubr.f32.gmra.mxu0 %v1433_v5  ;;  %12881 = vmatpush1.msra.mxu1 %v14706_v28  ;;  %v1441_v28 = vld [vmem:[#allocation6 + $0xd0] sm:$0xff]  ;;  %v1491_v5 = vld [vmem:[#allocation6 + $0x260] sm:$0xff] }
 0x2b3   :  { %12850 = vmatprep.subr.mxu1 %v18139_v6  ;;  %2080 = vmatprep.mubr.f32.mxu1 %v1436_v19  ;;  %v1493_v19 = vld [vmem:[#allocation6 + $0x270] sm:$0xff] }
 0x2b4   :  { %12882 = vmatpush1.msra.mxu1 %v14718_v4  ;;  %2865 = vmatprep.mubr.f32.mxu0 %v1438_v61  ;;  %v1446_v4 = vld [vmem:[#allocation6 + $0xf8] sm:$0xff]  ;;  %v1496_v61 = vld [vmem:[#allocation6 + $0x288] sm:$0xff] }
 0x2b5   :  { %2081 = vmatmul.mubr.f32.gmra.mxu1 %v1435_v27  ;;  %12851 = vmatprep.subr.mxu1 %v18139_v6  ;;  %v1498_v27 = vld [vmem:[#allocation6 + $0x298] sm:$0xff] }
 0x2b6   :  { %2866 = vmatmul.mubr.f32.gmra.mxu0 %v1437_v32  ;;  %12883 = vmatpush1.msra.mxu1 %v14728_v29  ;;  %v1445_v29 = vld [vmem:[#allocation6 + $0xf0] sm:$0xff]  ;;  %v1495_v32 = vld [vmem:[#allocation6 + $0x280] sm:$0xff] }
 0x2b7   :  { %12852 = vmatprep.subr.mxu1 %v18139_v6  ;;  %2085 = vmatprep.mubr.f32.mxu1 %v1440_v56  ;;  %v1497_v56 = vld [vmem:[#allocation6 + $0x290] sm:$0xff] }
 0x2b8   :  { %12884 = vmatpush1.msra.mxu1 %v14740_v13  ;;  %2870 = vmatprep.mubr.f32.mxu0 %v1442_v53  ;;  %v1450_v13 = vld [vmem:[#allocation6 + $0x118] sm:$0xff]  ;;  %v1500_v53 = vld [vmem:[#allocation6 + $0x2a8] sm:$0xff] }
 0x2b9   :  { %2086 = vmatmul.mubr.f32.gmra.mxu1 %v1439_v14  ;;  %12853 = vmatprep.subr.mxu1 %v18139_v6  ;;  %v1502_v14 = vld [vmem:[#allocation6 + $0x2b8] sm:$0xff] }
 0x2ba   :  { %2871 = vmatmul.mubr.f32.gmra.mxu0 %v1441_v28  ;;  %12885 = vmatpush1.msra.mxu1 %v14750_v49  ;;  %v1449_v49 = vld [vmem:[#allocation6 + $0x110] sm:$0xff]  ;;  %v1499_v28 = vld [vmem:[#allocation6 + $0x2a0] sm:$0xff] }
 0x2bb   :  { %12854 = vmatprep.subr.mxu1 %v18139_v6  ;;  %2090 = vmatprep.mubr.f32.mxu1 %v1444_v18  ;;  %v1501_v18 = vld [vmem:[#allocation6 + $0x2b0] sm:$0xff] }
 0x2bc   :  { %12886 = vmatpush1.msra.mxu1 %v14762_v26  ;;  %2875 = vmatprep.mubr.f32.mxu0 %v1446_v4  ;;  %v1454_v26 = vld [vmem:[#allocation6 + $0x138] sm:$0xff]  ;;  %v1504_v4 = vld [vmem:[#allocation6 + $0x2c8] sm:$0xff] }
 0x2bd   :  { %2091 = vmatmul.mubr.f32.gmra.mxu1 %v1443_v34  ;;  %12855 = vmatprep.subr.mxu1 %v18139_v6  ;;  %v1506_v34 = vld [vmem:[#allocation6 + $0x2d8] sm:$0xff] }
 0x2be   :  { %2876 = vmatmul.mubr.f32.gmra.mxu0 %v1445_v29  ;;  %12887 = vmatpush1.msra.mxu1 %v14772_v51  ;;  %v1453_v51 = vld [vmem:[#allocation6 + $0x130] sm:$0xff]  ;;  %v1503_v29 = vld [vmem:[#allocation6 + $0x2c0] sm:$0xff] }
 0x2bf   :  { %12856 = vmatprep.subr.mxu1 %v18139_v6  ;;  %2095 = vmatprep.mubr.f32.mxu1 %v1448_v55  ;;  %v1505_v55 = vld [vmem:[#allocation6 + $0x2d0] sm:$0xff] }
 0x2c0   :  { %12888 = vmatpush1.msra.mxu1 %v14784_v62  ;;  %2880 = vmatprep.mubr.f32.mxu0 %v1450_v13  ;;  %v1458_v62 = vld [vmem:[#allocation6 + $0x158] sm:$0xff]  ;;  %v1508_v13 = vld [vmem:[#allocation6 + $0x2e8] sm:$0xff] }
 0x2c1   :  { %2096 = vmatmul.mubr.f32.gmra.mxu1 %v1447_v31  ;;  %12857 = vmatprep.subr.mxu1 %v18139_v6  ;;  %v1510_v31 = vld [vmem:[#allocation6 + $0x2f8] sm:$0xff] }
 0x2c2   :  { %2881 = vmatmul.mubr.f32.gmra.mxu0 %v1449_v49  ;;  %12889 = vmatpush2.msra.mxu1 %v14794_v41  ;;  %v1457_v41 = vld [vmem:[#allocation6 + $0x150] sm:$0xff]  ;;  %v1507_v49 = vld [vmem:[#allocation6 + $0x2e0] sm:$0xff] }
 0x2c3   :  { %12858 = vmatprep.subr.mxu1 %v18139_v6  ;;  %2100 = vmatprep.mubr.f32.mxu1 %v1452_v24  ;;  %v1509_v24 = vld [vmem:[#allocation6 + $0x2f0] sm:$0xff] }
 0x2c4   :  { %12890 = vmatpush2.msra.mxu1 %v14806_v45  ;;  %2885 = vmatprep.mubr.f32.mxu0 %v1454_v26  ;;  %v1462_v45 = vld [vmem:[#allocation6 + $0x178] sm:$0xff]  ;;  %v1512_v26 = vld [vmem:[#allocation6 + $0x308] sm:$0xff] }
 0x2c5   :  { %2101 = vmatmul.mubr.f32.gmra.mxu1 %v1451_v3  ;;  %12859 = vmatprep.subr.mxu1 %v18139_v6  ;;  %v1514_v3 = vld [vmem:[#allocation6 + $0x318] sm:$0xff] }
 0x2c6   :  { %2886 = vmatmul.mubr.f32.gmra.mxu0 %v1453_v51  ;;  %12891 = vmatpush2.msra.mxu1 %v14816_v7  ;;  %v1461_v7 = vld [vmem:[#allocation6 + $0x170] sm:$0xff]  ;;  %v1511_v51 = vld [vmem:[#allocation6 + $0x300] sm:$0xff] }
 0x2c7   :  { %12860 = vmatprep.subr.mxu1 %v18139_v6  ;;  %2105 = vmatprep.mubr.f32.mxu1 %v1456_v11  ;;  %v1513_v11 = vld [vmem:[#allocation6 + $0x310] sm:$0xff] }
 0x2c8   :  { %12892 = vmatpush2.msra.mxu1 %v14828_v39  ;;  %2890 = vmatprep.mubr.f32.mxu0 %v1458_v62  ;;  %v1466_v39 = vld [vmem:[#allocation6 + $0x198] sm:$0xff]  ;;  %v1516_v62 = vld [vmem:[#allocation6 + $0x328] sm:$0xff] }
 0x2c9   :  { %2106 = vmatmul.mubr.f32.gmra.mxu1 %v1455_v50  ;;  %12861 = vmatprep.subr.mxu1 %v18139_v6  ;;  %v1518_v50 = vld [vmem:[#allocation6 + $0x338] sm:$0xff] }
 0x2ca   :  { %2891 = vmatmul.mubr.f32.gmra.mxu0 %v1457_v41  ;;  %12893 = vmatpush2.msra.mxu1 %v14838_v57  ;;  %v1465_v57 = vld [vmem:[#allocation6 + $0x190] sm:$0xff]  ;;  %v1515_v41 = vld [vmem:[#allocation6 + $0x320] sm:$0xff] }
 0x2cb   :  { %12862 = vmatprep.subr.mxu1 %v18139_v6  ;;  %2110 = vmatprep.mubr.f32.mxu1 %v1460_v43  ;;  %v1517_v43 = vld [vmem:[#allocation6 + $0x330] sm:$0xff] }
 0x2cc   :  { %12894 = vmatpush2.msra.mxu1 %v14850_v36  ;;  %2895 = vmatprep.mubr.f32.mxu0 %v1462_v45  ;;  %v1470_v36 = vld [vmem:[#allocation6 + $0x1b8] sm:$0xff]  ;;  %v1520_v45 = vld [vmem:[#allocation6 + $0x348] sm:$0xff] }
 0x2cd   :  { %2111 = vmatmul.mubr.f32.gmra.mxu1 %v1459_v2  ;;  %12863 = vmatprep.subr.mxu1 %v18139_v6  ;;  %v1522_v2 = vld [vmem:[#allocation6 + $0x358] sm:$0xff] }
 0x2ce   :  { %2896 = vmatmul.mubr.f32.gmra.mxu0 %v1461_v7  ;;  %12895 = vmatpush2.msra.mxu1 %v14860_v20  ;;  %v1469_v20 = vld [vmem:[#allocation6 + $0x1b0] sm:$0xff]  ;;  %v1519_v7 = vld [vmem:[#allocation6 + $0x340] sm:$0xff] }
 0x2cf   :  { %12864 = vmatprep.subr.mxu1 %v18139_v6  ;;  %2115 = vmatprep.mubr.f32.mxu1 %v1464_v63  ;;  %v1521_v63 = vld [vmem:[#allocation6 + $0x350] sm:$0xff] }
 0x2d0   :  { %12896 = vmatpush2.msra.mxu1 %v14872_v58  ;;  %2900 = vmatprep.mubr.f32.mxu0 %v1466_v39  ;;  %v1474_v58 = vld [vmem:[#allocation6 + $0x1d8] sm:$0xff]  ;;  %v1524_v39 = vld [vmem:[#allocation6 + $0x368] sm:$0xff] }
 0x2d1   :  { %2116 = vmatmul.mubr.f32.gmra.mxu1 %v1463_v17  ;;  %12865 = vmatprep.subr.mxu1 %v18139_v6  ;;  %v1526_v17 = vld [vmem:[#allocation6 + $0x378] sm:$0xff] }
 0x2d2   :  { %2901 = vmatmul.mubr.f32.gmra.mxu0 %v1465_v57  ;;  %12897 = vmatpush2.msra.mxu1 %v14882_v10  ;;  %v1473_v10 = vld [vmem:[#allocation6 + $0x1d0] sm:$0xff]  ;;  %v1523_v57 = vld [vmem:[#allocation6 + $0x360] sm:$0xff] }
 0x2d3   :  { %12866 = vmatprep.subr.mxu1 %v18139_v6  ;;  %2120 = vmatprep.mubr.f32.mxu1 %v1468_v15  ;;  %v1525_v15 = vld [vmem:[#allocation6 + $0x370] sm:$0xff] }
 0x2d4   :  { %12898 = vmatpush2.msra.mxu1 %v14894_v59  ;;  %2905 = vmatprep.mubr.f32.mxu0 %v1470_v36  ;;  %v1478_v59 = vld [vmem:[#allocation6 + $0x1f8] sm:$0xff]  ;;  %v1528_v36 = vld [vmem:[#allocation6 + $0x388] sm:$0xff] }
 0x2d5   :  { %2121 = vmatmul.mubr.f32.gmra.mxu1 %v1467_v44  ;;  %12867 = vmatprep.subr.mxu1 %v18139_v6  ;;  %v1530_v44 = vld [vmem:[#allocation6 + $0x398] sm:$0xff] }
 0x2d6   :  { %2906 = vmatmul.mubr.f32.gmra.mxu0 %v1469_v20  ;;  %12899 = vmatpush2.msra.mxu1 %v14904_v37  ;;  %v3561_v37 = vld [vmem:[%s18161_s0] sm:$0xff]  ;;  %v1527_v20 = vld [vmem:[#allocation6 + $0x380] sm:$0xff] }
 0x2d7   :  { %12868 = vmatprep.subr.mxu1 %v18139_v6  ;;  %2125 = vmatprep.mubr.f32.mxu1 %v1472_v22  ;;  %v4169_v12 = vrot.slane %v3561_v37, 6  ;;  %v1529_v22 = vld [vmem:[#allocation6 + $0x390] sm:$0xff]  ;;  %v1535_v37 = vld [vmem:[#allocation6 + $0x3c0] sm:$0xff] }
 0x2d8   :  { %12900 = vmatpush2.msra.mxu1 %v14912_v54  ;;  %2910 = vmatprep.mubr.f32.mxu0 %v1474_v58  ;;  %v1480_v54 = vld [vmem:[#allocation6 + $0x208] sm:$0xff] }
 0x2d9   :  { %2126 = vmatmul.mubr.f32.gmra.mxu1 %v1471_v38  ;;  %12869 = vmatprep.subr.mxu1 %v18139_v6  ;;  %v1532_v58 = vld [vmem:[#allocation6 + $0x3a8] sm:$0xff]  ;;  %v1534_v38 = vld [vmem:[#allocation6 + $0x3b8] sm:$0xff] }
 0x2da   :  { %2911 = vmatmul.mubr.f32.gmra.mxu0 %v1473_v10  ;;  %12901 = vmatpush2.msra.mxu1 %v14918_v21  ;;  %v1479_v21 = vld [vmem:[#allocation6 + $0x200] sm:$0xff] }
 0x2db   :  { %12870 = vmatprep.subr.mxu1 %v18139_v6  ;;  %2130 = vmatprep.mubr.f32.mxu1 %v1476_v0  ;;  %v1531_v10 = vld [vmem:[#allocation6 + $0x3a0] sm:$0xff]  ;;  %v1533_v0 = vld [vmem:[#allocation6 + $0x3b0] sm:$0xff] }
 0x2dc   :  { %12902 = vmatpush2.msra.mxu1 %v14672_v47  ;;  %2915 = vmatprep.mubr.f32.mxu0 %v1478_v59  ;;  %v1486_v47 = vld [vmem:[#allocation6 + $0x238] sm:$0xff]  ;;  %v1536_v59 = vld [vmem:[#allocation6 + $0x3c8] sm:$0xff] }
 0x2dd   :  { %2131 = vmatmul.mubr.f32.gmra.mxu1 %v1475_v40  ;;  %12871 = vmatprep.subr.mxu1 %v18139_v6  ;;  %v1538_v40 = vld [vmem:[#allocation6 + $0x3d8] sm:$0xff] }
 0x2de   :  { %2916 = vmatmul.mubr.f32.gmra.mxu0 %v1477_v30  ;;  %12903 = vmatpush2.msra.mxu1 %v14602_v48  ;;  %v1488_v48 = vld [vmem:[#allocation6 + $0x248] sm:$0xff]  ;;  %v1537_v30 = vld [vmem:[#allocation6 + $0x3d0] sm:$0xff] }
 0x2df   :  { %12872 = vmatprep.subr.mxu1 %v18139_v6  ;;  %2135 = vmatprep.mubr.f32.mxu1 %v1480_v54  ;;  %v1540_v54 = vld [vmem:[#allocation6 + $0x3e8] sm:$0xff] }
 0x2e0   :  { %12904 = vmatpush2.msra.mxu1 %v14678_v33  ;;  %2920 = vmatprep.mubr.f32.mxu0 %v1482_v46  ;;  %v1489_v33 = vld [vmem:[#allocation6 + $0x250] sm:$0xff]  ;;  %v1542_v46 = vld [vmem:[#allocation6 + $0x3f8] sm:$0xff] }
 0x2e1   :  { %2136 = vmatmul.mubr.f32.gmra.mxu1 %v1479_v21  ;;  %12219 = vmatprep.subr.msk.mxu0 %vm3614_vm3, %v4169_v12  ;;  %v1541_v21 = vld [vmem:[#allocation6 + $0x3f0] sm:$0xff] }
 0x2e2   :  { %2921 = vmatmul.mubr.f32.gmra.mxu0 %v1481_v35  ;;  %2140 = vmatprep.mubr.f32.mxu1 %v1484_v16  ;;  %v1544_v35 = vld [vmem:[#allocation6 + $0x408] sm:$0xff]  ;;  %v1546_v16 = vld [vmem:[#allocation6 + $0x418] sm:$0xff] }
 0x2e3   :  { %2925 = vmatprep.mubr.f32.mxu0 %v1486_v47  ;;  %12220 = vmatpush3.msk.msra.mxu0 %vm3614_vm3, %v4169_v12  ;;  %v1539_v12 = vld [vmem:[#allocation6 + $0x3e0] sm:$0xff] }
 0x2e4   :  { %v1543_v47 = vld [vmem:[#allocation6 + $0x400] sm:$0xff] }
 0x2e5   :  { %2141 = vmatmul.mubr.f32.gmra.mxu1 %v1483_v9  ;;  %v1545_v9 = vld [vmem:[#allocation6 + $0x410] sm:$0xff] }
 0x2e6   :  { %2926 = vmatmul.mubr.f32.gmra.mxu0 %v1485_v52  ;;  %2145 = vmatprep.mubr.f32.mxu1 %v1488_v48  ;;  %v1548_v52 = vld [vmem:[#allocation6 + $0x428] sm:$0xff]  ;;  %v1550_v48 = vld [vmem:[#allocation6 + $0x438] sm:$0xff] }
 0x2e7   :  { %2930 = vmatprep.mubr.f32.mxu0 %v1490_v8  ;;  %v1547_v8 = vld [vmem:[#allocation6 + $0x420] sm:$0xff] }
 0x2e9   :  { %2146 = vmatmul.mubr.f32.gmra.mxu1 %v1487_v60  ;;  %v1549_v60 = vld [vmem:[#allocation6 + $0x430] sm:$0xff] }
 0x2ea   :  { %2931 = vmatmul.mubr.f32.gmra.mxu0 %v1489_v33  ;;  %2150 = vmatprep.mubr.f32.mxu1 %v1492_v23  ;;  %v1552_v33 = vld [vmem:[#allocation6 + $0x448] sm:$0xff]  ;;  %v1554_v23 = vld [vmem:[#allocation6 + $0x458] sm:$0xff] }
 0x2eb   :  { %2935 = vmatprep.mubr.f32.mxu0 %v1494_v42  ;;  %v1551_v42 = vld [vmem:[#allocation6 + $0x440] sm:$0xff] }
 0x2ed   :  { %2151 = vmatmul.mubr.f32.gmra.mxu1 %v1491_v5  ;;  %v1553_v5 = vld [vmem:[#allocation6 + $0x450] sm:$0xff] }
 0x2ee   :  { %2936 = vmatmul.mubr.f32.gmra.mxu0 %v1493_v19  ;;  %2155 = vmatprep.mubr.f32.mxu1 %v1496_v61  ;;  %v1556_v19 = vld [vmem:[#allocation6 + $0x468] sm:$0xff]  ;;  %v1558_v61 = vld [vmem:[#allocation6 + $0x478] sm:$0xff] }
 0x2ef   :  { %2940 = vmatprep.mubr.f32.mxu0 %v1498_v27  ;;  %v1555_v27 = vld [vmem:[#allocation6 + $0x460] sm:$0xff] }
 0x2f1   :  { %2156 = vmatmul.mubr.f32.gmra.mxu1 %v1495_v32  ;;  %v1557_v32 = vld [vmem:[#allocation6 + $0x470] sm:$0xff] }
 0x2f2   :  { %2941 = vmatmul.mubr.f32.gmra.mxu0 %v1497_v56  ;;  %2160 = vmatprep.mubr.f32.mxu1 %v1500_v53  ;;  %v1560_v56 = vld [vmem:[#allocation6 + $0x488] sm:$0xff]  ;;  %v1562_v53 = vld [vmem:[#allocation6 + $0x498] sm:$0xff] }
 0x2f3   :  { %2945 = vmatprep.mubr.f32.mxu0 %v1502_v14  ;;  %v1559_v14 = vld [vmem:[#allocation6 + $0x480] sm:$0xff] }
 0x2f5   :  { %2161 = vmatmul.mubr.f32.gmra.mxu1 %v1499_v28  ;;  %v1561_v28 = vld [vmem:[#allocation6 + $0x490] sm:$0xff] }
 0x2f6   :  { %2946 = vmatmul.mubr.f32.gmra.mxu0 %v1501_v18  ;;  %2165 = vmatprep.mubr.f32.mxu1 %v1504_v4  ;;  %v1564_v18 = vld [vmem:[#allocation6 + $0x4a8] sm:$0xff]  ;;  %v1566_v4 = vld [vmem:[#allocation6 + $0x4b8] sm:$0xff] }
 0x2f7   :  { %2950 = vmatprep.mubr.f32.mxu0 %v1506_v34  ;;  %v1563_v34 = vld [vmem:[#allocation6 + $0x4a0] sm:$0xff] }
 0x2f9   :  { %2166 = vmatmul.mubr.f32.gmra.mxu1 %v1503_v29  ;;  %v1565_v29 = vld [vmem:[#allocation6 + $0x4b0] sm:$0xff] }
 0x2fa   :  { %2951 = vmatmul.mubr.f32.gmra.mxu0 %v1505_v55  ;;  %2170 = vmatprep.mubr.f32.mxu1 %v1508_v13  ;;  %v1568_v55 = vld [vmem:[#allocation6 + $0x4c8] sm:$0xff]  ;;  %v1570_v13 = vld [vmem:[#allocation6 + $0x4d8] sm:$0xff] }
 0x2fb   :  { %2955 = vmatprep.mubr.f32.mxu0 %v1510_v31  ;;  %v1567_v31 = vld [vmem:[#allocation6 + $0x4c0] sm:$0xff] }
 0x2fd   :  { %2171 = vmatmul.mubr.f32.gmra.mxu1 %v1507_v49  ;;  %v1569_v49 = vld [vmem:[#allocation6 + $0x4d0] sm:$0xff] }
 0x2fe   :  { %2956 = vmatmul.mubr.f32.gmra.mxu0 %v1509_v24  ;;  %2175 = vmatprep.mubr.f32.mxu1 %v1512_v26  ;;  %v1572_v24 = vld [vmem:[#allocation6 + $0x4e8] sm:$0xff]  ;;  %v1574_v26 = vld [vmem:[#allocation6 + $0x4f8] sm:$0xff] }
 0x2ff   :  { %2960 = vmatprep.mubr.f32.mxu0 %v1514_v3  ;;  %v1571_v3 = vld [vmem:[#allocation6 + $0x4e0] sm:$0xff] }
 0x301   :  { %2176 = vmatmul.mubr.f32.gmra.mxu1 %v1511_v51  ;;  %v1573_v51 = vld [vmem:[#allocation6 + $0x4f0] sm:$0xff] }
 0x302   :  { %2961 = vmatmul.mubr.f32.gmra.mxu0 %v1513_v11  ;;  %2180 = vmatprep.mubr.f32.mxu1 %v1516_v62  ;;  %v1576_v11 = vld [vmem:[#allocation6 + $0x508] sm:$0xff]  ;;  %v1578_v62 = vld [vmem:[#allocation6 + $0x518] sm:$0xff] }
 0x303   :  { %2965 = vmatprep.mubr.f32.mxu0 %v1518_v50  ;;  %v1575_v50 = vld [vmem:[#allocation6 + $0x500] sm:$0xff] }
 0x305   :  { %2181 = vmatmul.mubr.f32.gmra.mxu1 %v1515_v41  ;;  %v1577_v41 = vld [vmem:[#allocation6 + $0x510] sm:$0xff] }
 0x306   :  { %2966 = vmatmul.mubr.f32.gmra.mxu0 %v1517_v43  ;;  %2185 = vmatprep.mubr.f32.mxu1 %v1520_v45  ;;  %v1580_v43 = vld [vmem:[#allocation6 + $0x528] sm:$0xff]  ;;  %v1582_v45 = vld [vmem:[#allocation6 + $0x538] sm:$0xff] }
 0x307   :  { %2970 = vmatprep.mubr.f32.mxu0 %v1522_v2  ;;  %v1579_v2 = vld [vmem:[#allocation6 + $0x520] sm:$0xff] }
 0x309   :  { %2186 = vmatmul.mubr.f32.gmra.mxu1 %v1519_v7  ;;  %v1581_v7 = vld [vmem:[#allocation6 + $0x530] sm:$0xff] }
 0x30a   :  { %2971 = vmatmul.mubr.f32.gmra.mxu0 %v1521_v63  ;;  %2190 = vmatprep.mubr.f32.mxu1 %v1524_v39  ;;  %v1584_v63 = vld [vmem:[#allocation6 + $0x548] sm:$0xff]  ;;  %v1586_v39 = vld [vmem:[#allocation6 + $0x558] sm:$0xff] }
 0x30b   :  { %2975 = vmatprep.mubr.f32.mxu0 %v1526_v17  ;;  %v1583_v17 = vld [vmem:[#allocation6 + $0x540] sm:$0xff] }
 0x30d   :  { %2191 = vmatmul.mubr.f32.gmra.mxu1 %v1523_v57  ;;  %v1585_v57 = vld [vmem:[#allocation6 + $0x550] sm:$0xff] }
 0x30e   :  { %2976 = vmatmul.mubr.f32.gmra.mxu0 %v1525_v15  ;;  %2195 = vmatprep.mubr.f32.mxu1 %v1528_v36  ;;  %v1588_v15 = vld [vmem:[#allocation6 + $0x568] sm:$0xff]  ;;  %v1590_v36 = vld [vmem:[#allocation6 + $0x578] sm:$0xff] }
 0x30f   :  { %2980 = vmatprep.mubr.f32.mxu0 %v1530_v44  ;;  %v1587_v44 = vld [vmem:[#allocation6 + $0x560] sm:$0xff] }
 0x311   :  { %2196 = vmatmul.mubr.f32.gmra.mxu1 %v1527_v20  ;;  %v1589_v20 = vld [vmem:[#allocation6 + $0x570] sm:$0xff] }
 0x312   :  { %2981 = vmatmul.mubr.f32.gmra.mxu0 %v1529_v22  ;;  %2200 = vmatprep.mubr.f32.mxu1 %v1532_v58  ;;  %v1592_v22 = vld [vmem:[#allocation6 + $0x588] sm:$0xff]  ;;  %v1594_v58 = vld [vmem:[#allocation6 + $0x598] sm:$0xff] }
 0x313   :  { %2985 = vmatprep.mubr.f32.mxu0 %v1534_v38  ;;  %v1591_v38 = vld [vmem:[#allocation6 + $0x580] sm:$0xff] }
 0x315   :  { %2201 = vmatmul.mubr.f32.gmra.mxu1 %v1531_v10  ;;  %v1593_v10 = vld [vmem:[#allocation6 + $0x590] sm:$0xff] }
 0x316   :  { %2986 = vmatmul.mubr.f32.gmra.mxu0 %v1533_v0  ;;  %2205 = vmatprep.mubr.f32.mxu1 %v1536_v59  ;;  %v1596_v0 = vld [vmem:[#allocation6 + $0x5a8] sm:$0xff]  ;;  %v1598_v59 = vld [vmem:[#allocation6 + $0x5b8] sm:$0xff] }
 0x317   :  { %2990 = vmatprep.mubr.f32.mxu0 %v1538_v40  ;;  %v1595_v40 = vld [vmem:[#allocation6 + $0x5a0] sm:$0xff] }
 0x319   :  { %2206 = vmatmul.mubr.f32.gmra.mxu1 %v1535_v37  ;;  %v1597_v37 = vld [vmem:[#allocation6 + $0x5b0] sm:$0xff] }
 0x31a   :  { %2991 = vmatmul.mubr.f32.gmra.mxu0 %v1537_v30  ;;  %2210 = vmatprep.mubr.f32.mxu1 %v1540_v54  ;;  %v1600_v30 = vld [vmem:[#allocation6 + $0x5c8] sm:$0xff]  ;;  %v1602_v54 = vld [vmem:[#allocation6 + $0x5d8] sm:$0xff] }
 0x31b   :  { %2995 = vmatprep.mubr.f32.mxu0 %v1542_v46  ;;  %v1599_v46 = vld [vmem:[#allocation6 + $0x5c0] sm:$0xff] }
 0x31d   :  { %2211 = vmatmul.mubr.f32.gmra.mxu1 %v1539_v12  ;;  %v1601_v12 = vld [vmem:[#allocation6 + $0x5d0] sm:$0xff] }
 0x31e   :  { %2996 = vmatmul.mubr.f32.gmra.mxu0 %v1541_v21  ;;  %2215 = vmatprep.mubr.f32.mxu1 %v1544_v35  ;;  %v1604_v21 = vld [vmem:[#allocation6 + $0x5e8] sm:$0xff]  ;;  %v1606_v35 = vld [vmem:[#allocation6 + $0x5f8] sm:$0xff] }
 0x31f   :  { %3000 = vmatprep.mubr.f32.mxu0 %v1546_v16  ;;  %v1603_v16 = vld [vmem:[#allocation6 + $0x5e0] sm:$0xff] }
 0x321   :  { %2216 = vmatmul.mubr.f32.gmra.mxu1 %v1543_v47  ;;  %v1605_v47 = vld [vmem:[#allocation6 + $0x5f0] sm:$0xff] }
 0x322   :  { %3001 = vmatmul.mubr.f32.gmra.mxu0 %v1545_v9  ;;  %2220 = vmatprep.mubr.f32.mxu1 %v1548_v52  ;;  %v1608_v9 = vld [vmem:[#allocation6 + $0x608] sm:$0xff]  ;;  %v1610_v52 = vld [vmem:[#allocation6 + $0x618] sm:$0xff] }
 0x323   :  { %3005 = vmatprep.mubr.f32.mxu0 %v1550_v48  ;;  %v1607_v48 = vld [vmem:[#allocation6 + $0x600] sm:$0xff] }
 0x325   :  { %2221 = vmatmul.mubr.f32.gmra.mxu1 %v1547_v8  ;;  %v1609_v8 = vld [vmem:[#allocation6 + $0x610] sm:$0xff] }
 0x326   :  { %3006 = vmatmul.mubr.f32.gmra.mxu0 %v1549_v60  ;;  %2225 = vmatprep.mubr.f32.mxu1 %v1552_v33  ;;  %v1612_v60 = vld [vmem:[#allocation6 + $0x628] sm:$0xff]  ;;  %v1614_v33 = vld [vmem:[#allocation6 + $0x638] sm:$0xff] }
 0x327   :  { %3010 = vmatprep.mubr.f32.mxu0 %v1554_v23 }
 0x329   :  { %2226 = vmatmul.mubr.f32.gmra.mxu1 %v1551_v42 }
 0x32a   :  { %3011 = vmatmul.mubr.f32.gmra.mxu0 %v1553_v5  ;;  %2230 = vmatprep.mubr.f32.mxu1 %v1556_v19  ;;  %v1611_v5 = vld [vmem:[#allocation6 + $0x620] sm:$0xff] }
 0x32b   :  { %3015 = vmatprep.mubr.f32.mxu0 %v1558_v61 }
 0x32d   :  { %2231 = vmatmul.mubr.f32.gmra.mxu1 %v1555_v27  ;;  %v1613_v27 = vld [vmem:[#allocation6 + $0x630] sm:$0xff] }
 0x32e   :  { %3016 = vmatmul.mubr.f32.gmra.mxu0 %v1557_v32  ;;  %2235 = vmatprep.mubr.f32.mxu1 %v1560_v56  ;;  %v1616_v32 = vld [vmem:[#allocation6 + $0x648] sm:$0xff] }
 0x32f   :  { %3020 = vmatprep.mubr.f32.mxu0 %v1562_v53  ;;  %v1618_v53 = vld [vmem:[#allocation6 + $0x658] sm:$0xff] }
 0x331   :  { %2236 = vmatmul.mubr.f32.gmra.mxu1 %v1559_v14 }
 0x332   :  { %3021 = vmatmul.mubr.f32.gmra.mxu0 %v1561_v28  ;;  %2240 = vmatprep.mubr.f32.mxu1 %v1564_v18  ;;  %v1615_v18 = vld [vmem:[#allocation6 + $0x640] sm:$0xff] }
 0x333   :  { %3025 = vmatprep.mubr.f32.mxu0 %v1566_v4 }
 0x335   :  { %2241 = vmatmul.mubr.f32.gmra.mxu1 %v1563_v34 }
 0x336   :  { %3026 = vmatmul.mubr.f32.gmra.mxu0 %v1565_v29  ;;  %2245 = vmatprep.mubr.f32.mxu1 %v1568_v55  ;;  %v1617_v29 = vld [vmem:[#allocation6 + $0x650] sm:$0xff]  ;;  %v1620_v55 = vld [vmem:[#allocation6 + $0x668] sm:$0xff] }
 0x337   :  { %3030 = vmatprep.mubr.f32.mxu0 %v1570_v13 }
 0x339   :  { %2246 = vmatmul.mubr.f32.gmra.mxu1 %v1567_v31  ;;  %v1622_v31 = vld [vmem:[#allocation6 + $0x678] sm:$0xff] }
 0x33a   :  { %3031 = vmatmul.mubr.f32.gmra.mxu0 %v1569_v49  ;;  %2250 = vmatprep.mubr.f32.mxu1 %v1572_v24 }
 0x33b   :  { %3035 = vmatprep.mubr.f32.mxu0 %v1574_v26  ;;  %v1619_v26 = vld [vmem:[#allocation6 + $0x660] sm:$0xff] }
 0x33d   :  { %2251 = vmatmul.mubr.f32.gmra.mxu1 %v1571_v3 }
 0x33e   :  { %3036 = vmatmul.mubr.f32.gmra.mxu0 %v1573_v51  ;;  %2255 = vmatprep.mubr.f32.mxu1 %v1576_v11  ;;  %v1621_v11 = vld [vmem:[#allocation6 + $0x670] sm:$0xff] }
 0x33f   :  { %3040 = vmatprep.mubr.f32.mxu0 %v1578_v62  ;;  %v1624_v62 = vld [vmem:[#allocation6 + $0x688] sm:$0xff] }
 0x341   :  { %2256 = vmatmul.mubr.f32.gmra.mxu1 %v1575_v50 }
 0x342   :  { %3041 = vmatmul.mubr.f32.gmra.mxu0 %v1577_v41  ;;  %2260 = vmatprep.mubr.f32.mxu1 %v1580_v43  ;;  %v1626_v41 = vld [vmem:[#allocation6 + $0x698] sm:$0xff] }
 0x343   :  { %3045 = vmatprep.mubr.f32.mxu0 %v1582_v45 }
 0x345   :  { %2261 = vmatmul.mubr.f32.gmra.mxu1 %v1579_v2  ;;  %v1623_v2 = vld [vmem:[#allocation6 + $0x680] sm:$0xff] }
 0x346   :  { %3046 = vmatmul.mubr.f32.gmra.mxu0 %v1581_v7  ;;  %2265 = vmatprep.mubr.f32.mxu1 %v1584_v63 }
 0x347   :  { %3050 = vmatprep.mubr.f32.mxu0 %v1586_v39  ;;  %v1625_v39 = vld [vmem:[#allocation6 + $0x690] sm:$0xff] }
 0x349   :  { %2266 = vmatmul.mubr.f32.gmra.mxu1 %v1583_v17  ;;  %v1628_v17 = vld [vmem:[#allocation6 + $0x6a8] sm:$0xff] }
 0x34a   :  { %3051 = vmatmul.mubr.f32.gmra.mxu0 %v1585_v57  ;;  %2270 = vmatprep.mubr.f32.mxu1 %v1588_v15  ;;  %v1630_v15 = vld [vmem:[#allocation6 + $0x6b8] sm:$0xff] }
 0x34b   :  { %3055 = vmatprep.mubr.f32.mxu0 %v1590_v36 }
 0x34d   :  { %2271 = vmatmul.mubr.f32.gmra.mxu1 %v1587_v44 }
 0x34e   :  { %3056 = vmatmul.mubr.f32.gmra.mxu0 %v1589_v20  ;;  %2275 = vmatprep.mubr.f32.mxu1 %v1592_v22  ;;  %v1627_v20 = vld [vmem:[#allocation6 + $0x6a0] sm:$0xff] }
 0x34f   :  { %3060 = vmatprep.mubr.f32.mxu0 %v1594_v58 }
 0x351   :  { %2276 = vmatmul.mubr.f32.gmra.mxu1 %v1591_v38  ;;  %v1629_v38 = vld [vmem:[#allocation6 + $0x6b0] sm:$0xff] }
 0x352   :  { %3061 = vmatmul.mubr.f32.gmra.mxu0 %v1593_v10  ;;  %2280 = vmatprep.mubr.f32.mxu1 %v1596_v0  ;;  %v1632_v10 = vld [vmem:[#allocation6 + $0x6c8] sm:$0xff] }
 0x353   :  { %3065 = vmatprep.mubr.f32.mxu0 %v1598_v59  ;;  %v1634_v59 = vld [vmem:[#allocation6 + $0x6d8] sm:$0xff] }
 0x355   :  { %2281 = vmatmul.mubr.f32.gmra.mxu1 %v1595_v40 }
 0x356   :  { %3066 = vmatmul.mubr.f32.gmra.mxu0 %v1597_v37  ;;  %2285 = vmatprep.mubr.f32.mxu1 %v1600_v30  ;;  %v1631_v30 = vld [vmem:[#allocation6 + $0x6c0] sm:$0xff] }
 0x357   :  { %3070 = vmatprep.mubr.f32.mxu0 %v1602_v54 }
 0x359   :  { %2286 = vmatmul.mubr.f32.gmra.mxu1 %v1599_v46 }
 0x35a   :  { %3071 = vmatmul.mubr.f32.gmra.mxu0 %v1601_v12  ;;  %2290 = vmatprep.mubr.f32.mxu1 %v1604_v21  ;;  %v1633_v12 = vld [vmem:[#allocation6 + $0x6d0] sm:$0xff]  ;;  %v1636_v21 = vld [vmem:[#allocation6 + $0x6e8] sm:$0xff] }
 0x35b   :  { %3075 = vmatprep.mubr.f32.mxu0 %v1606_v35 }
 0x35d   :  { %2291 = vmatmul.mubr.f32.gmra.mxu1 %v1603_v16  ;;  %v1638_v16 = vld [vmem:[#allocation6 + $0x6f8] sm:$0xff] }
 0x35e   :  { %3076 = vmatmul.mubr.f32.gmra.mxu0 %v1605_v47  ;;  %2295 = vmatprep.mubr.f32.mxu1 %v1608_v9 }
 0x35f   :  { %3080 = vmatprep.mubr.f32.mxu0 %v1610_v52  ;;  %v1635_v52 = vld [vmem:[#allocation6 + $0x6e0] sm:$0xff] }
 0x361   :  { %v2057_v23 = vpop.f32.mrf.mxu1  ;;  %2296 = vmatmul.mubr.f32.gmra.mxu1 %v1607_v48 }
 0x362   :  { %v2842_v42 = vpop.f32.mrf.mxu0  ;;  %3081 = vmatmul.mubr.f32.gmra.mxu0 %v1609_v8  ;;  %2300 = vmatprep.mubr.f32.mxu1 %v1612_v60  ;;  %v1637_v60 = vld [vmem:[#allocation6 + $0x6f0] sm:$0xff] }
 0x363   :  { %v15005_v19 = vadd.f32 %v2842_v42, %v2057_v23  ;;  %v2059_v61 = vpop.f32.mrf.mxu1  ;;  %3085 = vmatprep.mubr.f32.mxu0 %v1614_v33  ;;  %v1640_v33 = vld [vmem:[#allocation6 + $0x708] sm:$0xff]  ;;  %v1642_v42 = vld [vmem:[#allocation6 + $0x718] sm:$0xff] }
 0x364   :  { %v2844_v56 = vpop.f32.mrf.mxu0 }
 0x365   :  { %v2062_v14 = vpop.f32.mrf.mxu1  ;;  %2301 = vmatmul.mubr.f32.gmra.mxu1 %v1611_v5 }
 0x366   :  { %v2847_v28 = vpop.f32.mrf.mxu0  ;;  %3086 = vmatmul.mubr.f32.gmra.mxu0 %v1613_v27  ;;  %2305 = vmatprep.mubr.f32.mxu1 %v1616_v32  ;;  %v1639_v27 = vld [vmem:[#allocation6 + $0x700] sm:$0xff] }
 0x367   :  { %v15007_v4 = vadd.f32 %v2847_v28, %v2062_v14  ;;  %v2064_v34 = vpop.f32.mrf.mxu1  ;;  %3090 = vmatprep.mubr.f32.mxu0 %v1618_v53  ;;  %v1641_v53 = vld [vmem:[#allocation6 + $0x710] sm:$0xff]  ;;  %v1644_v14 = vld [vmem:[#allocation6 + $0x728] sm:$0xff] }
 0x368   :  { %v2849_v13 = vpop.f32.mrf.mxu0 }
 0x369   :  { %18162 = vst [vmem:[#allocation35_spill] sm:$0xff] %v15007_v4  ;;  %v2067_v49 = vpop.f32.mrf.mxu1  ;;  %2306 = vmatmul.mubr.f32.gmra.mxu1 %v1615_v18  ;;  %v1646_v18 = vld [vmem:[#allocation6 + $0x738] sm:$0xff] }
 0x36a   :  { %v2852_v24 = vpop.f32.mrf.mxu0  ;;  %3091 = vmatmul.mubr.f32.gmra.mxu0 %v1617_v29  ;;  %2310 = vmatprep.mubr.f32.mxu1 %v1620_v55  ;;  %v1643_v55 = vld [vmem:[#allocation6 + $0x720] sm:$0xff] }
 0x36b   :  { %v15009_v3 = vadd.f32 %v2852_v24, %v2067_v49  ;;  %v2069_v51 = vpop.f32.mrf.mxu1  ;;  %3095 = vmatprep.mubr.f32.mxu0 %v1622_v31  ;;  %v1645_v49 = vld [vmem:[#allocation6 + $0x730] sm:$0xff]  ;;  %v1648_v24 = vld [vmem:[#allocation6 + $0x748] sm:$0xff] }
 0x36c   :  { %v2854_v50 = vpop.f32.mrf.mxu0  ;;  %v1650_v51 = vld [vmem:[#allocation6 + $0x758] sm:$0xff] }
 0x36d   :  { %18163 = vst [vmem:[#allocation36_spill] sm:$0xff] %v15009_v3  ;;  %v2072_v43 = vpop.f32.mrf.mxu1  ;;  %2311 = vmatmul.mubr.f32.gmra.mxu1 %v1619_v26  ;;  %v1647_v50 = vld [vmem:[#allocation6 + $0x740] sm:$0xff]  ;;  %v1973_v3 = vld [vmem:[#allocation6 + $0x1170] sm:$0xff] }
 0x36e   :  { %v2857_v45 = vpop.f32.mrf.mxu0  ;;  %3096 = vmatmul.mubr.f32.gmra.mxu0 %v1621_v11  ;;  %2315 = vmatprep.mubr.f32.mxu1 %v1624_v62 }
 0x36f   :  { %v15011_v7 = vadd.f32 %v2857_v45, %v2072_v43  ;;  %v2074_v63 = vpop.f32.mrf.mxu1  ;;  %3100 = vmatprep.mubr.f32.mxu0 %v1626_v41  ;;  %v1649_v45 = vld [vmem:[#allocation6 + $0x750] sm:$0xff] }
 0x370   :  { %v2859_v57 = vpop.f32.mrf.mxu0 }
 0x371   :  { %18164 = vst [vmem:[#allocation37_spill] sm:$0xff] %v15011_v7  ;;  %v2077_v36 = vpop.f32.mrf.mxu1  ;;  %2316 = vmatmul.mubr.f32.gmra.mxu1 %v1623_v2  ;;  %v1652_v2 = vld [vmem:[#allocation6 + $0x768] sm:$0xff]  ;;  %v1974_v7 = vld [vmem:[#allocation6 + $0x1178] sm:$0xff] }
 0x372   :  { %v2862_v44 = vpop.f32.mrf.mxu0  ;;  %3101 = vmatmul.mubr.f32.gmra.mxu0 %v1625_v39  ;;  %2320 = vmatprep.mubr.f32.mxu1 %v1628_v17  ;;  %v1654_v39 = vld [vmem:[#allocation6 + $0x778] sm:$0xff] }
 0x373   :  { %v15013_v22 = vadd.f32 %v2862_v44, %v2077_v36  ;;  %v2079_v58 = vpop.f32.mrf.mxu1  ;;  %3105 = vmatprep.mubr.f32.mxu0 %v1630_v15  ;;  %v1651_v15 = vld [vmem:[#allocation6 + $0x760] sm:$0xff] }
 0x374   :  { %v2864_v0 = vpop.f32.mrf.mxu0  ;;  %v1656_v58 = vld [vmem:[#allocation6 + $0x788] sm:$0xff] }
 0x375   :  { %18165 = vst [vmem:[#allocation20_spill] sm:$0xff] %v15013_v22  ;;  %v2082_v40 = vpop.f32.mrf.mxu1  ;;  %2321 = vmatmul.mubr.f32.gmra.mxu1 %v1627_v20  ;;  %v1653_v20 = vld [vmem:[#allocation6 + $0x770] sm:$0xff] }
 0x376   :  { %v2867_v37 = vpop.f32.mrf.mxu0  ;;  %3106 = vmatmul.mubr.f32.gmra.mxu0 %v1629_v38  ;;  %2325 = vmatprep.mubr.f32.mxu1 %v1632_v10  ;;  %v1658_v10 = vld [vmem:[#allocation6 + $0x798] sm:$0xff]  ;;  %v1969_v22 = vld [vmem:[#allocation6 + $0x1150] sm:$0xff] }
 0x377   :  { %v15015_v54 = vadd.f32 %v2867_v37, %v2082_v40  ;;  %v2084_v46 = vpop.f32.mrf.mxu1  ;;  %3110 = vmatprep.mubr.f32.mxu0 %v1634_v59  ;;  %v1655_v40 = vld [vmem:[#allocation6 + $0x780] sm:$0xff] }
 0x378   :  { %v2869_v35 = vpop.f32.mrf.mxu0  ;;  %v1657_v46 = vld [vmem:[#allocation6 + $0x790] sm:$0xff] }
 0x379   :  { %18166 = vst [vmem:[#allocation32_spill] sm:$0xff] %v15015_v54  ;;  %v2087_v47 = vpop.f32.mrf.mxu1  ;;  %2326 = vmatmul.mubr.f32.gmra.mxu1 %v1631_v30  ;;  %v1662_v35 = vld [vmem:[#allocation6 + $0x7b8] sm:$0xff] }
 0x37a   :  { %v2872_v9 = vpop.f32.mrf.mxu0  ;;  %3111 = vmatmul.mubr.f32.gmra.mxu0 %v1633_v12  ;;  %2330 = vmatprep.mubr.f32.mxu1 %v1636_v21  ;;  %v1660_v12 = vld [vmem:[#allocation6 + $0x7a8] sm:$0xff]  ;;  %v1970_v54 = vld [vmem:[#allocation6 + $0x1158] sm:$0xff] }
 0x37b   :  { %v15017_v48 = vadd.f32 %v2872_v9, %v2087_v47  ;;  %v2089_v8 = vpop.f32.mrf.mxu1  ;;  %3115 = vmatprep.mubr.f32.mxu0 %v1638_v16  ;;  %v1659_v9 = vld [vmem:[#allocation6 + $0x7a0] sm:$0xff] }
 0x37c   :  { %v2874_v23 = vpop.f32.mrf.mxu0 }
 0x37d   :  { %18167 = vst [vmem:[#allocation47_spill] sm:$0xff] %v15017_v48  ;;  %v2092_v5 = vpop.f32.mrf.mxu1  ;;  %2331 = vmatmul.mubr.f32.gmra.mxu1 %v1635_v52  ;;  %v1965_v48 = vld [vmem:[#allocation6 + $0x1130] sm:$0xff] }
 0x37e   :  { %v2877_v61 = vpop.f32.mrf.mxu0  ;;  %3116 = vmatmul.mubr.f32.gmra.mxu0 %v1637_v60  ;;  %2335 = vmatprep.mubr.f32.mxu1 %v1640_v33  ;;  %v1661_v60 = vld [vmem:[#allocation6 + $0x7b0] sm:$0xff]  ;;  %v1664_v33 = vld [vmem:[#allocation6 + $0x7c8] sm:$0xff] }
 0x37f   :  { %v15019_v32 = vadd.f32 %v2877_v61, %v2092_v5  ;;  %v2094_v56 = vpop.f32.mrf.mxu1  ;;  %3120 = vmatprep.mubr.f32.mxu0 %v1642_v42  ;;  %v1666_v42 = vld [vmem:[#allocation6 + $0x7d8] sm:$0xff] }
 0x380   :  { %v2879_v28 = vpop.f32.mrf.mxu0 }
 0x381   :  { %18168 = vst [vmem:[#allocation31_spill] sm:$0xff] %v15019_v32  ;;  %v2097_v34 = vpop.f32.mrf.mxu1  ;;  %2336 = vmatmul.mubr.f32.gmra.mxu1 %v1639_v27  ;;  %v1663_v27 = vld [vmem:[#allocation6 + $0x7c0] sm:$0xff]  ;;  %v1668_v28 = vld [vmem:[#allocation6 + $0x7e8] sm:$0xff]  ;;  %v1966_v32 = vld [vmem:[#allocation6 + $0x1138] sm:$0xff] }
 0x382   :  { %v2882_v29 = vpop.f32.mrf.mxu0  ;;  %3121 = vmatmul.mubr.f32.gmra.mxu0 %v1641_v53  ;;  %2340 = vmatprep.mubr.f32.mxu1 %v1644_v14  ;;  %v1665_v14 = vld [vmem:[#allocation6 + $0x7d0] sm:$0xff] }
 0x383   :  { %v15021_v13 = vadd.f32 %v2882_v29, %v2097_v34  ;;  %v2099_v31 = vpop.f32.mrf.mxu1  ;;  %3125 = vmatprep.mubr.f32.mxu0 %v1646_v18  ;;  %v1670_v34 = vld [vmem:[#allocation6 + $0x7f8] sm:$0xff] }
 0x384   :  { %v2884_v26 = vpop.f32.mrf.mxu0  ;;  %v1667_v31 = vld [vmem:[#allocation6 + $0x7e0] sm:$0xff] }
 0x385   :  { %18169 = vst [vmem:[#allocation46_spill] sm:$0xff] %v15021_v13  ;;  %v2102_v11 = vpop.f32.mrf.mxu1  ;;  %2341 = vmatmul.mubr.f32.gmra.mxu1 %v1643_v55  ;;  %v1669_v26 = vld [vmem:[#allocation6 + $0x7f0] sm:$0xff] }
 0x386   :  { %v2887_v62 = vpop.f32.mrf.mxu0  ;;  %3126 = vmatmul.mubr.f32.gmra.mxu0 %v1645_v49  ;;  %2345 = vmatprep.mubr.f32.mxu1 %v1648_v24  ;;  %v1961_v13 = vld [vmem:[#allocation6 + $0x1110] sm:$0xff] }
 0x387   :  { %v15023_v41 = vadd.f32 %v2887_v62, %v2102_v11  ;;  %v2104_v43 = vpop.f32.mrf.mxu1  ;;  %3130 = vmatprep.mubr.f32.mxu0 %v1650_v51  ;;  %v1672_v51 = vld [vmem:[#allocation6 + $0x808] sm:$0xff]  ;;  %v1674_v62 = vld [vmem:[#allocation6 + $0x818] sm:$0xff] }
 0x388   :  { %v2889_v63 = vpop.f32.mrf.mxu0 }
 0x389   :  { %18170 = vst [vmem:[#allocation30_spill] sm:$0xff] %v15023_v41  ;;  %v2107_v17 = vpop.f32.mrf.mxu1  ;;  %2346 = vmatmul.mubr.f32.gmra.mxu1 %v1647_v50 }
 0x38a   :  { %v2892_v57 = vpop.f32.mrf.mxu0  ;;  %3131 = vmatmul.mubr.f32.gmra.mxu0 %v1649_v45  ;;  %2350 = vmatprep.mubr.f32.mxu1 %v1652_v2  ;;  %v1671_v45 = vld [vmem:[#allocation6 + $0x800] sm:$0xff] }
 0x38b   :  { %v15025_v36 = vadd.f32 %v2892_v57, %v2107_v17  ;;  %v2109_v44 = vpop.f32.mrf.mxu1  ;;  %3135 = vmatprep.mubr.f32.mxu0 %v1654_v39  ;;  %v1673_v39 = vld [vmem:[#allocation6 + $0x810] sm:$0xff]  ;;  %v1676_v17 = vld [vmem:[#allocation6 + $0x828] sm:$0xff] }
 0x38c   :  { %v2894_v38 = vpop.f32.mrf.mxu0 }
 0x38d   :  { %18171 = vst [vmem:[#allocation45_spill] sm:$0xff] %v15025_v36  ;;  %v2112_v0 = vpop.f32.mrf.mxu1  ;;  %2351 = vmatmul.mubr.f32.gmra.mxu1 %v1651_v15  ;;  %v1678_v15 = vld [vmem:[#allocation6 + $0x838] sm:$0xff] }
 0x38e   :  { %v2897_v59 = vpop.f32.mrf.mxu0  ;;  %3136 = vmatmul.mubr.f32.gmra.mxu0 %v1653_v20  ;;  %2355 = vmatprep.mubr.f32.mxu1 %v1656_v58  ;;  %v1675_v58 = vld [vmem:[#allocation6 + $0x820] sm:$0xff] }
 0x38f   :  { %v15027_v37 = vadd.f32 %v2897_v59, %v2112_v0  ;;  %v2114_v30 = vpop.f32.mrf.mxu1  ;;  %3140 = vmatprep.mubr.f32.mxu0 %v1658_v10  ;;  %v1677_v0 = vld [vmem:[#allocation6 + $0x830] sm:$0xff]  ;;  %v1680_v59 = vld [vmem:[#allocation6 + $0x848] sm:$0xff] }
 0x390   :  { %v2899_v21 = vpop.f32.mrf.mxu0  ;;  %v1682_v30 = vld [vmem:[#allocation6 + $0x858] sm:$0xff] }
 0x391   :  { %18172 = vst [vmem:[#allocation29_spill] sm:$0xff] %v15027_v37  ;;  %v2117_v16 = vpop.f32.mrf.mxu1  ;;  %2356 = vmatmul.mubr.f32.gmra.mxu1 %v1655_v40  ;;  %v1679_v21 = vld [vmem:[#allocation6 + $0x840] sm:$0xff] }
 0x392   :  { %v2902_v47 = vpop.f32.mrf.mxu0  ;;  %3141 = vmatmul.mubr.f32.gmra.mxu0 %v1657_v46  ;;  %2360 = vmatprep.mubr.f32.mxu1 %v1660_v12 }
 0x393   :  { %v15029_v52 = vadd.f32 %v2902_v47, %v2117_v16  ;;  %v2119_v8 = vpop.f32.mrf.mxu1  ;;  %3145 = vmatprep.mubr.f32.mxu0 %v1662_v35  ;;  %v1681_v47 = vld [vmem:[#allocation6 + $0x850] sm:$0xff] }
 0x394   :  { %v2904_v23 = vpop.f32.mrf.mxu0 }
 0x395   :  { %18173 = vst [vmem:[#allocation44_spill] sm:$0xff] %v15029_v52  ;;  %v2122_v5 = vpop.f32.mrf.mxu1  ;;  %2361 = vmatmul.mubr.f32.gmra.mxu1 %v1659_v9  ;;  %v1684_v9 = vld [vmem:[#allocation6 + $0x868] sm:$0xff] }
 0x396   :  { %v2907_v61 = vpop.f32.mrf.mxu0  ;;  %3146 = vmatmul.mubr.f32.gmra.mxu0 %v1661_v60  ;;  %2365 = vmatprep.mubr.f32.mxu1 %v1664_v33  ;;  %v1686_v60 = vld [vmem:[#allocation6 + $0x878] sm:$0xff] }
 0x397   :  { %v15031_v56 = vadd.f32 %v2907_v61, %v2122_v5  ;;  %v2124_v53 = vpop.f32.mrf.mxu1  ;;  %3150 = vmatprep.mubr.f32.mxu0 %v1666_v42  ;;  %v1683_v42 = vld [vmem:[#allocation6 + $0x860] sm:$0xff] }
 0x398   :  { %v2909_v18 = vpop.f32.mrf.mxu0  ;;  %v1688_v53 = vld [vmem:[#allocation6 + $0x888] sm:$0xff] }
 0x399   :  { %18174 = vst [vmem:[#allocation28_spill] sm:$0xff] %v15031_v56  ;;  %v2127_v29 = vpop.f32.mrf.mxu1  ;;  %2366 = vmatmul.mubr.f32.gmra.mxu1 %v1663_v27  ;;  %v1685_v27 = vld [vmem:[#allocation6 + $0x870] sm:$0xff] }
 0x39a   :  { %v2912_v55 = vpop.f32.mrf.mxu0  ;;  %3151 = vmatmul.mubr.f32.gmra.mxu0 %v1665_v14  ;;  %2370 = vmatprep.mubr.f32.mxu1 %v1668_v28  ;;  %v1690_v28 = vld [vmem:[#allocation6 + $0x898] sm:$0xff] }
 0x39b   :  { %v15033_v49 = vadd.f32 %v2912_v55, %v2127_v29  ;;  %v2129_v24 = vpop.f32.mrf.mxu1  ;;  %3155 = vmatprep.mubr.f32.mxu0 %v1670_v34  ;;  %v1687_v29 = vld [vmem:[#allocation6 + $0x880] sm:$0xff] }
 0x39c   :  { %v2914_v11 = vpop.f32.mrf.mxu0  ;;  %v1689_v24 = vld [vmem:[#allocation6 + $0x890] sm:$0xff] }
 0x39d   :  { %18175 = vst [vmem:[#allocation43_spill] sm:$0xff] %v15033_v49  ;;  %v2132_v50 = vpop.f32.mrf.mxu1  ;;  %2371 = vmatmul.mubr.f32.gmra.mxu1 %v1667_v31  ;;  %v1694_v11 = vld [vmem:[#allocation6 + $0x8b8] sm:$0xff] }
 0x39e   :  { %v2917_v43 = vpop.f32.mrf.mxu0  ;;  %3156 = vmatmul.mubr.f32.gmra.mxu0 %v1669_v26  ;;  %2375 = vmatprep.mubr.f32.mxu1 %v1672_v51  ;;  %v1692_v26 = vld [vmem:[#allocation6 + $0x8a8] sm:$0xff] }
 0x39f   :  { %v15035_v2 = vadd.f32 %v2917_v43, %v2132_v50  ;;  %v2134_v63 = vpop.f32.mrf.mxu1  ;;  %3160 = vmatprep.mubr.f32.mxu0 %v1674_v62  ;;  %v1691_v43 = vld [vmem:[#allocation6 + $0x8a0] sm:$0xff] }
 0x3a0   :  { %v2919_v57 = vpop.f32.mrf.mxu0 }
 0x3a1   :  { %18176 = vst [vmem:[#allocation27_spill] sm:$0xff] %v15035_v2  ;;  %v2137_v44 = vpop.f32.mrf.mxu1  ;;  %2376 = vmatmul.mubr.f32.gmra.mxu1 %v1671_v45 }
 0x3a2   :  { %v2922_v20 = vpop.f32.mrf.mxu0  ;;  %3161 = vmatmul.mubr.f32.gmra.mxu0 %v1673_v39  ;;  %2380 = vmatprep.mubr.f32.mxu1 %v1676_v17  ;;  %v1693_v39 = vld [vmem:[#allocation6 + $0x8b0] sm:$0xff]  ;;  %v1696_v17 = vld [vmem:[#allocation6 + $0x8c8] sm:$0xff] }
 0x3a3   :  { %v15037_v38 = vadd.f32 %v2922_v20, %v2137_v44  ;;  %v2139_v10 = vpop.f32.mrf.mxu1  ;;  %3165 = vmatprep.mubr.f32.mxu0 %v1678_v15  ;;  %v1698_v15 = vld [vmem:[#allocation6 + $0x8d8] sm:$0xff] }
 0x3a4   :  { %v2924_v40 = vpop.f32.mrf.mxu0 }
 0x3a5   :  { %v2142_v46 = vpop.f32.mrf.mxu1  ;;  %2381 = vmatmul.mubr.f32.gmra.mxu1 %v1675_v58  ;;  %v1695_v58 = vld [vmem:[#allocation6 + $0x8c0] sm:$0xff]  ;;  %v1700_v40 = vld [vmem:[#allocation6 + $0x8e8] sm:$0xff] }
 0x3a6   :  { %v2927_v12 = vpop.f32.mrf.mxu0  ;;  %3166 = vmatmul.mubr.f32.gmra.mxu0 %v1677_v0  ;;  %2385 = vmatprep.mubr.f32.mxu1 %v1680_v59  ;;  %v1697_v59 = vld [vmem:[#allocation6 + $0x8d0] sm:$0xff] }
 0x3a7   :  { %v15039_v35 = vadd.f32 %v2927_v12, %v2142_v46  ;;  %v2144_v16 = vpop.f32.mrf.mxu1  ;;  %3170 = vmatprep.mubr.f32.mxu0 %v1682_v30  ;;  %v1702_v46 = vld [vmem:[#allocation6 + $0x8f8] sm:$0xff] }
 0x3a8   :  { %v2929_v8 = vpop.f32.mrf.mxu0  ;;  %v1699_v16 = vld [vmem:[#allocation6 + $0x8e0] sm:$0xff] }
 0x3a9   :  { %v2147_v33 = vpop.f32.mrf.mxu1  ;;  %2386 = vmatmul.mubr.f32.gmra.mxu1 %v1679_v21  ;;  %v1701_v8 = vld [vmem:[#allocation6 + $0x8f0] sm:$0xff] }
 0x3aa   :  { %v2932_v23 = vpop.f32.mrf.mxu0  ;;  %3171 = vmatmul.mubr.f32.gmra.mxu0 %v1681_v47  ;;  %2390 = vmatprep.mubr.f32.mxu1 %v1684_v9 }
 0x3ab   :  { %v15041_v5 = vadd.f32 %v2932_v23, %v2147_v33  ;;  %v2149_v61 = vpop.f32.mrf.mxu1  ;;  %3175 = vmatprep.mubr.f32.mxu0 %v1686_v60  ;;  %v1704_v60 = vld [vmem:[#allocation6 + $0x908] sm:$0xff]  ;;  %v1706_v23 = vld [vmem:[#allocation6 + $0x918] sm:$0xff] }
 0x3ac   :  { %v2934_v14 = vpop.f32.mrf.mxu0 }
 0x3ad   :  { %v2152_v18 = vpop.f32.mrf.mxu1  ;;  %2391 = vmatmul.mubr.f32.gmra.mxu1 %v1683_v42 }
 0x3ae   :  { %v2937_v34 = vpop.f32.mrf.mxu0  ;;  %3176 = vmatmul.mubr.f32.gmra.mxu0 %v1685_v27  ;;  %2395 = vmatprep.mubr.f32.mxu1 %v1688_v53  ;;  %v1703_v27 = vld [vmem:[#allocation6 + $0x900] sm:$0xff] }
 0x3af   :  { %v15043_v55 = vadd.f32 %v2937_v34, %v2152_v18  ;;  %v2154_v31 = vpop.f32.mrf.mxu1  ;;  %3180 = vmatprep.mubr.f32.mxu0 %v1690_v28  ;;  %v1705_v28 = vld [vmem:[#allocation6 + $0x910] sm:$0xff]  ;;  %v1708_v18 = vld [vmem:[#allocation6 + $0x928] sm:$0xff] }
 0x3b0   :  { %v2939_v51 = vpop.f32.mrf.mxu0 }
 0x3b1   :  { %v2157_v62 = vpop.f32.mrf.mxu1  ;;  %2396 = vmatmul.mubr.f32.gmra.mxu1 %v1687_v29  ;;  %v1710_v29 = vld [vmem:[#allocation6 + $0x938] sm:$0xff] }
 0x3b2   :  { %v2942_v50 = vpop.f32.mrf.mxu0  ;;  %3181 = vmatmul.mubr.f32.gmra.mxu0 %v1689_v24  ;;  %2400 = vmatprep.mubr.f32.mxu1 %v1692_v26  ;;  %v1707_v26 = vld [vmem:[#allocation6 + $0x920] sm:$0xff] }
 0x3b3   :  { %v15045_v45 = vadd.f32 %v2942_v50, %v2157_v62  ;;  %v2159_v63 = vpop.f32.mrf.mxu1  ;;  %3185 = vmatprep.mubr.f32.mxu0 %v1694_v11  ;;  %v1709_v62 = vld [vmem:[#allocation6 + $0x930] sm:$0xff]  ;;  %v1712_v50 = vld [vmem:[#allocation6 + $0x948] sm:$0xff] }
 0x3b4   :  { %v2944_v57 = vpop.f32.mrf.mxu0  ;;  %v1714_v63 = vld [vmem:[#allocation6 + $0x958] sm:$0xff] }
 0x3b5   :  { %v2162_v44 = vpop.f32.mrf.mxu1  ;;  %2401 = vmatmul.mubr.f32.gmra.mxu1 %v1691_v43  ;;  %v1711_v57 = vld [vmem:[#allocation6 + $0x940] sm:$0xff] }
 0x3b6   :  { %v2947_v20 = vpop.f32.mrf.mxu0  ;;  %3186 = vmatmul.mubr.f32.gmra.mxu0 %v1693_v39  ;;  %2405 = vmatprep.mubr.f32.mxu1 %v1696_v17 }
 0x3b7   :  { %v15047_v10 = vadd.f32 %v2947_v20, %v2162_v44  ;;  %v2164_v0 = vpop.f32.mrf.mxu1  ;;  %3190 = vmatprep.mubr.f32.mxu0 %v1698_v15  ;;  %v1713_v20 = vld [vmem:[#allocation6 + $0x950] sm:$0xff] }
 0x3b8   :  { %v2949_v30 = vpop.f32.mrf.mxu0 }
 0x3b9   :  { %v2167_v12 = vpop.f32.mrf.mxu1  ;;  %2406 = vmatmul.mubr.f32.gmra.mxu1 %v1695_v58  ;;  %v1716_v58 = vld [vmem:[#allocation6 + $0x968] sm:$0xff] }
 0x3ba   :  { %v2952_v21 = vpop.f32.mrf.mxu0  ;;  %3191 = vmatmul.mubr.f32.gmra.mxu0 %v1697_v59  ;;  %2410 = vmatprep.mubr.f32.mxu1 %v1700_v40  ;;  %v1718_v59 = vld [vmem:[#allocation6 + $0x978] sm:$0xff] }
 0x3bb   :  { %v15049_v47 = vadd.f32 %v2952_v21, %v2167_v12  ;;  %v2169_v9 = vpop.f32.mrf.mxu1  ;;  %3195 = vmatprep.mubr.f32.mxu0 %v1702_v46  ;;  %v1715_v46 = vld [vmem:[#allocation6 + $0x960] sm:$0xff] }
 0x3bc   :  { %v2954_v33 = vpop.f32.mrf.mxu0  ;;  %v1720_v9 = vld [vmem:[#allocation6 + $0x988] sm:$0xff] }
 0x3bd   :  { %v2172_v42 = vpop.f32.mrf.mxu1  ;;  %2411 = vmatmul.mubr.f32.gmra.mxu1 %v1699_v16  ;;  %v1717_v16 = vld [vmem:[#allocation6 + $0x970] sm:$0xff] }
 0x3be   :  { %v2957_v61 = vpop.f32.mrf.mxu0  ;;  %3196 = vmatmul.mubr.f32.gmra.mxu0 %v1701_v8  ;;  %2415 = vmatprep.mubr.f32.mxu1 %v1704_v60  ;;  %v1722_v60 = vld [vmem:[#allocation6 + $0x998] sm:$0xff] }
 0x3bf   :  { %v15051_v53 = vadd.f32 %v2957_v61, %v2172_v42  ;;  %v2174_v14 = vpop.f32.mrf.mxu1  ;;  %3200 = vmatprep.mubr.f32.mxu0 %v1706_v23  ;;  %v1719_v42 = vld [vmem:[#allocation6 + $0x980] sm:$0xff] }
 0x3c0   :  { %v2959_v34 = vpop.f32.mrf.mxu0  ;;  %v1721_v14 = vld [vmem:[#allocation6 + $0x990] sm:$0xff] }
 0x3c1   :  { %v2177_v31 = vpop.f32.mrf.mxu1  ;;  %2416 = vmatmul.mubr.f32.gmra.mxu1 %v1703_v27  ;;  %v1726_v34 = vld [vmem:[#allocation6 + $0x9b8] sm:$0xff] }
 0x3c2   :  { %v2962_v24 = vpop.f32.mrf.mxu0  ;;  %3201 = vmatmul.mubr.f32.gmra.mxu0 %v1705_v28  ;;  %2420 = vmatprep.mubr.f32.mxu1 %v1708_v18  ;;  %v1724_v28 = vld [vmem:[#allocation6 + $0x9a8] sm:$0xff] }
 0x3c3   :  { %v15053_v51 = vadd.f32 %v2962_v24, %v2177_v31  ;;  %v2179_v11 = vpop.f32.mrf.mxu1  ;;  %3205 = vmatprep.mubr.f32.mxu0 %v1710_v29  ;;  %v1723_v24 = vld [vmem:[#allocation6 + $0x9a0] sm:$0xff] }
 0x3c4   :  { %v2964_v43 = vpop.f32.mrf.mxu0 }
 0x3c5   :  { %v2182_v39 = vpop.f32.mrf.mxu1  ;;  %2421 = vmatmul.mubr.f32.gmra.mxu1 %v1707_v26 }
 0x3c6   :  { %v2967_v17 = vpop.f32.mrf.mxu0  ;;  %3206 = vmatmul.mubr.f32.gmra.mxu0 %v1709_v62  ;;  %2425 = vmatprep.mubr.f32.mxu1 %v1712_v50  ;;  %v1725_v62 = vld [vmem:[#allocation6 + $0x9b0] sm:$0xff]  ;;  %v1728_v50 = vld [vmem:[#allocation6 + $0x9c8] sm:$0xff] }
 0x3c7   :  { %v15055_v15 = vadd.f32 %v2967_v17, %v2182_v39  ;;  %v2184_v44 = vpop.f32.mrf.mxu1  ;;  %3210 = vmatprep.mubr.f32.mxu0 %v1714_v63  ;;  %v1730_v63 = vld [vmem:[#allocation6 + $0x9d8] sm:$0xff] }
 0x3c8   :  { %v2969_v0 = vpop.f32.mrf.mxu0 }
 0x3c9   :  { %v2187_v40 = vpop.f32.mrf.mxu1  ;;  %2426 = vmatmul.mubr.f32.gmra.mxu1 %v1711_v57  ;;  %v1727_v57 = vld [vmem:[#allocation6 + $0x9c0] sm:$0xff]  ;;  %v1732_v0 = vld [vmem:[#allocation6 + $0x9e8] sm:$0xff] }
 0x3ca   :  { %v2972_v30 = vpop.f32.mrf.mxu0  ;;  %3211 = vmatmul.mubr.f32.gmra.mxu0 %v1713_v20  ;;  %2430 = vmatprep.mubr.f32.mxu1 %v1716_v58  ;;  %v1729_v58 = vld [vmem:[#allocation6 + $0x9d0] sm:$0xff] }
 0x3cb   :  { %v15057_v12 = vadd.f32 %v2972_v30, %v2187_v40  ;;  %v2189_v21 = vpop.f32.mrf.mxu1  ;;  %3215 = vmatprep.mubr.f32.mxu0 %v1718_v59  ;;  %v1734_v40 = vld [vmem:[#allocation6 + $0x9f8] sm:$0xff] }
 0x3cc   :  { %v2974_v8 = vpop.f32.mrf.mxu0  ;;  %v1731_v21 = vld [vmem:[#allocation6 + $0x9e0] sm:$0xff] }
 0x3cd   :  { %v2192_v33 = vpop.f32.mrf.mxu1  ;;  %2431 = vmatmul.mubr.f32.gmra.mxu1 %v1715_v46  ;;  %v1733_v8 = vld [vmem:[#allocation6 + $0x9f0] sm:$0xff] }
 0x3ce   :  { %v2977_v23 = vpop.f32.mrf.mxu0  ;;  %3216 = vmatmul.mubr.f32.gmra.mxu0 %v1717_v16  ;;  %2435 = vmatprep.mubr.f32.mxu1 %v1720_v9 }
 0x3cf   :  { %v15059_v61 = vadd.f32 %v2977_v23, %v2192_v33  ;;  %v2194_v27 = vpop.f32.mrf.mxu1  ;;  %3220 = vmatprep.mubr.f32.mxu0 %v1722_v60  ;;  %v1736_v60 = vld [vmem:[#allocation6 + $0xa08] sm:$0xff]  ;;  %v1738_v23 = vld [vmem:[#allocation6 + $0xa18] sm:$0xff] }
 0x3d0   :  { %v2979_v18 = vpop.f32.mrf.mxu0 }
 0x3d1   :  { %v2197_v29 = vpop.f32.mrf.mxu1  ;;  %2436 = vmatmul.mubr.f32.gmra.mxu1 %v1719_v42 }
 0x3d2   :  { %v2982_v31 = vpop.f32.mrf.mxu0  ;;  %3221 = vmatmul.mubr.f32.gmra.mxu0 %v1721_v14  ;;  %2440 = vmatprep.mubr.f32.mxu1 %v1724_v28  ;;  %v1735_v14 = vld [vmem:[#allocation6 + $0xa00] sm:$0xff] }
 0x3d3   :  { %v15061_v26 = vadd.f32 %v2982_v31, %v2197_v29  ;;  %v2199_v11 = vpop.f32.mrf.mxu1  ;;  %3225 = vmatprep.mubr.f32.mxu0 %v1726_v34  ;;  %v1737_v34 = vld [vmem:[#allocation6 + $0xa10] sm:$0xff]  ;;  %v1740_v29 = vld [vmem:[#allocation6 + $0xa28] sm:$0xff] }
 0x3d4   :  { %v2984_v43 = vpop.f32.mrf.mxu0 }
 0x3d5   :  { %v2202_v39 = vpop.f32.mrf.mxu1  ;;  %2441 = vmatmul.mubr.f32.gmra.mxu1 %v1723_v24  ;;  %v1742_v24 = vld [vmem:[#allocation6 + $0xa38] sm:$0xff] }
 0x3d6   :  { %v2987_v17 = vpop.f32.mrf.mxu0  ;;  %3226 = vmatmul.mubr.f32.gmra.mxu0 %v1725_v62  ;;  %2445 = vmatprep.mubr.f32.mxu1 %v1728_v50  ;;  %v1739_v50 = vld [vmem:[#allocation6 + $0xa20] sm:$0xff] }
 0x3d7   :  { %v15063_v44 = vadd.f32 %v2987_v17, %v2202_v39  ;;  %v2204_v20 = vpop.f32.mrf.mxu1  ;;  %3230 = vmatprep.mubr.f32.mxu0 %v1730_v63  ;;  %v1741_v39 = vld [vmem:[#allocation6 + $0xa30] sm:$0xff]  ;;  %v1744_v17 = vld [vmem:[#allocation6 + $0xa48] sm:$0xff] }
 0x3d8   :  { %v2989_v59 = vpop.f32.mrf.mxu0  ;;  %v1746_v20 = vld [vmem:[#allocation6 + $0xa58] sm:$0xff] }
 0x3d9   :  { %v2207_v30 = vpop.f32.mrf.mxu1  ;;  %2446 = vmatmul.mubr.f32.gmra.mxu1 %v1727_v57  ;;  %v1743_v59 = vld [vmem:[#allocation6 + $0xa40] sm:$0xff] }
 0x3da   :  { %v2992_v46 = vpop.f32.mrf.mxu0  ;;  %3231 = vmatmul.mubr.f32.gmra.mxu0 %v1729_v58  ;;  %2450 = vmatprep.mubr.f32.mxu1 %v1732_v0 }
 0x3db   :  { %v15065_v16 = vadd.f32 %v2992_v46, %v2207_v30  ;;  %v2209_v9 = vpop.f32.mrf.mxu1  ;;  %3235 = vmatprep.mubr.f32.mxu0 %v1734_v40  ;;  %v1745_v46 = vld [vmem:[#allocation6 + $0xa50] sm:$0xff] }
 0x3dc   :  { %v2994_v33 = vpop.f32.mrf.mxu0 }
 0x3dd   :  { %v2212_v42 = vpop.f32.mrf.mxu1  ;;  %2451 = vmatmul.mubr.f32.gmra.mxu1 %v1731_v21  ;;  %v1748_v21 = vld [vmem:[#allocation6 + $0xa68] sm:$0xff] }
 0x3de   :  { %v2997_v27 = vpop.f32.mrf.mxu0  ;;  %3236 = vmatmul.mubr.f32.gmra.mxu0 %v1733_v8  ;;  %2455 = vmatprep.mubr.f32.mxu1 %v1736_v60  ;;  %v1750_v8 = vld [vmem:[#allocation6 + $0xa78] sm:$0xff] }
 0x3df   :  { %v15067_v28 = vadd.f32 %v2997_v27, %v2212_v42  ;;  %v2214_v18 = vpop.f32.mrf.mxu1  ;;  %3240 = vmatprep.mubr.f32.mxu0 %v1738_v23  ;;  %v1747_v23 = vld [vmem:[#allocation6 + $0xa60] sm:$0xff] }
 0x3e0   :  { %v2999_v31 = vpop.f32.mrf.mxu0  ;;  %v1752_v18 = vld [vmem:[#allocation6 + $0xa88] sm:$0xff] }
 0x3e1   :  { %v2217_v11 = vpop.f32.mrf.mxu1  ;;  %2456 = vmatmul.mubr.f32.gmra.mxu1 %v1735_v14  ;;  %v1749_v14 = vld [vmem:[#allocation6 + $0xa70] sm:$0xff] }
 0x3e2   :  { %v3002_v62 = vpop.f32.mrf.mxu0  ;;  %3241 = vmatmul.mubr.f32.gmra.mxu0 %v1737_v34  ;;  %2460 = vmatprep.mubr.f32.mxu1 %v1740_v29  ;;  %v1754_v29 = vld [vmem:[#allocation6 + $0xa98] sm:$0xff] }
 0x3e3   :  { %v15069_v43 = vadd.f32 %v3002_v62, %v2217_v11  ;;  %v2219_v63 = vpop.f32.mrf.mxu1  ;;  %3245 = vmatprep.mubr.f32.mxu0 %v1742_v24  ;;  %v1751_v11 = vld [vmem:[#allocation6 + $0xa80] sm:$0xff] }
 0x3e4   :  { %v3004_v57 = vpop.f32.mrf.mxu0  ;;  %v1753_v63 = vld [vmem:[#allocation6 + $0xa90] sm:$0xff] }
 0x3e5   :  { %18177 = vst [vmem:[#allocation42_spill] sm:$0xff] %v15069_v43  ;;  %v2222_v58 = vpop.f32.mrf.mxu1  ;;  %2461 = vmatmul.mubr.f32.gmra.mxu1 %v1739_v50  ;;  %v1758_v57 = vld [vmem:[#allocation6 + $0xab8] sm:$0xff] }
 0x3e6   :  { %v3007_v0 = vpop.f32.mrf.mxu0  ;;  %3246 = vmatmul.mubr.f32.gmra.mxu0 %v1741_v39  ;;  %2465 = vmatprep.mubr.f32.mxu1 %v1744_v17  ;;  %v1756_v39 = vld [vmem:[#allocation6 + $0xaa8] sm:$0xff] }
 0x3e7   :  { %v15071_v40 = vadd.f32 %v3007_v0, %v2222_v58  ;;  %v2224_v30 = vpop.f32.mrf.mxu1  ;;  %3250 = vmatprep.mubr.f32.mxu0 %v1746_v20  ;;  %v1755_v0 = vld [vmem:[#allocation6 + $0xaa0] sm:$0xff] }
 0x3e8   :  { %v3009_v9 = vpop.f32.mrf.mxu0 }
 0x3e9   :  { %18178 = vst [vmem:[#allocation26_spill] sm:$0xff] %v15071_v40  ;;  %v2227_v60 = vpop.f32.mrf.mxu1  ;;  %2466 = vmatmul.mubr.f32.gmra.mxu1 %v1743_v59 }
 0x3ea   :  { %v3012_v33 = vpop.f32.mrf.mxu0  ;;  %3251 = vmatmul.mubr.f32.gmra.mxu0 %v1745_v46  ;;  %2470 = vmatprep.mubr.f32.mxu1 %v1748_v21  ;;  %v1757_v46 = vld [vmem:[#allocation6 + $0xab0] sm:$0xff]  ;;  %v1760_v21 = vld [vmem:[#allocation6 + $0xac8] sm:$0xff] }
 0x3eb   :  { %v15073_v42 = vadd.f32 %v3012_v33, %v2227_v60  ;;  %v2229_v27 = vpop.f32.mrf.mxu1  ;;  %3255 = vmatprep.mubr.f32.mxu0 %v1750_v8  ;;  %v1762_v8 = vld [vmem:[#allocation6 + $0xad8] sm:$0xff] }
 0x3ec   :  { %v3014_v34 = vpop.f32.mrf.mxu0 }
 0x3ed   :  { %18179 = vst [vmem:[#allocation41_spill] sm:$0xff] %v15073_v42  ;;  %v2232_v31 = vpop.f32.mrf.mxu1  ;;  %2471 = vmatmul.mubr.f32.gmra.mxu1 %v1747_v23  ;;  %v1759_v23 = vld [vmem:[#allocation6 + $0xac0] sm:$0xff]  ;;  %v1764_v34 = vld [vmem:[#allocation6 + $0xae8] sm:$0xff] }
 0x3ee   :  { %v3017_v24 = vpop.f32.mrf.mxu0  ;;  %3256 = vmatmul.mubr.f32.gmra.mxu0 %v1749_v14  ;;  %2475 = vmatprep.mubr.f32.mxu1 %v1752_v18  ;;  %v1761_v18 = vld [vmem:[#allocation6 + $0xad0] sm:$0xff] }
 0x3ef   :  { %v15075_v62 = vadd.f32 %v3017_v24, %v2232_v31  ;;  %v2234_v50 = vpop.f32.mrf.mxu1  ;;  %3260 = vmatprep.mubr.f32.mxu0 %v1754_v29  ;;  %v1766_v31 = vld [vmem:[#allocation6 + $0xaf8] sm:$0xff] }
 0x3f0   :  { %v3019_v17 = vpop.f32.mrf.mxu0  ;;  %v1763_v50 = vld [vmem:[#allocation6 + $0xae0] sm:$0xff] }
 0x3f1   :  { %18180 = vst [vmem:[#allocation25_spill] sm:$0xff] %v15075_v62  ;;  %v2237_v20 = vpop.f32.mrf.mxu1  ;;  %2476 = vmatmul.mubr.f32.gmra.mxu1 %v1751_v11  ;;  %v1765_v17 = vld [vmem:[#allocation6 + $0xaf0] sm:$0xff] }
 0x3f2   :  { %v3022_v58 = vpop.f32.mrf.mxu0  ;;  %3261 = vmatmul.mubr.f32.gmra.mxu0 %v1753_v63  ;;  %2480 = vmatprep.mubr.f32.mxu1 %v1756_v39 }
 0x3f3   :  { %v15077_v59 = vadd.f32 %v3022_v58, %v2237_v20  ;;  %v2239_v30 = vpop.f32.mrf.mxu1  ;;  %3265 = vmatprep.mubr.f32.mxu0 %v1758_v57  ;;  %v1768_v57 = vld [vmem:[#allocation6 + $0xb08] sm:$0xff]  ;;  %v1770_v58 = vld [vmem:[#allocation6 + $0xb18] sm:$0xff] }
 0x3f4   :  { %v3024_v9 = vpop.f32.mrf.mxu0 }
 0x3f5   :  { %18181 = vst [vmem:[#allocation40_spill] sm:$0xff] %v15077_v59  ;;  %v2242_v60 = vpop.f32.mrf.mxu1  ;;  %2481 = vmatmul.mubr.f32.gmra.mxu1 %v1755_v0 }
 0x3f6   :  { %v3027_v33 = vpop.f32.mrf.mxu0  ;;  %3266 = vmatmul.mubr.f32.gmra.mxu0 %v1757_v46  ;;  %2485 = vmatprep.mubr.f32.mxu1 %v1760_v21  ;;  %v1767_v46 = vld [vmem:[#allocation6 + $0xb00] sm:$0xff] }
 0x3f7   :  { %v15079_v27 = vadd.f32 %v3027_v33, %v2242_v60  ;;  %v2244_v14 = vpop.f32.mrf.mxu1  ;;  %3270 = vmatprep.mubr.f32.mxu0 %v1762_v8  ;;  %v1769_v8 = vld [vmem:[#allocation6 + $0xb10] sm:$0xff]  ;;  %v1772_v60 = vld [vmem:[#allocation6 + $0xb28] sm:$0xff] }
 0x3f8   :  { %v3029_v29 = vpop.f32.mrf.mxu0 }
 0x3f9   :  { %18182 = vst [vmem:[#allocation24_spill] sm:$0xff] %v15079_v27  ;;  %v2247_v24 = vpop.f32.mrf.mxu1  ;;  %2486 = vmatmul.mubr.f32.gmra.mxu1 %v1759_v23  ;;  %v1774_v23 = vld [vmem:[#allocation6 + $0xb38] sm:$0xff] }
 0x3fa   :  { %v3032_v11 = vpop.f32.mrf.mxu0  ;;  %3271 = vmatmul.mubr.f32.gmra.mxu0 %v1761_v18  ;;  %2490 = vmatprep.mubr.f32.mxu1 %v1764_v34  ;;  %v1771_v34 = vld [vmem:[#allocation6 + $0xb20] sm:$0xff] }
 0x3fb   :  { %v15081_v63 = vadd.f32 %v3032_v11, %v2247_v24  ;;  %v2249_v39 = vpop.f32.mrf.mxu1  ;;  %3275 = vmatprep.mubr.f32.mxu0 %v1766_v31  ;;  %v1773_v24 = vld [vmem:[#allocation6 + $0xb30] sm:$0xff]  ;;  %v1776_v11 = vld [vmem:[#allocation6 + $0xb48] sm:$0xff] }
 0x3fc   :  { %v3034_v20 = vpop.f32.mrf.mxu0  ;;  %v1778_v39 = vld [vmem:[#allocation6 + $0xb58] sm:$0xff] }
 0x3fd   :  { %18183 = vst [vmem:[#allocation39_spill] sm:$0xff] %v15081_v63  ;;  %v2252_v0 = vpop.f32.mrf.mxu1  ;;  %2491 = vmatmul.mubr.f32.gmra.mxu1 %v1763_v50  ;;  %v1775_v20 = vld [vmem:[#allocation6 + $0xb40] sm:$0xff] }
 0x3fe   :  { %v3037_v30 = vpop.f32.mrf.mxu0  ;;  %3276 = vmatmul.mubr.f32.gmra.mxu0 %v1765_v17  ;;  %2495 = vmatprep.mubr.f32.mxu1 %v1768_v57 }
 0x3ff   :  { %v15083_v21 = vadd.f32 %v3037_v30, %v2252_v0  ;;  %v2254_v9 = vpop.f32.mrf.mxu1  ;;  %3280 = vmatprep.mubr.f32.mxu0 %v1770_v58  ;;  %v1777_v30 = vld [vmem:[#allocation6 + $0xb50] sm:$0xff] }
 0x400   :  { %v3039_v33 = vpop.f32.mrf.mxu0 }
 0x401   :  { %18184 = vst [vmem:[#allocation23_spill] sm:$0xff] %v15083_v21  ;;  %v2257_v14 = vpop.f32.mrf.mxu1  ;;  %2496 = vmatmul.mubr.f32.gmra.mxu1 %v1767_v46  ;;  %v1780_v46 = vld [vmem:[#allocation6 + $0xb68] sm:$0xff] }
 0x402   :  { %v3042_v18 = vpop.f32.mrf.mxu0  ;;  %3281 = vmatmul.mubr.f32.gmra.mxu0 %v1769_v8  ;;  %2500 = vmatprep.mubr.f32.mxu1 %v1772_v60  ;;  %v1782_v8 = vld [vmem:[#allocation6 + $0xb78] sm:$0xff] }
 0x403   :  { %v15085_v29 = vadd.f32 %v3042_v18, %v2257_v14  ;;  %v2259_v31 = vpop.f32.mrf.mxu1  ;;  %3285 = vmatprep.mubr.f32.mxu0 %v1774_v23  ;;  %v1779_v23 = vld [vmem:[#allocation6 + $0xb60] sm:$0xff] }
 0x404   :  { %v3044_v50 = vpop.f32.mrf.mxu0  ;;  %v1784_v31 = vld [vmem:[#allocation6 + $0xb88] sm:$0xff] }
 0x405   :  { %18185 = vst [vmem:[#allocation38_spill] sm:$0xff] %v15085_v29  ;;  %v2262_v17 = vpop.f32.mrf.mxu1  ;;  %2501 = vmatmul.mubr.f32.gmra.mxu1 %v1771_v34  ;;  %v1781_v34 = vld [vmem:[#allocation6 + $0xb70] sm:$0xff] }
 0x406   :  { %v3047_v57 = vpop.f32.mrf.mxu0  ;;  %3286 = vmatmul.mubr.f32.gmra.mxu0 %v1773_v24  ;;  %2505 = vmatprep.mubr.f32.mxu1 %v1776_v11  ;;  %v1786_v11 = vld [vmem:[#allocation6 + $0xb98] sm:$0xff] }
 0x407   :  { %v15087_v58 = vadd.f32 %v3047_v57, %v2262_v17  ;;  %v2264_v0 = vpop.f32.mrf.mxu1  ;;  %3290 = vmatprep.mubr.f32.mxu0 %v1778_v39  ;;  %v1783_v17 = vld [vmem:[#allocation6 + $0xb80] sm:$0xff] }
 0x408   :  { %v3049_v9 = vpop.f32.mrf.mxu0  ;;  %v1785_v0 = vld [vmem:[#allocation6 + $0xb90] sm:$0xff] }
 0x409   :  { %18186 = vst [vmem:[#allocation22_spill] sm:$0xff] %v15087_v58  ;;  %v2267_v60 = vpop.f32.mrf.mxu1  ;;  %2506 = vmatmul.mubr.f32.gmra.mxu1 %v1775_v20  ;;  %v1790_v9 = vld [vmem:[#allocation6 + $0xbb8] sm:$0xff] }
 0x40a   :  { %v3052_v33 = vpop.f32.mrf.mxu0  ;;  %3291 = vmatmul.mubr.f32.gmra.mxu0 %v1777_v30  ;;  %2510 = vmatprep.mubr.f32.mxu1 %v1780_v46  ;;  %v1788_v30 = vld [vmem:[#allocation6 + $0xba8] sm:$0xff] }
 0x40b   :  { %v15089_v14 = vadd.f32 %v3052_v33, %v2267_v60  ;;  %v2269_v18 = vpop.f32.mrf.mxu1  ;;  %3295 = vmatprep.mubr.f32.mxu0 %v1782_v8  ;;  %v1787_v33 = vld [vmem:[#allocation6 + $0xba0] sm:$0xff] }
 0x40c   :  { %v3054_v24 = vpop.f32.mrf.mxu0 }
 0x40d   :  { %18187 = vst [vmem:[#allocation48_spill] sm:$0xff] %v15089_v14  ;;  %v2272_v50 = vpop.f32.mrf.mxu1  ;;  %2511 = vmatmul.mubr.f32.gmra.mxu1 %v1779_v23 }
 0x40e   :  { %v3057_v39 = vpop.f32.mrf.mxu0  ;;  %3296 = vmatmul.mubr.f32.gmra.mxu0 %v1781_v34  ;;  %2515 = vmatprep.mubr.f32.mxu1 %v1784_v31  ;;  %v1789_v34 = vld [vmem:[#allocation6 + $0xbb0] sm:$0xff]  ;;  %v1792_v31 = vld [vmem:[#allocation6 + $0xbc8] sm:$0xff] }
 0x40f   :  { %v15091_v57 = vadd.f32 %v3057_v39, %v2272_v50  ;;  %v2274_v20 = vpop.f32.mrf.mxu1  ;;  %3300 = vmatprep.mubr.f32.mxu0 %v1786_v11  ;;  %v1794_v50 = vld [vmem:[#allocation6 + $0xbd8] sm:$0xff] }
 0x410   :  { %v3059_v46 = vpop.f32.mrf.mxu0  ;;  %v1791_v20 = vld [vmem:[#allocation6 + $0xbc0] sm:$0xff] }
 0x411   :  { %18188 = vst [vmem:[#allocation49_spill] sm:$0xff] %v15091_v57  ;;  %v2277_v60 = vpop.f32.mrf.mxu1  ;;  %2516 = vmatmul.mubr.f32.gmra.mxu1 %v1783_v17 }
 0x412   :  { %v3062_v8 = vpop.f32.mrf.mxu0  ;;  %3301 = vmatmul.mubr.f32.gmra.mxu0 %v1785_v0  ;;  %2520 = vmatprep.mubr.f32.mxu1 %v1788_v30  ;;  %v1793_v0 = vld [vmem:[#allocation6 + $0xbd0] sm:$0xff]  ;;  %v1796_v30 = vld [vmem:[#allocation6 + $0xbe8] sm:$0xff] }
 0x413   :  { %v15093_v18 = vadd.f32 %v3062_v8, %v2277_v60  ;;  %v2279_v23 = vpop.f32.mrf.mxu1  ;;  %3305 = vmatprep.mubr.f32.mxu0 %v1790_v9  ;;  %v1798_v8 = vld [vmem:[#allocation6 + $0xbf8] sm:$0xff] }
 0x414   :  { %v3064_v24 = vpop.f32.mrf.mxu0 }
 0x415   :  { %18189 = vst [vmem:[#allocation50_spill] sm:$0xff] %v15093_v18  ;;  %v2282_v39 = vpop.f32.mrf.mxu1  ;;  %2521 = vmatmul.mubr.f32.gmra.mxu1 %v1787_v33  ;;  %v1795_v24 = vld [vmem:[#allocation6 + $0xbe0] sm:$0xff] }
 0x416   :  { %v3067_v11 = vpop.f32.mrf.mxu0  ;;  %3306 = vmatmul.mubr.f32.gmra.mxu0 %v1789_v34  ;;  %2525 = vmatprep.mubr.f32.mxu1 %v1792_v31  ;;  %v1797_v34 = vld [vmem:[#allocation6 + $0xbf0] sm:$0xff]  ;;  %v1800_v31 = vld [vmem:[#allocation6 + $0xc08] sm:$0xff] }
 0x417   :  { %v15095_v46 = vadd.f32 %v3067_v11, %v2282_v39  ;;  %v2284_v17 = vpop.f32.mrf.mxu1  ;;  %3310 = vmatprep.mubr.f32.mxu0 %v1794_v50  ;;  %v1802_v11 = vld [vmem:[#allocation6 + $0xc18] sm:$0xff] }
 0x418   :  { %v3069_v60 = vpop.f32.mrf.mxu0 }
 0x419   :  { %18190 = vst [vmem:[#allocation51_spill] sm:$0xff] %v15095_v46  ;;  %v2287_v23 = vpop.f32.mrf.mxu1  ;;  %2526 = vmatmul.mubr.f32.gmra.mxu1 %v1791_v20  ;;  %v1799_v60 = vld [vmem:[#allocation6 + $0xc00] sm:$0xff] }
 0x41a   :  { %v3072_v9 = vpop.f32.mrf.mxu0  ;;  %3311 = vmatmul.mubr.f32.gmra.mxu0 %v1793_v0  ;;  %2530 = vmatprep.mubr.f32.mxu1 %v1796_v30  ;;  %v1801_v0 = vld [vmem:[#allocation6 + $0xc10] sm:$0xff]  ;;  %v1804_v30 = vld [vmem:[#allocation6 + $0xc28] sm:$0xff] }
 0x41b   :  { %v15097_v6 = vadd.f32 %v3072_v9, %v2287_v23  ;;  %v2289_v33 = vpop.f32.mrf.mxu1  ;;  %3315 = vmatprep.mubr.f32.mxu0 %v1798_v8  ;;  %v1806_v9 = vld [vmem:[#allocation6 + $0xc38] sm:$0xff] }
 0x41c   :  { %v3074_v39 = vpop.f32.mrf.mxu0 }
 0x41d   :  { %18191 = vst [vmem:[#allocation52_spill] sm:$0xff] %v15097_v6  ;;  %v2292_v17 = vpop.f32.mrf.mxu1  ;;  %2531 = vmatmul.mubr.f32.gmra.mxu1 %v1795_v24  ;;  %v1803_v39 = vld [vmem:[#allocation6 + $0xc20] sm:$0xff] }
 0x41e   :  { %v3077_v50 = vpop.f32.mrf.mxu0  ;;  %3316 = vmatmul.mubr.f32.gmra.mxu0 %v1797_v34  ;;  %2535 = vmatprep.mubr.f32.mxu1 %v1800_v31  ;;  %v1805_v34 = vld [vmem:[#allocation6 + $0xc30] sm:$0xff]  ;;  %v1808_v31 = vld [vmem:[#allocation6 + $0xc48] sm:$0xff] }
 0x41f   :  { %v15099_v1 = vadd.f32 %v3077_v50, %v2292_v17  ;;  %v2294_v20 = vpop.f32.mrf.mxu1  ;;  %3320 = vmatprep.mubr.f32.mxu0 %v1802_v11  ;;  %v1810_v50 = vld [vmem:[#allocation6 + $0xc58] sm:$0xff] }
 0x420   :  { %v3079_v23 = vpop.f32.mrf.mxu0 }
 0x421   :  { %18192 = vst [vmem:[#allocation53_spill] sm:$0xff] %v15099_v1  ;;  %v2297_v33 = vpop.f32.mrf.mxu1  ;;  %2536 = vmatmul.mubr.f32.gmra.mxu1 %v1799_v60  ;;  %v1807_v23 = vld [vmem:[#allocation6 + $0xc40] sm:$0xff] }
 0x422   :  { %v3082_v8 = vpop.f32.mrf.mxu0  ;;  %3321 = vmatmul.mubr.f32.gmra.mxu0 %v1801_v0  ;;  %2540 = vmatprep.mubr.f32.mxu1 %v1804_v30  ;;  %v1809_v0 = vld [vmem:[#allocation6 + $0xc50] sm:$0xff]  ;;  %v1812_v30 = vld [vmem:[#allocation6 + $0xc68] sm:$0xff] }
 0x423   :  { %v15101_v25 = vadd.f32 %v3082_v8, %v2297_v33  ;;  %v2299_v24 = vpop.f32.mrf.mxu1  ;;  %3325 = vmatprep.mubr.f32.mxu0 %v1806_v9  ;;  %v1814_v8 = vld [vmem:[#allocation6 + $0xc78] sm:$0xff] }
 0x424   :  { %v3084_v17 = vpop.f32.mrf.mxu0 }
 0x425   :  { %v2302_v20 = vpop.f32.mrf.mxu1  ;;  %2541 = vmatmul.mubr.f32.gmra.mxu1 %v1803_v39  ;;  %v1811_v17 = vld [vmem:[#allocation6 + $0xc60] sm:$0xff] }
 0x426   :  { %v3087_v11 = vpop.f32.mrf.mxu0  ;;  %3326 = vmatmul.mubr.f32.gmra.mxu0 %v1805_v34  ;;  %2545 = vmatprep.mubr.f32.mxu1 %v1808_v31  ;;  %v1813_v34 = vld [vmem:[#allocation6 + $0xc70] sm:$0xff]  ;;  %v1816_v31 = vld [vmem:[#allocation6 + $0xc88] sm:$0xff] }
 0x427   :  { %v15103_v1 = vadd.f32 %v3087_v11, %v2302_v20  ;;  %v2304_v60 = vpop.f32.mrf.mxu1  ;;  %3330 = vmatprep.mubr.f32.mxu0 %v1810_v50  ;;  %v1818_v11 = vld [vmem:[#allocation6 + $0xc98] sm:$0xff] }
 0x428   :  { %v3089_v33 = vpop.f32.mrf.mxu0 }
 0x429   :  { %v2307_v24 = vpop.f32.mrf.mxu1  ;;  %2546 = vmatmul.mubr.f32.gmra.mxu1 %v1807_v23  ;;  %v1815_v33 = vld [vmem:[#allocation6 + $0xc80] sm:$0xff] }
 0x42a   :  { %v3092_v9 = vpop.f32.mrf.mxu0  ;;  %3331 = vmatmul.mubr.f32.gmra.mxu0 %v1809_v0  ;;  %2550 = vmatprep.mubr.f32.mxu1 %v1812_v30  ;;  %v1817_v0 = vld [vmem:[#allocation6 + $0xc90] sm:$0xff]  ;;  %v1820_v30 = vld [vmem:[#allocation6 + $0xca8] sm:$0xff] }
 0x42b   :  { %v15105_v6 = vadd.f32 %v3092_v9, %v2307_v24  ;;  %v2309_v39 = vpop.f32.mrf.mxu1  ;;  %3335 = vmatprep.mubr.f32.mxu0 %v1814_v8  ;;  %v1822_v9 = vld [vmem:[#allocation6 + $0xcb8] sm:$0xff] }
 0x42c   :  { %v3094_v20 = vpop.f32.mrf.mxu0 }
 0x42d   :  { %v2312_v60 = vpop.f32.mrf.mxu1  ;;  %2551 = vmatmul.mubr.f32.gmra.mxu1 %v1811_v17  ;;  %v1819_v20 = vld [vmem:[#allocation6 + $0xca0] sm:$0xff] }
 0x42e   :  { %v3097_v50 = vpop.f32.mrf.mxu0  ;;  %3336 = vmatmul.mubr.f32.gmra.mxu0 %v1813_v34  ;;  %2555 = vmatprep.mubr.f32.mxu1 %v1816_v31  ;;  %v1821_v34 = vld [vmem:[#allocation6 + $0xcb0] sm:$0xff]  ;;  %v1824_v31 = vld [vmem:[#allocation6 + $0xcc8] sm:$0xff] }
 0x42f   :  { %v15107_v46 = vadd.f32 %v3097_v50, %v2312_v60  ;;  %v2314_v23 = vpop.f32.mrf.mxu1  ;;  %3340 = vmatprep.mubr.f32.mxu0 %v1818_v11  ;;  %v1826_v50 = vld [vmem:[#allocation6 + $0xcd8] sm:$0xff] }
 0x430   :  { %v3099_v24 = vpop.f32.mrf.mxu0 }
 0x431   :  { %v2317_v39 = vpop.f32.mrf.mxu1  ;;  %2556 = vmatmul.mubr.f32.gmra.mxu1 %v1815_v33  ;;  %v1823_v24 = vld [vmem:[#allocation6 + $0xcc0] sm:$0xff] }
 0x432   :  { %v3102_v8 = vpop.f32.mrf.mxu0  ;;  %3341 = vmatmul.mubr.f32.gmra.mxu0 %v1817_v0  ;;  %2560 = vmatprep.mubr.f32.mxu1 %v1820_v30  ;;  %v1825_v0 = vld [vmem:[#allocation6 + $0xcd0] sm:$0xff]  ;;  %v1828_v30 = vld [vmem:[#allocation6 + $0xce8] sm:$0xff] }
 0x433   :  { %v15109_v18 = vadd.f32 %v3102_v8, %v2317_v39  ;;  %v2319_v17 = vpop.f32.mrf.mxu1  ;;  %3345 = vmatprep.mubr.f32.mxu0 %v1822_v9  ;;  %v1830_v8 = vld [vmem:[#allocation6 + $0xcf8] sm:$0xff] }
 0x434   :  { %v3104_v60 = vpop.f32.mrf.mxu0 }
 0x435   :  { %v2322_v23 = vpop.f32.mrf.mxu1  ;;  %2561 = vmatmul.mubr.f32.gmra.mxu1 %v1819_v20  ;;  %v1827_v60 = vld [vmem:[#allocation6 + $0xce0] sm:$0xff] }
 0x436   :  { %v3107_v11 = vpop.f32.mrf.mxu0  ;;  %3346 = vmatmul.mubr.f32.gmra.mxu0 %v1821_v34  ;;  %2565 = vmatprep.mubr.f32.mxu1 %v1824_v31  ;;  %v1829_v34 = vld [vmem:[#allocation6 + $0xcf0] sm:$0xff]  ;;  %v1832_v31 = vld [vmem:[#allocation6 + $0xd08] sm:$0xff] }
 0x437   :  { %v15111_v57 = vadd.f32 %v3107_v11, %v2322_v23  ;;  %v2324_v33 = vpop.f32.mrf.mxu1  ;;  %3350 = vmatprep.mubr.f32.mxu0 %v1826_v50  ;;  %v1834_v11 = vld [vmem:[#allocation6 + $0xd18] sm:$0xff] }
 0x438   :  { %v3109_v39 = vpop.f32.mrf.mxu0 }
 0x439   :  { %v2327_v17 = vpop.f32.mrf.mxu1  ;;  %2566 = vmatmul.mubr.f32.gmra.mxu1 %v1823_v24  ;;  %v1831_v39 = vld [vmem:[#allocation6 + $0xd00] sm:$0xff] }
 0x43a   :  { %v3112_v9 = vpop.f32.mrf.mxu0  ;;  %3351 = vmatmul.mubr.f32.gmra.mxu0 %v1825_v0  ;;  %2570 = vmatprep.mubr.f32.mxu1 %v1828_v30  ;;  %v1833_v0 = vld [vmem:[#allocation6 + $0xd10] sm:$0xff]  ;;  %v1836_v30 = vld [vmem:[#allocation6 + $0xd28] sm:$0xff] }
 0x43b   :  { %v15113_v14 = vadd.f32 %v3112_v9, %v2327_v17  ;;  %v2329_v20 = vpop.f32.mrf.mxu1  ;;  %3355 = vmatprep.mubr.f32.mxu0 %v1830_v8  ;;  %v1838_v9 = vld [vmem:[#allocation6 + $0xd38] sm:$0xff] }
 0x43c   :  { %v3114_v23 = vpop.f32.mrf.mxu0 }
 0x43d   :  { %v2332_v33 = vpop.f32.mrf.mxu1  ;;  %2571 = vmatmul.mubr.f32.gmra.mxu1 %v1827_v60  ;;  %v1835_v23 = vld [vmem:[#allocation6 + $0xd20] sm:$0xff] }
 0x43e   :  { %v3117_v50 = vpop.f32.mrf.mxu0  ;;  %3356 = vmatmul.mubr.f32.gmra.mxu0 %v1829_v34  ;;  %2575 = vmatprep.mubr.f32.mxu1 %v1832_v31  ;;  %v1837_v34 = vld [vmem:[#allocation6 + $0xd30] sm:$0xff]  ;;  %v1840_v31 = vld [vmem:[#allocation6 + $0xd48] sm:$0xff] }
 0x43f   :  { %v15115_v58 = vadd.f32 %v3117_v50, %v2332_v33  ;;  %v2334_v24 = vpop.f32.mrf.mxu1  ;;  %3360 = vmatprep.mubr.f32.mxu0 %v1834_v11  ;;  %v1842_v50 = vld [vmem:[#allocation6 + $0xd58] sm:$0xff] }
 0x440   :  { %v3119_v17 = vpop.f32.mrf.mxu0 }
 0x441   :  { %v2337_v20 = vpop.f32.mrf.mxu1  ;;  %2576 = vmatmul.mubr.f32.gmra.mxu1 %v1831_v39  ;;  %v1839_v17 = vld [vmem:[#allocation6 + $0xd40] sm:$0xff] }
 0x442   :  { %v3122_v8 = vpop.f32.mrf.mxu0  ;;  %3361 = vmatmul.mubr.f32.gmra.mxu0 %v1833_v0  ;;  %2580 = vmatprep.mubr.f32.mxu1 %v1836_v30  ;;  %v1841_v0 = vld [vmem:[#allocation6 + $0xd50] sm:$0xff]  ;;  %v1844_v30 = vld [vmem:[#allocation6 + $0xd68] sm:$0xff] }
 0x443   :  { %v15117_v29 = vadd.f32 %v3122_v8, %v2337_v20  ;;  %v2339_v60 = vpop.f32.mrf.mxu1  ;;  %3365 = vmatprep.mubr.f32.mxu0 %v1838_v9  ;;  %v1846_v8 = vld [vmem:[#allocation6 + $0xd78] sm:$0xff] }
 0x444   :  { %v3124_v33 = vpop.f32.mrf.mxu0 }
 0x445   :  { %v2342_v24 = vpop.f32.mrf.mxu1  ;;  %2581 = vmatmul.mubr.f32.gmra.mxu1 %v1835_v23  ;;  %v1843_v33 = vld [vmem:[#allocation6 + $0xd60] sm:$0xff] }
 0x446   :  { %v3127_v11 = vpop.f32.mrf.mxu0  ;;  %3366 = vmatmul.mubr.f32.gmra.mxu0 %v1837_v34  ;;  %2585 = vmatprep.mubr.f32.mxu1 %v1840_v31  ;;  %v1845_v34 = vld [vmem:[#allocation6 + $0xd70] sm:$0xff]  ;;  %v1848_v31 = vld [vmem:[#allocation6 + $0xd88] sm:$0xff] }
 0x447   :  { %v15119_v21 = vadd.f32 %v3127_v11, %v2342_v24  ;;  %v2344_v39 = vpop.f32.mrf.mxu1  ;;  %3370 = vmatprep.mubr.f32.mxu0 %v1842_v50  ;;  %v1850_v11 = vld [vmem:[#allocation6 + $0xd98] sm:$0xff] }
 0x448   :  { %v3129_v20 = vpop.f32.mrf.mxu0 }
 0x449   :  { %v2347_v60 = vpop.f32.mrf.mxu1  ;;  %2586 = vmatmul.mubr.f32.gmra.mxu1 %v1839_v17  ;;  %v1847_v20 = vld [vmem:[#allocation6 + $0xd80] sm:$0xff] }
 0x44a   :  { %v3132_v9 = vpop.f32.mrf.mxu0  ;;  %3371 = vmatmul.mubr.f32.gmra.mxu0 %v1841_v0  ;;  %2590 = vmatprep.mubr.f32.mxu1 %v1844_v30  ;;  %v1849_v0 = vld [vmem:[#allocation6 + $0xd90] sm:$0xff]  ;;  %v1852_v30 = vld [vmem:[#allocation6 + $0xda8] sm:$0xff] }
 0x44b   :  { %v15121_v63 = vadd.f32 %v3132_v9, %v2347_v60  ;;  %v2349_v23 = vpop.f32.mrf.mxu1  ;;  %3375 = vmatprep.mubr.f32.mxu0 %v1846_v8  ;;  %v1854_v9 = vld [vmem:[#allocation6 + $0xdb8] sm:$0xff] }
 0x44c   :  { %v3134_v24 = vpop.f32.mrf.mxu0 }
 0x44d   :  { %v2352_v39 = vpop.f32.mrf.mxu1  ;;  %2591 = vmatmul.mubr.f32.gmra.mxu1 %v1843_v33  ;;  %v1851_v24 = vld [vmem:[#allocation6 + $0xda0] sm:$0xff] }
 0x44e   :  { %v3137_v50 = vpop.f32.mrf.mxu0  ;;  %3376 = vmatmul.mubr.f32.gmra.mxu0 %v1845_v34  ;;  %2595 = vmatprep.mubr.f32.mxu1 %v1848_v31  ;;  %v1853_v34 = vld [vmem:[#allocation6 + $0xdb0] sm:$0xff]  ;;  %v1856_v31 = vld [vmem:[#allocation6 + $0xdc8] sm:$0xff] }
 0x44f   :  { %v15123_v27 = vadd.f32 %v3137_v50, %v2352_v39  ;;  %v2354_v17 = vpop.f32.mrf.mxu1  ;;  %3380 = vmatprep.mubr.f32.mxu0 %v1850_v11  ;;  %v1858_v50 = vld [vmem:[#allocation6 + $0xdd8] sm:$0xff] }
 0x450   :  { %v3139_v60 = vpop.f32.mrf.mxu0 }
 0x451   :  { %v2357_v23 = vpop.f32.mrf.mxu1  ;;  %2596 = vmatmul.mubr.f32.gmra.mxu1 %v1847_v20  ;;  %v1855_v60 = vld [vmem:[#allocation6 + $0xdc0] sm:$0xff] }
 0x452   :  { %v3142_v8 = vpop.f32.mrf.mxu0  ;;  %3381 = vmatmul.mubr.f32.gmra.mxu0 %v1849_v0  ;;  %2600 = vmatprep.mubr.f32.mxu1 %v1852_v30  ;;  %v1857_v0 = vld [vmem:[#allocation6 + $0xdd0] sm:$0xff]  ;;  %v1860_v30 = vld [vmem:[#allocation6 + $0xde8] sm:$0xff] }
 0x453   :  { %v15125_v59 = vadd.f32 %v3142_v8, %v2357_v23  ;;  %v2359_v33 = vpop.f32.mrf.mxu1  ;;  %3385 = vmatprep.mubr.f32.mxu0 %v1854_v9  ;;  %v1862_v8 = vld [vmem:[#allocation6 + $0xdf8] sm:$0xff] }
 0x454   :  { %v3144_v39 = vpop.f32.mrf.mxu0 }
 0x455   :  { %v2362_v17 = vpop.f32.mrf.mxu1  ;;  %2601 = vmatmul.mubr.f32.gmra.mxu1 %v1851_v24  ;;  %v1859_v39 = vld [vmem:[#allocation6 + $0xde0] sm:$0xff] }
 0x456   :  { %v3147_v11 = vpop.f32.mrf.mxu0  ;;  %3386 = vmatmul.mubr.f32.gmra.mxu0 %v1853_v34  ;;  %2605 = vmatprep.mubr.f32.mxu1 %v1856_v31  ;;  %v1861_v34 = vld [vmem:[#allocation6 + $0xdf0] sm:$0xff]  ;;  %v1864_v31 = vld [vmem:[#allocation6 + $0xe08] sm:$0xff] }
 0x457   :  { %v15127_v62 = vadd.f32 %v3147_v11, %v2362_v17  ;;  %v2364_v20 = vpop.f32.mrf.mxu1  ;;  %3390 = vmatprep.mubr.f32.mxu0 %v1858_v50  ;;  %v1866_v11 = vld [vmem:[#allocation6 + $0xe18] sm:$0xff] }
 0x458   :  { %v3149_v23 = vpop.f32.mrf.mxu0 }
 0x459   :  { %v2367_v33 = vpop.f32.mrf.mxu1  ;;  %2606 = vmatmul.mubr.f32.gmra.mxu1 %v1855_v60  ;;  %v1863_v23 = vld [vmem:[#allocation6 + $0xe00] sm:$0xff] }
 0x45a   :  { %v3152_v9 = vpop.f32.mrf.mxu0  ;;  %3391 = vmatmul.mubr.f32.gmra.mxu0 %v1857_v0  ;;  %2610 = vmatprep.mubr.f32.mxu1 %v1860_v30  ;;  %v1865_v0 = vld [vmem:[#allocation6 + $0xe10] sm:$0xff]  ;;  %v1868_v30 = vld [vmem:[#allocation6 + $0xe28] sm:$0xff] }
 0x45b   :  { %v15129_v42 = vadd.f32 %v3152_v9, %v2367_v33  ;;  %v2369_v24 = vpop.f32.mrf.mxu1  ;;  %3395 = vmatprep.mubr.f32.mxu0 %v1862_v8  ;;  %v1870_v9 = vld [vmem:[#allocation6 + $0xe38] sm:$0xff] }
 0x45c   :  { %v3154_v17 = vpop.f32.mrf.mxu0 }
 0x45d   :  { %v2372_v20 = vpop.f32.mrf.mxu1  ;;  %2611 = vmatmul.mubr.f32.gmra.mxu1 %v1859_v39  ;;  %v1867_v17 = vld [vmem:[#allocation6 + $0xe20] sm:$0xff] }
 0x45e   :  { %v3157_v50 = vpop.f32.mrf.mxu0  ;;  %3396 = vmatmul.mubr.f32.gmra.mxu0 %v1861_v34  ;;  %2615 = vmatprep.mubr.f32.mxu1 %v1864_v31  ;;  %v1869_v34 = vld [vmem:[#allocation6 + $0xe30] sm:$0xff]  ;;  %v1872_v31 = vld [vmem:[#allocation6 + $0xe48] sm:$0xff] }
 0x45f   :  { %v15131_v40 = vadd.f32 %v3157_v50, %v2372_v20  ;;  %v2374_v60 = vpop.f32.mrf.mxu1  ;;  %3400 = vmatprep.mubr.f32.mxu0 %v1866_v11  ;;  %v1874_v50 = vld [vmem:[#allocation6 + $0xe58] sm:$0xff] }
 0x460   :  { %v3159_v33 = vpop.f32.mrf.mxu0 }
 0x461   :  { %v2377_v24 = vpop.f32.mrf.mxu1  ;;  %2616 = vmatmul.mubr.f32.gmra.mxu1 %v1863_v23  ;;  %v1871_v33 = vld [vmem:[#allocation6 + $0xe40] sm:$0xff] }
 0x462   :  { %v3162_v8 = vpop.f32.mrf.mxu0  ;;  %3401 = vmatmul.mubr.f32.gmra.mxu0 %v1865_v0  ;;  %2620 = vmatprep.mubr.f32.mxu1 %v1868_v30  ;;  %v1873_v0 = vld [vmem:[#allocation6 + $0xe50] sm:$0xff]  ;;  %v1876_v30 = vld [vmem:[#allocation6 + $0xe68] sm:$0xff] }
 0x463   :  { %v15133_v43 = vadd.f32 %v3162_v8, %v2377_v24  ;;  %v2379_v39 = vpop.f32.mrf.mxu1  ;;  %3405 = vmatprep.mubr.f32.mxu0 %v1870_v9  ;;  %v1878_v8 = vld [vmem:[#allocation6 + $0xe78] sm:$0xff] }
 0x464   :  { %v3164_v20 = vpop.f32.mrf.mxu0 }
 0x465   :  { %18193 = vst [vmem:[#allocation54_spill] sm:$0xff] %v15133_v43  ;;  %v2382_v60 = vpop.f32.mrf.mxu1  ;;  %2621 = vmatmul.mubr.f32.gmra.mxu1 %v1867_v17  ;;  %v1875_v20 = vld [vmem:[#allocation6 + $0xe60] sm:$0xff] }
 0x466   :  { %v3167_v11 = vpop.f32.mrf.mxu0  ;;  %3406 = vmatmul.mubr.f32.gmra.mxu0 %v1869_v34  ;;  %2625 = vmatprep.mubr.f32.mxu1 %v1872_v31  ;;  %v1877_v34 = vld [vmem:[#allocation6 + $0xe70] sm:$0xff]  ;;  %v1880_v31 = vld [vmem:[#allocation6 + $0xe88] sm:$0xff] }
 0x467   :  { %v15135_v2 = vadd.f32 %v3167_v11, %v2382_v60  ;;  %v2384_v23 = vpop.f32.mrf.mxu1  ;;  %3410 = vmatprep.mubr.f32.mxu0 %v1874_v50  ;;  %v1882_v11 = vld [vmem:[#allocation6 + $0xe98] sm:$0xff] }
 0x468   :  { %v3169_v24 = vpop.f32.mrf.mxu0 }
 0x469   :  { %18194 = vst [vmem:[#allocation55_spill] sm:$0xff] %v15135_v2  ;;  %v2387_v39 = vpop.f32.mrf.mxu1  ;;  %2626 = vmatmul.mubr.f32.gmra.mxu1 %v1871_v33  ;;  %v1879_v24 = vld [vmem:[#allocation6 + $0xe80] sm:$0xff] }
 0x46a   :  { %v3172_v9 = vpop.f32.mrf.mxu0  ;;  %3411 = vmatmul.mubr.f32.gmra.mxu0 %v1873_v0  ;;  %2630 = vmatprep.mubr.f32.mxu1 %v1876_v30  ;;  %v1881_v0 = vld [vmem:[#allocation6 + $0xe90] sm:$0xff]  ;;  %v1884_v30 = vld [vmem:[#allocation6 + $0xea8] sm:$0xff] }
 0x46b   :  { %v15137_v43 = vadd.f32 %v3172_v9, %v2387_v39  ;;  %v2389_v17 = vpop.f32.mrf.mxu1  ;;  %3415 = vmatprep.mubr.f32.mxu0 %v1878_v8  ;;  %v1886_v9 = vld [vmem:[#allocation6 + $0xeb8] sm:$0xff] }
 0x46c   :  { %v3174_v60 = vpop.f32.mrf.mxu0  ;;  %v15144_v8 = vld [vmem:[%s18161_s0] sm:$0xff] }
 0x46d   :  { %18195 = vst [vmem:[#allocation56_spill] sm:$0xff] %v15137_v43  ;;  %v2392_v23 = vpop.f32.mrf.mxu1  ;;  %2631 = vmatmul.mubr.f32.gmra.mxu1 %v1875_v20  ;;  %v17951_v17 = vrot.slane %v15144_v8, 2  ;;  %v15150_v20 = vld [vmem:[%s18161_s0 + $0x8] sm:$0xff]  ;;  %v1890_v43 = vld [vmem:[#allocation6 + $0xed8] sm:$0xff] }
 0x46e   :  { %v3177_v50 = vpop.f32.mrf.mxu0  ;;  %3416 = vmatmul.mubr.f32.gmra.mxu0 %v1877_v34  ;;  %2635 = vmatprep.mubr.f32.mxu1 %v1880_v31  ;;  %v17952_v31 = vrot.slane %v15150_v20, 2 }
 0x46f   :  { %v15139_v2 = vadd.f32 %v3177_v50, %v2392_v23  ;;  %v2394_v33 = vpop.f32.mrf.mxu1  ;;  %3420 = vmatprep.mubr.f32.mxu0 %v1882_v11  ;;  %v1883_v11 = vld [vmem:[#allocation6 + $0xea0] sm:$0xff]  ;;  %12141 = vmatprep.subr.msk.mxu1 %vm3614_vm3, %v17951_v17  ;;  %v1894_v17 = vld [vmem:[#allocation6 + $0xef8] sm:$0xff] }
 0x470   :  { %v3179_v39 = vpop.f32.mrf.mxu0  ;;  %v1885_v33 = vld [vmem:[#allocation6 + $0xeb0] sm:$0xff]  ;;  %12271 = vmatprep.subr.msk.mxu0 %vm3614_vm3, %v17952_v31  ;;  %v1891_v31 = vld [vmem:[#allocation6 + $0xee0] sm:$0xff] }
 0x471   :  { %18196 = vst [vmem:[#allocation57_spill] sm:$0xff] %v15139_v2  ;;  %v2397_v34 = vpop.f32.mrf.mxu1  ;;  %2636 = vmatmul.mubr.f32.gmra.mxu1 %v1879_v24  ;;  %v1888_v39 = vld [vmem:[#allocation6 + $0xec8] sm:$0xff] }
 0x472   :  { %v3182_v60 = vpop.f32.mrf.mxu0  ;;  %3421 = vmatmul.mubr.f32.gmra.mxu0 %v1881_v0  ;;  %2640 = vmatprep.mubr.f32.mxu1 %v1884_v30  ;;  %v1887_v30 = vld [vmem:[#allocation6 + $0xec0] sm:$0xff] }
 0x473   :  { %v15153_v23 = vadd.f32 %v3182_v60, %v2397_v34  ;;  %v2399_v50 = vpop.f32.mrf.mxu1  ;;  %3425 = vmatprep.mubr.f32.mxu0 %v1886_v9  ;;  %v1889_v60 = vld [vmem:[#allocation6 + $0xed0] sm:$0xff] }
 0x474   :  { %v3184_v2 = vpop.f32.mrf.mxu0  ;;  %v1892_v50 = vld [vmem:[#allocation6 + $0xee8] sm:$0xff] }
 0x475   :  { %18197 = vst [vmem:[#allocation58_spill] sm:$0xff] %v15153_v23  ;;  %v2402_v24 = vpop.f32.mrf.mxu1  ;;  %2641 = vmatmul.mubr.f32.gmra.mxu1 %v1883_v11 }
 0x476   :  { %v3187_v0 = vpop.f32.mrf.mxu0  ;;  %3426 = vmatmul.mubr.f32.gmra.mxu0 %v1885_v33  ;;  %2645 = vmatprep.mubr.f32.mxu1 %v1888_v39  ;;  %v1893_v33 = vld [vmem:[#allocation6 + $0xef0] sm:$0xff]  ;;  %v1896_v39 = vld [vmem:[#allocation6 + $0xf08] sm:$0xff] }
 0x477   :  { %v15161_v34 = vadd.f32 %v3187_v0, %v2402_v24  ;;  %v2404_v9 = vpop.f32.mrf.mxu1  ;;  %3430 = vmatprep.mubr.f32.mxu0 %v1890_v43  ;;  %v1898_v0 = vld [vmem:[#allocation6 + $0xf18] sm:$0xff] }
 0x478   :  { %v3189_v23 = vpop.f32.mrf.mxu0 }
 0x479   :  { %18198 = vst [vmem:[#allocation59_spill] sm:$0xff] %v15161_v34  ;;  %v2407_v2 = vpop.f32.mrf.mxu1  ;;  %2646 = vmatmul.mubr.f32.gmra.mxu1 %v1887_v30  ;;  %v1895_v23 = vld [vmem:[#allocation6 + $0xf00] sm:$0xff] }
 0x47a   :  { %v3192_v49 = vpop.f32.mrf.mxu0  ;;  %3431 = vmatmul.mubr.f32.gmra.mxu0 %v1889_v60  ;;  %2650 = vmatprep.mubr.f32.mxu1 %v1892_v50  ;;  %v1897_v60 = vld [vmem:[#allocation6 + $0xf10] sm:$0xff]  ;;  %v1900_v50 = vld [vmem:[#allocation6 + $0xf28] sm:$0xff] }
 0x47b   :  { %v15163_v56 = vadd.f32 %v3192_v49, %v2407_v2  ;;  %v2409_v11 = vpop.f32.mrf.mxu1  ;;  %3435 = vmatprep.mubr.f32.mxu0 %v1894_v17  ;;  %v1902_v2 = vld [vmem:[#allocation6 + $0xf38] sm:$0xff] }
 0x47c   :  { %v3194_v24 = vpop.f32.mrf.mxu0 }
 0x47d   :  { %18199 = vst [vmem:[#allocation60_spill] sm:$0xff] %v15163_v56  ;;  %v2412_v9 = vpop.f32.mrf.mxu1  ;;  %2651 = vmatmul.mubr.f32.gmra.mxu1 %v1891_v31  ;;  %v1899_v24 = vld [vmem:[#allocation6 + $0xf20] sm:$0xff] }
 0x47e   :  { %v3197_v43 = vpop.f32.mrf.mxu0  ;;  %3436 = vmatmul.mubr.f32.gmra.mxu0 %v1893_v33  ;;  %2655 = vmatprep.mubr.f32.mxu1 %v1896_v39  ;;  %v1901_v33 = vld [vmem:[#allocation6 + $0xf30] sm:$0xff]  ;;  %v1904_v39 = vld [vmem:[#allocation6 + $0xf48] sm:$0xff] }
 0x47f   :  { %v15165_v34 = vadd.f32 %v3197_v43, %v2412_v9  ;;  %v2414_v30 = vpop.f32.mrf.mxu1  ;;  %3440 = vmatprep.mubr.f32.mxu0 %v1898_v0  ;;  %v1906_v43 = vld [vmem:[#allocation6 + $0xf58] sm:$0xff] }
 0x480   :  { %v3199_v49 = vpop.f32.mrf.mxu0 }
 0x481   :  { %18200 = vst [vmem:[#allocation61_spill] sm:$0xff] %v15165_v34  ;;  %v2417_v11 = vpop.f32.mrf.mxu1  ;;  %2656 = vmatmul.mubr.f32.gmra.mxu1 %v1895_v23  ;;  %v1903_v49 = vld [vmem:[#allocation6 + $0xf40] sm:$0xff] }
 0x482   :  { %v3202_v17 = vpop.f32.mrf.mxu0  ;;  %3441 = vmatmul.mubr.f32.gmra.mxu0 %v1897_v60  ;;  %2660 = vmatprep.mubr.f32.mxu1 %v1900_v50  ;;  %v1905_v60 = vld [vmem:[#allocation6 + $0xf50] sm:$0xff]  ;;  %v1908_v50 = vld [vmem:[#allocation6 + $0xf68] sm:$0xff] }
 0x483   :  { %v15167_v56 = vadd.f32 %v3202_v17, %v2417_v11  ;;  %v2419_v31 = vpop.f32.mrf.mxu1  ;;  %3445 = vmatprep.mubr.f32.mxu0 %v1902_v2  ;;  %v1910_v17 = vld [vmem:[#allocation6 + $0xf78] sm:$0xff] }
 0x484   :  { %v3204_v9 = vpop.f32.mrf.mxu0 }
 0x485   :  { %18201 = vst [vmem:[#allocation62_spill] sm:$0xff] %v15167_v56  ;;  %v2422_v30 = vpop.f32.mrf.mxu1  ;;  %2661 = vmatmul.mubr.f32.gmra.mxu1 %v1899_v24  ;;  %v1907_v9 = vld [vmem:[#allocation6 + $0xf60] sm:$0xff] }
 0x486   :  { %v3207_v0 = vpop.f32.mrf.mxu0  ;;  %3446 = vmatmul.mubr.f32.gmra.mxu0 %v1901_v33  ;;  %2665 = vmatprep.mubr.f32.mxu1 %v1904_v39  ;;  %v1909_v33 = vld [vmem:[#allocation6 + $0xf70] sm:$0xff]  ;;  %v1912_v39 = vld [vmem:[#allocation6 + $0xf88] sm:$0xff] }
 0x487   :  { %v15169_v34 = vadd.f32 %v3207_v0, %v2422_v30  ;;  %v2424_v23 = vpop.f32.mrf.mxu1  ;;  %3450 = vmatprep.mubr.f32.mxu0 %v1906_v43  ;;  %v1914_v0 = vld [vmem:[#allocation6 + $0xf98] sm:$0xff] }
 0x488   :  { %v3209_v11 = vpop.f32.mrf.mxu0 }
 0x489   :  { %18202 = vst [vmem:[#allocation63_spill] sm:$0xff] %v15169_v34  ;;  %v2427_v31 = vpop.f32.mrf.mxu1  ;;  %2666 = vmatmul.mubr.f32.gmra.mxu1 %v1903_v49  ;;  %v1911_v11 = vld [vmem:[#allocation6 + $0xf80] sm:$0xff] }
 0x48a   :  { %v3212_v2 = vpop.f32.mrf.mxu0  ;;  %3451 = vmatmul.mubr.f32.gmra.mxu0 %v1905_v60  ;;  %2670 = vmatprep.mubr.f32.mxu1 %v1908_v50  ;;  %v1913_v60 = vld [vmem:[#allocation6 + $0xf90] sm:$0xff]  ;;  %v1916_v50 = vld [vmem:[#allocation6 + $0xfa8] sm:$0xff] }
 0x48b   :  { %v15171_v56 = vadd.f32 %v3212_v2, %v2427_v31  ;;  %v2429_v24 = vpop.f32.mrf.mxu1  ;;  %3455 = vmatprep.mubr.f32.mxu0 %v1910_v17  ;;  %v1918_v2 = vld [vmem:[#allocation6 + $0xfb8] sm:$0xff] }
 0x48c   :  { %v3214_v30 = vpop.f32.mrf.mxu0 }
 0x48d   :  { %18203 = vst [vmem:[#allocation64_spill] sm:$0xff] %v15171_v56  ;;  %v2432_v23 = vpop.f32.mrf.mxu1  ;;  %2671 = vmatmul.mubr.f32.gmra.mxu1 %v1907_v9  ;;  %v1915_v30 = vld [vmem:[#allocation6 + $0xfa0] sm:$0xff] }
 0x48e   :  { %v3217_v43 = vpop.f32.mrf.mxu0  ;;  %3456 = vmatmul.mubr.f32.gmra.mxu0 %v1909_v33  ;;  %2675 = vmatprep.mubr.f32.mxu1 %v1912_v39  ;;  %v1917_v33 = vld [vmem:[#allocation6 + $0xfb0] sm:$0xff]  ;;  %v1920_v39 = vld [vmem:[#allocation6 + $0xfc8] sm:$0xff] }
 0x48f   :  { %v15173_v34 = vadd.f32 %v3217_v43, %v2432_v23  ;;  %v2434_v49 = vpop.f32.mrf.mxu1  ;;  %3460 = vmatprep.mubr.f32.mxu0 %v1914_v0  ;;  %v1922_v43 = vld [vmem:[#allocation6 + $0xfd8] sm:$0xff] }
 0x490   :  { %v3219_v31 = vpop.f32.mrf.mxu0 }
 0x491   :  { %18204 = vst [vmem:[#allocation65_spill] sm:$0xff] %v15173_v34  ;;  %v2437_v24 = vpop.f32.mrf.mxu1  ;;  %2676 = vmatmul.mubr.f32.gmra.mxu1 %v1911_v11  ;;  %v1919_v31 = vld [vmem:[#allocation6 + $0xfc0] sm:$0xff] }
 0x492   :  { %v3222_v17 = vpop.f32.mrf.mxu0  ;;  %3461 = vmatmul.mubr.f32.gmra.mxu0 %v1913_v60  ;;  %2680 = vmatprep.mubr.f32.mxu1 %v1916_v50  ;;  %v1921_v60 = vld [vmem:[#allocation6 + $0xfd0] sm:$0xff]  ;;  %v1924_v50 = vld [vmem:[#allocation6 + $0xfe8] sm:$0xff] }
 0x493   :  { %v15175_v56 = vadd.f32 %v3222_v17, %v2437_v24  ;;  %v2439_v9 = vpop.f32.mrf.mxu1  ;;  %3465 = vmatprep.mubr.f32.mxu0 %v1918_v2  ;;  %v1926_v17 = vld [vmem:[#allocation6 + $0xff8] sm:$0xff] }
 0x494   :  { %v3224_v23 = vpop.f32.mrf.mxu0 }
 0x495   :  { %18205 = vst [vmem:[#allocation66_spill] sm:$0xff] %v15175_v56  ;;  %v2442_v49 = vpop.f32.mrf.mxu1  ;;  %2681 = vmatmul.mubr.f32.gmra.mxu1 %v1915_v30  ;;  %v1923_v23 = vld [vmem:[#allocation6 + $0xfe0] sm:$0xff] }
 0x496   :  { %v3227_v0 = vpop.f32.mrf.mxu0  ;;  %3466 = vmatmul.mubr.f32.gmra.mxu0 %v1917_v33  ;;  %2685 = vmatprep.mubr.f32.mxu1 %v1920_v39  ;;  %v1925_v33 = vld [vmem:[#allocation6 + $0xff0] sm:$0xff]  ;;  %v1928_v39 = vld [vmem:[#allocation6 + $0x1008] sm:$0xff] }
 0x497   :  { %v15177_v34 = vadd.f32 %v3227_v0, %v2442_v49  ;;  %v2444_v11 = vpop.f32.mrf.mxu1  ;;  %3470 = vmatprep.mubr.f32.mxu0 %v1922_v43  ;;  %v1930_v0 = vld [vmem:[#allocation6 + $0x1018] sm:$0xff] }
 0x498   :  { %v3229_v24 = vpop.f32.mrf.mxu0 }
 0x499   :  { %18206 = vst [vmem:[#allocation67_spill] sm:$0xff] %v15177_v34  ;;  %v2447_v9 = vpop.f32.mrf.mxu1  ;;  %2686 = vmatmul.mubr.f32.gmra.mxu1 %v1919_v31  ;;  %v1927_v24 = vld [vmem:[#allocation6 + $0x1000] sm:$0xff] }
 0x49a   :  { %v3232_v2 = vpop.f32.mrf.mxu0  ;;  %3471 = vmatmul.mubr.f32.gmra.mxu0 %v1921_v60  ;;  %2690 = vmatprep.mubr.f32.mxu1 %v1924_v50  ;;  %v1929_v60 = vld [vmem:[#allocation6 + $0x1010] sm:$0xff]  ;;  %v1932_v50 = vld [vmem:[#allocation6 + $0x1028] sm:$0xff] }
 0x49b   :  { %v15179_v56 = vadd.f32 %v3232_v2, %v2447_v9  ;;  %v2449_v30 = vpop.f32.mrf.mxu1  ;;  %3475 = vmatprep.mubr.f32.mxu0 %v1926_v17  ;;  %v1934_v2 = vld [vmem:[#allocation6 + $0x1038] sm:$0xff] }
 0x49c   :  { %v3234_v49 = vpop.f32.mrf.mxu0 }
 0x49d   :  { %18207 = vst [vmem:[#allocation68_spill] sm:$0xff] %v15179_v56  ;;  %v2452_v11 = vpop.f32.mrf.mxu1  ;;  %2691 = vmatmul.mubr.f32.gmra.mxu1 %v1923_v23  ;;  %v1931_v49 = vld [vmem:[#allocation6 + $0x1020] sm:$0xff] }
 0x49e   :  { %v3237_v43 = vpop.f32.mrf.mxu0  ;;  %3476 = vmatmul.mubr.f32.gmra.mxu0 %v1925_v33  ;;  %2695 = vmatprep.mubr.f32.mxu1 %v1928_v39  ;;  %v1933_v33 = vld [vmem:[#allocation6 + $0x1030] sm:$0xff]  ;;  %v1936_v39 = vld [vmem:[#allocation6 + $0x1048] sm:$0xff] }
 0x49f   :  { %v15181_v34 = vadd.f32 %v3237_v43, %v2452_v11  ;;  %v2454_v31 = vpop.f32.mrf.mxu1  ;;  %3480 = vmatprep.mubr.f32.mxu0 %v1930_v0  ;;  %v1938_v43 = vld [vmem:[#allocation6 + $0x1058] sm:$0xff] }
 0x4a0   :  { %v3239_v9 = vpop.f32.mrf.mxu0 }
 0x4a1   :  { %18208 = vst [vmem:[#allocation69_spill] sm:$0xff] %v15181_v34  ;;  %v2457_v30 = vpop.f32.mrf.mxu1  ;;  %2696 = vmatmul.mubr.f32.gmra.mxu1 %v1927_v24  ;;  %v1935_v9 = vld [vmem:[#allocation6 + $0x1040] sm:$0xff] }
 0x4a2   :  { %v3242_v17 = vpop.f32.mrf.mxu0  ;;  %3481 = vmatmul.mubr.f32.gmra.mxu0 %v1929_v60  ;;  %2700 = vmatprep.mubr.f32.mxu1 %v1932_v50  ;;  %v1937_v60 = vld [vmem:[#allocation6 + $0x1050] sm:$0xff]  ;;  %v1940_v50 = vld [vmem:[#allocation6 + $0x1068] sm:$0xff] }
 0x4a3   :  { %v15183_v56 = vadd.f32 %v3242_v17, %v2457_v30  ;;  %v2459_v23 = vpop.f32.mrf.mxu1  ;;  %3485 = vmatprep.mubr.f32.mxu0 %v1934_v2  ;;  %v1942_v17 = vld [vmem:[#allocation6 + $0x1078] sm:$0xff] }
 0x4a4   :  { %v3244_v11 = vpop.f32.mrf.mxu0 }
 0x4a5   :  { %v2462_v31 = vpop.f32.mrf.mxu1  ;;  %2701 = vmatmul.mubr.f32.gmra.mxu1 %v1931_v49  ;;  %v1939_v11 = vld [vmem:[#allocation6 + $0x1060] sm:$0xff] }
 0x4a6   :  { %v3247_v0 = vpop.f32.mrf.mxu0  ;;  %3486 = vmatmul.mubr.f32.gmra.mxu0 %v1933_v33  ;;  %2705 = vmatprep.mubr.f32.mxu1 %v1936_v39  ;;  %v1941_v33 = vld [vmem:[#allocation6 + $0x1070] sm:$0xff]  ;;  %v1944_v39 = vld [vmem:[#allocation6 + $0x1088] sm:$0xff] }
 0x4a7   :  { %v15185_v34 = vadd.f32 %v3247_v0, %v2462_v31  ;;  %v2464_v24 = vpop.f32.mrf.mxu1  ;;  %3490 = vmatprep.mubr.f32.mxu0 %v1938_v43  ;;  %v1946_v0 = vld [vmem:[#allocation6 + $0x1098] sm:$0xff] }
 0x4a8   :  { %v3249_v30 = vpop.f32.mrf.mxu0 }
 0x4a9   :  { %v2467_v23 = vpop.f32.mrf.mxu1  ;;  %2706 = vmatmul.mubr.f32.gmra.mxu1 %v1935_v9  ;;  %v1943_v30 = vld [vmem:[#allocation6 + $0x1080] sm:$0xff] }
 0x4aa   :  { %v3252_v2 = vpop.f32.mrf.mxu0  ;;  %3491 = vmatmul.mubr.f32.gmra.mxu0 %v1937_v60  ;;  %2710 = vmatprep.mubr.f32.mxu1 %v1940_v50  ;;  %v1945_v60 = vld [vmem:[#allocation6 + $0x1090] sm:$0xff]  ;;  %v1948_v50 = vld [vmem:[#allocation6 + $0x10a8] sm:$0xff] }
 0x4ab   :  { %v15187_v52 = vadd.f32 %v3252_v2, %v2467_v23  ;;  %v2469_v49 = vpop.f32.mrf.mxu1  ;;  %3495 = vmatprep.mubr.f32.mxu0 %v1942_v17  ;;  %v1950_v2 = vld [vmem:[#allocation6 + $0x10b8] sm:$0xff] }
 0x4ac   :  { %v3254_v31 = vpop.f32.mrf.mxu0 }
 0x4ad   :  { %v2472_v24 = vpop.f32.mrf.mxu1  ;;  %2711 = vmatmul.mubr.f32.gmra.mxu1 %v1939_v11  ;;  %v1947_v31 = vld [vmem:[#allocation6 + $0x10a0] sm:$0xff] }
 0x4ae   :  { %v3257_v43 = vpop.f32.mrf.mxu0  ;;  %3496 = vmatmul.mubr.f32.gmra.mxu0 %v1941_v33  ;;  %2715 = vmatprep.mubr.f32.mxu1 %v1944_v39  ;;  %v1949_v33 = vld [vmem:[#allocation6 + $0x10b0] sm:$0xff]  ;;  %v1952_v39 = vld [vmem:[#allocation6 + $0x10c8] sm:$0xff] }
 0x4af   :  { %v15189_v37 = vadd.f32 %v3257_v43, %v2472_v24  ;;  %v2474_v9 = vpop.f32.mrf.mxu1  ;;  %3500 = vmatprep.mubr.f32.mxu0 %v1946_v0  ;;  %v1954_v43 = vld [vmem:[#allocation6 + $0x10d8] sm:$0xff] }
 0x4b0   :  { %v3259_v23 = vpop.f32.mrf.mxu0 }
 0x4b1   :  { %v2477_v49 = vpop.f32.mrf.mxu1  ;;  %2716 = vmatmul.mubr.f32.gmra.mxu1 %v1943_v30  ;;  %v1951_v23 = vld [vmem:[#allocation6 + $0x10c0] sm:$0xff] }
 0x4b2   :  { %v3262_v17 = vpop.f32.mrf.mxu0  ;;  %3501 = vmatmul.mubr.f32.gmra.mxu0 %v1945_v60  ;;  %2720 = vmatprep.mubr.f32.mxu1 %v1948_v50  ;;  %v1953_v60 = vld [vmem:[#allocation6 + $0x10d0] sm:$0xff]  ;;  %v1956_v50 = vld [vmem:[#allocation6 + $0x10e8] sm:$0xff] }
 0x4b3   :  { %v15191_v36 = vadd.f32 %v3262_v17, %v2477_v49  ;;  %v2479_v11 = vpop.f32.mrf.mxu1  ;;  %3505 = vmatprep.mubr.f32.mxu0 %v1950_v2  ;;  %v1958_v17 = vld [vmem:[#allocation6 + $0x10f8] sm:$0xff] }
 0x4b4   :  { %v3264_v24 = vpop.f32.mrf.mxu0 }
 0x4b5   :  { %v2482_v9 = vpop.f32.mrf.mxu1  ;;  %2721 = vmatmul.mubr.f32.gmra.mxu1 %v1947_v31  ;;  %v1955_v31 = vld [vmem:[#allocation6 + $0x10e0] sm:$0xff] }
 0x4b6   :  { %v3267_v0 = vpop.f32.mrf.mxu0  ;;  %3506 = vmatmul.mubr.f32.gmra.mxu0 %v1949_v33  ;;  %2725 = vmatprep.mubr.f32.mxu1 %v1952_v39  ;;  %v1957_v33 = vld [vmem:[#allocation6 + $0x10f0] sm:$0xff]  ;;  %v1960_v39 = vld [vmem:[#allocation6 + $0x1108] sm:$0xff] }
 0x4b7   :  { %v15193_v41 = vadd.f32 %v3267_v0, %v2482_v9  ;;  %v2484_v30 = vpop.f32.mrf.mxu1  ;;  %3510 = vmatprep.mubr.f32.mxu0 %v1954_v43  ;;  %v1962_v0 = vld [vmem:[#allocation6 + $0x1118] sm:$0xff] }
 0x4b8   :  { %v3269_v49 = vpop.f32.mrf.mxu0 }
 0x4b9   :  { %v15195_v11 = vpop.f32.mrf.mxu1  ;;  %2726 = vmatmul.mubr.f32.gmra.mxu1 %v1951_v23  ;;  %v1959_v49 = vld [vmem:[#allocation6 + $0x1100] sm:$0xff] }
 0x4ba   :  { %v15197_v2 = vpop.f32.mrf.mxu0  ;;  %3511 = vmatmul.mubr.f32.gmra.mxu0 %v1953_v60  ;;  %2730 = vmatprep.mubr.f32.mxu1 %v1956_v50  ;;  %v1964_v60 = vld [vmem:[#allocation6 + $0x1128] sm:$0xff] }
 0x4bb   :  { %v2489_v24 = vpop.f32.mrf.mxu1  ;;  %3515 = vmatprep.mubr.f32.mxu0 %v1958_v17 }
 0x4bc   :  { %v3274_v9 = vpop.f32.mrf.mxu0 }
 0x4bd   :  { %v15199_v30 = vpop.f32.mrf.mxu1  ;;  %2731 = vmatmul.mubr.f32.gmra.mxu1 %v1955_v31  ;;  %v1963_v9 = vld [vmem:[#allocation6 + $0x1120] sm:$0xff] }
 0x4be   :  { %v15201_v43 = vpop.f32.mrf.mxu0  ;;  %3516 = vmatmul.mubr.f32.gmra.mxu0 %v1957_v33  ;;  %2735 = vmatprep.mubr.f32.mxu1 %v1960_v39  ;;  %v1968_v33 = vld [vmem:[#allocation6 + $0x1148] sm:$0xff] }
 0x4bf   :  { %v2494_v23 = vpop.f32.mrf.mxu1  ;;  %3520 = vmatprep.mubr.f32.mxu0 %v1962_v0 }
 0x4c0   :  { %v3279_v50 = vpop.f32.mrf.mxu0 }
 0x4c1   :  { %v15203_v24 = vpop.f32.mrf.mxu1  ;;  %2736 = vmatmul.mubr.f32.gmra.mxu1 %v1959_v49  ;;  %v1967_v50 = vld [vmem:[#allocation6 + $0x1140] sm:$0xff] }
 0x4c2   :  { %v15205_v17 = vpop.f32.mrf.mxu0  ;;  %3521 = vmatmul.mubr.f32.gmra.mxu0 %v1961_v13  ;;  %2740 = vmatprep.mubr.f32.mxu1 %v1964_v60  ;;  %v1972_v13 = vld [vmem:[#allocation6 + $0x1168] sm:$0xff] }
 0x4c3   :  { %v2499_v31 = vpop.f32.mrf.mxu1  ;;  %3525 = vmatprep.mubr.f32.mxu0 %v1966_v32 }
 0x4c4   :  { %v3284_v39 = vpop.f32.mrf.mxu0 }
 0x4c5   :  { %v15207_v23 = vpop.f32.mrf.mxu1  ;;  %2741 = vmatmul.mubr.f32.gmra.mxu1 %v1963_v9  ;;  %v1971_v39 = vld [vmem:[#allocation6 + $0x1160] sm:$0xff] }
 0x4c6   :  { %v15209_v0 = vpop.f32.mrf.mxu0  ;;  %3526 = vmatmul.mubr.f32.gmra.mxu0 %v1965_v48  ;;  %2745 = vmatprep.mubr.f32.mxu1 %v1968_v33  ;;  %v1976_v48 = vld [vmem:[#allocation6 + $0x1188] sm:$0xff] }
 0x4c7   :  { %v2504_v49 = vpop.f32.mrf.mxu1  ;;  %3530 = vmatprep.mubr.f32.mxu0 %v1970_v54 }
 0x4c8   :  { %v3289_v60 = vpop.f32.mrf.mxu0  ;;  %v1975_v49 = vld [vmem:[#allocation6 + $0x1180] sm:$0xff] }
 0x4c9   :  { %v15211_v31 = vpop.f32.mrf.mxu1  ;;  %2746 = vmatmul.mubr.f32.gmra.mxu1 %v1967_v50  ;;  %v5017_v60 = vrot.slane %v15150_v20, 6 }
 0x4ca   :  { %v15213_v32 = vpop.f32.mrf.mxu0  ;;  %3531 = vmatmul.mubr.f32.gmra.mxu0 %v1969_v22  ;;  %2750 = vmatprep.mubr.f32.mxu1 %v1972_v13  ;;  %v1980_v22 = vld [vmem:[#allocation6 + $0x11a8] sm:$0xff] }
 0x4cb   :  { %v2509_v9 = vpop.f32.mrf.mxu1  ;;  %3535 = vmatprep.mubr.f32.mxu0 %v1974_v7 }
 0x4cc   :  { %v3294_v33 = vpop.f32.mrf.mxu0 }
 0x4cd   :  { %v15215_v4 = vpop.f32.mrf.mxu1  ;;  %2751 = vmatmul.mubr.f32.gmra.mxu1 %v1971_v39 }
 0x4ce   :  { %v15217_v54 = vpop.f32.mrf.mxu0  ;;  %3536 = vmatmul.mubr.f32.gmra.mxu0 %v1973_v3  ;;  %2755 = vmatprep.mubr.f32.mxu1 %v1976_v48  ;;  %v1979_v3 = vld [vmem:[#allocation6 + $0x11a0] sm:$0xff]  ;;  %v18209_v48 = vrot.slane %v15150_v20, 2 }
 0x4cf   :  { %12221 = vmatprep.mubr.msk.f32.mxu0 %vm879_vm2, %v15101_v25  ;;  %v2514_v50 = vpop.f32.mrf.mxu1  ;;  %v1984_v25 = vld [vmem:[#allocation6 + $0x11c8] sm:$0xff] }
 0x4d0   :  { %v3299_v13 = vpop.f32.mrf.mxu0 }
 0x4d1   :  { %v15222_v7 = vpop.f32.mrf.mxu1  ;;  %2756 = vmatmul.mubr.f32.gmra.mxu1 %v1975_v49 }
 0x4d2   :  { %v15224_v9 = vpop.f32.mrf.mxu0  ;;  %12222 = vmatmul.mubr.msk.f32.vlgmr.msra.gmra.mxu0 %vm879_vm2, %v15103_v1  ;;  %2760 = vmatprep.mubr.f32.mxu1 %v1980_v22  ;;  %v1988_v22 = vld [vmem:[#allocation6 + $0x11e8] sm:$0xff] }
 0x4d3   :  { %12224 = vmatprep.mubr.msk.f32.mxu0 %vm879_vm2, %v15105_v6  ;;  %v2519_v39 = vpop.f32.mrf.mxu1  ;;  %12272 = vmatpush3.msk.msra.mxu0 %vm3614_vm3, %v18209_v48  ;;  %v1983_v6 = vld [vmem:[#allocation6 + $0x11c0] sm:$0xff] }
 0x4d4   :  { %v3304_v33 = vpop.f32.mrf.mxu0  ;;  %12323 = vmatprep.subr.msk.mxu0 %vm3614_vm3, %v5017_v60 }
 0x4d5   :  { %v15236_v49 = vpop.f32.mrf.mxu1  ;;  %2761 = vmatmul.mubr.f32.gmra.mxu1 %v1979_v3  ;;  %v1987_v3 = vld [vmem:[#allocation6 + $0x11e0] sm:$0xff] }
 0x4d6   :  { %v15238_v1 = vpop.f32.mrf.mxu0  ;;  %12225 = vmatmul.mubr.msk.f32.gmra.mxu0 %vm879_vm2, %v15107_v46  ;;  %2765 = vmatprep.mubr.f32.mxu1 %v1984_v25  ;;  %v1978_v25 = vld [vmem:[#allocation6 + $0x1198] sm:$0xff] }
 0x4d7   :  { %12227 = vmatprep.mubr.msk.f32.mxu0 %vm879_vm2, %v15109_v18  ;;  %v2524_v50 = vpop.f32.mrf.mxu1 }
 0x4d8   :  { %v3309_v13 = vpop.f32.mrf.mxu0 }
 0x4d9   :  { %v15244_v39 = vpop.f32.mrf.mxu1  ;;  %2766 = vmatmul.mubr.f32.gmra.mxu1 %v1983_v6  ;;  %v1977_v6 = vld [vmem:[#allocation6 + $0x1190] sm:$0xff] }
 0x4da   :  { %v15246_v48 = vpop.f32.mrf.mxu0  ;;  %12228 = vmatmul.mubr.msk.f32.gmra.mxu0 %vm879_vm2, %v15111_v57  ;;  %2770 = vmatprep.mubr.f32.mxu1 %v1988_v22  ;;  %v1982_v22 = vld [vmem:[#allocation6 + $0x11b8] sm:$0xff] }
 0x4db   :  { %12230 = vmatprep.mubr.msk.f32.mxu0 %vm879_vm2, %v15113_v14  ;;  %v2529_v46 = vpop.f32.mrf.mxu1 }
 0x4dc   :  { %v3314_v33 = vpop.f32.mrf.mxu0 }
 0x4dd   :  { %v15252_v18 = vpop.f32.mrf.mxu1  ;;  %2771 = vmatmul.mubr.f32.gmra.mxu1 %v1987_v3  ;;  %v1981_v3 = vld [vmem:[#allocation6 + $0x11b0] sm:$0xff] }
 0x4de   :  { %v15254_v50 = vpop.f32.mrf.mxu0  ;;  %12231 = vmatmul.mubr.msk.f32.gmra.mxu0 %vm879_vm2, %v15115_v58  ;;  %3540 = vmatprep.mubr.f32.mxu1 %v1978_v25  ;;  %v1986_v25 = vld [vmem:[#allocation6 + $0x11d8] sm:$0xff] }
 0x4df   :  { %12233 = vmatprep.mubr.msk.f32.mxu0 %vm879_vm2, %v15117_v29  ;;  %v2534_v57 = vpop.f32.mrf.mxu1  ;;  %v18210_v29 = vrot.slane %v15144_v8, 2 }
 0x4e0   :  { %v3319_v13 = vpop.f32.mrf.mxu0 }
 0x4e1   :  { %v2537_v14 = vpop.f32.mrf.mxu1  ;;  %3541 = vmatmul.mubr.f32.vlgmr.msra.gmra.mxu1 %v1977_v6 }
 0x4e2   :  { %v3322_v46 = vpop.f32.mrf.mxu0  ;;  %12234 = vmatmul.mubr.msk.f32.gmra.mxu0 %vm879_vm2, %v15119_v21  ;;  %3545 = vmatprep.mubr.f32.mxu1 %v1982_v22  ;;  %v1985_v22 = vld [vmem:[#allocation6 + $0x11d0] sm:$0xff] }
 0x4e3   :  { %v15262_v33 = vadd.f32 %v3322_v46, %v2537_v14  ;;  %12236 = vmatprep.mubr.msk.f32.mxu0 %vm879_vm2, %v15121_v63  ;;  %v2539_v58 = vpop.f32.mrf.mxu1  ;;  %12142 = vmatpush3.msk.msra.mxu1 %vm3614_vm3, %v18210_v29  ;;  %v1990_v14 = vld [vmem:[#allocation6 + $0x11f8] sm:$0xff] }
 0x4e4   :  { %v3324_v57 = vpop.f32.mrf.mxu0  ;;  %12167 = vmatprep.subr.msk.mxu1 %vm3614_vm3, %v15144_v8 }
 0x4e5   :  { %v2542_v6 = vpop.f32.mrf.mxu1  ;;  %3546 = vmatmul.mubr.f32.gmra.mxu1 %v1981_v3  ;;  %v1989_v3 = vld [vmem:[#allocation6 + $0x11f0] sm:$0xff] }
 0x4e6   :  { %v3327_v21 = vpop.f32.mrf.mxu0  ;;  %12237 = vmatmul.mubr.msk.f32.gmra.mxu0 %vm879_vm2, %v15123_v27  ;;  %3550 = vmatprep.mubr.f32.mxu1 %v1986_v25 }
 0x4e7   :  { %v15273_v13 = vadd.f32 %v3327_v21, %v2542_v6  ;;  %12239 = vmatprep.mubr.msk.f32.mxu0 %vm879_vm2, %v15125_v59  ;;  %v2544_v63 = vpop.f32.mrf.mxu1 }
 0x4e8   :  { %v3329_v46 = vpop.f32.mrf.mxu0 }
 0x4e9   :  { %v2547_v58 = vpop.f32.mrf.mxu1  ;;  %3551 = vmatmul.mubr.f32.gmra.mxu1 %v1985_v22  ;;  %v3273_v46 = vadd.f32 %v15197_v2, %v15195_v11  ;;  %v3283_v2 = vadd.f32 %v15205_v17, %v15203_v24  ;;  %v3293_v24 = vadd.f32 %v15213_v32, %v15211_v31  ;;  %v3303_v31 = vadd.f32 %v15224_v9, %v15222_v7 }
 0x4ea   :  { %v3332_v29 = vpop.f32.mrf.mxu0  ;;  %12240 = vmatmul.mubr.msk.f32.gmra.mxu0 %vm879_vm2, %v15127_v62  ;;  %3555 = vmatprep.mubr.f32.mxu1 %v1990_v14  ;;  %v3313_v7 = vadd.f32 %v15246_v48, %v15244_v39 }
 0x4eb   :  { %v15279_v57 = vadd.f32 %v3332_v29, %v2547_v58  ;;  %12242 = vmatprep.mubr.msk.f32.mxu0 %vm879_vm2, %v15129_v42  ;;  %v2549_v27 = vpop.f32.mrf.mxu1  ;;  %v3957_v42 = vrot.slane %v15144_v8, 4 }
 0x4ec   :  { %v3334_v25 = vpop.f32.mrf.mxu0 }
 0x4ed   :  { %v2552_v6 = vpop.f32.mrf.mxu1  ;;  %3556 = vmatmul.mubr.f32.gmra.mxu1 %v1989_v3 }
 0x4ee   :  { %v3337_v59 = vpop.f32.mrf.mxu0  ;;  %12243 = vmatmul.mubr.msk.f32.gmra.mxu0 %vm879_vm2, %v15131_v40  ;;  %12143 = vmatprep.mubr.msk.f32.mxu1 %vm879_vm2, %v15037_v38 }
 0x4ef   :  { %v15287_v21 = vadd.f32 %v3337_v59, %v2552_v6  ;;  %12273 = vmatprep.mubr.msk.f32.mxu0 %vm879_vm2, %v15183_v56  ;;  %v2554_v62 = vpop.f32.mrf.mxu1 }
 0x4f0   :  { %v3339_v22 = vpop.f32.mrf.mxu0  ;;  %v18211_v62 = vld [vmem:[#allocation35_spill] sm:$0xff] }
 0x4f1   :  { %v2557_v63 = vpop.f32.mrf.mxu1  ;;  %12144 = vmatmul.mubr.msk.f32.vlgmr.msra.gmra.mxu1 %vm879_vm2, %v15039_v35 }
 0x4f2   :  { %v3342_v14 = vpop.f32.mrf.mxu0  ;;  %12274 = vmatmul.mubr.msk.f32.vlgmr.msra.gmra.mxu0 %vm879_vm2, %v15185_v34  ;;  %12146 = vmatprep.mubr.msk.f32.mxu1 %vm879_vm2, %v15041_v5 }
 0x4f3   :  { %v15298_v38 = vadd.f32 %v3342_v14, %v2557_v63  ;;  %12276 = vmatprep.mubr.msk.f32.mxu0 %vm879_vm2, %v15187_v52  ;;  %v2559_v56 = vpop.f32.mrf.mxu1  ;;  %12168 = vmatpush3.msk.msra.mxu1 %vm3614_vm3, %v15144_v8  ;;  %v18213_v14 = vld [vmem:[#allocation37_spill] sm:$0xff] }
 0x4f4   :  { %v3344_v40 = vpop.f32.mrf.mxu0  ;;  %12324 = vmatpush3.msk.msra.mxu0 %vm3614_vm3, %v5017_v60  ;;  %12193 = vmatprep.subr.msk.mxu1 %vm3614_vm3, %v3957_v42 }
 0x4f5   :  { %v2562_v35 = vpop.f32.mrf.mxu1  ;;  %12147 = vmatmul.mubr.msk.f32.gmra.mxu1 %vm879_vm2, %v15043_v55  ;;  %v18214_v40 = vld [vmem:[#allocation20_spill] sm:$0xff] }
 0x4f6   :  { %v3347_v5 = vpop.f32.mrf.mxu0  ;;  %12277 = vmatmul.mubr.msk.f32.gmra.mxu0 %vm879_vm2, %v15189_v37  ;;  %12149 = vmatprep.mubr.msk.f32.mxu1 %vm879_vm2, %v15045_v45  ;;  %v3278_v45 = vadd.f32 %v15201_v43, %v15199_v30  ;;  %v3288_v30 = vadd.f32 %v15209_v0, %v15207_v23  ;;  %v3298_v23 = vadd.f32 %v15217_v54, %v15215_v4 }
 0x4f7   :  { %v15316_v52 = vadd.f32 %v3347_v5, %v2562_v35  ;;  %12279 = vmatprep.mubr.msk.f32.mxu0 %vm879_vm2, %v15191_v36  ;;  %v2564_v34 = vpop.f32.mrf.mxu1  ;;  %v3308_v4 = vadd.f32 %v15238_v1, %v15236_v49  ;;  %v3318_v49 = vadd.f32 %v15254_v50, %v15252_v18  ;;  %v18212_v50 = vld [vmem:[#allocation36_spill] sm:$0xff] }
 0x4f8   :  { %v3349_v60 = vpop.f32.mrf.mxu0  ;;  %v18215_v34 = vld [vmem:[#allocation32_spill] sm:$0xff] }
 0x4f9   :  { %v2567_v58 = vpop.f32.mrf.mxu1  ;;  %12150 = vmatmul.mubr.msk.f32.gmra.mxu1 %vm879_vm2, %v15047_v10 }
 0x4fa   :  { %v3352_v55 = vpop.f32.mrf.mxu0  ;;  %12280 = vmatmul.mubr.msk.f32.gmra.mxu0 %vm879_vm2, %v15193_v41  ;;  %12152 = vmatprep.mubr.msk.f32.mxu1 %vm879_vm2, %v15049_v47 }
 0x4fb   :  { %v15328_v37 = vadd.f32 %v3352_v55, %v2567_v58  ;;  %12282 = vmatprep.mubr.msk.f32.mxu0 %vm879_vm2, %v3273_v46  ;;  %v2569_v36 = vpop.f32.mrf.mxu1  ;;  %v18216_v46 = vld [vmem:[#allocation47_spill] sm:$0xff] }
 0x4fc   :  { %v3354_v11 = vpop.f32.mrf.mxu0 }
 0x4fd   :  { %v2572_v10 = vpop.f32.mrf.mxu1  ;;  %12153 = vmatmul.mubr.msk.f32.gmra.mxu1 %vm879_vm2, %v15051_v53 }
 0x4fe   :  { %v3357_v41 = vpop.f32.mrf.mxu0  ;;  %12283 = vmatmul.mubr.msk.f32.gmra.mxu0 %vm879_vm2, %v3278_v45  ;;  %12155 = vmatprep.mubr.msk.f32.mxu1 %vm879_vm2, %v15053_v51  ;;  %v18217_v45 = vld [vmem:[#allocation31_spill] sm:$0xff] }
 0x4ff   :  { %v15340_v47 = vadd.f32 %v3357_v41, %v2572_v10  ;;  %12285 = vmatprep.mubr.msk.f32.mxu0 %vm879_vm2, %v3283_v2  ;;  %v2574_v29 = vpop.f32.mrf.mxu1  ;;  %v18218_v2 = vld [vmem:[#allocation46_spill] sm:$0xff] }
 0x500   :  { %v3359_v43 = vpop.f32.mrf.mxu0 }
 0x501   :  { %v2577_v17 = vpop.f32.mrf.mxu1  ;;  %12156 = vmatmul.mubr.msk.f32.gmra.mxu1 %vm879_vm2, %v15055_v15  ;;  %v18219_v43 = vld [vmem:[#allocation30_spill] sm:$0xff] }
 0x502   :  { %v3362_v53 = vpop.f32.mrf.mxu0  ;;  %12286 = vmatmul.mubr.msk.f32.gmra.mxu0 %vm879_vm2, %v3288_v30  ;;  %12158 = vmatprep.mubr.msk.f32.mxu1 %vm879_vm2, %v15057_v12 }
 0x503   :  { %v15352_v51 = vadd.f32 %v3362_v53, %v2577_v17  ;;  %12288 = vmatprep.mubr.msk.f32.mxu0 %vm879_vm2, %v3293_v24  ;;  %v2579_v3 = vpop.f32.mrf.mxu1  ;;  %v18220_v17 = vld [vmem:[#allocation45_spill] sm:$0xff] }
 0x504   :  { %v3364_v0 = vpop.f32.mrf.mxu0 }
 0x505   :  { %v2582_v32 = vpop.f32.mrf.mxu1  ;;  %12159 = vmatmul.mubr.msk.f32.gmra.mxu1 %vm879_vm2, %v15059_v61 }
 0x506   :  { %v3367_v15 = vpop.f32.mrf.mxu0  ;;  %12289 = vmatmul.mubr.msk.f32.gmra.mxu0 %vm879_vm2, %v3298_v23  ;;  %12161 = vmatprep.mubr.msk.f32.mxu1 %vm879_vm2, %v15061_v26 }
 0x507   :  { %v15364_v12 = vadd.f32 %v3367_v15, %v2582_v32  ;;  %12291 = vmatprep.mubr.msk.f32.mxu0 %vm879_vm2, %v3303_v31  ;;  %v2584_v27 = vpop.f32.mrf.mxu1  ;;  %v18221_v31 = vld [vmem:[#allocation29_spill] sm:$0xff]  ;;  %v18222_v15 = vld [vmem:[#allocation44_spill] sm:$0xff] }
 0x508   :  { %v3369_v54 = vpop.f32.mrf.mxu0 }
 0x509   :  { %v2587_v9 = vpop.f32.mrf.mxu1  ;;  %12162 = vmatmul.mubr.msk.f32.gmra.mxu1 %vm879_vm2, %v15063_v44 }
 0x50a   :  { %v3372_v61 = vpop.f32.mrf.mxu0  ;;  %12292 = vmatmul.mubr.msk.f32.gmra.mxu0 %vm879_vm2, %v3308_v4  ;;  %12164 = vmatprep.mubr.msk.f32.mxu1 %vm879_vm2, %v15065_v16 }
 0x50b   :  { %v15376_v26 = vadd.f32 %v3372_v61, %v2587_v9  ;;  %12294 = vmatprep.mubr.msk.f32.mxu0 %vm879_vm2, %v3313_v7  ;;  %v2589_v25 = vpop.f32.mrf.mxu1  ;;  %v18223_v9 = vld [vmem:[#allocation28_spill] sm:$0xff] }
 0x50c   :  { %v3374_v1 = vpop.f32.mrf.mxu0  ;;  %v18224_v25 = vld [vmem:[#allocation43_spill] sm:$0xff] }
 0x50d   :  { %v2592_v39 = vpop.f32.mrf.mxu1  ;;  %12165 = vmatmul.mubr.msk.f32.gmra.mxu1 %vm879_vm2, %v15067_v28 }
 0x50e   :  { %v3377_v44 = vpop.f32.mrf.mxu0  ;;  %12295 = vmatmul.mubr.msk.f32.gmra.mxu0 %vm879_vm2, %v3318_v49  ;;  %12169 = vmatprep.mubr.msk.f32.mxu1 %vm879_vm2, %v15005_v19 }
 0x50f   :  { %v15386_v16 = vadd.f32 %v3377_v44, %v2592_v39  ;;  %v2594_v48 = vpop.f32.mrf.mxu1 }
 0x510   :  { %v3379_v6 = vpop.f32.mrf.mxu0  ;;  %v18225_v48 = vld [vmem:[#allocation27_spill] sm:$0xff] }
 0x511   :  { %v2597_v59 = vpop.f32.mrf.mxu1  ;;  %12170 = vmatmul.mubr.msk.f32.vlgmr.msra.gmra.mxu1 %vm879_vm2, %v18211_v62 }
 0x512   :  { %v3382_v18 = vpop.f32.mrf.mxu0  ;;  %12172 = vmatprep.mubr.msk.f32.mxu1 %vm879_vm2, %v18212_v50  ;;  %12194 = vmatpush3.msk.msra.mxu1 %vm3614_vm3, %v3957_v42  ;;  %v15439_v50 = vld [vmem:[%s18161_s0 + $0x8] sm:$0xff] }
 0x513   :  { %v15395_v28 = vadd.f32 %v3382_v18, %v2597_v59  ;;  %v2599_v22 = vpop.f32.mrf.mxu1  ;;  %12245 = vmatprep.subr.msk.mxu1 %vm3614_vm3, %v15150_v20  ;;  %v18226_v59 = vld [vmem:[#allocation42_spill] sm:$0xff] }
 0x514   :  { %v3384_v19 = vpop.f32.mrf.mxu0  ;;  %v4805_v22 = vrot.slane %v15439_v50, 4 }
 0x515   :  { %v2602_v63 = vpop.f32.mrf.mxu1  ;;  %12173 = vmatmul.mubr.msk.f32.gmra.mxu1 %vm879_vm2, %v18213_v14  ;;  %v18227_v14 = vld [vmem:[#allocation26_spill] sm:$0xff] }
 0x516   :  { %v3387_v56 = vpop.f32.mrf.mxu0  ;;  %12175 = vmatprep.mubr.msk.f32.mxu1 %vm879_vm2, %v18214_v40  ;;  %v18228_v40 = vld [vmem:[#allocation41_spill] sm:$0xff] }
 0x517   :  { %v15403_v35 = vadd.f32 %v3387_v56, %v2602_v63  ;;  %v2604_v8 = vpop.f32.mrf.mxu1 }
 0x518   :  { %v3389_v5 = vpop.f32.mrf.mxu0 }
 0x519   :  { %v2607_v42 = vpop.f32.mrf.mxu1  ;;  %12176 = vmatmul.mubr.msk.f32.gmra.mxu1 %vm879_vm2, %v18215_v34 }
 0x51a   :  { %v3392_v60 = vpop.f32.mrf.mxu0  ;;  %12178 = vmatprep.mubr.msk.f32.mxu1 %vm879_vm2, %v18216_v46 }
 0x51b   :  { %v15409_v20 = vadd.f32 %v3392_v60, %v2607_v42  ;;  %v2609_v58 = vpop.f32.mrf.mxu1  ;;  %v18229_v60 = vld [vmem:[#allocation25_spill] sm:$0xff] }
 0x51c   :  { %v3394_v55 = vpop.f32.mrf.mxu0  ;;  %v18230_v58 = vld [vmem:[#allocation40_spill] sm:$0xff] }
 0x51d   :  { %v2612_v36 = vpop.f32.mrf.mxu1  ;;  %12179 = vmatmul.mubr.msk.f32.gmra.mxu1 %vm879_vm2, %v18217_v45 }
 0x51e   :  { %v3397_v11 = vpop.f32.mrf.mxu0  ;;  %12181 = vmatprep.mubr.msk.f32.mxu1 %vm879_vm2, %v18218_v2  ;;  %v18231_v2 = vld [vmem:[#allocation24_spill] sm:$0xff] }
 0x51f   :  { %v15415_v10 = vadd.f32 %v3397_v11, %v2612_v36  ;;  %v2614_v41 = vpop.f32.mrf.mxu1 }
 0x520   :  { %v3399_v29 = vpop.f32.mrf.mxu0 }
 0x521   :  { %v2617_v30 = vpop.f32.mrf.mxu1  ;;  %12182 = vmatmul.mubr.msk.f32.gmra.mxu1 %vm879_vm2, %v18219_v43  ;;  %v18232_v29 = vld [vmem:[#allocation39_spill] sm:$0xff] }
 0x522   :  { %v3402_v24 = vpop.f32.mrf.mxu0  ;;  %12184 = vmatprep.mubr.msk.f32.mxu1 %vm879_vm2, %v18220_v17 }
 0x523   :  { %v3403_v53 = vadd.f32 %v3402_v24, %v2617_v30  ;;  %v2619_v3 = vpop.f32.mrf.mxu1 }
 0x524   :  { %v3404_v23 = vpop.f32.mrf.mxu0 }
 0x525   :  { %12325 = vmatprep.mubr.msk.f32.mxu0 %vm879_vm2, %v3403_v53  ;;  %v2622_v0 = vpop.f32.mrf.mxu1  ;;  %12185 = vmatmul.mubr.msk.f32.gmra.mxu1 %vm879_vm2, %v18221_v31  ;;  %v18233_v53 = vld [vmem:[#allocation23_spill] sm:$0xff]  ;;  %v18234_v23 = vld [vmem:[#allocation38_spill] sm:$0xff] }
 0x526   :  { %v3407_v32 = vpop.f32.mrf.mxu0  ;;  %12187 = vmatprep.mubr.msk.f32.mxu1 %vm879_vm2, %v18222_v15 }
 0x527   :  { %v3408_v27 = vadd.f32 %v3407_v32, %v2622_v0  ;;  %v2624_v4 = vpop.f32.mrf.mxu1 }
 0x528   :  { %v3409_v54 = vpop.f32.mrf.mxu0 }
 0x529   :  { %12326 = vmatmul.mubr.msk.f32.vlgmr.msra.gmra.mxu0 %vm879_vm2, %v3408_v27  ;;  %v2627_v7 = vpop.f32.mrf.mxu1  ;;  %12188 = vmatmul.mubr.msk.f32.gmra.mxu1 %vm879_vm2, %v18223_v9  ;;  %v18235_v27 = vld [vmem:[#allocation22_spill] sm:$0xff]  ;;  %v18236_v54 = vld [vmem:[#allocation48_spill] sm:$0xff] }
 0x52a   :  { %v3412_v61 = vpop.f32.mrf.mxu0  ;;  %12190 = vmatprep.mubr.msk.f32.mxu1 %vm879_vm2, %v18224_v25 }
 0x52b   :  { %v3413_v49 = vadd.f32 %v3412_v61, %v2627_v7  ;;  %v2629_v1 = vpop.f32.mrf.mxu1 }
 0x52c   :  { %v3414_v39 = vpop.f32.mrf.mxu0 }
 0x52d   :  { %12328 = vmatprep.mubr.msk.f32.mxu0 %vm879_vm2, %v3413_v49  ;;  %v2632_v44 = vpop.f32.mrf.mxu1  ;;  %12191 = vmatmul.mubr.msk.f32.gmra.mxu1 %vm879_vm2, %v18225_v48  ;;  %v18237_v49 = vld [vmem:[#allocation49_spill] sm:$0xff]  ;;  %v18238_v39 = vld [vmem:[#allocation50_spill] sm:$0xff] }
 0x52e   :  { %v3417_v6 = vpop.f32.mrf.mxu0  ;;  %12195 = vmatprep.mubr.msk.f32.mxu1 %vm879_vm2, %v18226_v59 }
 0x52f   :  { %v3418_v62 = vadd.f32 %v3417_v6, %v2632_v44  ;;  %v2634_v18 = vpop.f32.mrf.mxu1 }
 0x530   :  { %v3419_v19 = vpop.f32.mrf.mxu0 }
 0x531   :  { %12329 = vmatmul.mubr.msk.f32.gmra.mxu0 %vm879_vm2, %v3418_v62  ;;  %v2637_v63 = vpop.f32.mrf.mxu1  ;;  %12196 = vmatmul.mubr.msk.f32.vlgmr.msra.gmra.mxu1 %vm879_vm2, %v18227_v14  ;;  %v18239_v62 = vld [vmem:[#allocation51_spill] sm:$0xff]  ;;  %v18240_v19 = vld [vmem:[#allocation52_spill] sm:$0xff] }
 0x532   :  { %v3422_v56 = vpop.f32.mrf.mxu0  ;;  %12198 = vmatprep.mubr.msk.f32.mxu1 %vm879_vm2, %v18228_v40  ;;  %12246 = vmatpush3.msk.msra.mxu1 %vm3614_vm3, %v15439_v50 }
 0x533   :  { %v3423_v8 = vadd.f32 %v3422_v56, %v2637_v63  ;;  %v2639_v5 = vpop.f32.mrf.mxu1  ;;  %12297 = vmatprep.subr.msk.mxu1 %vm3614_vm3, %v4805_v22 }
 0x534   :  { %v3424_v42 = vpop.f32.mrf.mxu0 }
 0x535   :  { %12331 = vmatprep.mubr.msk.f32.mxu0 %vm879_vm2, %v3423_v8  ;;  %v2642_v34 = vpop.f32.mrf.mxu1  ;;  %12199 = vmatmul.mubr.msk.f32.gmra.mxu1 %vm879_vm2, %v18229_v60  ;;  %v18241_v8 = vld [vmem:[#allocation53_spill] sm:$0xff]  ;;  %v18242_v42 = vld [vmem:[#allocation54_spill] sm:$0xff] }
 0x536   :  { %v3427_v46 = vpop.f32.mrf.mxu0  ;;  %12201 = vmatprep.mubr.msk.f32.mxu1 %vm879_vm2, %v18230_v58  ;;  %v15490_v58 = vld [vmem:[%s18161_s0 + $0x10] sm:$0x3]  ;;  %s13103_s0 = smov 116  }
 0x537   :  { %v3428_v55 = vadd.f32 %v3427_v46, %v2642_v34  ;;  %v2644_v36 = vpop.f32.mrf.mxu1 }
 0x538   :  { %v3429_v45 = vpop.f32.mrf.mxu0  ;;  %v18243_v36 = vld [vmem:[#allocation55_spill] sm:$0xff] }
 0x539   :  { %12332 = vmatmul.mubr.msk.f32.gmra.mxu0 %vm879_vm2, %v3428_v55  ;;  %v2647_v11 = vpop.f32.mrf.mxu1  ;;  %12202 = vmatmul.mubr.msk.f32.gmra.mxu1 %vm879_vm2, %v18231_v2 }
 0x53a   :  { %v3432_v41 = vpop.f32.mrf.mxu0  ;;  %12204 = vmatprep.mubr.msk.f32.mxu1 %vm879_vm2, %v18232_v29 }
 0x53b   :  { %v3433_v30 = vadd.f32 %v3432_v41, %v2647_v11  ;;  %v2649_v43 = vpop.f32.mrf.mxu1  ;;  %v18244_v11 = vld [vmem:[#allocation56_spill] sm:$0xff] }
 0x53c   :  { %v3434_v24 = vpop.f32.mrf.mxu0  ;;  %v18245_v43 = vld [vmem:[#allocation57_spill] sm:$0xff] }
 0x53d   :  { %12334 = vmatprep.mubr.msk.f32.mxu0 %vm879_vm2, %v3433_v30  ;;  %v2652_v17 = vpop.f32.mrf.mxu1  ;;  %12205 = vmatmul.mubr.msk.f32.gmra.mxu1 %vm879_vm2, %v18233_v53 }
 0x53e   :  { %v3437_v3 = vpop.f32.mrf.mxu0  ;;  %12207 = vmatprep.mubr.msk.f32.mxu1 %vm879_vm2, %v18234_v23  ;;  %v18247_v23 = vld [vmem:[#allocation59_spill] sm:$0xff] }
 0x53f   :  { %v3438_v0 = vadd.f32 %v3437_v3, %v2652_v17  ;;  %v2654_v31 = vpop.f32.mrf.mxu1  ;;  %v18246_v17 = vld [vmem:[#allocation58_spill] sm:$0xff] }
 0x540   :  { %v3439_v32 = vpop.f32.mrf.mxu0  ;;  %v18248_v31 = vld [vmem:[#allocation60_spill] sm:$0xff] }
 0x541   :  { %12335 = vmatmul.mubr.msk.f32.gmra.mxu0 %vm879_vm2, %v3438_v0  ;;  %v2657_v15 = vpop.f32.mrf.mxu1  ;;  %12208 = vmatmul.mubr.msk.f32.gmra.mxu1 %vm879_vm2, %v18235_v27 }
 0x542   :  { %v3442_v4 = vpop.f32.mrf.mxu0  ;;  %12210 = vmatprep.mubr.msk.f32.mxu1 %vm879_vm2, %v18236_v54  ;;  %v18249_v54 = vld [vmem:[#allocation61_spill] sm:$0xff] }
 0x543   :  { %v3443_v7 = vadd.f32 %v3442_v4, %v2657_v15  ;;  %v2659_v9 = vpop.f32.mrf.mxu1 }
 0x544   :  { %v3444_v61 = vpop.f32.mrf.mxu0  ;;  %v18250_v9 = vld [vmem:[#allocation62_spill] sm:$0xff] }
 0x545   :  { %12337 = vmatprep.mubr.msk.f32.mxu0 %vm879_vm2, %v3443_v7  ;;  %v2662_v25 = vpop.f32.mrf.mxu1  ;;  %12211 = vmatmul.mubr.msk.f32.gmra.mxu1 %vm879_vm2, %v18237_v49 }
 0x546   :  { %v3447_v1 = vpop.f32.mrf.mxu0  ;;  %12213 = vmatprep.mubr.msk.f32.mxu1 %vm879_vm2, %v18238_v39  ;;  %v18251_v39 = vld [vmem:[#allocation63_spill] sm:$0xff] }
 0x547   :  { %v3448_v44 = vadd.f32 %v3447_v1, %v2662_v25  ;;  %v2664_v48 = vpop.f32.mrf.mxu1 }
 0x548   :  { %v3449_v6 = vpop.f32.mrf.mxu0  ;;  %v18252_v48 = vld [vmem:[#allocation64_spill] sm:$0xff] }
 0x549   :  { %12338 = vmatmul.mubr.msk.f32.gmra.mxu0 %vm879_vm2, %v3448_v44  ;;  %v2667_v59 = vpop.f32.mrf.mxu1  ;;  %12214 = vmatmul.mubr.msk.f32.gmra.mxu1 %vm879_vm2, %v18239_v62 }
 0x54a   :  { %v3452_v18 = vpop.f32.mrf.mxu0  ;;  %12216 = vmatprep.mubr.msk.f32.mxu1 %vm879_vm2, %v18240_v19 }
 0x54b   :  { %v3453_v63 = vadd.f32 %v3452_v18, %v2667_v59  ;;  %v2669_v14 = vpop.f32.mrf.mxu1  ;;  %v18253_v18 = vld [vmem:[#allocation65_spill] sm:$0xff] }
 0x54c   :  { %v3454_v56 = vpop.f32.mrf.mxu0 }
 0x54d   :  { %12340 = vmatprep.mubr.msk.f32.mxu0 %vm879_vm2, %v3453_v63  ;;  %v2672_v40 = vpop.f32.mrf.mxu1  ;;  %12217 = vmatmul.mubr.msk.f32.gmra.mxu1 %vm879_vm2, %v18241_v8  ;;  %v18254_v63 = vld [vmem:[#allocation66_spill] sm:$0xff]  ;;  %v18255_v8 = vld [vmem:[#allocation67_spill] sm:$0xff] }
 0x54e   :  { %v3457_v5 = vpop.f32.mrf.mxu0  ;;  %12247 = vmatprep.mubr.msk.f32.mxu1 %vm879_vm2, %v18242_v42  ;;  %v18256_v42 = vld [vmem:[#allocation68_spill] sm:$0xff] }
 0x54f   :  { %v3458_v34 = vadd.f32 %v3457_v5, %v2672_v40  ;;  %v2674_v60 = vpop.f32.mrf.mxu1 }
 0x550   :  { %v3459_v46 = vpop.f32.mrf.mxu0 }
 0x551   :  { %12341 = vmatmul.mubr.msk.f32.gmra.mxu0 %vm879_vm2, %v3458_v34  ;;  %v2677_v55 = vpop.f32.mrf.mxu1  ;;  %12248 = vmatmul.mubr.msk.f32.vlgmr.msra.gmra.mxu1 %vm879_vm2, %v18243_v36 }
 0x552   :  { %v3462_v45 = vpop.f32.mrf.mxu0  ;;  %12250 = vmatprep.mubr.msk.f32.mxu1 %vm879_vm2, %v18244_v11  ;;  %12298 = vmatpush3.msk.msra.mxu1 %vm3614_vm3, %v4805_v22 }
 0x553   :  { %v3463_v2 = vadd.f32 %v3462_v45, %v2677_v55  ;;  %v2679_v41 = vpop.f32.mrf.mxu1  ;;  %12349 = vmatprep.subr.msk.mxu1 %vm3614_vm3, %v15490_v58  ;;  %v18257_v55 = vld [vmem:[#allocation69_spill] sm:$0xff] }
 0x554   :  { %v3464_v29 = vpop.f32.mrf.mxu0 }
 0x555   :  { %12343 = vmatprep.mubr.msk.f32.mxu0 %vm879_vm2, %v3463_v2  ;;  %v2682_v30 = vpop.f32.mrf.mxu1  ;;  %12251 = vmatmul.mubr.msk.f32.gmra.mxu1 %vm879_vm2, %v18245_v43 }
 0x556   :  { %v3467_v24 = vpop.f32.mrf.mxu0  ;;  %12253 = vmatprep.mubr.msk.f32.mxu1 %vm879_vm2, %v18246_v17 }
 0x557   :  { %v3468_v53 = vadd.f32 %v3467_v24, %v2682_v30  ;;  %v2684_v50 = vpop.f32.mrf.mxu1 }
 0x558   :  { %v3469_v3 = vpop.f32.mrf.mxu0 }
 0x559   :  { %12344 = vmatmul.mubr.msk.f32.gmra.mxu0 %vm879_vm2, %v3468_v53  ;;  %v2687_v22 = vpop.f32.mrf.mxu1  ;;  %12254 = vmatmul.mubr.msk.f32.gmra.mxu1 %vm879_vm2, %v18247_v23 }
 0x55a   :  { %v3472_v0 = vpop.f32.mrf.mxu0  ;;  %12256 = vmatprep.mubr.msk.f32.mxu1 %vm879_vm2, %v18248_v31 }
 0x55b   :  { %v3473_v32 = vadd.f32 %v3472_v0, %v2687_v22  ;;  %v2689_v15 = vpop.f32.mrf.mxu1 }
 0x55c   :  { %v3474_v27 = vpop.f32.mrf.mxu0 }
 0x55d   :  { %12346 = vmatprep.mubr.msk.f32.mxu0 %vm879_vm2, %v3473_v32  ;;  %v2692_v4 = vpop.f32.mrf.mxu1  ;;  %12257 = vmatmul.mubr.msk.f32.gmra.mxu1 %vm879_vm2, %v18249_v54 }
 0x55e   :  { %v3477_v7 = vpop.f32.mrf.mxu0  ;;  %12259 = vmatprep.mubr.msk.f32.mxu1 %vm879_vm2, %v18250_v9 }
 0x55f   :  { %v3478_v61 = vadd.f32 %v3477_v7, %v2692_v4  ;;  %v2694_v25 = vpop.f32.mrf.mxu1 }
 0x560   :  { %v3479_v49 = vpop.f32.mrf.mxu0 }
 0x561   :  { %12347 = vmatmul.mubr.msk.f32.gmra.mxu0 %vm879_vm2, %v3478_v61  ;;  %v15518_v1 = vpop.f32.mrf.mxu1  ;;  %12260 = vmatmul.mubr.msk.f32.gmra.mxu1 %vm879_vm2, %v18251_v39 }
 0x562   :  { %v15522_v44 = vpop.f32.mrf.mxu0  ;;  %12262 = vmatprep.mubr.msk.f32.mxu1 %vm879_vm2, %v18252_v48 }
 0x563   :  { %v2699_v6 = vpop.f32.mrf.mxu1  ;;  %v3483_v15 = vadd.f32 %v15522_v44, %v15518_v1 }
 0x564   :  { %v3484_v59 = vpop.f32.mrf.mxu0 }
 0x565   :  { %v15526_v62 = vpop.f32.mrf.mxu1  ;;  %12263 = vmatmul.mubr.msk.f32.gmra.mxu1 %vm879_vm2, %v18253_v18 }
 0x566   :  { %v15530_v19 = vpop.f32.mrf.mxu0  ;;  %12265 = vmatprep.mubr.msk.f32.mxu1 %vm879_vm2, %v18254_v63 }
 0x567   :  { %v2704_v14 = vpop.f32.mrf.mxu1  ;;  %v3488_v4 = vadd.f32 %v15530_v19, %v15526_v62 }
 0x568   :  { %v3489_v56 = vpop.f32.mrf.mxu0 }
 0x569   :  { %v2707_v40 = vpop.f32.mrf.mxu1  ;;  %12266 = vmatmul.mubr.msk.f32.gmra.mxu1 %vm879_vm2, %v18255_v8 }
 0x56a   :  { %v3492_v5 = vpop.f32.mrf.mxu0  ;;  %12268 = vmatprep.mubr.msk.f32.mxu1 %vm879_vm2, %v18256_v42 }
 0x56b   :  { %v2709_v34 = vpop.f32.mrf.mxu1  ;;  %v3493_v54 = vadd.f32 %v3492_v5, %v2707_v40 }
 0x56c   :  { %v3494_v60 = vpop.f32.mrf.mxu0 }
 0x56d   :  { %v2712_v46 = vpop.f32.mrf.mxu1  ;;  %12269 = vmatmul.mubr.msk.f32.gmra.mxu1 %vm879_vm2, %v18257_v55 }
 0x56e   :  { %v3497_v36 = vpop.f32.mrf.mxu0  ;;  %12299 = vmatprep.mubr.msk.f32.mxu1 %vm879_vm2, %v15262_v33 }
 0x56f   :  { %v2714_v45 = vpop.f32.mrf.mxu1 }
 0x570   :  { %v3499_v11 = vpop.f32.mrf.mxu0 }
 0x571   :  { %v2717_v2 = vpop.f32.mrf.mxu1  ;;  %12300 = vmatmul.mubr.msk.f32.vlgmr.msra.gmra.mxu1 %vm879_vm2, %v15273_v13 }
 0x572   :  { %v3502_v41 = vpop.f32.mrf.mxu0  ;;  %12302 = vmatprep.mubr.msk.f32.mxu1 %vm879_vm2, %v15279_v57  ;;  %12350 = vmatpush3.msk.msra.mxu1 %vm3614_vm3, %v15490_v58 }
 0x573   :  { %v2719_v29 = vpop.f32.mrf.mxu1  ;;  %v3503_v25 = vadd.f32 %v3502_v41, %v2717_v2 }
 0x574   :  { %v3504_v30 = vpop.f32.mrf.mxu0 }
 0x575   :  { %v2722_v43 = vpop.f32.mrf.mxu1  ;;  %12303 = vmatmul.mubr.msk.f32.gmra.mxu1 %vm879_vm2, %v15287_v21 }
 0x576   :  { %v3507_v33 = vpop.f32.mrf.mxu0  ;;  %12305 = vmatprep.mubr.msk.f32.mxu1 %vm879_vm2, %v15298_v38 }
 0x577   :  { %v2724_v24 = vpop.f32.mrf.mxu1 }
 0x578   :  { %v3509_v17 = vpop.f32.mrf.mxu0 }
 0x579   :  { %v2727_v13 = vpop.f32.mrf.mxu1  ;;  %12306 = vmatmul.mubr.msk.f32.gmra.mxu1 %vm879_vm2, %v15316_v52 }
 0x57a   :  { %v3512_v57 = vpop.f32.mrf.mxu0  ;;  %12308 = vmatprep.mubr.msk.f32.mxu1 %vm879_vm2, %v15328_v37 }
 0x57b   :  { %v2729_v58 = vpop.f32.mrf.mxu1  ;;  %v3513_v39 = vadd.f32 %v3512_v57, %v2727_v13 }
 0x57c   :  { %v3514_v53 = vpop.f32.mrf.mxu0 }
 0x57d   :  { %v2732_v50 = vpop.f32.mrf.mxu1  ;;  %12309 = vmatmul.mubr.msk.f32.gmra.mxu1 %vm879_vm2, %v15340_v47 }
 0x57e   :  { %v3517_v21 = vpop.f32.mrf.mxu0  ;;  %12311 = vmatprep.mubr.msk.f32.mxu1 %vm879_vm2, %v15352_v51 }
 0x57f   :  { %v2734_v38 = vpop.f32.mrf.mxu1  ;;  %v3518_v48 = vadd.f32 %v3517_v21, %v2732_v50 }
 0x580   :  { %v3519_v3 = vpop.f32.mrf.mxu0 }
 0x581   :  { %v2737_v22 = vpop.f32.mrf.mxu1  ;;  %12312 = vmatmul.mubr.msk.f32.gmra.mxu1 %vm879_vm2, %v15364_v12 }
 0x582   :  { %v3522_v52 = vpop.f32.mrf.mxu0  ;;  %12314 = vmatprep.mubr.msk.f32.mxu1 %vm879_vm2, %v15376_v26 }
 0x583   :  { %v2739_v37 = vpop.f32.mrf.mxu1  ;;  %v3523_v59 = vadd.f32 %v3522_v52, %v2737_v22 }
 0x584   :  { %v3524_v23 = vpop.f32.mrf.mxu0 }
 0x585   :  { %v2742_v0 = vpop.f32.mrf.mxu1  ;;  %12315 = vmatmul.mubr.msk.f32.gmra.mxu1 %vm879_vm2, %v15386_v16 }
 0x586   :  { %v3527_v47 = vpop.f32.mrf.mxu0  ;;  %12317 = vmatprep.mubr.msk.f32.mxu1 %vm879_vm2, %v15395_v28 }
 0x587   :  { %v2744_v51 = vpop.f32.mrf.mxu1  ;;  %v3528_v18 = vadd.f32 %v3527_v47, %v2742_v0 }
 0x588   :  { %v3529_v31 = vpop.f32.mrf.mxu0 }
 0x589   :  { %v2747_v32 = vpop.f32.mrf.mxu1  ;;  %12318 = vmatmul.mubr.msk.f32.gmra.mxu1 %vm879_vm2, %v15403_v35 }
 0x58a   :  { %v3532_v12 = vpop.f32.mrf.mxu0  ;;  %12320 = vmatprep.mubr.msk.f32.mxu1 %vm879_vm2, %v15409_v20  ;;  %v3498_v20 = vadd.f32 %v3497_v36, %v2712_v46 }
 0x58b   :  { %v2749_v26 = vpop.f32.mrf.mxu1  ;;  %v3533_v63 = vadd.f32 %v3532_v12, %v2747_v32 }
 0x58c   :  { %v3534_v27 = vpop.f32.mrf.mxu0 }
 0x58d   :  { %v2752_v16 = vpop.f32.mrf.mxu1  ;;  %12321 = vmatmul.mubr.msk.f32.gmra.mxu1 %vm879_vm2, %v15415_v10  ;;  %v3508_v10 = vadd.f32 %v3507_v33, %v2722_v43 }
 0x58e   :  { %v3537_v28 = vpop.f32.mrf.mxu0  ;;  %12351 = vmatprep.mubr.msk.f32.mxu1 %vm879_vm2, %v3483_v15 }
 0x58f   :  { %v2754_v35 = vpop.f32.mrf.mxu1  ;;  %v3538_v56 = vadd.f32 %v3537_v28, %v2752_v16 }
 0x590   :  { %v3539_v7 = vpop.f32.mrf.mxu0 }
 0x591   :  { %v2757_v9 = vpop.f32.mrf.mxu1  ;;  %12352 = vmatmul.mubr.msk.f32.vlgmr.msra.gmra.mxu1 %vm879_vm2, %v3488_v4 }
 0x592   :  { %12354 = vmatprep.mubr.msk.f32.mxu1 %vm879_vm2, %v3493_v54  ;;  %v15602_v57 = vpop.f32.mrf.mxu0 }
 0x593   :  { %v2759_v61 = vpop.f32.mrf.mxu1 }
 0x594   :  { %v15606_v50 = vpop.f32.mrf.mxu0 }
 0x595   :  { %v2762_v49 = vpop.f32.mrf.mxu1  ;;  %12355 = vmatmul.mubr.msk.f32.gmra.mxu1 %vm879_vm2, %v3498_v20 }
 0x596   :  { %12357 = vmatprep.mubr.msk.f32.mxu1 %vm879_vm2, %v3503_v25  ;;  %v15610_v3 = vpop.f32.mrf.mxu0 }
 0x597   :  { %v2764_v1 = vpop.f32.mrf.mxu1 }
 0x598   :  { %v15614_v37 = vpop.f32.mrf.mxu0 }
 0x599   :  { %v2767_v44 = vpop.f32.mrf.mxu1  ;;  %12358 = vmatmul.mubr.msk.f32.gmra.mxu1 %vm879_vm2, %v3508_v10 }
 0x59a   :  { %12360 = vmatprep.mubr.msk.f32.mxu1 %vm879_vm2, %v3513_v39  ;;  %v15618_v51 = vpop.f32.mrf.mxu0 }
 0x59b   :  { %v2769_v6 = vpop.f32.mrf.mxu1 }
 0x59c   :  { %v15622_v26 = vpop.f32.mrf.mxu0 }
 0x59d   :  { %v2772_v62 = vpop.f32.mrf.mxu1  ;;  %12361 = vmatmul.mubr.msk.f32.gmra.mxu1 %vm879_vm2, %v3518_v48 }
 0x59e   :  { %12363 = vmatprep.mubr.msk.f32.mxu1 %vm879_vm2, %v3523_v59  ;;  %v15626_v28 = vpop.f32.mrf.mxu0 }
 0x59f   :  { %v2774_v19 = vpop.f32.mrf.mxu1 }
 0x5a0   :  { %v15630_v7 = vpop.f32.mrf.mxu0 }
 0x5a1   :  { %v3542_v14 = vpop.f32.mrf.mxu1  ;;  %12364 = vmatmul.mubr.msk.f32.gmra.mxu1 %vm879_vm2, %v3528_v18 }
 0x5a2   :  { %12366 = vmatprep.mubr.msk.f32.mxu1 %vm879_vm2, %v3533_v63  ;;  %v3543_v8 = vadd.f32 %v3542_v14, %v2757_v9  ;;  %v15634_v25 = vpop.f32.mrf.mxu0 }
 0x5a3   :  { %v3544_v40 = vpop.f32.mrf.mxu1 }
 0x5a4   :  { %v15638_v39 = vpop.f32.mrf.mxu0 }
 0x5a5   :  { %v3547_v5 = vpop.f32.mrf.mxu1  ;;  %12367 = vmatmul.mubr.msk.f32.gmra.mxu1 %vm879_vm2, %v3538_v56 }
 0x5a6   :  { %v3548_v42 = vadd.f32 %v3547_v5, %v2762_v49  ;;  %12369 = vmatprep.mubr.msk.f32.mxu1 %vm879_vm2, %v3543_v8  ;;  %v15642_v59 = vpop.f32.mrf.mxu0 }
 0x5a7   :  { %v3549_v34 = vpop.f32.mrf.mxu1 }
 0x5a8   :  { %v15646_v63 = vpop.f32.mrf.mxu0 }
 0x5a9   :  { %v3552_v60 = vpop.f32.mrf.mxu1  ;;  %12370 = vmatmul.mubr.msk.f32.gmra.mxu1 %vm879_vm2, %v3548_v42  ;;  %18258 = vst [vmem:[#allocation35_spill] sm:$0xff] %v15646_v63 }
 0x5aa   :  { %v3553_v46 = vadd.f32 %v3552_v60, %v2767_v44  ;;  %v15652_v8 = vpop.f32.mrf.mxu0 }
 0x5ab   :  { %v3554_v55 = vpop.f32.mrf.mxu1  ;;  %18259 = vst [vmem:[#allocation36_spill] sm:$0xff] %v15652_v8 }
 0x5ac   :  { %12372 = vmatprep.mubr.msk.f32.mxu1 %vm879_vm2, %v3553_v46  ;;  %v15658_v60 = vpop.f32.mrf.mxu0 }
 0x5ad   :  { %v3557_v36 = vpop.f32.mrf.mxu1  ;;  %18260 = vst [vmem:[#allocation37_spill] sm:$0xff] %v15658_v60 }
 0x5ae   :  { %v3558_v45 = vadd.f32 %v3557_v36, %v2772_v62 }
 0x5af   :  { %v3559_v11 = vpop.f32.mrf.mxu1 }
 0x5b0   :  { %12373 = vmatmul.mubr.msk.f32.gmra.mxu1 %vm879_vm2, %v3558_v45  ;;  %v15664_v45 = vpop.f32.mrf.mxu0 }
 0x5b1   :  { %v12145_v2 = vpop.f32.mrf.mxu1  ;;  %18261 = vst [vmem:[#allocation20_spill] sm:$0xff] %v15664_v45 }
 0x5b3   :  { %v15594_v41 = vpop.f32.mrf.mxu1 }
 0x5b5   :  { %v12148_v29 = vpop.f32.mrf.mxu1 }
 0x5b7   :  { %v15596_v30 = vpop.f32.mrf.mxu1 }
 0x5b9   :  { %v12151_v43 = vpop.f32.mrf.mxu1 }
 0x5bb   :  { %v15598_v33 = vpop.f32.mrf.mxu1 }
 0x5bd   :  { %v12154_v24 = vpop.f32.mrf.mxu1 }
 0x5bf   :  { %v15600_v17 = vpop.f32.mrf.mxu1 }
 0x5c1   :  { %v12157_v13 = vpop.f32.mrf.mxu1 }
 0x5c3   :  { %v15604_v58 = vpop.f32.mrf.mxu1 }
 0x5c5   :  { %v12160_v53 = vpop.f32.mrf.mxu1 }
 0x5c7   :  { %v15608_v21 = vpop.f32.mrf.mxu1 }
 0x5c9   :  { %v12163_v38 = vpop.f32.mrf.mxu1 }
 0x5cb   :  { %v15612_v22 = vpop.f32.mrf.mxu1 }
 0x5cd   :  { %v12166_v52 = vpop.f32.mrf.mxu1 }
 0x5cf   :  { %v15616_v23 = vpop.f32.mrf.mxu1 }
 0x5d1   :  { %v12171_v0 = vpop.f32.mrf.mxu1 }
 0x5d2   :  { %v3884_v47 = vadd.f32 %v12171_v0, %v12145_v2 }
 0x5d3   :  { %v15620_v31 = vpop.f32.mrf.mxu1 }
 0x5d5   :  { %v12174_v32 = vpop.f32.mrf.mxu1 }
 0x5d6   :  { %v3894_v12 = vadd.f32 %v12174_v32, %v12148_v29 }
 0x5d7   :  { %v15624_v15 = vpop.f32.mrf.mxu1 }
 0x5d9   :  { %v12177_v27 = vpop.f32.mrf.mxu1 }
 0x5da   :  { %v3904_v16 = vadd.f32 %v12177_v27, %v12151_v43  ;;  %v15670_v43 = vpop.f32.mrf.mxu0 }
 0x5db   :  { %v15628_v4 = vpop.f32.mrf.mxu1  ;;  %18262 = vst [vmem:[#allocation32_spill] sm:$0xff] %v15670_v43 }
 0x5dd   :  { %v12180_v35 = vpop.f32.mrf.mxu1 }
 0x5de   :  { %v3914_v54 = vadd.f32 %v12180_v35, %v12154_v24 }
 0x5df   :  { %v15632_v9 = vpop.f32.mrf.mxu1 }
 0x5e1   :  { %v12183_v20 = vpop.f32.mrf.mxu1 }
 0x5e2   :  { %v3924_v61 = vadd.f32 %v12183_v20, %v12157_v13 }
 0x5e3   :  { %v15636_v49 = vpop.f32.mrf.mxu1 }
 0x5e5   :  { %v12186_v10 = vpop.f32.mrf.mxu1 }
 0x5e6   :  { %v3934_v1 = vadd.f32 %v12186_v10, %v12160_v53 }
 0x5e7   :  { %v15640_v44 = vpop.f32.mrf.mxu1 }
 0x5e9   :  { %v12189_v48 = vpop.f32.mrf.mxu1 }
 0x5ea   :  { %v3944_v6 = vadd.f32 %v12189_v48, %v12163_v38  ;;  %v15676_v38 = vpop.f32.mrf.mxu0 }
 0x5eb   :  { %v15644_v62 = vpop.f32.mrf.mxu1 }
 0x5ec   :  { %v15682_v32 = vpop.f32.mrf.mxu0 }
 0x5ed   :  { %v12192_v18 = vpop.f32.mrf.mxu1 }
 0x5ee   :  { %v3954_v19 = vadd.f32 %v12192_v18, %v12166_v52  ;;  %v15688_v35 = vpop.f32.mrf.mxu0 }
 0x5ef   :  { %v15648_v14 = vpop.f32.mrf.mxu1 }
 0x5f0   :  { %v15694_v10 = vpop.f32.mrf.mxu0 }
 0x5f1   :  { %v12197_v56 = vpop.f32.mrf.mxu1 }
 0x5f2   :  { %v15650_v40 = vadd.f32 %v12197_v56, %v3884_v47  ;;  %v15698_v18 = vpop.f32.mrf.mxu0 }
 0x5f3   :  { %v15654_v5 = vpop.f32.mrf.mxu1  ;;  %18266 = vst [vmem:[#allocation30_spill] sm:$0xff] %v15698_v18 }
 0x5f5   :  { %v12200_v42 = vpop.f32.mrf.mxu1 }
 0x5f6   :  { %v15656_v34 = vadd.f32 %v12200_v42, %v3894_v12 }
 0x5f7   :  { %v15660_v46 = vpop.f32.mrf.mxu1 }
 0x5f9   :  { %v12203_v55 = vpop.f32.mrf.mxu1 }
 0x5fa   :  { %v15662_v36 = vadd.f32 %v12203_v55, %v3904_v16  ;;  %v15700_v55 = vpop.f32.mrf.mxu0 }
 0x5fb   :  { %v15666_v11 = vpop.f32.mrf.mxu1  ;;  %18267 = vst [vmem:[#allocation45_spill] sm:$0xff] %v15700_v55 }
 0x5fd   :  { %v12206_v2 = vpop.f32.mrf.mxu1 }
 0x5fe   :  { %v15668_v29 = vadd.f32 %v12206_v2, %v3914_v54 }
 0x5ff   :  { %v15672_v24 = vpop.f32.mrf.mxu1 }
 0x601   :  { %v12209_v13 = vpop.f32.mrf.mxu1 }
 0x602   :  { %v15674_v53 = vadd.f32 %v12209_v13, %v3924_v61  ;;  %v15706_v13 = vpop.f32.mrf.mxu0 }
 0x603   :  { %v15678_v52 = vpop.f32.mrf.mxu1  ;;  %18268 = vst [vmem:[#allocation29_spill] sm:$0xff] %v15706_v13 }
 0x605   :  { %v12212_v0 = vpop.f32.mrf.mxu1 }
 0x606   :  { %v15680_v47 = vadd.f32 %v12212_v0, %v3934_v1 }
 0x607   :  { %v15684_v12 = vpop.f32.mrf.mxu1 }
 0x609   :  { %v12215_v27 = vpop.f32.mrf.mxu1 }
 0x60a   :  { %v15686_v16 = vadd.f32 %v12215_v27, %v3944_v6  ;;  %v15712_v27 = vpop.f32.mrf.mxu0 }
 0x60b   :  { %v15690_v54 = vpop.f32.mrf.mxu1  ;;  %18270 = vst [vmem:[#allocation28_spill] sm:$0xff] %v15712_v27 }
 0x60c   :  { %18263 = vst [vmem:[#allocation47_spill] sm:$0xff] %v15686_v16  ;;  %v15718_v45 = vpop.f32.mrf.mxu0 }
 0x60d   :  { %v12218_v20 = vpop.f32.mrf.mxu1  ;;  %18273 = vst [vmem:[#allocation42_spill] sm:$0xff] %v15718_v45 }
 0x60e   :  { %v15692_v61 = vadd.f32 %v12218_v20, %v3954_v19 }
 0x60f   :  { %v15696_v48 = vpop.f32.mrf.mxu1 }
 0x610   :  { %18264 = vst [vmem:[#allocation31_spill] sm:$0xff] %v15692_v61  ;;  %18265 = vst [vmem:[#allocation46_spill] sm:$0xff] %v15696_v48  ;;  %v15724_v48 = vpop.f32.mrf.mxu0 }
 0x611   :  { %v12249_v1 = vpop.f32.mrf.mxu1  ;;  %18276 = vst [vmem:[#allocation25_spill] sm:$0xff] %v15724_v48 }
 0x612   :  { %v15730_v60 = vpop.f32.mrf.mxu0 }
 0x613   :  { %v4498_v56 = vpop.f32.mrf.mxu1  ;;  %18279 = vst [vmem:[#allocation39_spill] sm:$0xff] %v15730_v60 }
 0x615   :  { %v12252_v42 = vpop.f32.mrf.mxu1 }
 0x617   :  { %v15702_v6 = vpop.f32.mrf.mxu1 }
 0x619   :  { %v15704_v2 = vpop.f32.mrf.mxu1 }
 0x61b   :  { %v15708_v0 = vpop.f32.mrf.mxu1 }
 0x61d   :  { %v15710_v19 = vpop.f32.mrf.mxu1 }
 0x61e   :  { %18269 = vst [vmem:[#allocation44_spill] sm:$0xff] %v15710_v19 }
 0x61f   :  { %v15714_v20 = vpop.f32.mrf.mxu1 }
 0x620   :  { %18271 = vst [vmem:[#allocation43_spill] sm:$0xff] %v15714_v20  ;;  %v15736_v20 = vpop.f32.mrf.mxu0 }
 0x621   :  { %v15716_v43 = vpop.f32.mrf.mxu1  ;;  %18282 = vst [vmem:[#allocation22_spill] sm:$0xff] %v15736_v20 }
 0x622   :  { %18272 = vst [vmem:[#allocation27_spill] sm:$0xff] %v15716_v43 }
 0x623   :  { %v15720_v61 = vpop.f32.mrf.mxu1 }
 0x624   :  { %18274 = vst [vmem:[#allocation26_spill] sm:$0xff] %v15720_v61  ;;  %v15740_v61 = vpop.f32.mrf.mxu0 }
 0x625   :  { %v15722_v55 = vpop.f32.mrf.mxu1  ;;  %18284 = vst [vmem:[#allocation49_spill] sm:$0xff] %v15740_v61  ;;  %v3879_v61 = vadd.f32 %v15620_v31, %v15594_v41  ;;  %v3899_v31 = vadd.f32 %v15628_v4, %v15598_v33 }
 0x626   :  { %18275 = vst [vmem:[#allocation41_spill] sm:$0xff] %v15722_v55  ;;  %v15742_v48 = vpop.f32.mrf.mxu0 }
 0x627   :  { %v15726_v18 = vpop.f32.mrf.mxu1  ;;  %18285 = vst [vmem:[#allocation50_spill] sm:$0xff] %v15742_v48  ;;  %v4153_v48 = vadd.f32 %v15654_v5, %v3879_v61  ;;  %v4157_v33 = vadd.f32 %v15666_v11, %v3899_v31  ;;  %v4370_v11 = vadd.f32 %v15618_v51, %v15662_v36  ;;  %v4372_v51 = vadd.f32 %v15626_v28, %v15668_v29 }
 0x628   :  { %18277 = vst [vmem:[#allocation40_spill] sm:$0xff] %v15726_v18  ;;  %v15748_v60 = vpop.f32.mrf.mxu0 }
 0x629   :  { %v15728_v13 = vpop.f32.mrf.mxu1  ;;  %18288 = vst [vmem:[#allocation53_spill] sm:$0xff] %v15748_v60  ;;  %v3889_v60 = vadd.f32 %v15624_v15, %v15596_v30  ;;  %v4365_v41 = vadd.f32 %v15606_v50, %v4153_v48  ;;  %v15780_v30 = vld [vmem:[%s18293_s12] sm:$0x7]  ;;  %v4368_v15 = vadd.f32 %v15610_v3, %v15656_v34  ;;  %v3919_v50 = vadd.f32 %v15636_v49, %v15604_v58 }
 0x62a   :  { %18278 = vst [vmem:[#allocation24_spill] sm:$0xff] %v15728_v13  ;;  %v15754_v20 = vpop.f32.mrf.mxu0  ;;  %v3929_v3 = vadd.f32 %v15640_v44, %v15608_v21  ;;  %v3949_v21 = vadd.f32 %v15648_v14, %v15616_v23  ;;  %v4374_v14 = vadd.f32 %v15634_v25, %v15674_v53  ;;  %v18299_v53 = vld [vmem:[#allocation37_spill] sm:$0xff] }
 0x62b   :  { %v15732_v8 = vpop.f32.mrf.mxu1  ;;  %18291 = vst [vmem:[#allocation56_spill] sm:$0xff] %v15754_v20  ;;  %v4161_v49 = vadd.f32 %v15678_v52, %v3919_v50  ;;  %v18303_v50 = vld [vmem:[#allocation43_spill] sm:$0xff] }
 0x62c   :  { %18280 = vst [vmem:[#allocation23_spill] sm:$0xff] %v15732_v8  ;;  %v12327_v63 = vpop.f32.mrf.mxu0 }
 0x62d   :  { %v15734_v27 = vpop.f32.mrf.mxu1 }
 0x62e   :  { %18281 = vst [vmem:[#allocation38_spill] sm:$0xff] %v15734_v27 }
 0x62f   :  { %v15738_v43 = vpop.f32.mrf.mxu1 }
 0x630   :  { %18283 = vst [vmem:[#allocation48_spill] sm:$0xff] %v15738_v43 }
 0x631   :  { %v12301_v45 = vpop.f32.mrf.mxu1 }
 0x633   :  { %v4922_v55 = vpop.f32.mrf.mxu1 }
 0x635   :  { %v12304_v16 = vpop.f32.mrf.mxu1 }
 0x637   :  { %v15744_v18 = vpop.f32.mrf.mxu1 }
 0x638   :  { %18286 = vst [vmem:[#allocation51_spill] sm:$0xff] %v15744_v18 }
 0x639   :  { %v15746_v13 = vpop.f32.mrf.mxu1 }
 0x63a   :  { %18287 = vst [vmem:[#allocation52_spill] sm:$0xff] %v15746_v13 }
 0x63b   :  { %v15750_v8 = vpop.f32.mrf.mxu1 }
 0x63c   :  { %18289 = vst [vmem:[#allocation54_spill] sm:$0xff] %v15750_v8  ;;  %v5134_v8 = vpop.f32.mrf.mxu0 }
 0x63d   :  { %v15752_v27 = vpop.f32.mrf.mxu1 }
 0x63e   :  { %18290 = vst [vmem:[#allocation55_spill] sm:$0xff] %v15752_v27  ;;  %v4366_v27 = vadd.f32 %v15602_v57, %v15650_v40  ;;  %v12330_v5 = vpop.f32.mrf.mxu0  ;;  %v4577_v57 = vadd.f32 %v4498_v56, %v4365_v41  ;;  %v3909_v40 = vadd.f32 %v15632_v9, %v15600_v17  ;;  %v3939_v17 = vadd.f32 %v15644_v62, %v15612_v22 }
 0x63f   :  { %v15756_v43 = vpop.f32.mrf.mxu1  ;;  %v4163_v22 = vadd.f32 %v15684_v12, %v3929_v3  ;;  %v4373_v12 = vadd.f32 %v15638_v39, %v4161_v49  ;;  %v18300_v31 = vld [vmem:[#allocation51_spill] sm:$0xff] }
 0x640   :  { %18292 = vst [vmem:[#allocation57_spill] sm:$0xff] %v15756_v43  ;;  %v4155_v43 = vadd.f32 %v15660_v46, %v3889_v60  ;;  %v4578_v13 = vadd.f32 %v12249_v1, %v4366_v27  ;;  %v4580_v60 = vadd.f32 %v12252_v42, %v4368_v15  ;;  %v18294_v1 = vld [vmem:[#allocation21_spill] sm:$0xff]  ;;  %v5144_v58 = vpop.f32.mrf.mxu0  ;;  %v4159_v9 = vadd.f32 %v15672_v24, %v3909_v40  ;;  %v18298_v27 = vld [vmem:[#allocation36_spill] sm:$0xff]  ;;  %v18301_v15 = vld [vmem:[#allocation30_spill] sm:$0xff] }
 0x641   :  { %v15760_v19 = vpop.f32.mrf.mxu1  ;;  %v15795_v56 = vrot.slane %v15780_v30, %v18294_v1  ;;  %v4165_v62 = vadd.f32 %v15690_v54, %v3939_v17  ;;  %v4369_v24 = vadd.f32 %v15622_v26, %v4157_v33  ;;  %v4582_v42 = vadd.f32 %v15704_v2, %v4370_v11 }
 0x642   :  { %v4367_v46 = vadd.f32 %v15614_v37, %v4155_v43  ;;  %v4790_v48 = vadd.f32 %v15676_v38, %v4578_v13  ;;  %v4789_v38 = vadd.f32 %v15682_v32, %v4577_v57  ;;  %v12333_v44 = vpop.f32.mrf.mxu0  ;;  %v4371_v23 = vadd.f32 %v15630_v7, %v4159_v9  ;;  %v18296_v13 = vld [vmem:[#allocation35_spill] sm:$0xff]  ;;  %v18306_v9 = vld [vmem:[#allocation52_spill] sm:$0xff] }
 0x643   :  { %v15763_v18 = vpop.f32.mrf.mxu1  ;;  %v4581_v32 = vadd.f32 %v15708_v0, %v4369_v24  ;;  %v4376_v54 = vadd.f32 %v15642_v59, %v15680_v47  ;;  %v4375_v7 = vadd.f32 %v18296_v13, %v4163_v22  ;;  %v18297_v0 = vld [vmem:[#allocation47_spill] sm:$0xff]  ;;  %v4377_v39 = vadd.f32 %v18299_v53, %v4165_v62  ;;  %v18308_v22 = vld [vmem:[#allocation41_spill] sm:$0xff]  ;;  %v18310_v24 = vld [vmem:[#allocation20_spill] sm:$0xff] }
 0x644   :  { %v4579_v37 = vadd.f32 %v15702_v6, %v4367_v46  ;;  %v5002_v43 = vadd.f32 %v12301_v45, %v4790_v48  ;;  %v5001_v36 = vadd.f32 %v4922_v55, %v4789_v38  ;;  %v4792_v45 = vadd.f32 %v15688_v35, %v4580_v60  ;;  %v5154_v35 = vpop.f32.mrf.mxu0  ;;  %v18295_v55 = vld [vmem:[#allocation44_spill] sm:$0xff]  ;;  %v18304_v60 = vld [vmem:[#allocation27_spill] sm:$0xff]  ;;  %v18305_v48 = vld [vmem:[#allocation45_spill] sm:$0xff] }
 0x645   :  { %v15769_v20 = vpop.f32.mrf.mxu1  ;;  %v4584_v2 = vadd.f32 %v18295_v55, %v4372_v51  ;;  %v4378_v25 = vadd.f32 %v18298_v27, %v18297_v0  ;;  %v4794_v59 = vadd.f32 %v18301_v15, %v4582_v42  ;;  %v4583_v33 = vadd.f32 %v18303_v50, %v4371_v23  ;;  %v18307_v38 = vld [vmem:[#allocation26_spill] sm:$0xff]  ;;  %v18311_v51 = vld [vmem:[#allocation29_spill] sm:$0xff] }
 0x646   :  { %v5004_v6 = vadd.f32 %v12304_v16, %v4792_v45  ;;  %v4791_v28 = vadd.f32 %v15694_v10, %v4579_v37  ;;  %v5214_v29 = vadd.f32 %v12327_v63, %v5002_v43  ;;  %v5213_v16 = vadd.f32 %v5134_v8, %v5001_v36  ;;  %v12336_v10 = vpop.f32.mrf.mxu0  ;;  %v18302_v63 = vld [vmem:[#allocation46_spill] sm:$0xff] }
 0x647   :  { %v15775_v61 = vpop.f32.mrf.mxu1  ;;  %v15838_v40 = vadd.f32 %v18302_v63, %v3949_v21  ;;  %v4586_v46 = vadd.f32 %v18304_v60, %v4374_v14  ;;  %v4793_v3 = vadd.f32 %v18305_v48, %v4581_v32  ;;  %v5006_v49 = vadd.f32 %v18306_v9, %v4794_v59  ;;  %v18309_v21 = vld [vmem:[#allocation31_spill] sm:$0xff]  ;;  %v18312_v32 = vld [vmem:[#allocation54_spill] sm:$0xff]  ;;  %v18318_v63 = vld [vmem:[#allocation25_spill] sm:$0xff] }
 0x648   :  { %v5003_v57 = vadd.f32 %v18300_v31, %v4791_v28  ;;  %v5216_v43 = vadd.f32 %v12330_v5, %v5004_v6  ;;  %v4585_v8 = vadd.f32 %v18307_v38, %v4373_v12  ;;  %v4588_v62 = vadd.f32 %v18308_v22, %v4376_v54  ;;  %v5164_v55 = vpop.f32.mrf.mxu0  ;;  %v18313_v5 = vld [vmem:[#allocation55_spill] sm:$0xff]  ;;  %v18314_v12 = vld [vmem:[#allocation28_spill] sm:$0xff]  ;;  %v18315_v54 = vld [vmem:[#allocation42_spill] sm:$0xff] }
 0x649   :  { %v15789_v4 = vpop.f32.mrf.mxu1  ;;  %v15851_v42 = vadd.f32 %v18310_v24, %v18309_v21  ;;  %v4796_v36 = vadd.f32 %v18311_v51, %v4584_v2  ;;  %v5005_v23 = vadd.f32 %v18312_v32, %v4793_v3  ;;  %v4795_v13 = vadd.f32 %v18314_v12, %v4583_v33  ;;  %v18319_v33 = vld [vmem:[#allocation39_spill] sm:$0xff] }
 0x64a   :  { %v4798_v0 = vadd.f32 %v18315_v54, %v4586_v46  ;;  %v5218_v15 = vadd.f32 %v12333_v44, %v5006_v49  ;;  %v12339_v59 = vpop.f32.mrf.mxu0  ;;  %v4797_v50 = vadd.f32 %v18318_v63, %v4585_v8  ;;  %v4800_v60 = vadd.f32 %v18319_v33, %v4588_v62  ;;  %v18320_v44 = vld [vmem:[#allocation24_spill] sm:$0xff] }
 0x64b   :  { %v15803_v34 = vpop.f32.mrf.mxu1  ;;  %v5008_v6 = vadd.f32 %v18313_v5, %v4796_v36  ;;  %v5217_v9 = vadd.f32 %v5154_v35, %v5005_v23  ;;  %v4590_v49 = vadd.f32 %v18320_v44, %v4378_v25  ;;  %v18321_v35 = vld [vmem:[#allocation23_spill] sm:$0xff]  ;;  %v18322_v25 = vld [vmem:[#allocation22_spill] sm:$0xff] }
 0x64c   :  { %v5174_v24 = vpop.f32.mrf.mxu0  ;;  %v4589_v51 = vadd.f32 %v18321_v35, %v4377_v39  ;;  %v5009_v23 = vadd.f32 %v15763_v18, %v4797_v50 }
 0x64d   :  { %v15814_v52 = vpop.f32.mrf.mxu1  ;;  %v5220_v38 = vadd.f32 %v12336_v10, %v5008_v6  ;;  %v5012_v6 = vadd.f32 %v15769_v20, %v4800_v60  ;;  %v18324_v20 = vld [vmem:[#allocation50_spill] sm:$0xff] }
 0x64e   :  { %v12342_v5 = vpop.f32.mrf.mxu0  ;;  %v5221_v33 = vadd.f32 %v5174_v24, %v5009_v23  ;;  %v18327_v23 = vld [vmem:[#allocation48_spill] sm:$0xff] }
 0x64f   :  { %v15825_v26 = vpop.f32.mrf.mxu1 }
 0x650   :  { %v5184_v60 = vpop.f32.mrf.mxu0 }
 0x651   :  { %v12353_v41 = vpop.f32.mrf.mxu1 }
 0x652   :  { %v5426_v47 = vadd.f32 %v12353_v41, %v5214_v29  ;;  %v5215_v29 = vadd.f32 %v5144_v58, %v5003_v57  ;;  %v18317_v57 = vld [vmem:[#allocation57_spill] sm:$0xff] }
 0x653   :  { %v5346_v17 = vpop.f32.mrf.mxu1 }
 0x654   :  { %v15845_v37 = vadd.f32 %v15795_v56, %v5426_v47  ;;  %v5425_v11 = vadd.f32 %v5346_v17, %v5213_v16  ;;  %v18316_v47 = vld [vmem:[#allocation40_spill] sm:$0xff]  ;;  %v5007_v16 = vadd.f32 %v18317_v57, %v4795_v13 }
 0x655   :  { %v12356_v45 = vpop.f32.mrf.mxu1  ;;  %v4587_v58 = vadd.f32 %v18316_v47, %v4375_v7  ;;  %v5010_v7 = vadd.f32 %v15760_v19, %v4798_v0 }
 0x656   :  { %v15856_v14 = vadd.f32 %v15795_v56, %v5425_v11  ;;  %v5428_v28 = vadd.f32 %v12356_v45, %v5216_v43  ;;  %v5463_v27 = vmax.f32 %v15845_v37, 0.0  ;;  %v5219_v32 = vadd.f32 %v5164_v55, %v5007_v16 }
 0x657   :  { %v5356_v53 = vpop.f32.mrf.mxu1  ;;  %v4799_v36 = vadd.f32 %v18322_v25, %v4587_v58  ;;  %v5222_v54 = vadd.f32 %v12339_v59, %v5010_v7  ;;  %v4801_v58 = vadd.f32 %v18324_v20, %v4589_v51 }
 0x658   :  { %v5462_v2 = vmax.f32 %v15856_v14, 0.0  ;;  %v15864_v41 = vadd.f32 %v15795_v56, %v5428_v28  ;;  %v5427_v31 = vadd.f32 %v5356_v53, %v5215_v29  ;;  %v5480_v11 = vsel %vm5478_vm4, %v5463_v27, 0.0 }
 0x659   :  { %v12359_v46 = vpop.f32.mrf.mxu1 }
 0x65a   :  { %v5479_v48 = vsel %vm5478_vm4, %v5462_v2, 0.0  ;;  %v15874_v3 = vadd.f32 %v15795_v56, %v5427_v31  ;;  %v5430_v17 = vadd.f32 %v12359_v46, %v5218_v15  ;;  %v5465_v8 = vmax.f32 %v15864_v41, 0.0  ;;  %v18323_v15 = vld [vmem:[#allocation49_spill] sm:$0xff] }
 0x65b   :  { %v5366_v43 = vpop.f32.mrf.mxu1  ;;  %v5481_v19 = vadd.f32 %v5480_v11, %v5479_v48  ;;  %v5011_v31 = vadd.f32 %v15775_v61, %v4799_v36  ;;  %v4802_v47 = vadd.f32 %v18323_v15, %v4590_v49  ;;  %v5013_v36 = vadd.f32 %v15803_v34, %v4801_v58 }
 0x65c   :  { %v5464_v22 = vmax.f32 %v15874_v3, 0.0  ;;  %v15884_v62 = vadd.f32 %v15795_v56, %v5430_v17  ;;  %v5429_v21 = vadd.f32 %v5366_v43, %v5217_v9  ;;  %v5484_v18 = vsel %vm5478_vm4, %v5465_v8, 0.0  ;;  %v12345_v43 = vpop.f32.mrf.mxu0 }
 0x65d   :  { %v12362_v45 = vpop.f32.mrf.mxu1  ;;  %v5014_v46 = vadd.f32 %v15789_v4, %v4802_v47  ;;  %v5224_v9 = vadd.f32 %v12342_v5, %v5012_v6  ;;  %v18326_v4 = vld [vmem:[#allocation32_spill] sm:$0xff]  ;;  %v5223_v25 = vadd.f32 %v5184_v60, %v5011_v31 }
 0x65e   :  { %v5482_v10 = vsel %vm5478_vm4, %v5464_v22, 0.0  ;;  %v15893_v28 = vadd.f32 %v15795_v56, %v5429_v21  ;;  %v5432_v29 = vadd.f32 %v12362_v45, %v5220_v38  ;;  %v5467_v39 = vmax.f32 %v15884_v62, 0.0  ;;  %v18325_v38 = vld [vmem:[#allocation38_spill] sm:$0xff] }
 0x65f   :  { %v5483_v12 = vadd.f32 %v5482_v10, %v5481_v19  ;;  %v5376_v13 = vpop.f32.mrf.mxu1  ;;  %v4592_v21 = vadd.f32 %v18325_v38, %v15851_v42  ;;  %v4379_v24 = vadd.f32 %v18326_v4, %v15838_v40  ;;  %v5226_v40 = vadd.f32 %v12345_v43, %v5014_v46 }
 0x660   :  { %v5466_v55 = vmax.f32 %v15893_v28, 0.0  ;;  %v15902_v0 = vadd.f32 %v15795_v56, %v5432_v29  ;;  %v5431_v53 = vadd.f32 %v5376_v13, %v5219_v32  ;;  %v5488_v61 = vsel %vm5478_vm4, %v5467_v39, 0.0 }
 0x661   :  { %v5485_v57 = vadd.f32 %v5484_v18, %v5483_v12  ;;  %v12365_v16 = vpop.f32.mrf.mxu1  ;;  %v4591_v10 = vadd.f32 %v18327_v23, %v4379_v24  ;;  %v18328_v18 = vld [vmem:[#allocation53_spill] sm:$0xff] }
 0x662   :  { %v5486_v59 = vsel %vm5478_vm4, %v5466_v55, 0.0  ;;  %v15911_v63 = vadd.f32 %v15795_v56, %v5431_v53  ;;  %v5434_v50 = vadd.f32 %v12365_v16, %v5222_v54  ;;  %v5469_v44 = vmax.f32 %v15902_v0, 0.0  ;;  %v5194_v54 = vpop.f32.mrf.mxu0 }
 0x663   :  { %v5487_v48 = vadd.f32 %v5486_v59, %v5485_v57  ;;  %v5386_v17 = vpop.f32.mrf.mxu1  ;;  %v4804_v53 = vadd.f32 %v18328_v18, %v4592_v21  ;;  %v5225_v57 = vadd.f32 %v5194_v54, %v5013_v36  ;;  %v18329_v59 = vld [vmem:[#allocation56_spill] sm:$0xff] }
 0x664   :  { %v5468_v49 = vmax.f32 %v15911_v63, 0.0  ;;  %v15920_v7 = vadd.f32 %v15795_v56, %v5434_v50  ;;  %v5433_v11 = vadd.f32 %v5386_v17, %v5221_v33  ;;  %v5492_v6 = vsel %vm5478_vm4, %v5469_v44, 0.0 }
 0x665   :  { %v5489_v35 = vadd.f32 %v5488_v61, %v5487_v48  ;;  %v12368_v51 = vpop.f32.mrf.mxu1  ;;  %v5016_v16 = vadd.f32 %v15814_v52, %v4804_v53  ;;  %v4803_v50 = vadd.f32 %v18329_v59, %v4591_v10  ;;  %v12348_v61 = vpop.f32.mrf.mxu0 }
 0x666   :  { %v5490_v19 = vsel %vm5478_vm4, %v5468_v49, 0.0  ;;  %v15931_v45 = vadd.f32 %v15795_v56, %v5433_v11  ;;  %v5436_v32 = vadd.f32 %v12368_v51, %v5224_v9  ;;  %v5471_v42 = vmax.f32 %v15920_v7, 0.0 }
 0x667   :  { %v5491_v29 = vadd.f32 %v5490_v19, %v5489_v35  ;;  %v5396_v5 = vpop.f32.mrf.mxu1  ;;  %v5015_v43 = vadd.f32 %v15825_v26, %v4803_v50  ;;  %v5228_v24 = vadd.f32 %v12348_v61, %v5016_v16  ;;  %v5204_v35 = vpop.f32.mrf.mxu0 }
 0x668   :  { %v5470_v34 = vmax.f32 %v15931_v45, 0.0  ;;  %v15940_v12 = vadd.f32 %v15795_v56, %v5436_v32  ;;  %v5435_v13 = vadd.f32 %v5396_v5, %v5223_v25  ;;  %v5496_v33 = vsel %vm5478_vm4, %v5471_v42, 0.0 }
 0x669   :  { %v5493_v31 = vadd.f32 %v5492_v6, %v5491_v29  ;;  %v12371_v15 = vpop.f32.mrf.mxu1  ;;  %v5227_v26 = vadd.f32 %v5204_v35, %v5015_v43 }
 0x66a   :  { %v5494_v47 = vsel %vm5478_vm4, %v5470_v34, 0.0  ;;  %v15947_v20 = vadd.f32 %v15795_v56, %v5435_v13  ;;  %v5438_v58 = vadd.f32 %v12371_v15, %v5226_v40  ;;  %v5473_v48 = vmax.f32 %v15940_v12, 0.0 }
 0x66b   :  { %v5495_v60 = vadd.f32 %v5494_v47, %v5493_v31  ;;  %v5406_v46 = vpop.f32.mrf.mxu1  ;;  %v5630_v31 = vld [vmem:[#allocation8] sm:$0xff] }
 0x66c   :  { %v5472_v17 = vmax.f32 %v15947_v20, 0.0  ;;  %v5459_v9 = vadd.f32 %v15795_v56, %v5438_v58  ;;  %v5437_v11 = vadd.f32 %v5406_v46, %v5225_v57  ;;  %v5500_v51 = vsel %vm5478_vm4, %v5473_v48, 0.0  ;;  %12407 = vmatprep.mubr.f32.mxu0 %v5630_v31 }
 0x66d   :  { %v5497_v38 = vadd.f32 %v5496_v33, %v5495_v60 }
 0x66e   :  { %v5498_v52 = vsel %vm5478_vm4, %v5472_v17, 0.0  ;;  %v15962_v21 = vadd.f32 %v15795_v56, %v5437_v11  ;;  %v5475_v25 = vmax.f32 %v5459_v9, 0.0 }
 0x66f   :  { %v5499_v4 = vadd.f32 %v5498_v52, %v5497_v38 }
 0x670   :  { %v5474_v36 = vmax.f32 %v15962_v21, 0.0  ;;  %v12374_v19 = vpop.f32.mrf.mxu1  ;;  %v5504_v12 = vsel %vm5478_vm4, %v5475_v25, 0.0 }
 0x671   :  { %v5501_v32 = vadd.f32 %v5500_v51, %v5499_v4  ;;  %v5440_v23 = vadd.f32 %v12374_v19, %v5228_v24 }
 0x672   :  { %v5502_v10 = vsel %vm5478_vm4, %v5474_v36, 0.0  ;;  %v5416_v29 = vpop.f32.mrf.mxu1 }
 0x673   :  { %v5503_v5 = vadd.f32 %v5502_v10, %v5501_v32  ;;  %v5461_v40 = vadd.f32 %v15795_v56, %v5440_v23  ;;  %v5439_v6 = vadd.f32 %v5416_v29, %v5227_v26 }
 0x675   :  { %v15972_v13 = vadd.f32 %v15795_v56, %v5439_v6  ;;  %v5505_v54 = vadd.f32 %v5504_v12, %v5503_v5  ;;  %v5477_v18 = vmax.f32 %v5461_v40, 0.0 }
 0x677   :  { %v5476_v53 = vmax.f32 %v15972_v13, 0.0  ;;  %v5508_v58 = vsel %vm5478_vm4, %v5477_v18, 0.0 }
 0x679   :  { %v5506_v15 = vsel %vm5478_vm4, %v5476_v53, 0.0 }
 0x67a   :  { %v5507_v47 = vadd.f32 %v5506_v15, %v5505_v54 }
 0x67c   :  { %v5509_v57 = vadd.f32 %v5508_v58, %v5507_v47 }
 0x67e   :  { %v5510_v16 = vrot.slane %v5509_v57, 4 }
 0x680   :  { %v5511_v59 = vadd.f32 %v5510_v16, %v5509_v57 }
 0x682   :  { %v5512_v50 = vrot.slane %v5511_v59, 2 }
 0x684   :  { %v5513_v33 = vadd.f32 %v5512_v50, %v5511_v59 }
 0x686   :  { %v5514_v60 = vrot.slane %v5513_v33, 1 }
 0x688   :  { %v5515_v46 = vadd.f32 %v5514_v60, %v5513_v33 }
 0x68a   :  { %v5516_v56 = vmul.f32 0.0078125, %v5515_v46 }
 0x68c   :  { %v15979_v61 = vsub.f32 %v5462_v2, %v5516_v56  ;;  %v15983_v9 = vsub.f32 %v5463_v27, %v5516_v56  ;;  %v15987_v11 = vsub.f32 %v5465_v8, %v5516_v56  ;;  %v15991_v43 = vsub.f32 %v5464_v22, %v5516_v56 }
 0x68d   :  { %v15995_v38 = vsub.f32 %v5467_v39, %v5516_v56  ;;  %v15999_v14 = vsub.f32 %v5469_v44, %v5516_v56  ;;  %v16003_v37 = vsub.f32 %v5471_v42, %v5516_v56  ;;  %v16005_v27 = vsub.f32 %v5473_v48, %v5516_v56 }
 0x68e   :  { %v16007_v2 = vsub.f32 %v5475_v25, %v5516_v56  ;;  %v5533_v41 = vmul.f32 %v15979_v61, %v15979_v61  ;;  %v5534_v3 = vmul.f32 %v15983_v9, %v15983_v9  ;;  %v16015_v8 = vsub.f32 %v5466_v55, %v5516_v56 }
 0x68f   :  { %v5535_v22 = vmul.f32 %v15991_v43, %v15991_v43  ;;  %v5536_v62 = vmul.f32 %v15987_v11, %v15987_v11  ;;  %v16025_v7 = vsub.f32 %v5468_v49, %v5516_v56  ;;  %v5538_v48 = vmul.f32 %v15995_v38, %v15995_v38 }
 0x690   :  { %v5549_v39 = vsel %vm5478_vm4, %v5533_v41, 0.0  ;;  %v5550_v0 = vsel %vm5478_vm4, %v5534_v3, 0.0  ;;  %v5537_v28 = vmul.f32 %v16015_v8, %v16015_v8  ;;  %v5532_v4 = vsub.f32 %v5477_v18, %v5516_v56 }
 0x691   :  { %v5551_v44 = vadd.f32 %v5550_v0, %v5549_v39  ;;  %v5552_v55 = vsel %vm5478_vm4, %v5535_v22, 0.0  ;;  %v5554_v52 = vsel %vm5478_vm4, %v5536_v62, 0.0  ;;  %v16035_v35 = vsub.f32 %v5470_v34, %v5516_v56 }
 0x692   :  { %v5539_v63 = vmul.f32 %v16025_v7, %v16025_v7  ;;  %v5556_v49 = vsel %vm5478_vm4, %v5537_v28, 0.0  ;;  %v5540_v25 = vmul.f32 %v15999_v14, %v15999_v14  ;;  %v5558_v19 = vsel %vm5478_vm4, %v5538_v48, 0.0 }
 0x693   :  { %v5553_v42 = vadd.f32 %v5552_v55, %v5551_v44  ;;  %v5527_v23 = vsub.f32 %v5472_v17, %v5516_v56  ;;  %v5541_v45 = vmul.f32 %v16035_v35, %v16035_v35  ;;  %v5542_v10 = vmul.f32 %v16003_v37, %v16003_v37 }
 0x694   :  { %v5560_v34 = vsel %vm5478_vm4, %v5539_v63, 0.0  ;;  %v5562_v29 = vsel %vm5478_vm4, %v5540_v25, 0.0  ;;  %v5529_v40 = vsub.f32 %v5474_v36, %v5516_v56  ;;  %v5544_v17 = vmul.f32 %v16005_v27, %v16005_v27  ;;  %v18331_v63 = vld [vmem:[#allocation34_spill] sm:$0xff] }
 0x695   :  { %v5555_v24 = vadd.f32 %v5554_v52, %v5553_v42  ;;  %v5543_v6 = vmul.f32 %v5527_v23, %v5527_v23  ;;  %v5564_v12 = vsel %vm5478_vm4, %v5541_v45, 0.0  ;;  %v5566_v13 = vsel %vm5478_vm4, %v5542_v10, 0.0  ;;  %v18330_v52 = vld [vmem:[#allocation33_spill] sm:$0xff] }
 0x696   :  { %v5531_v18 = vsub.f32 %v5476_v53, %v5516_v56  ;;  %v5545_v31 = vmul.f32 %v5529_v40, %v5529_v40  ;;  %v5546_v58 = vmul.f32 %v16007_v2, %v16007_v2  ;;  %v5570_v21 = vsel %vm5478_vm4, %v5544_v17, 0.0 }
 0x697   :  { %v5557_v51 = vadd.f32 %v5556_v49, %v5555_v24  ;;  %v5568_v15 = vsel %vm5478_vm4, %v5543_v6, 0.0  ;;  %v5548_v33 = vmul.f32 %v5532_v4, %v5532_v4  ;;  %v5613_v49 = vrot.slane %v15780_v30, %v18331_v63 }
 0x698   :  { %v5547_v57 = vmul.f32 %v5531_v18, %v5531_v18  ;;  %v5572_v16 = vsel %vm5478_vm4, %v5545_v31, 0.0  ;;  %v5574_v50 = vsel %vm5478_vm4, %v5546_v58, 0.0  ;;  %v5633_v58 = vld [vmem:[#allocation8 + $0x18] sm:$0xff] }
 0x699   :  { %v5559_v32 = vadd.f32 %v5558_v19, %v5557_v51  ;;  %v5578_v56 = vsel %vm5478_vm4, %v5548_v33, 0.0  ;;  %v5642_v33 = vld [vmem:[#allocation8 + $0x60] sm:$0xff] }
 0x69a   :  { %v5576_v53 = vsel %vm5478_vm4, %v5547_v57, 0.0  ;;  %v5638_v57 = vld [vmem:[#allocation8 + $0x40] sm:$0xff] }
 0x69b   :  { %v5561_v26 = vadd.f32 %v5560_v34, %v5559_v32 }
 0x69d   :  { %v5563_v5 = vadd.f32 %v5562_v29, %v5561_v26 }
 0x69f   :  { %v5565_v20 = vadd.f32 %v5564_v12, %v5563_v5 }
 0x6a1   :  { %v5567_v54 = vadd.f32 %v5566_v13, %v5565_v20 }
 0x6a3   :  { %v5569_v47 = vadd.f32 %v5568_v15, %v5567_v54 }
 0x6a5   :  { %v5571_v36 = vadd.f32 %v5570_v21, %v5569_v47  ;;  %v5631_v47 = vld [vmem:[#allocation8 + $0x8] sm:$0xff] }
 0x6a6   :  { %v5635_v21 = vld [vmem:[#allocation8 + $0x28] sm:$0xff] }
 0x6a7   :  { %v5573_v59 = vadd.f32 %v5572_v16, %v5571_v36  ;;  %v5636_v36 = vld [vmem:[#allocation8 + $0x30] sm:$0xff]  ;;  %v5639_v16 = vld [vmem:[#allocation8 + $0x48] sm:$0xff] }
 0x6a9   :  { %v5575_v60 = vadd.f32 %v5574_v50, %v5573_v59  ;;  %v5640_v59 = vld [vmem:[#allocation8 + $0x50] sm:$0xff]  ;;  %v5641_v50 = vld [vmem:[#allocation8 + $0x58] sm:$0xff] }
 0x6ab   :  { %v5577_v46 = vadd.f32 %v5576_v53, %v5575_v60  ;;  %v5643_v60 = vld [vmem:[#allocation8 + $0x68] sm:$0xff]  ;;  %v5644_v53 = vld [vmem:[#allocation8 + $0x70] sm:$0xff] }
 0x6ad   :  { %v5579_v41 = vadd.f32 %v5578_v56, %v5577_v46  ;;  %v5645_v46 = vld [vmem:[#allocation8 + $0x78] sm:$0xff]  ;;  %v5646_v56 = vld [vmem:[#allocation8 + $0x80] sm:$0xff] }
 0x6af   :  { %v5580_v3 = vrot.slane %v5579_v41, 4 }
 0x6b1   :  { %v5581_v22 = vadd.f32 %v5580_v3, %v5579_v41  ;;  %v5647_v41 = vld [vmem:[#allocation8 + $0x88] sm:$0xff]  ;;  %v5648_v3 = vld [vmem:[#allocation8 + $0x90] sm:$0xff] }
 0x6b3   :  { %v5582_v62 = vrot.slane %v5581_v22, 2 }
 0x6b5   :  { %v5583_v39 = vadd.f32 %v5582_v62, %v5581_v22  ;;  %v5649_v22 = vld [vmem:[#allocation8 + $0x98] sm:$0xff]  ;;  %v5650_v62 = vld [vmem:[#allocation8 + $0xa0] sm:$0xff] }
 0x6b7   :  { %v5584_v0 = vrot.slane %v5583_v39, 1 }
 0x6b9   :  { %v5585_v44 = vadd.f32 %v5584_v0, %v5583_v39  ;;  %v5651_v39 = vld [vmem:[#allocation8 + $0xa8] sm:$0xff]  ;;  %v5652_v0 = vld [vmem:[#allocation8 + $0xb0] sm:$0xff] }
 0x6bb   :  { %v5586_v28 = vmul.f32 0.0078125, %v5585_v44  ;;  %v5653_v44 = vld [vmem:[#allocation8 + $0xb8] sm:$0xff] }
 0x6bd   :  { %v5587_v55 = vadd.f32 1e-05, %v5586_v28  ;;  %v5654_v28 = vld [vmem:[#allocation8 + $0xc0] sm:$0xff] }
 0x6bf   :  { %12935 = vrsqrt.f32 %v5587_v55  ;;  %v5655_v55 = vld [vmem:[#allocation8 + $0xc8] sm:$0xff] }
 0x6cc   :  { %v12936_v42 = vpop.eup %12935 }
 0x6cd   :  { %v5589_v48 = vmul.f32 %v12936_v42, %v15780_v30  ;;  %v5656_v42 = vld [vmem:[#allocation8 + $0xd0] sm:$0xff] }
 0x6cf   :  { %v5593_v24 = vrot.slane %v5589_v48, %v18330_v52  ;;  %v5657_v48 = vld [vmem:[#allocation8 + $0xd8] sm:$0xff] }
 0x6d1   :  { %v5609_v51 = vmul.f32 %v5593_v24, %v5532_v4  ;;  %v5608_v25 = vmul.f32 %v5593_v24, %v5531_v18  ;;  %v5607_v19 = vmul.f32 %v5593_v24, %v16007_v2  ;;  %v5606_v32 = vmul.f32 %v5593_v24, %v5529_v40 }
 0x6d2   :  { %v5605_v45 = vmul.f32 %v5593_v24, %v16005_v27  ;;  %v5604_v34 = vmul.f32 %v5593_v24, %v5527_v23  ;;  %v5603_v26 = vmul.f32 %v5593_v24, %v16003_v37  ;;  %v5602_v27 = vmul.f32 %v5593_v24, %v16035_v35 }
 0x6d3   :  { %v5629_v10 = vadd.f32 %v5613_v49, %v5609_v51  ;;  %v5628_v29 = vadd.f32 %v5613_v49, %v5608_v25  ;;  %v5627_v5 = vadd.f32 %v5613_v49, %v5607_v19  ;;  %v5626_v6 = vadd.f32 %v5613_v49, %v5606_v32  ;;  %v5660_v51 = vld [vmem:[#allocation8 + $0xf0] sm:$0xff]  ;;  %v5661_v25 = vld [vmem:[#allocation8 + $0xf8] sm:$0xff]  ;;  %v5662_v19 = vld [vmem:[#allocation8 + $0x100] sm:$0xff] }
 0x6d4   :  { %v5625_v30 = vadd.f32 %v5613_v49, %v5605_v45  ;;  %v5624_v2 = vadd.f32 %v5613_v49, %v5604_v34  ;;  %v5623_v37 = vadd.f32 %v5613_v49, %v5603_v26  ;;  %v5601_v4 = vmul.f32 %v5593_v24, %v15999_v14  ;;  %v5663_v32 = vld [vmem:[#allocation8 + $0x108] sm:$0xff]  ;;  %v5664_v45 = vld [vmem:[#allocation8 + $0x110] sm:$0xff]  ;;  %v5665_v34 = vld [vmem:[#allocation8 + $0x118] sm:$0xff] }
 0x6d5   :  { %12375 = vmatprep.subr.mxu0 %v5629_v10  ;;  %v5622_v23 = vadd.f32 %v5613_v49, %v5602_v27  ;;  %v5600_v40 = vmul.f32 %v5593_v24, %v16025_v7  ;;  %v5599_v20 = vmul.f32 %v5593_v24, %v15995_v38  ;;  %v5598_v35 = vmul.f32 %v5593_v24, %v16015_v8  ;;  %v5911_v26 = vld [vmem:[%s18332_s27] sm:$0xff] }
 0x6d6   :  { %12376 = vmatpush3.msra.mxu0 %v5629_v10  ;;  %v5621_v12 = vadd.f32 %v5613_v49, %v5601_v4  ;;  %v5597_v14 = vmul.f32 %v5593_v24, %v15987_v11  ;;  %v5596_v7 = vmul.f32 %v5593_v24, %v15991_v43  ;;  %v5595_v38 = vmul.f32 %v5593_v24, %v15983_v9  ;;  %v5632_v43 = vld [vmem:[#allocation8 + $0x10] sm:$0xff]  ;;  %v5634_v9 = vld [vmem:[#allocation8 + $0x20] sm:$0xff] }
 0x6d7   :  { %12377 = vmatprep.subr.mxu0 %v5628_v29  ;;  %v5620_v17 = vadd.f32 %v5613_v49, %v5600_v40  ;;  %v5619_v13 = vadd.f32 %v5613_v49, %v5599_v20  ;;  %v5618_v54 = vadd.f32 %v5613_v49, %v5598_v35  ;;  %v5594_v8 = vmul.f32 %v5593_v24, %v15979_v61  ;;  %v5637_v61 = vld [vmem:[#allocation8 + $0x38] sm:$0xff]  ;;  %v5658_v24 = vld [vmem:[#allocation8 + $0xe0] sm:$0xff] }
 0x6d8   :  { %12378 = vmatpush3.msra.mxu0 %v5628_v29  ;;  %v5617_v18 = vadd.f32 %v5613_v49, %v5597_v14  ;;  %v5616_v31 = vadd.f32 %v5613_v49, %v5596_v7  ;;  %v5615_v15 = vadd.f32 %v5613_v49, %v5595_v38  ;;  %v5917_v10 = vrot.slane %v5911_v26, 4  ;;  %v16090_v29 = vld [vmem:[%s18332_s27 + $0x18] sm:$0xff] }
 0x6d9   :  { %12379 = vmatprep.subr.mxu0 %v5627_v5  ;;  %v5614_v11 = vadd.f32 %v5613_v49, %v5594_v8  ;;  %v5659_v49 = vld [vmem:[#allocation8 + $0xe8] sm:$0xff] }
 0x6da   :  { %12380 = vmatpush3.msra.mxu0 %v5627_v5  ;;  %12461 = vmatprep.subr.msk.mxu1 %vm5930_vm5, %v5917_v10  ;;  %v16099_v5 = vld [vmem:[%s18332_s27 + $0x20] sm:$0xf] }
 0x6db   :  { %12381 = vmatprep.subr.mxu0 %v5626_v6  ;;  %12462 = vmatpush3.msk.msra.mxu1 %vm5930_vm5, %v5917_v10 }
 0x6dc   :  { %12382 = vmatpush3.msra.mxu0 %v5626_v6  ;;  %12469 = vmatprep.subr.msk.mxu1 %vm5930_vm5, %v5911_v26 }
 0x6dd   :  { %12383 = vmatprep.subr.mxu0 %v5625_v30 }
 0x6de   :  { %12384 = vmatpush3.msra.mxu0 %v5625_v30 }
 0x6df   :  { %12385 = vmatprep.subr.mxu0 %v5624_v2 }
 0x6e0   :  { %12386 = vmatpush3.msra.mxu0 %v5624_v2 }
 0x6e1   :  { %12387 = vmatprep.subr.mxu0 %v5623_v37 }
 0x6e2   :  { %12388 = vmatpush3.msra.mxu0 %v5623_v37 }
 0x6e3   :  { %12389 = vmatprep.subr.mxu0 %v5622_v23 }
 0x6e4   :  { %12390 = vmatpush3.msra.mxu0 %v5622_v23  ;;  %v5912_v23 = vld [vmem:[%s18332_s27 + $0x8] sm:$0xff] }
 0x6e5   :  { %12391 = vmatprep.subr.mxu0 %v5621_v12  ;;  %v6221_v35 = vrot.slane %v5912_v23, 4 }
 0x6e6   :  { %12392 = vmatpush3.msra.mxu0 %v5621_v12 }
 0x6e7   :  { %12393 = vmatprep.subr.mxu0 %v5620_v17 }
 0x6e8   :  { %12394 = vmatpush3.msra.mxu0 %v5620_v17 }
 0x6e9   :  { %12395 = vmatprep.subr.mxu0 %v5619_v13 }
 0x6ea   :  { %12396 = vmatpush3.msra.mxu0 %v5619_v13 }
 0x6eb   :  { %12397 = vmatprep.subr.mxu0 %v5618_v54 }
 0x6ec   :  { %12398 = vmatpush3.msra.mxu0 %v5618_v54 }
 0x6ed   :  { %12399 = vmatprep.subr.mxu0 %v5617_v18 }
 0x6ee   :  { %12400 = vmatpush3.msra.mxu0 %v5617_v18  ;;  %v5913_v18 = vld [vmem:[%s18332_s27 + $0x10] sm:$0xff] }
 0x6ef   :  { %12401 = vmatprep.subr.mxu0 %v5616_v31 }
 0x6f0   :  { %12402 = vmatpush3.msra.mxu0 %v5616_v31 }
 0x6f1   :  { %12403 = vmatprep.subr.mxu0 %v5615_v15 }
 0x6f2   :  { %12404 = vmatpush3.msra.mxu0 %v5615_v15 }
 0x6f3   :  { %12405 = vmatprep.subr.mxu0 %v5614_v11 }
 0x6f4   :  { %12406 = vmatpush3.msra.mxu0 %v5614_v11  ;;  %v6429_v11 = vrot.slane %v5913_v18, 4 }
 0x6f5   :  { %12408 = vmatmul.mubr.f32.vlgmr.msra.gmra.mxu0 %v5631_v47  ;;  %12509 = vmatprep.subr.msk.mxu0 %vm5930_vm5, %v16090_v29 }
 0x6f6   :  { %12410 = vmatprep.mubr.f32.mxu0 %v5632_v43  ;;  %12510 = vmatpush3.msk.msra.mxu0 %vm5930_vm5, %v16090_v29 }
 0x6f7   :  { %12525 = vmatprep.subr.msk.mxu0 %vm5930_vm5, %v16099_v5 }
 0x6f9   :  { %12411 = vmatmul.mubr.f32.gmra.mxu0 %v5633_v58 }
 0x6fa   :  { %12413 = vmatprep.mubr.f32.mxu0 %v5634_v9  ;;  %v6637_v9 = vrot.slane %v16090_v29, 4 }
 0x6fd   :  { %12414 = vmatmul.mubr.f32.gmra.mxu0 %v5635_v21 }
 0x6fe   :  { %12416 = vmatprep.mubr.f32.mxu0 %v5636_v36 }
 0x701   :  { %12417 = vmatmul.mubr.f32.gmra.mxu0 %v5637_v61 }
 0x702   :  { %12419 = vmatprep.mubr.f32.mxu0 %v5638_v57 }
 0x705   :  { %12420 = vmatmul.mubr.f32.gmra.mxu0 %v5639_v16 }
 0x706   :  { %12422 = vmatprep.mubr.f32.mxu0 %v5640_v59 }
 0x709   :  { %12423 = vmatmul.mubr.f32.gmra.mxu0 %v5641_v50 }
 0x70a   :  { %12425 = vmatprep.mubr.f32.mxu0 %v5642_v33  ;;  %v18333_v33 = vmov 0.0  }
 0x70d   :  { %12426 = vmatmul.mubr.f32.gmra.mxu0 %v5643_v60 }
 0x70e   :  { %12428 = vmatprep.mubr.f32.mxu0 %v5644_v53 }
 0x711   :  { %12429 = vmatmul.mubr.f32.gmra.mxu0 %v5645_v46 }
 0x712   :  { %12431 = vmatprep.mubr.f32.mxu0 %v5646_v56 }
 0x715   :  { %12432 = vmatmul.mubr.f32.gmra.mxu0 %v5647_v41 }
 0x716   :  { %12434 = vmatprep.mubr.f32.mxu0 %v5648_v3 }
 0x719   :  { %12435 = vmatmul.mubr.f32.gmra.mxu0 %v5649_v22 }
 0x71a   :  { %12437 = vmatprep.mubr.f32.mxu0 %v5650_v62 }
 0x71d   :  { %12438 = vmatmul.mubr.f32.gmra.mxu0 %v5651_v39 }
 0x71e   :  { %12440 = vmatprep.mubr.f32.mxu0 %v5652_v0 }
 0x721   :  { %12441 = vmatmul.mubr.f32.gmra.mxu0 %v5653_v44 }
 0x722   :  { %12443 = vmatprep.mubr.f32.mxu0 %v5654_v28 }
 0x725   :  { %12444 = vmatmul.mubr.f32.gmra.mxu0 %v5655_v55 }
 0x726   :  { %12446 = vmatprep.mubr.f32.mxu0 %v5656_v42 }
 0x729   :  { %12447 = vmatmul.mubr.f32.gmra.mxu0 %v5657_v48 }
 0x72a   :  { %12449 = vmatprep.mubr.f32.mxu0 %v5658_v24 }
 0x72d   :  { %12450 = vmatmul.mubr.f32.gmra.mxu0 %v5659_v49 }
 0x72e   :  { %12452 = vmatprep.mubr.f32.mxu0 %v5660_v51 }
 0x731   :  { %12453 = vmatmul.mubr.f32.gmra.mxu0 %v5661_v25 }
 0x732   :  { %12455 = vmatprep.mubr.f32.mxu0 %v5662_v19 }
 0x735   :  { %12456 = vmatmul.mubr.f32.gmra.mxu0 %v5663_v32 }
 0x736   :  { %12458 = vmatprep.mubr.f32.mxu0 %v5664_v45 }
 0x739   :  { %12459 = vmatmul.mubr.f32.gmra.mxu0 %v5665_v34 }
 0x7b5   :  { %v12409_v6 = vpop.f32.mrf.mxu0 }
 0x7b7   :  { %v5732_v30 = vpop.f32.mrf.mxu0 }
 0x7b9   :  { %v12412_v2 = vpop.f32.mrf.mxu0 }
 0x7bb   :  { %v5742_v27 = vpop.f32.mrf.mxu0 }
 0x7bd   :  { %v12415_v37 = vpop.f32.mrf.mxu0 }
 0x7bf   :  { %v5752_v4 = vpop.f32.mrf.mxu0 }
 0x7c0   :  { %12463 = vmatprep.mubr.msk.f32.mxu1 %vm5478_vm4, %v5752_v4 }
 0x7c1   :  { %v12418_v40 = vpop.f32.mrf.mxu0  ;;  %12464 = vmatmul.mubr.msk.f32.vlgmr.msra.gmra.mxu1 %vm5478_vm4, %v12415_v37 }
 0x7c2   :  { %12470 = vmatpush3.msk.msra.mxu1 %vm5930_vm5, %v5911_v26 }
 0x7c3   :  { %v5762_v12 = vpop.f32.mrf.mxu0  ;;  %12477 = vmatprep.subr.msk.mxu1 %vm5930_vm5, %v5912_v23 }
 0x7c4   :  { %12466 = vmatprep.mubr.msk.f32.mxu1 %vm5478_vm4, %v5762_v12 }
 0x7c5   :  { %v12421_v20 = vpop.f32.mrf.mxu0  ;;  %12467 = vmatmul.mubr.msk.f32.gmra.mxu1 %vm5478_vm4, %v12418_v40 }
 0x7c6   :  { %12471 = vmatprep.mubr.msk.f32.mxu1 %vm5478_vm4, %v5732_v30 }
 0x7c7   :  { %v5772_v17 = vpop.f32.mrf.mxu0 }
 0x7c9   :  { %v12424_v13 = vpop.f32.mrf.mxu0  ;;  %12472 = vmatmul.mubr.msk.f32.vlgmr.msra.gmra.mxu1 %vm5478_vm4, %v12409_v6 }
 0x7ca   :  { %12474 = vmatprep.mubr.msk.f32.mxu1 %vm5478_vm4, %v5742_v27  ;;  %12478 = vmatpush3.msk.msra.mxu1 %vm5930_vm5, %v5912_v23 }
 0x7cb   :  { %v5782_v14 = vpop.f32.mrf.mxu0  ;;  %12485 = vmatprep.subr.msk.mxu1 %vm5930_vm5, %v6221_v35 }
 0x7cd   :  { %v12427_v54 = vpop.f32.mrf.mxu0  ;;  %12475 = vmatmul.mubr.msk.f32.gmra.mxu1 %vm5478_vm4, %v12412_v2 }
 0x7ce   :  { %12479 = vmatprep.mubr.msk.f32.mxu1 %vm5478_vm4, %v5772_v17 }
 0x7cf   :  { %v5792_v7 = vpop.f32.mrf.mxu0 }
 0x7d1   :  { %v12430_v38 = vpop.f32.mrf.mxu0  ;;  %12480 = vmatmul.mubr.msk.f32.vlgmr.msra.gmra.mxu1 %vm5478_vm4, %v12421_v20 }
 0x7d2   :  { %12482 = vmatprep.mubr.msk.f32.mxu1 %vm5478_vm4, %v5782_v14  ;;  %12486 = vmatpush3.msk.msra.mxu1 %vm5930_vm5, %v6221_v35 }
 0x7d3   :  { %v5802_v31 = vpop.f32.mrf.mxu0  ;;  %12493 = vmatprep.subr.msk.mxu1 %vm5930_vm5, %v5913_v18 }
 0x7d5   :  { %v12433_v8 = vpop.f32.mrf.mxu0  ;;  %12483 = vmatmul.mubr.msk.f32.gmra.mxu1 %vm5478_vm4, %v12424_v13 }
 0x7d6   :  { %12487 = vmatprep.mubr.msk.f32.mxu1 %vm5478_vm4, %v5792_v7 }
 0x7d7   :  { %v5812_v15 = vpop.f32.mrf.mxu0 }
 0x7d9   :  { %v12436_v47 = vpop.f32.mrf.mxu0  ;;  %12488 = vmatmul.mubr.msk.f32.vlgmr.msra.gmra.mxu1 %vm5478_vm4, %v12427_v54 }
 0x7da   :  { %12490 = vmatprep.mubr.msk.f32.mxu1 %vm5478_vm4, %v5802_v31  ;;  %12494 = vmatpush3.msk.msra.mxu1 %vm5930_vm5, %v5913_v18 }
 0x7db   :  { %v5822_v43 = vpop.f32.mrf.mxu0  ;;  %12501 = vmatprep.subr.msk.mxu1 %vm5930_vm5, %v6429_v11 }
 0x7dd   :  { %v12439_v58 = vpop.f32.mrf.mxu0  ;;  %12491 = vmatmul.mubr.msk.f32.gmra.mxu1 %vm5478_vm4, %v12430_v38 }
 0x7de   :  { %12495 = vmatprep.mubr.msk.f32.mxu1 %vm5478_vm4, %v5812_v15 }
 0x7df   :  { %v5832_v21 = vpop.f32.mrf.mxu0 }
 0x7e1   :  { %v12442_v36 = vpop.f32.mrf.mxu0  ;;  %12496 = vmatmul.mubr.msk.f32.vlgmr.msra.gmra.mxu1 %vm5478_vm4, %v12433_v8 }
 0x7e2   :  { %12498 = vmatprep.mubr.msk.f32.mxu1 %vm5478_vm4, %v5822_v43  ;;  %12502 = vmatpush3.msk.msra.mxu1 %vm5930_vm5, %v6429_v11 }
 0x7e3   :  { %v5842_v61 = vpop.f32.mrf.mxu0  ;;  %12517 = vmatprep.subr.msk.mxu1 %vm5930_vm5, %v6637_v9 }
 0x7e5   :  { %v12445_v57 = vpop.f32.mrf.mxu0  ;;  %12499 = vmatmul.mubr.msk.f32.gmra.mxu1 %vm5478_vm4, %v12436_v47 }
 0x7e6   :  { %12503 = vmatprep.mubr.msk.f32.mxu1 %vm5478_vm4, %v5832_v21 }
 0x7e7   :  { %v5852_v16 = vpop.f32.mrf.mxu0 }
 0x7e8   :  { %12511 = vmatprep.mubr.msk.f32.mxu0 %vm5478_vm4, %v5852_v16 }
 0x7e9   :  { %v12448_v59 = vpop.f32.mrf.mxu0  ;;  %12504 = vmatmul.mubr.msk.f32.vlgmr.msra.gmra.mxu1 %vm5478_vm4, %v12439_v58  ;;  %12512 = vmatmul.mubr.msk.f32.vlgmr.msra.gmra.mxu0 %vm5478_vm4, %v12445_v57 }
 0x7ea   :  { %12506 = vmatprep.mubr.msk.f32.mxu1 %vm5478_vm4, %v5842_v61  ;;  %12518 = vmatpush3.msk.msra.mxu1 %vm5930_vm5, %v6637_v9 }
 0x7eb   :  { %v5862_v50 = vpop.f32.mrf.mxu0  ;;  %12526 = vmatpush3.msk.msra.mxu0 %vm5930_vm5, %v16099_v5  ;;  %12533 = vmatprep.subr.mxu1 %v18333_v33 }
 0x7ec   :  { %12514 = vmatprep.mubr.msk.f32.mxu0 %vm5478_vm4, %v5862_v50  ;;  %12568 = vmatprep.subr.mxu0 %v18333_v33 }
 0x7ed   :  { %v12451_v60 = vpop.f32.mrf.mxu0  ;;  %12507 = vmatmul.mubr.msk.f32.gmra.mxu1 %vm5478_vm4, %v12442_v36  ;;  %12515 = vmatmul.mubr.msk.f32.gmra.mxu0 %vm5478_vm4, %v12448_v59  ;;  %v16168_v36 = vld [vmem:[%s18334_s4] sm:$0x7] }
 0x7ef   :  { %v5872_v53 = vpop.f32.mrf.mxu0 }
 0x7f0   :  { %12519 = vmatprep.mubr.msk.f32.mxu1 %vm5478_vm4, %v5872_v53 }
 0x7f1   :  { %v12454_v46 = vpop.f32.mrf.mxu0  ;;  %12520 = vmatmul.mubr.msk.f32.vlgmr.msra.gmra.mxu1 %vm5478_vm4, %v12451_v60 }
 0x7f3   :  { %v5882_v56 = vpop.f32.mrf.mxu0 }
 0x7f4   :  { %12522 = vmatprep.mubr.msk.f32.mxu1 %vm5478_vm4, %v5882_v56  ;;  %v6849_v56 = vrot.slane %v16168_v36, %v18294_v1 }
 0x7f5   :  { %v12457_v41 = vpop.f32.mrf.mxu0  ;;  %12523 = vmatmul.mubr.msk.f32.gmra.mxu1 %vm5478_vm4, %v12454_v46 }
 0x7f6   :  { %12541 = vmatprep.mubr.msk.f32.mxu1 %vm13093_vm6, %v18333_v33 }
 0x7f7   :  { %v5892_v3 = vpop.f32.mrf.mxu0 }
 0x7f8   :  { %12527 = vmatprep.mubr.msk.f32.mxu0 %vm5478_vm4, %v5892_v3 }
 0x7f9   :  { %v12460_v22 = vpop.f32.mrf.mxu0  ;;  %12528 = vmatmul.mubr.msk.f32.vlgmr.msra.gmra.mxu0 %vm5478_vm4, %v12457_v41 }
 0x7fb   :  { %v5902_v62 = vpop.f32.mrf.mxu0 }
 0x7fc   :  { %12530 = vmatprep.mubr.msk.f32.mxu0 %vm5478_vm4, %v5902_v62 }
 0x7fd   :  { %12531 = vmatmul.mubr.msk.f32.gmra.mxu0 %vm5478_vm4, %v12460_v22 }
 0x7fe   :  { %12570 = vmatprep.mubr.msk.f32.mxu0 %vm13093_vm6, %v18333_v33 }
 0x881   :  { %v12465_v39 = vpop.f32.mrf.mxu1 }
 0x883   :  { %v5999_v0 = vpop.f32.mrf.mxu1 }
 0x885   :  { %v12468_v44 = vpop.f32.mrf.mxu1 }
 0x887   :  { %v6009_v28 = vpop.f32.mrf.mxu1 }
 0x889   :  { %v12473_v55 = vpop.f32.mrf.mxu1 }
 0x88a   :  { %v6104_v2 = vadd.f32 %v12473_v55, %v12465_v39 }
 0x88b   :  { %v6098_v42 = vpop.f32.mrf.mxu1 }
 0x88c   :  { %v6099_v4 = vadd.f32 %v6098_v42, %v5999_v0 }
 0x88d   :  { %v12476_v48 = vpop.f32.mrf.mxu1 }
 0x88e   :  { %v6114_v12 = vadd.f32 %v12476_v48, %v12468_v44 }
 0x88f   :  { %v6108_v24 = vpop.f32.mrf.mxu1 }
 0x890   :  { %v6109_v14 = vadd.f32 %v6108_v24, %v6009_v28 }
 0x891   :  { %v12481_v49 = vpop.f32.mrf.mxu1 }
 0x892   :  { %v6218_v23 = vadd.f32 %v12481_v49, %v6104_v2 }
 0x893   :  { %v6198_v51 = vpop.f32.mrf.mxu1 }
 0x894   :  { %v6217_v20 = vadd.f32 %v6198_v51, %v6099_v4 }
 0x895   :  { %v12484_v25 = vpop.f32.mrf.mxu1 }
 0x896   :  { %v6220_v54 = vadd.f32 %v12484_v25, %v6114_v12 }
 0x897   :  { %v6208_v19 = vpop.f32.mrf.mxu1 }
 0x898   :  { %v6219_v31 = vadd.f32 %v6208_v19, %v6109_v14 }
 0x899   :  { %v12489_v32 = vpop.f32.mrf.mxu1 }
 0x89a   :  { %v6322_v17 = vadd.f32 %v12489_v32, %v6218_v23 }
 0x89b   :  { %v6302_v45 = vpop.f32.mrf.mxu1 }
 0x89c   :  { %v6321_v7 = vadd.f32 %v6302_v45, %v6217_v20 }
 0x89d   :  { %v12492_v34 = vpop.f32.mrf.mxu1 }
 0x89e   :  { %v6324_v8 = vadd.f32 %v12492_v34, %v6220_v54 }
 0x89f   :  { %v6312_v26 = vpop.f32.mrf.mxu1 }
 0x8a0   :  { %v6323_v58 = vadd.f32 %v6312_v26, %v6219_v31 }
 0x8a1   :  { %v12497_v10 = vpop.f32.mrf.mxu1 }
 0x8a2   :  { %v6426_v18 = vadd.f32 %v12497_v10, %v6322_v17 }
 0x8a3   :  { %v6406_v29 = vpop.f32.mrf.mxu1 }
 0x8a4   :  { %v6425_v15 = vadd.f32 %v6406_v29, %v6321_v7 }
 0x8a5   :  { %v12500_v5 = vpop.f32.mrf.mxu1 }
 0x8a6   :  { %v6428_v9 = vadd.f32 %v12500_v5, %v6324_v8 }
 0x8a7   :  { %v6416_v6 = vpop.f32.mrf.mxu1 }
 0x8a8   :  { %v6427_v61 = vadd.f32 %v6416_v6, %v6323_v58 }
 0x8a9   :  { %v12505_v30 = vpop.f32.mrf.mxu1  ;;  %v12513_v27 = vpop.f32.mrf.mxu0 }
 0x8aa   :  { %v6530_v11 = vadd.f32 %v12505_v30, %v6426_v18 }
 0x8ab   :  { %v6510_v37 = vpop.f32.mrf.mxu1  ;;  %v6614_v35 = vpop.f32.mrf.mxu0 }
 0x8ac   :  { %v6529_v21 = vadd.f32 %v6510_v37, %v6425_v15  ;;  %v6634_v57 = vadd.f32 %v12513_v27, %v6530_v11 }
 0x8ad   :  { %v12508_v40 = vpop.f32.mrf.mxu1  ;;  %v12516_v47 = vpop.f32.mrf.mxu0 }
 0x8ae   :  { %v6532_v16 = vadd.f32 %v12508_v40, %v6428_v9  ;;  %v6633_v60 = vadd.f32 %v6614_v35, %v6529_v21 }
 0x8af   :  { %v6520_v13 = vpop.f32.mrf.mxu1  ;;  %v6624_v59 = vpop.f32.mrf.mxu0 }
 0x8b0   :  { %v6531_v53 = vadd.f32 %v6520_v13, %v6427_v61  ;;  %v6636_v3 = vadd.f32 %v12516_v47, %v6532_v16 }
 0x8b1   :  { %v12521_v38 = vpop.f32.mrf.mxu1 }
 0x8b2   :  { %v6738_v46 = vadd.f32 %v12521_v38, %v6634_v57  ;;  %v6635_v44 = vadd.f32 %v6624_v59, %v6531_v53 }
 0x8b3   :  { %v6718_v43 = vpop.f32.mrf.mxu1 }
 0x8b4   :  { %v6737_v22 = vadd.f32 %v6718_v43, %v6633_v60 }
 0x8b5   :  { %v12524_v50 = vpop.f32.mrf.mxu1 }
 0x8b6   :  { %v6740_v28 = vadd.f32 %v12524_v50, %v6636_v3 }
 0x8b7   :  { %v6728_v39 = vpop.f32.mrf.mxu1 }
 0x8b8   :  { %v6739_v24 = vadd.f32 %v6728_v39, %v6635_v44 }
 0x8b9   :  { %v12529_v41 = vpop.f32.mrf.mxu0 }
 0x8ba   :  { %v6842_v62 = vadd.f32 %v12529_v41, %v6738_v46 }
 0x8bb   :  { %v6822_v0 = vpop.f32.mrf.mxu0 }
 0x8bc   :  { %v6851_v55 = vadd.f32 %v6849_v56, %v6842_v62  ;;  %v6841_v42 = vadd.f32 %v6822_v0, %v6737_v22  ;;  %v6909_v22 = vrot.slane %v16168_v36, %v18331_v63 }
 0x8bd   :  { %v12532_v48 = vpop.f32.mrf.mxu0 }
 0x8be   :  { %v6850_v49 = vadd.f32 %v6849_v56, %v6841_v42  ;;  %v6844_v51 = vadd.f32 %v12532_v48, %v6740_v28  ;;  %v6855_v19 = vmax.f32 %v6851_v55, 0.0 }
 0x8bf   :  { %v6832_v25 = vpop.f32.mrf.mxu0 }
 0x8c0   :  { %v6854_v32 = vmax.f32 %v6850_v49, 0.0  ;;  %v6853_v45 = vadd.f32 %v6849_v56, %v6844_v51  ;;  %v6843_v34 = vadd.f32 %v6832_v25, %v6739_v24  ;;  %v6860_v29 = vsel %vm6858_vm7, %v6855_v19, 0.0  ;;  %v6914_v49 = vld [vmem:[#allocation10] sm:$0xff]  ;;  %v6916_v51 = vld [vmem:[#allocation10 + $0x10] sm:$0xff]  ;;  %v6917_v25 = vld [vmem:[#allocation10 + $0x18] sm:$0xff] }
 0x8c2   :  { %v6859_v26 = vsel %vm6858_vm7, %v6854_v32, 0.0  ;;  %v6852_v10 = vadd.f32 %v6849_v56, %v6843_v34  ;;  %v6857_v5 = vmax.f32 %v6853_v45, 0.0  ;;  %v6920_v45 = vld [vmem:[#allocation10 + $0x30] sm:$0xff]  ;;  %v6921_v34 = vld [vmem:[#allocation10 + $0x38] sm:$0xff] }
 0x8c3   :  { %v6861_v30 = vadd.f32 %v6860_v29, %v6859_v26  ;;  %v6922_v26 = vld [vmem:[#allocation10 + $0x40] sm:$0xff] }
 0x8c4   :  { %v6856_v6 = vmax.f32 %v6852_v10, 0.0  ;;  %v6864_v37 = vsel %vm6858_vm7, %v6857_v5, 0.0  ;;  %v7062_v10 = vld [vmem:[#allocation11 + $0x8] sm:$0xff] }
 0x8c5   :  { %12569 = vmatpush3.msra.mxu0 %v7062_v10 }
 0x8c6   :  { %v6862_v2 = vsel %vm6858_vm7, %v6856_v6, 0.0  ;;  %12573 = vmatprep.subr.mxu0 %v18333_v33 }
 0x8c7   :  { %v6863_v27 = vadd.f32 %v6862_v2, %v6861_v30 }
 0x8c9   :  { %v6865_v4 = vadd.f32 %v6864_v37, %v6863_v27  ;;  %v7063_v27 = vld [vmem:[#allocation11 + $0x10] sm:$0xff] }
 0x8cb   :  { %v6866_v23 = vrot.slane %v6865_v4, 4 }
 0x8cd   :  { %v6867_v40 = vadd.f32 %v6866_v23, %v6865_v4  ;;  %v7064_v23 = vld [vmem:[#allocation11 + $0x18] sm:$0xff] }
 0x8cf   :  { %v6868_v12 = vrot.slane %v6867_v40, 2 }
 0x8d1   :  { %v6869_v20 = vadd.f32 %v6868_v12, %v6867_v40 }
 0x8d3   :  { %v6870_v17 = vrot.slane %v6869_v20, 1 }
 0x8d5   :  { %v6871_v35 = vadd.f32 %v6870_v17, %v6869_v20  ;;  %v7065_v20 = vld [vmem:[#allocation11 + $0x20] sm:$0xff] }
 0x8d7   :  { %v6872_v13 = vmul.f32 0.03125, %v6871_v35 }
 0x8d9   :  { %v6873_v14 = vsub.f32 %v6854_v32, %v6872_v13  ;;  %v6874_v54 = vsub.f32 %v6855_v19, %v6872_v13  ;;  %v6875_v7 = vsub.f32 %v6856_v6, %v6872_v13  ;;  %v6876_v18 = vsub.f32 %v6857_v5, %v6872_v13  ;;  %v6918_v19 = vld [vmem:[#allocation10 + $0x20] sm:$0xff]  ;;  %v6919_v32 = vld [vmem:[#allocation10 + $0x28] sm:$0xff]  ;;  %v7066_v13 = vld [vmem:[#allocation11 + $0x28] sm:$0xff] }
 0x8da   :  { %v7061_v6 = vld [vmem:[#allocation11] sm:$0xff] }
 0x8db   :  { %v6877_v38 = vmul.f32 %v6873_v14, %v6873_v14  ;;  %v6878_v31 = vmul.f32 %v6874_v54, %v6874_v54  ;;  %v6879_v8 = vmul.f32 %v6875_v7, %v6875_v7  ;;  %v6880_v15 = vmul.f32 %v6876_v18, %v6876_v18 }
 0x8dd   :  { %v6881_v11 = vsel %vm6858_vm7, %v6877_v38, 0.0  ;;  %v6882_v47 = vsel %vm6858_vm7, %v6878_v31, 0.0  ;;  %v6884_v58 = vsel %vm6858_vm7, %v6879_v8, 0.0  ;;  %v6886_v21 = vsel %vm6858_vm7, %v6880_v15, 0.0  ;;  %v7068_v31 = vld [vmem:[#allocation11 + $0x38] sm:$0xff] }
 0x8de   :  { %v6883_v43 = vadd.f32 %v6882_v47, %v6881_v11  ;;  %v7069_v11 = vld [vmem:[#allocation11 + $0x40] sm:$0xff] }
 0x8e0   :  { %v6885_v9 = vadd.f32 %v6884_v58, %v6883_v43 }
 0x8e2   :  { %v6887_v61 = vadd.f32 %v6886_v21, %v6885_v9 }
 0x8e4   :  { %v6888_v57 = vrot.slane %v6887_v61, 4 }
 0x8e6   :  { %v6889_v16 = vadd.f32 %v6888_v57, %v6887_v61 }
 0x8e8   :  { %v6890_v59 = vrot.slane %v6889_v16, 2 }
 0x8ea   :  { %v6891_v50 = vadd.f32 %v6890_v59, %v6889_v16 }
 0x8ec   :  { %v6892_v60 = vrot.slane %v6891_v50, 1 }
 0x8ee   :  { %v6893_v53 = vadd.f32 %v6892_v60, %v6891_v50 }
 0x8f0   :  { %v6894_v46 = vmul.f32 0.03125, %v6893_v53 }
 0x8f2   :  { %v6895_v56 = vadd.f32 1e-05, %v6894_v46 }
 0x8f4   :  { %12937 = vrsqrt.f32 %v6895_v56 }
 0x901   :  { %v12938_v41 = vpop.eup %12937 }
 0x902   :  { %v6897_v3 = vmul.f32 %v12938_v41, %v16168_v36  ;;  %v6915_v36 = vld [vmem:[#allocation10 + $0x8] sm:$0xff] }
 0x904   :  { %v6901_v62 = vrot.slane %v6897_v3, %v18330_v52 }
 0x906   :  { %v6904_v39 = vmul.f32 %v6901_v62, %v6875_v7  ;;  %v6905_v0 = vmul.f32 %v6901_v62, %v6876_v18  ;;  %v6903_v28 = vmul.f32 %v6901_v62, %v6874_v54  ;;  %v6902_v42 = vmul.f32 %v6901_v62, %v6873_v14  ;;  %v7067_v7 = vld [vmem:[#allocation11 + $0x30] sm:$0xff] }
 0x908   :  { %v6913_v44 = vadd.f32 %v6909_v22, %v6905_v0  ;;  %v6912_v55 = vadd.f32 %v6909_v22, %v6904_v39  ;;  %v6911_v48 = vadd.f32 %v6909_v22, %v6903_v28  ;;  %v6910_v24 = vadd.f32 %v6909_v22, %v6902_v42 }
 0x90a   :  { %12534 = vmatpush3.msra.mxu1 %v6913_v44 }
 0x90b   :  { %12535 = vmatprep.subr.mxu1 %v18333_v33 }
 0x90c   :  { %12536 = vmatpush3.msra.mxu1 %v6912_v55  ;;  %v7734_v55 = vld [vmem:[%s17819_s11] sm:$0x7] }
 0x90d   :  { %12537 = vmatprep.subr.mxu1 %v18333_v33 }
 0x90e   :  { %12538 = vmatpush3.msra.mxu1 %v6911_v48 }
 0x90f   :  { %12539 = vmatprep.subr.mxu1 %v18333_v33 }
 0x910   :  { %12540 = vmatpush3.msra.mxu1 %v6910_v24 }
 0x911   :  { %12542 = vmatmul.mubr.msk.f32.vlgmr.msra.gmra.mxu1 %vm6923_vm8, %v6914_v49  ;;  %12613 = vmatprep.subr.mxu1 %v18333_v33  ;;  %v7738_v49 = vrot.slane %v7734_v55, %v18294_v1 }
 0x912   :  { %12544 = vmatprep.mubr.msk.f32.mxu1 %vm13093_vm6, %v18333_v33 }
 0x915   :  { %12545 = vmatmul.mubr.msk.f32.gmra.mxu1 %vm6923_vm8, %v6915_v36 }
 0x916   :  { %12547 = vmatprep.mubr.msk.f32.mxu1 %vm13093_vm6, %v18333_v33 }
 0x919   :  { %12548 = vmatmul.mubr.msk.f32.gmra.mxu1 %vm6923_vm8, %v6916_v51 }
 0x91a   :  { %12550 = vmatprep.mubr.msk.f32.mxu1 %vm13093_vm6, %v18333_v33 }
 0x91d   :  { %12551 = vmatmul.mubr.msk.f32.gmra.mxu1 %vm6923_vm8, %v6917_v25 }
 0x91e   :  { %12553 = vmatprep.mubr.msk.f32.mxu1 %vm13093_vm6, %v18333_v33 }
 0x921   :  { %12554 = vmatmul.mubr.msk.f32.gmra.mxu1 %vm6923_vm8, %v6918_v19 }
 0x922   :  { %12556 = vmatprep.mubr.msk.f32.mxu1 %vm13093_vm6, %v18333_v33 }
 0x925   :  { %12557 = vmatmul.mubr.msk.f32.gmra.mxu1 %vm6923_vm8, %v6919_v32 }
 0x926   :  { %12559 = vmatprep.mubr.msk.f32.mxu1 %vm13093_vm6, %v18333_v33 }
 0x929   :  { %12560 = vmatmul.mubr.msk.f32.gmra.mxu1 %vm6923_vm8, %v6920_v45 }
 0x92a   :  { %12562 = vmatprep.mubr.msk.f32.mxu1 %vm13093_vm6, %v18333_v33 }
 0x92d   :  { %12563 = vmatmul.mubr.msk.f32.gmra.mxu1 %vm6923_vm8, %v6921_v34 }
 0x92e   :  { %12565 = vmatprep.mubr.msk.f32.mxu1 %vm13093_vm6, %v18333_v33 }
 0x931   :  { %12566 = vmatmul.mubr.msk.f32.gmra.mxu1 %vm6923_vm8, %v6922_v26 }
 0x932   :  { %12615 = vmatprep.mubr.msk.f32.mxu1 %vm13093_vm6, %v18333_v33 }
 0x9d1   :  { %v7017_v29 = vpop.f32.mrf.mxu1 }
 0x9d3   :  { %v12543_v5 = vpop.f32.mrf.mxu1 }
 0x9d5   :  { %v7022_v30 = vpop.f32.mrf.mxu1 }
 0x9d6   :  { %12571 = vmatmul.mubr.msk.f32.vlgmr.msra.gmra.mxu0 %vm6858_vm7, %v7022_v30 }
 0x9d7   :  { %v12546_v2 = vpop.f32.mrf.mxu1  ;;  %12574 = vmatpush3.msra.mxu0 %v7061_v6  ;;  %12575 = vmatprep.mubr.msk.f32.mxu0 %vm13093_vm6, %v18333_v33 }
 0x9d8   :  { %12578 = vmatprep.subr.mxu0 %v18333_v33 }
 0x9d9   :  { %v7027_v37 = vpop.f32.mrf.mxu1 }
 0x9da   :  { %12576 = vmatmul.mubr.msk.f32.vlgmr.msra.gmra.mxu0 %vm6858_vm7, %v7017_v29 }
 0x9db   :  { %v12549_v4 = vpop.f32.mrf.mxu1  ;;  %12579 = vmatpush3.msra.mxu0 %v7063_v27  ;;  %12580 = vmatprep.mubr.msk.f32.mxu0 %vm13093_vm6, %v18333_v33 }
 0x9dc   :  { %12583 = vmatprep.subr.mxu0 %v18333_v33 }
 0x9dd   :  { %v7032_v40 = vpop.f32.mrf.mxu1 }
 0x9de   :  { %12581 = vmatmul.mubr.msk.f32.vlgmr.msra.gmra.mxu0 %vm6858_vm7, %v7027_v37 }
 0x9df   :  { %v12552_v12 = vpop.f32.mrf.mxu1  ;;  %12584 = vmatpush3.msra.mxu0 %v7064_v23  ;;  %12585 = vmatprep.mubr.msk.f32.mxu0 %vm13093_vm6, %v18333_v33 }
 0x9e0   :  { %12588 = vmatprep.subr.mxu0 %v18333_v33 }
 0x9e1   :  { %v7037_v17 = vpop.f32.mrf.mxu1 }
 0x9e2   :  { %12586 = vmatmul.mubr.msk.f32.vlgmr.msra.gmra.mxu0 %vm6858_vm7, %v7032_v40 }
 0x9e3   :  { %v12555_v35 = vpop.f32.mrf.mxu1  ;;  %12589 = vmatpush3.msra.mxu0 %v7065_v20  ;;  %12590 = vmatprep.mubr.msk.f32.mxu0 %vm13093_vm6, %v18333_v33 }
 0x9e4   :  { %12593 = vmatprep.subr.mxu0 %v18333_v33 }
 0x9e5   :  { %v7042_v14 = vpop.f32.mrf.mxu1 }
 0x9e6   :  { %12591 = vmatmul.mubr.msk.f32.vlgmr.msra.gmra.mxu0 %vm6858_vm7, %v7037_v17 }
 0x9e7   :  { %v12558_v54 = vpop.f32.mrf.mxu1  ;;  %12594 = vmatpush3.msra.mxu0 %v7066_v13  ;;  %12595 = vmatprep.mubr.msk.f32.mxu0 %vm13093_vm6, %v18333_v33 }
 0x9e8   :  { %12598 = vmatprep.subr.mxu0 %v18333_v33 }
 0x9e9   :  { %v7047_v18 = vpop.f32.mrf.mxu1 }
 0x9ea   :  { %12596 = vmatmul.mubr.msk.f32.vlgmr.msra.gmra.mxu0 %vm6858_vm7, %v7042_v14 }
 0x9eb   :  { %v12561_v38 = vpop.f32.mrf.mxu1  ;;  %12599 = vmatpush3.msra.mxu0 %v7067_v7  ;;  %12600 = vmatprep.mubr.msk.f32.mxu0 %vm13093_vm6, %v18333_v33 }
 0x9ec   :  { %12603 = vmatprep.subr.mxu0 %v18333_v33 }
 0x9ed   :  { %v7052_v8 = vpop.f32.mrf.mxu1 }
 0x9ee   :  { %12601 = vmatmul.mubr.msk.f32.vlgmr.msra.gmra.mxu0 %vm6858_vm7, %v7047_v18  ;;  %v7771_v18 = vrot.slane %v7734_v55, %v18331_v63 }
 0x9ef   :  { %v12564_v15 = vpop.f32.mrf.mxu1  ;;  %12604 = vmatpush3.msra.mxu0 %v7068_v31  ;;  %12605 = vmatprep.mubr.msk.f32.mxu0 %vm13093_vm6, %v18333_v33 }
 0x9f0   :  { %12608 = vmatprep.subr.mxu0 %v18333_v33  ;;  %v7774_v15 = vld [vmem:[#allocation13 + $0x8] sm:$0xff] }
 0x9f1   :  { %v7057_v47 = vpop.f32.mrf.mxu1 }
 0x9f2   :  { %12606 = vmatmul.mubr.msk.f32.vlgmr.msra.gmra.mxu0 %vm6858_vm7, %v7052_v8  ;;  %v7773_v8 = vld [vmem:[#allocation13] sm:$0xff] }
 0x9f3   :  { %v12567_v43 = vpop.f32.mrf.mxu1  ;;  %12609 = vmatpush3.msra.mxu0 %v7069_v11  ;;  %12610 = vmatprep.mubr.msk.f32.mxu0 %vm13093_vm6, %v18333_v33  ;;  %v7775_v11 = vld [vmem:[#allocation13 + $0x10] sm:$0x3] }
 0x9f4   :  { %12624 = vmatprep.subr.mxu0 %v18333_v33  ;;  %v7867_v43 = vld [vmem:[#allocation14 + $0x10] sm:$0xff] }
 0x9f6   :  { %12611 = vmatmul.mubr.msk.f32.vlgmr.msra.gmra.mxu0 %vm6858_vm7, %v7057_v47  ;;  %v7868_v47 = vld [vmem:[#allocation14 + $0x18] sm:$0xff] }
 0x9f7   :  { %12628 = vmatprep.mubr.msk.f32.mxu0 %vm13093_vm6, %v18333_v33  ;;  %12625 = vmatpush3.msra.mxu0 %v7868_v47 }
 0x9f8   :  { %12626 = vmatprep.subr.mxu0 %v18333_v33 }
 0x9f9   :  { %12627 = vmatpush3.msra.mxu0 %v7867_v43 }
 0x9fa   :  { %12631 = vmatprep.subr.mxu0 %v18333_v33 }
 0xa96   :  { %v7139_v58 = vpop.f32.mrf.mxu0 }
 0xa98   :  { %v12572_v9 = vpop.f32.mrf.mxu0 }
 0xa99   :  { %v7871_v9 = vld [vmem:[#allocation14 + $0x30] sm:$0xff] }
 0xa9a   :  { %v7212_v21 = vpop.f32.mrf.mxu0 }
 0xa9b   :  { %v7213_v46 = vadd.f32 %v7212_v21, %v7139_v58  ;;  %v7872_v58 = vld [vmem:[#allocation14 + $0x38] sm:$0xff] }
 0xa9c   :  { %v12577_v61 = vpop.f32.mrf.mxu0 }
 0xa9e   :  { %v7285_v57 = vpop.f32.mrf.mxu0 }
 0xa9f   :  { %v7289_v41 = vadd.f32 %v7285_v57, %v7213_v46  ;;  %v7870_v46 = vld [vmem:[#allocation14 + $0x28] sm:$0xff] }
 0xaa0   :  { %v12582_v16 = vpop.f32.mrf.mxu0 }
 0xaa1   :  { %v7866_v16 = vld [vmem:[#allocation14 + $0x8] sm:$0xff] }
 0xaa2   :  { %v7359_v59 = vpop.f32.mrf.mxu0 }
 0xaa3   :  { %v7363_v22 = vadd.f32 %v7359_v59, %v7289_v41 }
 0xaa4   :  { %v12587_v50 = vpop.f32.mrf.mxu0 }
 0xaa5   :  { %v7876_v50 = vld [vmem:[#allocation14 + $0x58] sm:$0xff] }
 0xaa6   :  { %v7433_v60 = vpop.f32.mrf.mxu0 }
 0xaa7   :  { %v7437_v39 = vadd.f32 %v7433_v60, %v7363_v22  ;;  %v7865_v60 = vld [vmem:[#allocation14] sm:$0xff] }
 0xaa8   :  { %v12592_v53 = vpop.f32.mrf.mxu0 }
 0xaaa   :  { %v7507_v56 = vpop.f32.mrf.mxu0 }
 0xaab   :  { %v7511_v44 = vadd.f32 %v7507_v56, %v7437_v39  ;;  %v7875_v56 = vld [vmem:[#allocation14 + $0x50] sm:$0xff]  ;;  %v7874_v39 = vld [vmem:[#allocation14 + $0x48] sm:$0xff] }
 0xaac   :  { %v12597_v3 = vpop.f32.mrf.mxu0 }
 0xaad   :  { %v7869_v3 = vld [vmem:[#allocation14 + $0x20] sm:$0xff] }
 0xaae   :  { %v7581_v62 = vpop.f32.mrf.mxu0 }
 0xaaf   :  { %v7585_v42 = vadd.f32 %v7581_v62, %v7511_v44 }
 0xab0   :  { %v12602_v0 = vpop.f32.mrf.mxu0 }
 0xab2   :  { %v7655_v28 = vpop.f32.mrf.mxu0 }
 0xab3   :  { %v7659_v24 = vadd.f32 %v7655_v28, %v7585_v42  ;;  %v7873_v28 = vld [vmem:[#allocation14 + $0x40] sm:$0xff]  ;;  %v7880_v42 = vld [vmem:[#allocation14 + $0x78] sm:$0xff] }
 0xab4   :  { %v12607_v48 = vpop.f32.mrf.mxu0 }
 0xab5   :  { %v7877_v48 = vld [vmem:[#allocation14 + $0x60] sm:$0xff] }
 0xab6   :  { %v7729_v36 = vpop.f32.mrf.mxu0 }
 0xab7   :  { %v7733_v51 = vadd.f32 %v7729_v36, %v7659_v24  ;;  %v7879_v36 = vld [vmem:[#allocation14 + $0x70] sm:$0xff] }
 0xab8   :  { %v12612_v25 = vpop.f32.mrf.mxu0 }
 0xab9   :  { %v7739_v19 = vadd.f32 %v7738_v49, %v7733_v51  ;;  %v7882_v51 = vld [vmem:[#allocation14 + $0x88] sm:$0xff]  ;;  %v7881_v25 = vld [vmem:[#allocation14 + $0x80] sm:$0xff] }
 0xabb   :  { %v7740_v32 = vmax.f32 %v7739_v19, 0.0  ;;  %v8589_v19 = vld [vmem:[%s17823_s15 + $0x18] sm:$0xff] }
 0xabd   :  { %v7742_v45 = vsel %vm7741_vm9, %v7740_v32, 0.0 }
 0xabe   :  { %v7743_v34 = vrot.slane %v7742_v45, 4 }
 0xac0   :  { %v7744_v26 = vadd.f32 %v7743_v34, %v7742_v45  ;;  %v8587_v45 = vld [vmem:[%s17823_s15 + $0x8] sm:$0xff]  ;;  %v8586_v34 = vld [vmem:[%s17823_s15] sm:$0xff] }
 0xac2   :  { %v7745_v10 = vrot.slane %v7744_v26, 2 }
 0xac4   :  { %v7746_v29 = vadd.f32 %v7745_v10, %v7744_v26 }
 0xac6   :  { %v7747_v5 = vrot.slane %v7746_v29, 1 }
 0xac8   :  { %v7748_v6 = vadd.f32 %v7747_v5, %v7746_v29 }
 0xaca   :  { %v7749_v30 = vmul.f32 0.125, %v7748_v6 }
 0xacc   :  { %v7750_v2 = vsub.f32 %v7740_v32, %v7749_v30  ;;  %v8588_v32 = vld [vmem:[%s17823_s15 + $0x10] sm:$0xff] }
 0xace   :  { %v7751_v27 = vmul.f32 %v7750_v2, %v7750_v2 }
 0xad0   :  { %v7752_v37 = vsel %vm7741_vm9, %v7751_v27, 0.0 }
 0xad1   :  { %v7753_v4 = vrot.slane %v7752_v37, 4 }
 0xad3   :  { %v7754_v23 = vadd.f32 %v7753_v4, %v7752_v37 }
 0xad5   :  { %v7755_v40 = vrot.slane %v7754_v23, 2 }
 0xad7   :  { %v7756_v12 = vadd.f32 %v7755_v40, %v7754_v23 }
 0xad9   :  { %v7757_v20 = vrot.slane %v7756_v12, 1 }
 0xadb   :  { %v7758_v17 = vadd.f32 %v7757_v20, %v7756_v12 }
 0xadd   :  { %v7759_v35 = vmul.f32 0.125, %v7758_v17 }
 0xadf   :  { %v7760_v13 = vadd.f32 1e-05, %v7759_v35 }
 0xae1   :  { %12939 = vrsqrt.f32 %v7760_v13 }
 0xaee   :  { %v12940_v14 = vpop.eup %12939 }
 0xaef   :  { %v7762_v54 = vmul.f32 %v12940_v14, %v7734_v55  ;;  %v7878_v55 = vld [vmem:[#allocation14 + $0x68] sm:$0xff] }
 0xaf1   :  { %v7766_v7 = vrot.slane %v7762_v54, %v18330_v52 }
 0xaf3   :  { %v7767_v38 = vmul.f32 %v7766_v7, %v7750_v2  ;;  %v8547_v7 = vld [vmem:[%s17822_s14] sm:$0x7]  ;;  %s13094_s14 = smov 80  }
 0xaf5   :  { %v7772_v31 = vadd.f32 %v7771_v18, %v7767_v38 }
 0xaf7   :  { %12614 = vmatpush3.msra.mxu1 %v7772_v31 }
 0xaf8   :  { %12616 = vmatmul.mubr.msk.f32.vlgmr.msra.gmra.mxu1 %vm6858_vm7, %v7773_v8  ;;  %12645 = vmatprep.subr.mxu1 %v18333_v33  ;;  %v8551_v8 = vrot.slane %v8547_v7, %v18294_v1 }
 0xaf9   :  { %12618 = vmatprep.mubr.msk.f32.mxu1 %vm13093_vm6, %v18333_v33  ;;  %12646 = vmatpush3.msra.mxu1 %v7872_v58 }
 0xafa   :  { %12647 = vmatprep.subr.mxu1 %v18333_v33 }
 0xafb   :  { %12648 = vmatpush3.msra.mxu1 %v7871_v9 }
 0xafc   :  { %12619 = vmatmul.mubr.msk.f32.gmra.mxu1 %vm6858_vm7, %v7774_v15  ;;  %12659 = vmatprep.subr.mxu1 %v18333_v33 }
 0xafd   :  { %12621 = vmatprep.mubr.msk.f32.mxu1 %vm13093_vm6, %v18333_v33 }
 0xb00   :  { %12622 = vmatmul.mubr.msk.f32.gmra.mxu1 %vm6858_vm7, %v7775_v11 }
 0xb01   :  { %12649 = vmatprep.mubr.msk.f32.mxu1 %vm13093_vm6, %v18333_v33 }
 0xbb8   :  { %v7851_v21 = vpop.f32.mrf.mxu1 }
 0xbb9   :  { %v7884_v61 = vrot.slane %v7851_v21, 2  ;;  %v8103_v57 = vrot.slane %v7851_v21, 6  ;;  %v8029_v62 = vrot.slane %v7851_v21, 4 }
 0xbba   :  { %v12617_v59 = vpop.f32.mrf.mxu1 }
 0xbbb   :  { %12629 = vmatmul.mubr.msk.f32.vlgmr.msra.gmra.mxu0 %vm7741_vm9, %v7884_v61  ;;  %12650 = vmatmul.mubr.msk.f32.vlgmr.msra.gmra.mxu1 %vm7741_vm9, %v8103_v57 }
 0xbbc   :  { %12632 = vmatpush3.msra.mxu0 %v7866_v16  ;;  %12635 = vmatprep.mubr.msk.f32.mxu0 %vm13093_vm6, %v18333_v33  ;;  %v7856_v53 = vpop.f32.mrf.mxu1 }
 0xbbd   :  { %12633 = vmatprep.subr.mxu0 %v18333_v33  ;;  %12660 = vmatpush3.msra.mxu1 %v7876_v50  ;;  %v8251_v0 = vrot.slane %v7856_v53, 2  ;;  %v8325_v24 = vrot.slane %v7856_v53, 4  ;;  %v8399_v49 = vrot.slane %v7856_v53, 6 }
 0xbbe   :  { %12634 = vmatpush3.msra.mxu0 %v7865_v60  ;;  %12661 = vmatprep.subr.mxu1 %v18333_v33  ;;  %v12620_v41 = vpop.f32.mrf.mxu1 }
 0xbbf   :  { %12636 = vmatmul.mubr.msk.f32.vlgmr.msra.gmra.mxu0 %vm7741_vm9, %v7851_v21  ;;  %12638 = vmatprep.subr.mxu0 %v18333_v33 }
 0xbc0   :  { %12639 = vmatpush3.msra.mxu0 %v7870_v46  ;;  %12642 = vmatprep.mubr.msk.f32.mxu0 %vm13093_vm6, %v18333_v33  ;;  %v7861_v22 = vpop.f32.mrf.mxu1 }
 0xbc1   :  { %12640 = vmatprep.subr.mxu0 %v18333_v33  ;;  %12662 = vmatpush3.msra.mxu1 %v7875_v56 }
 0xbc2   :  { %12641 = vmatpush3.msra.mxu0 %v7869_v3  ;;  %12663 = vmatprep.mubr.msk.f32.mxu1 %vm13093_vm6, %v18333_v33  ;;  %v12623_v44 = vpop.f32.mrf.mxu1 }
 0xbc3   :  { %12643 = vmatmul.mubr.msk.f32.vlgmr.msra.gmra.mxu0 %vm7741_vm9, %v8029_v62  ;;  %12652 = vmatprep.subr.mxu0 %v18333_v33 }
 0xbc4   :  { %12653 = vmatpush3.msra.mxu0 %v7874_v39  ;;  %12656 = vmatprep.mubr.msk.f32.mxu0 %vm13093_vm6, %v18333_v33 }
 0xbc5   :  { %12654 = vmatprep.subr.mxu0 %v18333_v33  ;;  %12664 = vmatmul.mubr.msk.f32.vlgmr.msra.gmra.mxu1 %vm7741_vm9, %v8251_v0 }
 0xbc6   :  { %12655 = vmatpush3.msra.mxu0 %v7873_v28  ;;  %12673 = vmatprep.subr.mxu1 %v18333_v33 }
 0xbc7   :  { %12657 = vmatmul.mubr.msk.f32.vlgmr.msra.gmra.mxu0 %vm7741_vm9, %v7856_v53  ;;  %12666 = vmatprep.subr.mxu0 %v18333_v33 }
 0xbc8   :  { %12667 = vmatpush3.msra.mxu0 %v7878_v55  ;;  %12670 = vmatprep.mubr.msk.f32.mxu0 %vm13093_vm6, %v18333_v33 }
 0xbc9   :  { %12668 = vmatprep.subr.mxu0 %v18333_v33  ;;  %12674 = vmatpush3.msra.mxu1 %v7880_v42 }
 0xbca   :  { %12669 = vmatpush3.msra.mxu0 %v7877_v48  ;;  %12675 = vmatprep.subr.mxu1 %v18333_v33 }
 0xbcb   :  { %12671 = vmatmul.mubr.msk.f32.vlgmr.msra.gmra.mxu0 %vm7741_vm9, %v8325_v24  ;;  %12680 = vmatprep.subr.mxu0 %v18333_v33 }
 0xbcc   :  { %12676 = vmatpush3.msra.mxu1 %v7879_v36  ;;  %12677 = vmatprep.mubr.msk.f32.mxu1 %vm13093_vm6, %v18333_v33 }
 0xbcd   :  { %12681 = vmatpush3.msra.mxu0 %v7882_v51  ;;  %12678 = vmatmul.mubr.msk.f32.vlgmr.msra.gmra.mxu1 %vm7741_vm9, %v8399_v49  ;;  %v8584_v49 = vrot.slane %v8547_v7, %v18331_v63 }
 0xbce   :  { %12682 = vmatprep.subr.mxu0 %v18333_v33  ;;  %12684 = vmatprep.mubr.msk.f32.mxu0 %vm13093_vm6, %v18333_v33 }
 0xbcf   :  { %12683 = vmatpush3.msra.mxu0 %v7881_v25  ;;  %12687 = vmatprep.subr.mxu1 %v18333_v33 }
 0xbd0   :  { %12685 = vmatmul.mubr.msk.f32.vlgmr.msra.gmra.mxu0 %vm7741_vm9, %v7861_v22  ;;  %12695 = vmatprep.mubr.msk.f32.mxu1 %vm13093_vm6, %v18333_v33 }
 0xbd1   :  { %12698 = vmatprep.subr.mxu0 %v18333_v33  ;;  %12702 = vmatprep.mubr.msk.f32.mxu0 %vm13093_vm6, %v18333_v33 }
 0xbd2   :  { %12688 = vmatpush3.msra.mxu1 %v8589_v19 }
 0xbd3   :  { %12689 = vmatprep.subr.mxu1 %v18333_v33 }
 0xbd4   :  { %12690 = vmatpush3.msra.mxu1 %v8588_v32 }
 0xbd5   :  { %12691 = vmatprep.subr.mxu1 %v18333_v33 }
 0xbd6   :  { %12692 = vmatpush3.msra.mxu1 %v8587_v45 }
 0xbd7   :  { %12693 = vmatprep.subr.mxu1 %v18333_v33 }
 0xbd8   :  { %12694 = vmatpush3.msra.mxu1 %v8586_v34 }
 0xc7b   :  { %v7953_v26 = vpop.f32.mrf.mxu0  ;;  %v8172_v10 = vpop.f32.mrf.mxu1 }
 0xc7d   :  { %v12630_v29 = vpop.f32.mrf.mxu0  ;;  %v12651_v5 = vpop.f32.mrf.mxu1 }
 0xc7f   :  { %v8025_v6 = vpop.f32.mrf.mxu0 }
 0xc80   :  { %v8026_v2 = vadd.f32 %v8025_v6, %v7953_v26 }
 0xc81   :  { %v12637_v30 = vpop.f32.mrf.mxu0 }
 0xc83   :  { %v8098_v27 = vpop.f32.mrf.mxu0 }
 0xc84   :  { %v8102_v37 = vadd.f32 %v8098_v27, %v8026_v2 }
 0xc85   :  { %v12644_v4 = vpop.f32.mrf.mxu0  ;;  %v8320_v23 = vpop.f32.mrf.mxu1 }
 0xc86   :  { %v8176_v40 = vadd.f32 %v8172_v10, %v8102_v37 }
 0xc87   :  { %v8246_v12 = vpop.f32.mrf.mxu0  ;;  %v12665_v20 = vpop.f32.mrf.mxu1 }
 0xc88   :  { %v8250_v17 = vadd.f32 %v8246_v12, %v8176_v40 }
 0xc89   :  { %v12658_v35 = vpop.f32.mrf.mxu0 }
 0xc8a   :  { %v8324_v13 = vadd.f32 %v8320_v23, %v8250_v17 }
 0xc8b   :  { %v8394_v14 = vpop.f32.mrf.mxu0 }
 0xc8c   :  { %v8398_v54 = vadd.f32 %v8394_v14, %v8324_v13 }
 0xc8d   :  { %v12672_v18 = vpop.f32.mrf.mxu0  ;;  %v8468_v38 = vpop.f32.mrf.mxu1 }
 0xc8e   :  { %v8472_v31 = vadd.f32 %v8468_v38, %v8398_v54  ;;  %v8663_v18 = vld [vmem:[%s17824_s16] sm:$0x3] }
 0xc8f   :  { %v12679_v15 = vpop.f32.mrf.mxu1  ;;  %v8743_v38 = vrot.slane %v8663_v18, %v18330_v52 }
 0xc90   :  { %v8542_v11 = vpop.f32.mrf.mxu0 }
 0xc91   :  { %v8546_v47 = vadd.f32 %v8542_v11, %v8472_v31 }
 0xc92   :  { %v12686_v43 = vpop.f32.mrf.mxu0 }
 0xc93   :  { %v8552_v58 = vadd.f32 %v8551_v8, %v8546_v47 }
 0xc95   :  { %v8553_v9 = vmax.f32 %v8552_v58, 0.0 }
 0xc97   :  { %v8555_v21 = vsel %vm8554_vm10, %v8553_v9, 0.0 }
 0xc98   :  { %v8556_v61 = vrot.slane %v8555_v21, 4 }
 0xc9a   :  { %v8557_v57 = vadd.f32 %v8556_v61, %v8555_v21 }
 0xc9c   :  { %v8558_v16 = vrot.slane %v8557_v57, 2 }
 0xc9e   :  { %v8559_v59 = vadd.f32 %v8558_v16, %v8557_v57 }
 0xca0   :  { %v8560_v50 = vrot.slane %v8559_v59, 1 }
 0xca2   :  { %v8561_v60 = vadd.f32 %v8560_v50, %v8559_v59 }
 0xca4   :  { %v8562_v53 = vmul.f32 0.5, %v8561_v60 }
 0xca6   :  { %v8563_v46 = vsub.f32 %v8553_v9, %v8562_v53 }
 0xca8   :  { %v8564_v56 = vmul.f32 %v8563_v46, %v8563_v46 }
 0xcaa   :  { %v8565_v41 = vsel %vm8554_vm10, %v8564_v56, 0.0 }
 0xcab   :  { %v8566_v3 = vrot.slane %v8565_v41, 4 }
 0xcad   :  { %v8567_v22 = vadd.f32 %v8566_v3, %v8565_v41 }
 0xcaf   :  { %v8568_v62 = vrot.slane %v8567_v22, 2 }
 0xcb1   :  { %v8569_v39 = vadd.f32 %v8568_v62, %v8567_v22 }
 0xcb3   :  { %v8570_v0 = vrot.slane %v8569_v39, 1 }
 0xcb5   :  { %v8571_v44 = vadd.f32 %v8570_v0, %v8569_v39  ;;  %v8789_v0 = vld [vmem:[%s17825_s17 + $0x8] sm:$0xff] }
 0xcb6   :  { %12699 = vmatpush3.msra.mxu0 %v8789_v0 }
 0xcb7   :  { %v8572_v28 = vmul.f32 0.5, %v8571_v44  ;;  %v8788_v44 = vld [vmem:[%s17825_s17] sm:$0xff]  ;;  %12700 = vmatprep.subr.mxu0 %v18333_v33  ;;  %s13099_s17 = smov 120  }
 0xcb8   :  { %12701 = vmatpush3.msra.mxu0 %v8788_v44 }
 0xcb9   :  { %v8573_v55 = vadd.f32 1e-05, %v8572_v28 }
 0xcbb   :  { %12941 = vrsqrt.f32 %v8573_v55 }
 0xcc8   :  { %v12942_v42 = vpop.eup %12941 }
 0xcc9   :  { %v8575_v48 = vmul.f32 %v12942_v42, %v8547_v7 }
 0xccb   :  { %v8579_v24 = vrot.slane %v8575_v48, %v18330_v52 }
 0xccd   :  { %v8580_v36 = vmul.f32 %v8579_v24, %v8563_v46 }
 0xccf   :  { %v8585_v51 = vadd.f32 %v8584_v49, %v8580_v36 }
 0xcd1   :  { %12696 = vmatmul.mubr.msk.f32.vlgmr.msra.gmra.mxu1 %vm6923_vm8, %v8585_v51 }
 0xd91   :  { %v8659_v25 = vpop.f32.mrf.mxu1 }
 0xd92   :  { %v8665_v19 = vsel %vm8664_vm11, %v8659_v25, 0.0 }
 0xd93   :  { %v8666_v32 = vrot.slane %v8665_v19, 4  ;;  %v12697_v45 = vpop.f32.mrf.mxu1 }
 0xd95   :  { %v8667_v34 = vadd.f32 %v8666_v32, %v8665_v19 }
 0xd97   :  { %v8668_v26 = vrot.slane %v8667_v34, 2 }
 0xd99   :  { %v8669_v10 = vadd.f32 %v8668_v26, %v8667_v34 }
 0xd9b   :  { %v8670_v29 = vrot.slane %v8669_v10, 1 }
 0xd9d   :  { %v8671_v5 = vadd.f32 %v8670_v29, %v8669_v10 }
 0xd9f   :  { %8681 = vrot.lane.b32.xlu1 %v8671_v5, %s13094_s14  ;;  %8673 = vrot.lane.b32.xlu0 %v8671_v5, %s13095_s2 }
 0xda3   :  { %8677 = vrot.lane.b32.xlu0 %v8671_v5, %s13096_s3 }
 0xe11   :  { %v8674_v63 = vpop.permute.xlu0 %8673  ;;  %v8682_v27 = vpop.permute.xlu1 %8681 }
 0xe12   :  { %v8676_v6 = vadd.f32 %v8674_v63, %v8671_v5 }
 0xe15   :  { %v8678_v30 = vpop.permute.xlu0 %8677 }
 0xe16   :  { %v8680_v2 = vadd.f32 %v8678_v30, %v8676_v6 }
 0xe18   :  { %v8684_v37 = vadd.f32 %v8682_v27, %v8680_v2 }
 0xe1a   :  { %v8685_v4 = vmul.f32 0.125, %v8684_v37 }
 0xe1c   :  { %v8689_v23 = vrot.slane %v8685_v4, %v18294_v1 }
 0xe1e   :  { %8696 = vrot.lane.b32.xlu0 %v8689_v23, %s13088_s6  ;;  %8692 = vrot.lane.b32.xlu1 %v8689_v23, %s13097_s26  ;;  %v8690_v31 = vsub.f32 %v8659_v25, %v8689_v23 }
 0xe20   :  { %v8704_v8 = vmul.f32 %v8690_v31, %v8690_v31 }
 0xe22   :  { %8700 = vrot.lane.b32.xlu1 %v8689_v23, %s13098_s1 }
 0xe90   :  { %v8697_v40 = vpop.permute.xlu0 %8696  ;;  %v8693_v12 = vpop.permute.xlu1 %8692 }
 0xe91   :  { %v8699_v20 = vsub.f32 %v8659_v25, %v8697_v40  ;;  %v8695_v17 = vsub.f32 %v8659_v25, %v8693_v12 }
 0xe93   :  { %v8711_v35 = vmul.f32 %v8699_v20, %v8699_v20  ;;  %v8705_v13 = vmul.f32 %v8695_v17, %v8695_v17 }
 0xe94   :  { %v8701_v14 = vpop.permute.xlu1 %8700 }
 0xe95   :  { %v8703_v54 = vsub.f32 %v8659_v25, %v8701_v14  ;;  %8713 = vrot.lane.b32.xlu1 %v8711_v35, %s13096_s3  ;;  %8707 = vrot.lane.b32.xlu0 %v8705_v13, %s13095_s2 }
 0xe97   :  { %v8717_v7 = vmul.f32 %v8703_v54, %v8703_v54 }
 0xe99   :  { %8719 = vrot.lane.b32.xlu0 %v8717_v7, %s13094_s14 }
 0xe9d   :  { %8752 = vrot.lane.b32.xlu0 %v8743_v38, %s13097_s26 }
 0xf07   :  { %v8708_v15 = vpop.permute.xlu0 %8707  ;;  %v8714_v47 = vpop.permute.xlu1 %8713 }
 0xf08   :  { %v8710_v11 = vadd.f32 %v8708_v15, %v8704_v8 }
 0xf0a   :  { %v8716_v43 = vadd.f32 %v8714_v47, %v8710_v11  ;;  %v8863_v47 = vld [vmem:[%s17826_s18] sm:$0x3] }
 0xf0b   :  { %v8720_v58 = vpop.permute.xlu0 %8719 }
 0xf0c   :  { %v8722_v9 = vadd.f32 %v8720_v58, %v8716_v43  ;;  %v8941_v43 = vrot.slane %v8863_v47, %v18330_v52 }
 0xf0e   :  { %v8724_v21 = vsel %vm8723_vm12, %v8722_v9, 0.0 }
 0xf0f   :  { %v8725_v61 = vrot.slane %v8724_v21, 4  ;;  %v8753_v39 = vpop.permute.xlu0 %8752 }
 0xf11   :  { %v8726_v57 = vadd.f32 %v8725_v61, %v8724_v21 }
 0xf13   :  { %v8727_v16 = vrot.slane %v8726_v57, 2 }
 0xf15   :  { %v8728_v59 = vadd.f32 %v8727_v16, %v8726_v57 }
 0xf17   :  { %v8729_v50 = vrot.slane %v8728_v59, 1 }
 0xf19   :  { %v8730_v60 = vadd.f32 %v8729_v50, %v8728_v59 }
 0xf1b   :  { %v8731_v53 = vmul.f32 0.125, %v8730_v60 }
 0xf1d   :  { %v8732_v46 = vadd.f32 1e-05, %v8731_v53 }
 0xf1f   :  { %12943 = vrsqrt.f32 %v8732_v46 }
 0xf2c   :  { %v12944_v56 = vpop.eup %12943 }
 0xf2d   :  { %v8734_v41 = vmul.f32 %v12944_v56, %v8663_v18 }
 0xf2f   :  { %v8738_v3 = vrot.slane %v8734_v41, %v18294_v1 }
 0xf31   :  { %8761 = vrot.lane.b32.xlu0 %v8738_v3, %s13088_s6  ;;  %v8739_v22 = vmul.f32 %v8738_v3, %v8690_v31  ;;  %8747 = vrot.lane.b32.xlu1 %v8738_v3, %s13097_s26 }
 0xf33   :  { %v8744_v62 = vadd.f32 %v8743_v38, %v8739_v22 }
 0xf35   :  { %8745 = vst.msk [vmem:[#allocation2] sm:$0x3] %vm8723_vm12, %v8744_v62  ;;  %8774 = vrot.lane.b32.xlu1 %v8738_v3, %s13098_s1  ;;  %8778 = vrot.lane.b32.xlu0 %v8743_v38, %s13098_s1 }
 0xf39   :  { %8765 = vrot.lane.b32.xlu1 %v8743_v38, %s13088_s6  ;;  %s13100_s6 = smov 104  }
 0xfa3   :  { %v8762_v28 = vpop.permute.xlu0 %8761  ;;  %v8748_v55 = vpop.permute.xlu1 %8747 }
 0xfa4   :  { %v8750_v42 = vmul.f32 %v8748_v55, %v8695_v17  ;;  %v8764_v51 = vmul.f32 %v8762_v28, %v8699_v20 }
 0xfa6   :  { %v8755_v48 = vadd.f32 %v8753_v39, %v8750_v42 }
 0xfa7   :  { %v8775_v24 = vpop.permute.xlu1 %8774  ;;  %v8779_v49 = vpop.permute.xlu0 %8778 }
 0xfa8   :  { %v8777_v36 = vmul.f32 %v8775_v24, %v8703_v54  ;;  %8757 = vrot.lane.b32.xlu1 %v8755_v48, %s13095_s2 }
 0xfaa   :  { %v8781_v25 = vadd.f32 %v8779_v49, %v8777_v36  ;;  %v8989_v49 = vld [vmem:[%s17827_s19] sm:$0xff]  ;;  %s13102_s19 = smov 124  }
 0xfab   :  { %v8766_v19 = vpop.permute.xlu1 %8765  ;;  %12705 = vmatprep.subr.mxu0 %v8989_v49 }
 0xfac   :  { %v8768_v32 = vadd.f32 %v8766_v19, %v8764_v51  ;;  %8783 = vrot.lane.b32.xlu1 %v8781_v25, %s13094_s14 }
 0xfae   :  { %8770 = vrot.lane.b32.xlu0 %v8768_v32, %s13096_s3  ;;  %s13109_s3 = smov 6  }
0x101a   :  { %v8758_v45 = vpop.permute.xlu1 %8757 }
0x101b   :  { %8760 = vst.msk [vmem:[#allocation2 + $0x2] sm:$0x3] %vm8723_vm12, %v8758_v45 }
0x101e   :  { %v8784_v33 = vpop.permute.xlu1 %8783 }
0x101f   :  { %8786 = vst.msk [vmem:[#allocation2 + $0x6] sm:$0x3] %vm8723_vm12, %v8784_v33 }
0x1020   :  { %v8771_v34 = vpop.permute.xlu0 %8770 }
0x1021   :  { %8773 = vst.msk [vmem:[#allocation2 + $0x4] sm:$0x3] %vm8723_vm12, %v8771_v34 }
0x1028   :  { %v8787_v26 = vld [vmem:[#allocation2] sm:$0xff] }
0x1029   :  { %12703 = vmatmul.mubr.msk.f32.vlgmr.msra.gmra.mxu0 %vm7741_vm9, %v8787_v26 }
0x102a   :  { %12706 = vmatpush3.msra.mxu0 %v8989_v49 }
0x10e9   :  { %v8859_v10 = vpop.f32.mrf.mxu0 }
0x10ea   :  { %v8864_v29 = vsel %vm6923_vm8, %v8859_v10, 0.0 }
0x10eb   :  { %v8865_v5 = vrot.slane %v8864_v29, 4  ;;  %v12704_v63 = vpop.f32.mrf.mxu0 }
0x10ed   :  { %v8866_v6 = vadd.f32 %v8865_v5, %v8864_v29 }
0x10ef   :  { %v8867_v30 = vrot.slane %v8866_v6, 2 }
0x10f1   :  { %v8868_v2 = vadd.f32 %v8867_v30, %v8866_v6 }
0x10f3   :  { %v8869_v27 = vrot.slane %v8868_v2, 1 }
0x10f5   :  { %v8870_v37 = vadd.f32 %v8869_v27, %v8868_v2 }
0x10f7   :  { %8876 = vrot.lane.b32.xlu1 %v8870_v37, %s13095_s2  ;;  %8872 = vrot.lane.b32.xlu0 %v8870_v37, %s13099_s17 }
0x10fb   :  { %8880 = vrot.lane.b32.xlu0 %v8870_v37, %s13100_s6 }
0x1169   :  { %v8873_v4 = vpop.permute.xlu0 %8872  ;;  %v8877_v40 = vpop.permute.xlu1 %8876 }
0x116a   :  { %v8875_v23 = vadd.f32 %v8873_v4, %v8870_v37 }
0x116c   :  { %v8879_v12 = vadd.f32 %v8877_v40, %v8875_v23 }
0x116d   :  { %v8881_v20 = vpop.permute.xlu0 %8880 }
0x116e   :  { %v8883_v17 = vadd.f32 %v8881_v20, %v8879_v12 }
0x1170   :  { %v8884_v35 = vmul.f32 0.03125, %v8883_v17 }
0x1172   :  { %v8888_v13 = vrot.slane %v8884_v35, %v18294_v1 }
0x1174   :  { %8895 = vrot.lane.b32.xlu0 %v8888_v13, %s13097_s26  ;;  %8891 = vrot.lane.b32.xlu1 %v8888_v13, %s13084_s7  ;;  %v8889_v58 = vsub.f32 %v8859_v10, %v8888_v13 }
0x1176   :  { %v8903_v9 = vmul.f32 %v8889_v58, %v8889_v58 }
0x1178   :  { %8899 = vrot.lane.b32.xlu1 %v8888_v13, %s13101_s30 }
0x11e6   :  { %v8896_v14 = vpop.permute.xlu0 %8895  ;;  %v8892_v54 = vpop.permute.xlu1 %8891 }
0x11e7   :  { %v8898_v7 = vsub.f32 %v8859_v10, %v8896_v14  ;;  %v8894_v18 = vsub.f32 %v8859_v10, %v8892_v54 }
0x11e9   :  { %v8910_v38 = vmul.f32 %v8898_v7, %v8898_v7  ;;  %v8904_v31 = vmul.f32 %v8894_v18, %v8894_v18 }
0x11ea   :  { %v8900_v8 = vpop.permute.xlu1 %8899 }
0x11eb   :  { %v8902_v15 = vsub.f32 %v8859_v10, %v8900_v8  ;;  %8912 = vrot.lane.b32.xlu1 %v8910_v38, %s13095_s2  ;;  %8906 = vrot.lane.b32.xlu0 %v8904_v31, %s13099_s17 }
0x11ed   :  { %v8916_v11 = vmul.f32 %v8902_v15, %v8902_v15 }
0x11ef   :  { %8918 = vrot.lane.b32.xlu0 %v8916_v11, %s13100_s6 }
0x11f3   :  { %8950 = vrot.lane.b32.xlu0 %v8941_v43, %s13084_s7 }
0x125d   :  { %v8907_v21 = vpop.permute.xlu0 %8906  ;;  %v8913_v57 = vpop.permute.xlu1 %8912 }
0x125e   :  { %v8909_v61 = vadd.f32 %v8907_v21, %v8903_v9 }
0x1260   :  { %v8915_v16 = vadd.f32 %v8913_v57, %v8909_v61 }
0x1261   :  { %v8919_v59 = vpop.permute.xlu0 %8918 }
0x1262   :  { %v8921_v50 = vadd.f32 %v8919_v59, %v8915_v16 }
0x1264   :  { %v8922_v60 = vsel %vm6858_vm7, %v8921_v50, 0.0 }
0x1265   :  { %v8923_v53 = vrot.slane %v8922_v60, 4  ;;  %v8951_v24 = vpop.permute.xlu0 %8950 }
0x1267   :  { %v8924_v46 = vadd.f32 %v8923_v53, %v8922_v60 }
0x1269   :  { %v8925_v56 = vrot.slane %v8924_v46, 2 }
0x126b   :  { %v8926_v41 = vadd.f32 %v8925_v56, %v8924_v46 }
0x126d   :  { %v8927_v3 = vrot.slane %v8926_v41, 1 }
0x126f   :  { %v8928_v22 = vadd.f32 %v8927_v3, %v8926_v41 }
0x1271   :  { %v8929_v62 = vmul.f32 0.03125, %v8928_v22 }
0x1273   :  { %v8930_v39 = vadd.f32 1e-05, %v8929_v62 }
0x1275   :  { %12945 = vrsqrt.f32 %v8930_v39 }
0x1282   :  { %v12946_v0 = vpop.eup %12945 }
0x1283   :  { %v8932_v44 = vmul.f32 %v12946_v0, %v8863_v47 }
0x1285   :  { %v8936_v28 = vrot.slane %v8932_v44, %v18294_v1 }
0x1287   :  { %8972 = vrot.lane.b32.xlu0 %v8936_v28, %s13101_s30  ;;  %v8937_v55 = vmul.f32 %v8936_v28, %v8889_v58  ;;  %8945 = vrot.lane.b32.xlu1 %v8936_v28, %s13084_s7 }
0x1289   :  { %v8942_v42 = vadd.f32 %v8941_v43, %v8937_v55 }
0x128b   :  { %8943 = vst.msk [vmem:[#allocation3] sm:$0xff] %vm6858_vm7, %v8942_v42  ;;  %8976 = vrot.lane.b32.xlu0 %v8941_v43, %s13101_s30  ;;  %8959 = vrot.lane.b32.xlu1 %v8936_v28, %s13097_s26 }
0x128f   :  { %8963 = vrot.lane.b32.xlu1 %v8941_v43, %s13097_s26 }
0x1292   :  { %v8985_v48 = vld [vmem:[#allocation3] sm:$0xff] }
0x1293   :  { %12707 = vmatprep.mubr.msk.f32.mxu0 %vm6858_vm7, %v8985_v48 }
0x12f9   :  { %v8973_v36 = vpop.permute.xlu0 %8972  ;;  %v8946_v51 = vpop.permute.xlu1 %8945 }
0x12fa   :  { %v8948_v25 = vmul.f32 %v8946_v51, %v8894_v18  ;;  %v8975_v33 = vmul.f32 %v8973_v36, %v8902_v15 }
0x12fc   :  { %v8953_v19 = vadd.f32 %v8951_v24, %v8948_v25 }
0x12fd   :  { %v8977_v32 = vpop.permute.xlu0 %8976  ;;  %v8960_v45 = vpop.permute.xlu1 %8959 }
0x12fe   :  { %8955 = vrot.lane.b32.xlu1 %v8953_v19, %s13099_s17  ;;  %v8979_v34 = vadd.f32 %v8977_v32, %v8975_v33  ;;  %v8962_v26 = vmul.f32 %v8960_v45, %v8898_v7 }
0x1301   :  { %v8964_v10 = vpop.permute.xlu1 %8963 }
0x1302   :  { %v8966_v29 = vadd.f32 %v8964_v10, %v8962_v26  ;;  %8981 = vrot.lane.b32.xlu1 %v8979_v34, %s13100_s6  ;;  %v9087_v34 = vld [vmem:[%s17828_s20] sm:$0x3]  ;;  %s13106_s20 = smov 126  }
0x1303   :  { %v16514_v26 = vrot.slane %v9087_v34, %v18330_v52  ;;  %v9378_v10 = vld [vmem:[%s17829_s21] sm:$0xf]  ;;  %s13107_s21 = smov 122  }
0x1304   :  { %8968 = vrot.lane.b32.xlu0 %v8966_v29, %s13095_s2  ;;  %12713 = vmatprep.subr.msk.mxu1 %vm5930_vm5, %v9378_v10 }
0x1305   :  { %12714 = vmatpush3.msk.msra.mxu1 %vm5930_vm5, %v9378_v10 }
0x1370   :  { %v8956_v5 = vpop.permute.xlu1 %8955 }
0x1371   :  { %8958 = vst.msk [vmem:[#allocation3 + $0x8] sm:$0xff] %vm6858_vm7, %v8956_v5 }
0x1374   :  { %v8982_v63 = vpop.permute.xlu1 %8981 }
0x1375   :  { %8984 = vst.msk [vmem:[#allocation3 + $0x18] sm:$0xff] %vm6858_vm7, %v8982_v63 }
0x1376   :  { %v8969_v6 = vpop.permute.xlu0 %8968 }
0x1377   :  { %8971 = vst.msk [vmem:[#allocation3 + $0x10] sm:$0xff] %vm6858_vm7, %v8969_v6 }
0x1378   :  { %v8986_v30 = vld [vmem:[#allocation3 + $0x8] sm:$0xff] }
0x1379   :  { %12708 = vmatmul.mubr.msk.f32.vlgmr.msra.gmra.mxu0 %vm6858_vm7, %v8986_v30 }
0x137c   :  { %v8988_v27 = vld [vmem:[#allocation3 + $0x18] sm:$0xff] }
0x137e   :  { %v8987_v2 = vld [vmem:[#allocation3 + $0x10] sm:$0xff] }
0x137f   :  { %12710 = vmatprep.mubr.msk.f32.mxu0 %vm6858_vm7, %v8987_v2 }
0x1380   :  { %12711 = vmatmul.mubr.msk.f32.gmra.mxu0 %vm6858_vm7, %v8988_v27 }
0x1439   :  { %v16410_v37 = vpop.f32.mrf.mxu0 }
0x143a   :  { %v9089_v12 = vsel %vm7741_vm9, %v16410_v37, 0.0 }
0x143b   :  { %v16412_v4 = vpop.f32.mrf.mxu0 }
0x143c   :  { %v9088_v23 = vsel %vm7741_vm9, %v16412_v4, 0.0 }
0x143d   :  { %v9090_v20 = vadd.f32 %v9089_v12, %v9088_v23 }
0x1440   :  { %v16416_v40 = vpop.f32.mrf.mxu0 }
0x1441   :  { %v9093_v14 = vsel %vm7741_vm9, %v16416_v40, 0.0 }
0x1442   :  { %v16420_v17 = vpop.f32.mrf.mxu0 }
0x1443   :  { %v9091_v35 = vsel %vm7741_vm9, %v16420_v17, 0.0 }
0x1444   :  { %v9092_v13 = vadd.f32 %v9091_v35, %v9090_v20 }
0x1446   :  { %v9094_v54 = vadd.f32 %v9093_v14, %v9092_v13 }
0x1448   :  { %v9095_v7 = vrot.slane %v9094_v54, 4 }
0x144a   :  { %v9096_v18 = vadd.f32 %v9095_v7, %v9094_v54 }
0x144c   :  { %v9097_v38 = vrot.slane %v9096_v18, 2 }
0x144e   :  { %v9098_v31 = vadd.f32 %v9097_v38, %v9096_v18 }
0x1450   :  { %v9099_v8 = vrot.slane %v9098_v31, 1 }
0x1452   :  { %v9100_v15 = vadd.f32 %v9099_v8, %v9098_v31 }
0x1454   :  { %9106 = vrot.lane.b32.xlu1 %v9100_v15, %s13099_s17  ;;  %9102 = vrot.lane.b32.xlu0 %v9100_v15, %s13102_s19 }
0x1458   :  { %9110 = vrot.lane.b32.xlu0 %v9100_v15, %s13103_s0 }
0x14c6   :  { %v9103_v11 = vpop.permute.xlu0 %9102  ;;  %v9107_v43 = vpop.permute.xlu1 %9106 }
0x14c7   :  { %v9105_v47 = vadd.f32 %v9103_v11, %v9100_v15 }
0x14c9   :  { %v9109_v58 = vadd.f32 %v9107_v43, %v9105_v47 }
0x14ca   :  { %v9111_v9 = vpop.permute.xlu0 %9110 }
0x14cb   :  { %v9113_v21 = vadd.f32 %v9111_v9, %v9109_v58 }
0x14cd   :  { %v9114_v61 = vmul.f32 0.0078125, %v9113_v21 }
0x14cf   :  { %v16430_v57 = vrot.slane %v9114_v61, %v18294_v1 }
0x14d1   :  { %9131 = vrot.lane.b32.xlu0 %v16430_v57, %s13084_s7  ;;  %9124 = vrot.lane.b32.xlu1 %v16430_v57, %s13104_s29  ;;  %v9119_v30 = vsub.f32 %v16412_v4, %v16430_v57  ;;  %v9120_v2 = vsub.f32 %v16410_v37, %v16430_v57  ;;  %v9121_v35 = vsub.f32 %v16420_v17, %v16430_v57 }
0x14d2   :  { %v9122_v13 = vsub.f32 %v16416_v40, %v16430_v57 }
0x14d3   :  { %v9145_v12 = vmul.f32 %v9119_v30, %v9119_v30  ;;  %v9146_v20 = vmul.f32 %v9120_v2, %v9120_v2  ;;  %v9147_v38 = vmul.f32 %v9121_v35, %v9121_v35 }
0x14d4   :  { %v9148_v8 = vmul.f32 %v9122_v13, %v9122_v13 }
0x14d5   :  { %9138 = vrot.lane.b32.xlu1 %v16430_v57, %s13105_s13 }
0x1543   :  { %v9132_v16 = vpop.permute.xlu0 %9131  ;;  %v9125_v59 = vpop.permute.xlu1 %9124 }
0x1544   :  { %v16439_v50 = vsub.f32 %v16410_v37, %v9125_v59  ;;  %v16442_v60 = vsub.f32 %v16412_v4, %v9125_v59  ;;  %v16449_v56 = vsub.f32 %v16412_v4, %v9132_v16  ;;  %v16452_v41 = vsub.f32 %v16420_v17, %v9125_v59 }
0x1545   :  { %v16461_v62 = vsub.f32 %v16416_v40, %v9125_v59  ;;  %v16464_v39 = vsub.f32 %v16410_v37, %v9132_v16  ;;  %v16473_v55 = vsub.f32 %v16420_v17, %v9132_v16  ;;  %v16488_v36 = vsub.f32 %v16416_v40, %v9132_v16 }
0x1546   :  { %v9150_v53 = vmul.f32 %v16439_v50, %v16439_v50  ;;  %v9149_v46 = vmul.f32 %v16442_v60, %v16442_v60  ;;  %v9173_v3 = vmul.f32 %v16449_v56, %v16449_v56  ;;  %v9151_v22 = vmul.f32 %v16452_v41, %v16452_v41 }
0x1547   :  { %v9139_v0 = vpop.permute.xlu1 %9138  ;;  %v9152_v44 = vmul.f32 %v16461_v62, %v16461_v62  ;;  %v9174_v28 = vmul.f32 %v16464_v39, %v16464_v39  ;;  %v9175_v48 = vmul.f32 %v16473_v55, %v16473_v55  ;;  %v9176_v25 = vmul.f32 %v16488_v36, %v16488_v36 }
0x1548   :  { %9159 = vrot.lane.b32.xlu1 %v9150_v53, %s13102_s19  ;;  %9157 = vrot.lane.b32.xlu0 %v9149_v46, %s13102_s19  ;;  %v16476_v42 = vsub.f32 %v16412_v4, %v9139_v0  ;;  %v16485_v49 = vsub.f32 %v16410_v37, %v9139_v0  ;;  %v16497_v19 = vsub.f32 %v16420_v17, %v9139_v0 }
0x1549   :  { %v16500_v32 = vsub.f32 %v16416_v40, %v9139_v0 }
0x154a   :  { %v9197_v24 = vmul.f32 %v16476_v42, %v16476_v42  ;;  %v9198_v51 = vmul.f32 %v16485_v49, %v16485_v49  ;;  %v9199_v45 = vmul.f32 %v16497_v19, %v16497_v19 }
0x154b   :  { %v9200_v33 = vmul.f32 %v16500_v32, %v16500_v32 }
0x154c   :  { %9181 = vrot.lane.b32.xlu1 %v9173_v3, %s13099_s17  ;;  %9161 = vrot.lane.b32.xlu0 %v9151_v22, %s13102_s19 }
0x1550   :  { %9163 = vrot.lane.b32.xlu1 %v9152_v44, %s13102_s19  ;;  %9183 = vrot.lane.b32.xlu0 %v9174_v28, %s13099_s17 }
0x1554   :  { %9185 = vrot.lane.b32.xlu0 %v9175_v48, %s13099_s17  ;;  %9205 = vrot.lane.b32.xlu1 %v9197_v24, %s13103_s0 }
0x1558   :  { %9207 = vrot.lane.b32.xlu0 %v9198_v51, %s13103_s0  ;;  %9187 = vrot.lane.b32.xlu1 %v9176_v25, %s13099_s17 }
0x155c   :  { %9209 = vrot.lane.b32.xlu0 %v9199_v45, %s13103_s0  ;;  %9211 = vrot.lane.b32.xlu1 %v9200_v33, %s13103_s0 }
0x1560   :  { %9267 = vrot.lane.b32.xlu1 %v16514_v26, %s13104_s29 }
0x1564   :  { %9301 = vrot.lane.b32.xlu1 %v16514_v26, %s13084_s7 }
0x1568   :  { %9335 = vrot.lane.b32.xlu1 %v16514_v26, %s13105_s13 }
0x15ba   :  { %v9158_v29 = vpop.permute.xlu0 %9157  ;;  %v9160_v5 = vpop.permute.xlu1 %9159 }
0x15bb   :  { %v9169_v7 = vadd.f32 %v9158_v29, %v9145_v12  ;;  %v9170_v18 = vadd.f32 %v9160_v5, %v9146_v20 }
0x15be   :  { %v9162_v63 = vpop.permute.xlu0 %9161  ;;  %v9182_v6 = vpop.permute.xlu1 %9181 }
0x15bf   :  { %v9193_v31 = vadd.f32 %v9182_v6, %v9169_v7  ;;  %v9171_v11 = vadd.f32 %v9162_v63, %v9147_v38 }
0x15c2   :  { %v9184_v27 = vpop.permute.xlu0 %9183  ;;  %v9164_v23 = vpop.permute.xlu1 %9163 }
0x15c3   :  { %v9194_v4 = vadd.f32 %v9184_v27, %v9170_v18  ;;  %v9172_v47 = vadd.f32 %v9164_v23, %v9148_v8 }
0x15c6   :  { %v9186_v14 = vpop.permute.xlu0 %9185  ;;  %v9206_v54 = vpop.permute.xlu1 %9205 }
0x15c7   :  { %v9217_v43 = vadd.f32 %v9206_v54, %v9193_v31  ;;  %v9195_v9 = vadd.f32 %v9186_v14, %v9171_v11 }
0x15c9   :  { %v9221_v57 = vsel %vm5478_vm4, %v9217_v43, 0.0 }
0x15ca   :  { %v9208_v15 = vpop.permute.xlu0 %9207  ;;  %v9188_v37 = vpop.permute.xlu1 %9187 }
0x15cb   :  { %v9218_v58 = vadd.f32 %v9208_v15, %v9194_v4  ;;  %v9196_v21 = vadd.f32 %v9188_v37, %v9172_v47 }
0x15cd   :  { %v9222_v17 = vsel %vm5478_vm4, %v9218_v58, 0.0 }
0x15ce   :  { %v9210_v61 = vpop.permute.xlu0 %9209  ;;  %v9212_v40 = vpop.permute.xlu1 %9211  ;;  %v9223_v53 = vadd.f32 %v9222_v17, %v9221_v57 }
0x15cf   :  { %v9219_v16 = vadd.f32 %v9210_v61, %v9195_v9  ;;  %v9220_v59 = vadd.f32 %v9212_v40, %v9196_v21 }
0x15d1   :  { %v9224_v46 = vsel %vm5478_vm4, %v9219_v16, 0.0  ;;  %v9226_v22 = vsel %vm5478_vm4, %v9220_v59, 0.0 }
0x15d2   :  { %v9225_v3 = vadd.f32 %v9224_v46, %v9223_v53 }
0x15d4   :  { %v9227_v0 = vadd.f32 %v9226_v22, %v9225_v3 }
0x15d6   :  { %v9228_v44 = vrot.slane %v9227_v0, 4 }
0x15d8   :  { %v9229_v28 = vadd.f32 %v9228_v44, %v9227_v0 }
0x15da   :  { %v9230_v48 = vrot.slane %v9229_v28, 2 }
0x15dc   :  { %v9231_v24 = vadd.f32 %v9230_v48, %v9229_v28 }
0x15de   :  { %v9232_v51 = vrot.slane %v9231_v24, 1 }
0x15e0   :  { %v9233_v25 = vadd.f32 %v9232_v51, %v9231_v24 }
0x15e2   :  { %v9234_v45 = vmul.f32 0.0078125, %v9233_v25 }
0x15e4   :  { %v9235_v33 = vadd.f32 1e-05, %v9234_v45 }
0x15e6   :  { %12947 = vrsqrt.f32 %v9235_v33 }
0x15f3   :  { %v12948_v10 = vpop.eup %12947 }
0x15f4   :  { %v9237_v29 = vmul.f32 %v12948_v10, %v9087_v34 }
0x15f6   :  { %v9241_v5 = vrot.slane %v9237_v29, %v18294_v1 }
0x15f8   :  { %9259 = vrot.lane.b32.xlu0 %v9241_v5, %s13104_s29  ;;  %v9242_v63 = vmul.f32 %v9241_v5, %v9119_v30  ;;  %v9243_v6 = vmul.f32 %v9241_v5, %v9120_v2  ;;  %v9244_v27 = vmul.f32 %v9241_v5, %v9121_v35  ;;  %v9245_v23 = vmul.f32 %v9241_v5, %v9122_v13  ;;  %v9268_v13 = vpop.permute.xlu1 %9267 }
0x15fa   :  { %v9250_v12 = vadd.f32 %v16514_v26, %v9242_v63  ;;  %v9251_v20 = vadd.f32 %v16514_v26, %v9243_v6  ;;  %v9252_v14 = vadd.f32 %v16514_v26, %v9244_v27  ;;  %v9253_v54 = vadd.f32 %v16514_v26, %v9245_v23 }
0x15fc   :  { %9294 = vrot.lane.b32.xlu0 %v9241_v5, %s13084_s7  ;;  %9254 = vst.msk [vmem:[#allocation4] sm:$0xff] %vm5478_vm4, %v9250_v12  ;;  %9255 = vst.msk [vmem:[#allocation4 + $0x8] sm:$0xff] %vm5478_vm4, %v9251_v20  ;;  %s13108_s7 = smov 2  }
0x15fd   :  { %9256 = vst.msk [vmem:[#allocation4 + $0x10] sm:$0xff] %vm5478_vm4, %v9252_v14  ;;  %9257 = vst.msk [vmem:[#allocation4 + $0x18] sm:$0xff] %vm5478_vm4, %v9253_v54 }
0x1600   :  { %9328 = vrot.lane.b32.xlu0 %v9241_v5, %s13105_s13 }
0x1603   :  { %v9362_v34 = vld [vmem:[#allocation4] sm:$0xff]  ;;  %v9363_v30 = vld [vmem:[#allocation4 + $0x8] sm:$0xff] }
0x1604   :  { %12715 = vmatprep.mubr.msk.f32.mxu1 %vm5478_vm4, %v9362_v34  ;;  %v9364_v2 = vld [vmem:[#allocation4 + $0x10] sm:$0xff]  ;;  %v9365_v26 = vld [vmem:[#allocation4 + $0x18] sm:$0xff] }
0x1605   :  { %12716 = vmatmul.mubr.msk.f32.vlgmr.msra.gmra.mxu1 %vm5478_vm4, %v9363_v30 }
0x1606   :  { %12718 = vmatprep.mubr.msk.f32.mxu1 %vm5478_vm4, %v9364_v2 }
0x1609   :  { %12719 = vmatmul.mubr.msk.f32.gmra.mxu1 %vm5478_vm4, %v9365_v26 }
0x166a   :  { %v9260_v35 = vpop.permute.xlu0 %9259 }
0x166b   :  { %v9263_v7 = vmul.f32 %v9260_v35, %v16439_v50  ;;  %v9262_v18 = vmul.f32 %v9260_v35, %v16442_v60  ;;  %v9265_v4 = vmul.f32 %v9260_v35, %v16461_v62  ;;  %v9264_v8 = vmul.f32 %v9260_v35, %v16452_v41  ;;  %v9302_v50 = vpop.permute.xlu1 %9301 }
0x166d   :  { %v9271_v38 = vadd.f32 %v9268_v13, %v9263_v7  ;;  %v9270_v31 = vadd.f32 %v9268_v13, %v9262_v18  ;;  %v9273_v37 = vadd.f32 %v9268_v13, %v9265_v4  ;;  %v9272_v11 = vadd.f32 %v9268_v13, %v9264_v8 }
0x166e   :  { %v9295_v15 = vpop.permute.xlu0 %9294 }
0x166f   :  { %9280 = vrot.lane.b32.xlu1 %v9271_v38, %s13102_s19  ;;  %9278 = vrot.lane.b32.xlu0 %v9270_v31, %s13102_s19  ;;  %v9298_v47 = vmul.f32 %v9295_v15, %v16464_v39  ;;  %v9297_v43 = vmul.f32 %v9295_v15, %v16449_v56  ;;  %v9300_v41 = vmul.f32 %v9295_v15, %v16488_v36  ;;  %v9336_v61 = vpop.permute.xlu1 %9335 }
0x1670   :  { %v9299_v58 = vmul.f32 %v9295_v15, %v16473_v55 }
0x1671   :  { %v9305_v60 = vadd.f32 %v9302_v50, %v9298_v47  ;;  %v9304_v62 = vadd.f32 %v9302_v50, %v9297_v43  ;;  %v9307_v17 = vadd.f32 %v9302_v50, %v9300_v41 }
0x1672   :  { %v9329_v9 = vpop.permute.xlu0 %9328  ;;  %v9306_v39 = vadd.f32 %v9302_v50, %v9299_v58 }
0x1673   :  { %9284 = vrot.lane.b32.xlu1 %v9273_v37, %s13102_s19  ;;  %9282 = vrot.lane.b32.xlu0 %v9272_v11, %s13102_s19  ;;  %v9332_v56 = vmul.f32 %v9329_v9, %v16485_v49  ;;  %v9331_v21 = vmul.f32 %v9329_v9, %v16476_v42  ;;  %v9334_v55 = vmul.f32 %v9329_v9, %v16500_v32 }
0x1674   :  { %v9333_v57 = vmul.f32 %v9329_v9, %v16497_v19 }
0x1675   :  { %v9339_v40 = vadd.f32 %v9336_v61, %v9332_v56  ;;  %v9338_v36 = vadd.f32 %v9336_v61, %v9331_v21  ;;  %v9341_v16 = vadd.f32 %v9336_v61, %v9334_v55 }
0x1676   :  { %v9340_v59 = vadd.f32 %v9336_v61, %v9333_v57 }
0x1677   :  { %9314 = vrot.lane.b32.xlu1 %v9305_v60, %s13099_s17  ;;  %9312 = vrot.lane.b32.xlu0 %v9304_v62, %s13099_s17 }
0x167b   :  { %9318 = vrot.lane.b32.xlu1 %v9307_v17, %s13099_s17  ;;  %9316 = vrot.lane.b32.xlu0 %v9306_v39, %s13099_s17 }
0x167f   :  { %9348 = vrot.lane.b32.xlu1 %v9339_v40, %s13103_s0  ;;  %9346 = vrot.lane.b32.xlu0 %v9338_v36, %s13103_s0 }
0x1683   :  { %9352 = vrot.lane.b32.xlu1 %v9341_v16, %s13103_s0  ;;  %9350 = vrot.lane.b32.xlu0 %v9340_v59, %s13103_s0 }
0x16c5   :  { %v16603_v12 = vpop.f32.mrf.mxu1 }
0x16c6   :  { %v9577_v30 = vsel %vm6858_vm7, %v16603_v12, 0.0 }
0x16c7   :  { %v16605_v20 = vpop.f32.mrf.mxu1 }
0x16c8   :  { %v9576_v34 = vsel %vm6858_vm7, %v16605_v20, 0.0 }
0x16c9   :  { %v16607_v14 = vpop.f32.mrf.mxu1  ;;  %v9578_v26 = vadd.f32 %v9577_v30, %v9576_v34 }
0x16ca   :  { %v9581_v7 = vsel %vm6858_vm7, %v16607_v14, 0.0 }
0x16cb   :  { %v16609_v54 = vpop.f32.mrf.mxu1 }
0x16cc   :  { %v9579_v2 = vsel %vm6858_vm7, %v16609_v54, 0.0 }
0x16cd   :  { %v9580_v35 = vadd.f32 %v9579_v2, %v9578_v26 }
0x16cf   :  { %v9582_v38 = vadd.f32 %v9581_v7, %v9580_v35 }
0x16e1   :  { %v9281_v42 = vpop.permute.xlu1 %9280  ;;  %v9279_v49 = vpop.permute.xlu0 %9278 }
0x16e2   :  { %9291 = vst.msk [vmem:[#allocation4 + $0x28] sm:$0xff] %vm5478_vm4, %v9281_v42  ;;  %9290 = vst.msk [vmem:[#allocation4 + $0x20] sm:$0xff] %vm5478_vm4, %v9279_v49 }
0x16e5   :  { %v9285_v53 = vpop.permute.xlu1 %9284  ;;  %v9283_v32 = vpop.permute.xlu0 %9282 }
0x16e6   :  { %9293 = vst.msk [vmem:[#allocation4 + $0x38] sm:$0xff] %vm5478_vm4, %v9285_v53  ;;  %9292 = vst.msk [vmem:[#allocation4 + $0x30] sm:$0xff] %vm5478_vm4, %v9283_v32 }
0x16e9   :  { %v9315_v19 = vpop.permute.xlu1 %9314  ;;  %v9313_v46 = vpop.permute.xlu0 %9312  ;;  %v9366_v3 = vld [vmem:[#allocation4 + $0x20] sm:$0xff]  ;;  %v9367_v22 = vld [vmem:[#allocation4 + $0x28] sm:$0xff] }
0x16ea   :  { %9325 = vst.msk [vmem:[#allocation4 + $0x48] sm:$0xff] %vm5478_vm4, %v9315_v19  ;;  %9324 = vst.msk [vmem:[#allocation4 + $0x40] sm:$0xff] %vm5478_vm4, %v9313_v46  ;;  %12721 = vmatprep.mubr.msk.f32.mxu1 %vm5478_vm4, %v9366_v3 }
0x16eb   :  { %12722 = vmatmul.mubr.msk.f32.gmra.mxu1 %vm5478_vm4, %v9367_v22 }
0x16ed   :  { %v9319_v0 = vpop.permute.xlu1 %9318  ;;  %v9317_v44 = vpop.permute.xlu0 %9316  ;;  %v9368_v28 = vld [vmem:[#allocation4 + $0x30] sm:$0xff]  ;;  %v9369_v48 = vld [vmem:[#allocation4 + $0x38] sm:$0xff] }
0x16ee   :  { %9327 = vst.msk [vmem:[#allocation4 + $0x58] sm:$0xff] %vm5478_vm4, %v9319_v0  ;;  %9326 = vst.msk [vmem:[#allocation4 + $0x50] sm:$0xff] %vm5478_vm4, %v9317_v44  ;;  %12724 = vmatprep.mubr.msk.f32.mxu1 %vm5478_vm4, %v9368_v28 }
0x16ef   :  { %12725 = vmatmul.mubr.msk.f32.gmra.mxu1 %vm5478_vm4, %v9369_v48 }
0x16f1   :  { %v9349_v24 = vpop.permute.xlu1 %9348  ;;  %v9347_v51 = vpop.permute.xlu0 %9346  ;;  %v9370_v25 = vld [vmem:[#allocation4 + $0x40] sm:$0xff]  ;;  %v9371_v45 = vld [vmem:[#allocation4 + $0x48] sm:$0xff] }
0x16f2   :  { %9359 = vst.msk [vmem:[#allocation4 + $0x68] sm:$0xff] %vm5478_vm4, %v9349_v24  ;;  %9358 = vst.msk [vmem:[#allocation4 + $0x60] sm:$0xff] %vm5478_vm4, %v9347_v51  ;;  %12727 = vmatprep.mubr.msk.f32.mxu1 %vm5478_vm4, %v9370_v25 }
0x16f3   :  { %12728 = vmatmul.mubr.msk.f32.gmra.mxu1 %vm5478_vm4, %v9371_v45 }
0x16f5   :  { %v9353_v33 = vpop.permute.xlu1 %9352  ;;  %v9351_v10 = vpop.permute.xlu0 %9350  ;;  %v9372_v29 = vld [vmem:[#allocation4 + $0x50] sm:$0xff]  ;;  %v9373_v5 = vld [vmem:[#allocation4 + $0x58] sm:$0xff] }
0x16f6   :  { %9361 = vst.msk [vmem:[#allocation4 + $0x78] sm:$0xff] %vm5478_vm4, %v9353_v33  ;;  %9360 = vst.msk [vmem:[#allocation4 + $0x70] sm:$0xff] %vm5478_vm4, %v9351_v10  ;;  %12730 = vmatprep.mubr.msk.f32.mxu1 %vm5478_vm4, %v9372_v29 }
0x16f7   :  { %12731 = vmatmul.mubr.msk.f32.gmra.mxu1 %vm5478_vm4, %v9373_v5 }
0x16f9   :  { %v9374_v63 = vld [vmem:[#allocation4 + $0x60] sm:$0xff]  ;;  %v9375_v6 = vld [vmem:[#allocation4 + $0x68] sm:$0xff] }
0x16fa   :  { %12733 = vmatprep.mubr.msk.f32.mxu1 %vm5478_vm4, %v9374_v63 }
0x16fb   :  { %12734 = vmatmul.mubr.msk.f32.gmra.mxu1 %vm5478_vm4, %v9375_v6 }
0x16fd   :  { %v9376_v27 = vld [vmem:[#allocation4 + $0x70] sm:$0xff]  ;;  %v9377_v23 = vld [vmem:[#allocation4 + $0x78] sm:$0xff] }
0x16fe   :  { %12736 = vmatprep.mubr.msk.f32.mxu1 %vm5478_vm4, %v9376_v27 }
0x16ff   :  { %12737 = vmatmul.mubr.msk.f32.gmra.mxu1 %vm5478_vm4, %v9377_v23 }
0x17ab   :  { %v16617_v13 = vpop.f32.mrf.mxu1 }
0x17ac   :  { %v9585_v15 = vsel %vm6858_vm7, %v16617_v13, 0.0 }
0x17ad   :  { %v16621_v18 = vpop.f32.mrf.mxu1 }
0x17ae   :  { %v9583_v31 = vsel %vm6858_vm7, %v16621_v18, 0.0 }
0x17af   :  { %v9584_v4 = vadd.f32 %v9583_v31, %v9582_v38  ;;  %v16625_v8 = vpop.f32.mrf.mxu1 }
0x17b0   :  { %v9589_v60 = vsel %vm6858_vm7, %v16625_v8, 0.0 }
0x17b1   :  { %v16629_v37 = vpop.f32.mrf.mxu1  ;;  %v9586_v11 = vadd.f32 %v9585_v15, %v9584_v4 }
0x17b2   :  { %v9587_v47 = vsel %vm6858_vm7, %v16629_v37, 0.0 }
0x17b3   :  { %v9588_v43 = vadd.f32 %v9587_v47, %v9586_v11  ;;  %v16633_v50 = vpop.f32.mrf.mxu1 }
0x17b4   :  { %v9593_v39 = vsel %vm6858_vm7, %v16633_v50, 0.0 }
0x17b5   :  { %v16637_v62 = vpop.f32.mrf.mxu1  ;;  %v9590_v41 = vadd.f32 %v9589_v60, %v9588_v43 }
0x17b6   :  { %v9591_v58 = vsel %vm6858_vm7, %v16637_v62, 0.0 }
0x17b7   :  { %v9592_v9 = vadd.f32 %v9591_v58, %v9590_v41  ;;  %v16641_v17 = vpop.f32.mrf.mxu1 }
0x17b8   :  { %v9597_v55 = vsel %vm6858_vm7, %v16641_v17, 0.0 }
0x17b9   :  { %v16645_v56 = vpop.f32.mrf.mxu1  ;;  %v9594_v21 = vadd.f32 %v9593_v39, %v9592_v9 }
0x17ba   :  { %v9595_v61 = vsel %vm6858_vm7, %v16645_v56, 0.0 }
0x17bb   :  { %v9596_v40 = vadd.f32 %v9595_v61, %v9594_v21  ;;  %v16649_v36 = vpop.f32.mrf.mxu1 }
0x17bc   :  { %v9601_v53 = vsel %vm6858_vm7, %v16649_v36, 0.0 }
0x17bd   :  { %v16653_v57 = vpop.f32.mrf.mxu1  ;;  %v9598_v16 = vadd.f32 %v9597_v55, %v9596_v40 }
0x17be   :  { %v9599_v59 = vsel %vm6858_vm7, %v16653_v57, 0.0 }
0x17bf   :  { %v9600_v42 = vadd.f32 %v9599_v59, %v9598_v16  ;;  %v16657_v49 = vpop.f32.mrf.mxu1 }
0x17c0   :  { %v9605_v22 = vsel %vm6858_vm7, %v16657_v49, 0.0 }
0x17c1   :  { %v16661_v32 = vpop.f32.mrf.mxu1  ;;  %v9602_v19 = vadd.f32 %v9601_v53, %v9600_v42 }
0x17c2   :  { %v9603_v46 = vsel %vm6858_vm7, %v16661_v32, 0.0 }
0x17c3   :  { %v9604_v3 = vadd.f32 %v9603_v46, %v9602_v19 }
0x17c5   :  { %v9606_v0 = vadd.f32 %v9605_v22, %v9604_v3 }
0x17c7   :  { %v9607_v44 = vrot.slane %v9606_v0, 4 }
0x17c9   :  { %v9608_v28 = vadd.f32 %v9607_v44, %v9606_v0 }
0x17cb   :  { %v9609_v48 = vrot.slane %v9608_v28, 2 }
0x17cd   :  { %v9610_v24 = vadd.f32 %v9609_v48, %v9608_v28 }
0x17cf   :  { %v9611_v51 = vrot.slane %v9610_v24, 1 }
0x17d1   :  { %v9612_v25 = vadd.f32 %v9611_v51, %v9610_v24 }
0x17d3   :  { %9618 = vrot.lane.b32.xlu1 %v9612_v25, %s13102_s19  ;;  %9614 = vrot.lane.b32.xlu0 %v9612_v25, %s13106_s20 }
0x17d7   :  { %9622 = vrot.lane.b32.xlu0 %v9612_v25, %s13107_s21 }
0x1845   :  { %v9615_v45 = vpop.permute.xlu0 %9614  ;;  %v9619_v10 = vpop.permute.xlu1 %9618 }
0x1846   :  { %v9617_v33 = vadd.f32 %v9615_v45, %v9612_v25 }
0x1848   :  { %v9621_v29 = vadd.f32 %v9619_v10, %v9617_v33 }
0x1849   :  { %v9623_v5 = vpop.permute.xlu0 %9622 }
0x184a   :  { %v9625_v63 = vadd.f32 %v9623_v5, %v9621_v29 }
0x184c   :  { %v9626_v6 = vmul.f32 0.001953125, %v9625_v63 }
0x184e   :  { %v16671_v27 = vrot.slane %v9626_v6, %v18294_v1 }
0x1850   :  { %9667 = vrot.lane.b32.xlu0 %v16671_v27, %s13104_s29  ;;  %9648 = vrot.lane.b32.xlu1 %v16671_v27, %s13108_s7 }
0x1854   :  { %9686 = vrot.lane.b32.xlu1 %v16671_v27, %s13109_s3 }
0x18c2   :  { %v16679_v23 = vpop.permute.xlu0 %9667  ;;  %v16681_v34 = vpop.permute.xlu1 %9648 }
0x18c3   :  { %v16685_v30 = vsub.f32 %v16603_v12, %v16681_v34  ;;  %v16689_v2 = vsub.f32 %v16605_v20, %v16681_v34  ;;  %v16697_v7 = vsub.f32 %v16605_v20, %v16679_v23  ;;  %v16701_v38 = vsub.f32 %v16609_v54, %v16681_v34 }
0x18c4   :  { %v16711_v15 = vsub.f32 %v16607_v14, %v16681_v34  ;;  %v16715_v11 = vsub.f32 %v16603_v12, %v16679_v23  ;;  %v16727_v41 = vsub.f32 %v16609_v54, %v16679_v23  ;;  %v16745_v61 = vsub.f32 %v16621_v18, %v16681_v34 }
0x18c5   :  { %18335 = vst [vmem:[#allocation58_spill] sm:$0xff] %v16685_v30  ;;  %18336 = vst [vmem:[#allocation59_spill] sm:$0xff] %v16689_v2  ;;  %v9722_v26 = vmul.f32 %v16685_v30, %v16685_v30  ;;  %v9721_v35 = vmul.f32 %v16689_v2, %v16689_v2  ;;  %v9817_v31 = vmul.f32 %v16697_v7, %v16697_v7 }
0x18c6   :  { %18337 = vst [vmem:[#allocation60_spill] sm:$0xff] %v16697_v7  ;;  %18338 = vst [vmem:[#allocation61_spill] sm:$0xff] %v16701_v38  ;;  %v9723_v4 = vmul.f32 %v16701_v38, %v16701_v38  ;;  %v16717_v47 = vpop.permute.xlu1 %9686  ;;  %v9724_v43 = vmul.f32 %v16711_v15, %v16711_v15  ;;  %v9818_v60 = vmul.f32 %v16715_v11, %v16715_v11 }
0x18c7   :  { %9755 = vrot.lane.b32.xlu1 %v9722_v26, %s13106_s20  ;;  %9753 = vrot.lane.b32.xlu0 %v9721_v35, %s13106_s20  ;;  %18339 = vst [vmem:[#allocation62_spill] sm:$0xff] %v16711_v15  ;;  %18340 = vst [vmem:[#allocation63_spill] sm:$0xff] %v16715_v11  ;;  %v16731_v58 = vsub.f32 %v16605_v20, %v16717_v47  ;;  %v9819_v9 = vmul.f32 %v16727_v41, %v16727_v41 }
0x18c8   :  { %18341 = vst [vmem:[#allocation64_spill] sm:$0xff] %v16727_v41  ;;  %v16741_v21 = vsub.f32 %v16603_v12, %v16717_v47  ;;  %18344 = vst [vmem:[#allocation67_spill] sm:$0xff] %v16745_v61  ;;  %v9725_v55 = vmul.f32 %v16745_v61, %v16745_v61  ;;  %v16755_v16 = vsub.f32 %v16607_v14, %v16679_v23 }
0x18c9   :  { %18342 = vst [vmem:[#allocation65_spill] sm:$0xff] %v16731_v58  ;;  %v9913_v39 = vmul.f32 %v16731_v58, %v16731_v58  ;;  %v16759_v59 = vsub.f32 %v16609_v54, %v16717_v47  ;;  %v16769_v19 = vsub.f32 %v16617_v13, %v16681_v34  ;;  %v16773_v46 = vsub.f32 %v16621_v18, %v16679_v23 }
0x18ca   :  { %18343 = vst [vmem:[#allocation66_spill] sm:$0xff] %v16741_v21  ;;  %v9914_v40 = vmul.f32 %v16741_v21, %v16741_v21  ;;  %18345 = vst [vmem:[#allocation68_spill] sm:$0xff] %v16755_v16  ;;  %v9820_v42 = vmul.f32 %v16755_v16, %v16755_v16  ;;  %v16783_v0 = vsub.f32 %v16607_v14, %v16717_v47 }
0x18cb   :  { %9849 = vrot.lane.b32.xlu1 %v9817_v31, %s13102_s19  ;;  %9757 = vrot.lane.b32.xlu0 %v9723_v4, %s13106_s20  ;;  %18346 = vst [vmem:[#allocation69_spill] sm:$0xff] %v16759_v59  ;;  %v9915_v53 = vmul.f32 %v16759_v59, %v16759_v59  ;;  %18347 = vst [vmem:[#allocation21_spill] sm:$0xff] %v16769_v19  ;;  %v9726_v3 = vmul.f32 %v16769_v19, %v16769_v19 }
0x18cc   :  { %18348 = vst [vmem:[#allocation44_spill] sm:$0xff] %v16773_v46  ;;  %v9821_v22 = vmul.f32 %v16773_v46, %v16773_v46  ;;  %18349 = vst [vmem:[#allocation35_spill] sm:$0xff] %v16783_v0  ;;  %v16787_v44 = vsub.f32 %v16629_v37, %v16681_v34  ;;  %v9916_v28 = vmul.f32 %v16783_v0, %v16783_v0 }
0x18cd   :  { %v16797_v24 = vsub.f32 %v16617_v13, %v16679_v23  ;;  %v16801_v51 = vsub.f32 %v16621_v18, %v16717_v47  ;;  %v16811_v33 = vsub.f32 %v16625_v8, %v16681_v34  ;;  %v16815_v10 = vsub.f32 %v16629_v37, %v16679_v23 }
0x18ce   :  { %18350 = vst [vmem:[#allocation47_spill] sm:$0xff] %v16787_v44  ;;  %v9727_v48 = vmul.f32 %v16787_v44, %v16787_v44  ;;  %v16825_v63 = vsub.f32 %v16617_v13, %v16717_v47  ;;  %v16829_v6 = vsub.f32 %v16637_v62, %v16681_v34  ;;  %v16839_v31 = vsub.f32 %v16625_v8, %v16679_v23 }
0x18cf   :  { %9759 = vrot.lane.b32.xlu1 %v9724_v43, %s13106_s20  ;;  %9851 = vrot.lane.b32.xlu0 %v9818_v60, %s13102_s19  ;;  %18351 = vst [vmem:[#allocation36_spill] sm:$0xff] %v16797_v24  ;;  %18352 = vst [vmem:[#allocation37_spill] sm:$0xff] %v16801_v51  ;;  %v9822_v25 = vmul.f32 %v16797_v24, %v16797_v24  ;;  %v9917_v45 = vmul.f32 %v16801_v51, %v16801_v51 }
0x18d0   :  { %18353 = vst [vmem:[#allocation51_spill] sm:$0xff] %v16811_v33  ;;  %18354 = vst [vmem:[#allocation30_spill] sm:$0xff] %v16815_v10  ;;  %v9728_v29 = vmul.f32 %v16811_v33, %v16811_v33  ;;  %v9823_v5 = vmul.f32 %v16815_v10, %v16815_v10  ;;  %v9918_v26 = vmul.f32 %v16825_v63, %v16825_v63 }
0x18d1   :  { %18355 = vst [vmem:[#allocation46_spill] sm:$0xff] %v16825_v63  ;;  %18356 = vst [vmem:[#allocation43_spill] sm:$0xff] %v16829_v6  ;;  %v9729_v35 = vmul.f32 %v16829_v6, %v16829_v6  ;;  %v16843_v4 = vsub.f32 %v16629_v37, %v16717_v47  ;;  %v9824_v43 = vmul.f32 %v16839_v31, %v16839_v31 }
0x18d2   :  { %18357 = vst [vmem:[#allocation27_spill] sm:$0xff] %v16839_v31  ;;  %v17007_v51 = vsub.f32 %v16661_v32, %v16717_v47  ;;  %v17011_v63 = vsub.f32 %v16657_v49, %v16717_v47  ;;  %v17095_v38 = vsub.f32 %v16629_v37, %v16671_v27 }
0x18d3   :  { %9853 = vrot.lane.b32.xlu0 %v9819_v9, %s13102_s19  ;;  %9945 = vrot.lane.b32.xlu1 %v9913_v39, %s13107_s21  ;;  %18358 = vst [vmem:[#allocation45_spill] sm:$0xff] %v16843_v4  ;;  %v9919_v60 = vmul.f32 %v16843_v4, %v16843_v4  ;;  %v16853_v9 = vsub.f32 %v16633_v50, %v16681_v34 }
0x18d4   :  { %v16857_v39 = vsub.f32 %v16637_v62, %v16679_v23  ;;  %v16969_v4 = vsub.f32 %v16653_v57, %v16717_v47  ;;  %18381 = vst [vmem:[#allocation53_spill] sm:$0xff] %v17007_v51  ;;  %18382 = vst [vmem:[#allocation56_spill] sm:$0xff] %v17011_v63 }
0x18d5   :  { %18359 = vst [vmem:[#allocation52_spill] sm:$0xff] %v16853_v9 }
0x18d6   :  { %18360 = vst [vmem:[#allocation26_spill] sm:$0xff] %v16857_v39  ;;  %18376 = vst [vmem:[#allocation49_spill] sm:$0xff] %v16969_v4 }
0x18d7   :  { %9947 = vrot.lane.b32.xlu0 %v9914_v40, %s13107_s21  ;;  %9761 = vrot.lane.b32.xlu1 %v9725_v55, %s13106_s20  ;;  %v9730_v40 = vmul.f32 %v16853_v9, %v16853_v9  ;;  %v9825_v55 = vmul.f32 %v16857_v39, %v16857_v39  ;;  %v17073_v9 = vsub.f32 %v16607_v14, %v16671_v27 }
0x18d9   :  { %v9708_v14 = vmul.f32 %v17073_v9, %v17073_v9 }
0x18db   :  { %9855 = vrot.lane.b32.xlu0 %v9820_v42, %s13102_s19  ;;  %9949 = vrot.lane.b32.xlu1 %v9915_v53, %s13107_s21  ;;  %v16867_v42 = vsub.f32 %v16625_v8, %v16717_v47  ;;  %v16871_v53 = vsub.f32 %v16645_v56, %v16681_v34 }
0x18dd   :  { %18361 = vst [vmem:[#allocation41_spill] sm:$0xff] %v16867_v42  ;;  %18362 = vst [vmem:[#allocation31_spill] sm:$0xff] %v16871_v53 }
0x18df   :  { %9763 = vrot.lane.b32.xlu0 %v9726_v3, %s13106_s20  ;;  %9857 = vrot.lane.b32.xlu1 %v9821_v22, %s13102_s19  ;;  %v9920_v3 = vmul.f32 %v16867_v42, %v16867_v42  ;;  %v9731_v22 = vmul.f32 %v16871_v53, %v16871_v53  ;;  %v16983_v42 = vsub.f32 %v16661_v32, %v16679_v23 }
0x18e1   :  { %18378 = vst [vmem:[#allocation38_spill] sm:$0xff] %v16983_v42 }
0x18e3   :  { %9951 = vrot.lane.b32.xlu0 %v9916_v28, %s13107_s21  ;;  %9765 = vrot.lane.b32.xlu1 %v9727_v48, %s13106_s20  ;;  %v16881_v28 = vsub.f32 %v16633_v50, %v16679_v23  ;;  %v16885_v48 = vsub.f32 %v16637_v62, %v16717_v47 }
0x18e5   :  { %18363 = vst [vmem:[#allocation20_spill] sm:$0xff] %v16881_v28  ;;  %18364 = vst [vmem:[#allocation29_spill] sm:$0xff] %v16885_v48 }
0x18e7   :  { %9859 = vrot.lane.b32.xlu0 %v9822_v25, %s13102_s19  ;;  %9953 = vrot.lane.b32.xlu1 %v9917_v45, %s13107_s21  ;;  %v9826_v25 = vmul.f32 %v16881_v28, %v16881_v28  ;;  %v9921_v45 = vmul.f32 %v16885_v48, %v16885_v48  ;;  %v16955_v48 = vsub.f32 %v16661_v32, %v16681_v34 }
0x18e9   :  { %18374 = vst [vmem:[#allocation23_spill] sm:$0xff] %v16955_v48 }
0x18eb   :  { %9767 = vrot.lane.b32.xlu0 %v9728_v29, %s13106_s20  ;;  %9861 = vrot.lane.b32.xlu1 %v9823_v5, %s13102_s19  ;;  %v16895_v29 = vsub.f32 %v16641_v17, %v16681_v34  ;;  %v16899_v5 = vsub.f32 %v16645_v56, %v16679_v23 }
0x18ed   :  { %18365 = vst [vmem:[#allocation54_spill] sm:$0xff] %v16895_v29  ;;  %18366 = vst [vmem:[#allocation55_spill] sm:$0xff] %v16899_v5 }
0x18ef   :  { %9955 = vrot.lane.b32.xlu0 %v9918_v26, %s13107_s21  ;;  %9769 = vrot.lane.b32.xlu1 %v9729_v35, %s13106_s20  ;;  %v9732_v26 = vmul.f32 %v16895_v29, %v16895_v29  ;;  %v9827_v35 = vmul.f32 %v16899_v5, %v16899_v5 }
0x18f3   :  { %9863 = vrot.lane.b32.xlu0 %v9824_v43, %s13102_s19  ;;  %9957 = vrot.lane.b32.xlu1 %v9919_v60, %s13107_s21  ;;  %v16909_v43 = vsub.f32 %v16633_v50, %v16717_v47  ;;  %v16913_v60 = vsub.f32 %v16653_v57, %v16681_v34 }
0x18f5   :  { %18367 = vst [vmem:[#allocation28_spill] sm:$0xff] %v16909_v43  ;;  %18368 = vst [vmem:[#allocation42_spill] sm:$0xff] %v16913_v60 }
0x18f7   :  { %9771 = vrot.lane.b32.xlu0 %v9730_v40, %s13106_s20  ;;  %9865 = vrot.lane.b32.xlu1 %v9825_v55, %s13102_s19  ;;  %v9922_v40 = vmul.f32 %v16909_v43, %v16909_v43  ;;  %v9733_v55 = vmul.f32 %v16913_v60, %v16913_v60  ;;  %v16965_v43 = vsub.f32 %v16649_v36, %v16679_v23 }
0x18f9   :  { %18375 = vst [vmem:[#allocation22_spill] sm:$0xff] %v16965_v43 }
0x18fb   :  { %9959 = vrot.lane.b32.xlu0 %v9920_v3, %s13107_s21  ;;  %9773 = vrot.lane.b32.xlu1 %v9731_v22, %s13106_s20  ;;  %v16923_v3 = vsub.f32 %v16641_v17, %v16679_v23  ;;  %v16927_v22 = vsub.f32 %v16645_v56, %v16717_v47 }
0x18fd   :  { %18369 = vst [vmem:[#allocation40_spill] sm:$0xff] %v16923_v3  ;;  %18370 = vst [vmem:[#allocation57_spill] sm:$0xff] %v16927_v22 }
0x18ff   :  { %9867 = vrot.lane.b32.xlu0 %v9826_v25, %s13102_s19  ;;  %9961 = vrot.lane.b32.xlu1 %v9921_v45, %s13107_s21  ;;  %v9828_v25 = vmul.f32 %v16923_v3, %v16923_v3  ;;  %v9923_v45 = vmul.f32 %v16927_v22, %v16927_v22  ;;  %v16951_v22 = vsub.f32 %v16641_v17, %v16717_v47 }
0x1901   :  { %18373 = vst [vmem:[#allocation24_spill] sm:$0xff] %v16951_v22 }
0x1903   :  { %9775 = vrot.lane.b32.xlu0 %v9732_v26, %s13106_s20  ;;  %9869 = vrot.lane.b32.xlu1 %v9827_v35, %s13102_s19  ;;  %v16937_v26 = vsub.f32 %v16649_v36, %v16681_v34  ;;  %v16941_v35 = vsub.f32 %v16653_v57, %v16679_v23 }
0x1905   :  { %18371 = vst [vmem:[#allocation25_spill] sm:$0xff] %v16937_v26  ;;  %18372 = vst [vmem:[#allocation39_spill] sm:$0xff] %v16941_v35 }
0x1907   :  { %9963 = vrot.lane.b32.xlu0 %v9922_v40, %s13107_s21  ;;  %9777 = vrot.lane.b32.xlu1 %v9733_v55, %s13106_s20  ;;  %v9734_v40 = vmul.f32 %v16937_v26, %v16937_v26  ;;  %v9829_v55 = vmul.f32 %v16941_v35, %v16941_v35  ;;  %v17063_v26 = vsub.f32 %v16609_v54, %v16671_v27 }
0x1908   :  { %v17081_v54 = vsub.f32 %v16621_v18, %v16671_v27 }
0x1909   :  { %v9707_v6 = vmul.f32 %v17063_v26, %v17063_v26 }
0x190a   :  { %v9709_v2 = vmul.f32 %v17081_v54, %v17081_v54 }
0x190b   :  { %9871 = vrot.lane.b32.xlu0 %v9828_v25, %s13102_s19  ;;  %9965 = vrot.lane.b32.xlu1 %v9923_v45, %s13107_s21  ;;  %v9924_v25 = vmul.f32 %v16951_v22, %v16951_v22  ;;  %v9735_v45 = vmul.f32 %v16955_v48, %v16955_v48  ;;  %v16979_v22 = vsub.f32 %v16657_v49, %v16681_v34 }
0x190c   :  { %v16997_v34 = vsub.f32 %v16657_v49, %v16679_v23  ;;  %v9927_v23 = vmul.f32 %v17007_v51, %v17007_v51  ;;  %v17059_v48 = vsub.f32 %v16605_v20, %v16671_v27 }
0x190d   :  { %18377 = vst [vmem:[#allocation50_spill] sm:$0xff] %v16979_v22 }
0x190e   :  { %18380 = vst [vmem:[#allocation48_spill] sm:$0xff] %v16997_v34 }
0x190f   :  { %9779 = vrot.lane.b32.xlu0 %v9734_v40, %s13106_s20  ;;  %9873 = vrot.lane.b32.xlu1 %v9829_v55, %s13102_s19  ;;  %v9830_v40 = vmul.f32 %v16965_v43, %v16965_v43  ;;  %v9925_v55 = vmul.f32 %v16969_v4, %v16969_v4  ;;  %v16993_v4 = vsub.f32 %v16649_v36, %v16717_v47 }
0x1911   :  { %18379 = vst [vmem:[#allocation32_spill] sm:$0xff] %v16993_v4 }
0x1913   :  { %9967 = vrot.lane.b32.xlu0 %v9924_v25, %s13107_s21  ;;  %9781 = vrot.lane.b32.xlu1 %v9735_v45, %s13106_s20  ;;  %v9736_v25 = vmul.f32 %v16979_v22, %v16979_v22  ;;  %v9831_v45 = vmul.f32 %v16983_v42, %v16983_v42  ;;  %v17055_v22 = vsub.f32 %v16603_v12, %v16671_v27 }
0x1914   :  { %v9705_v12 = vmul.f32 %v17059_v48, %v17059_v48 }
0x1915   :  { %v9706_v53 = vmul.f32 %v17055_v22, %v17055_v22 }
0x1917   :  { %9875 = vrot.lane.b32.xlu0 %v9830_v40, %s13102_s19  ;;  %9969 = vrot.lane.b32.xlu1 %v9925_v55, %s13107_s21  ;;  %v9926_v40 = vmul.f32 %v16993_v4, %v16993_v4  ;;  %v9832_v55 = vmul.f32 %v16997_v34, %v16997_v34 }
0x191b   :  { %9783 = vrot.lane.b32.xlu0 %v9736_v25, %s13106_s20  ;;  %9877 = vrot.lane.b32.xlu1 %v9831_v45, %s13102_s19  ;;  %v9928_v25 = vmul.f32 %v17011_v63, %v17011_v63  ;;  %v17022_v45 = vld [vmem:[%s17830_s22] sm:$0x3] }
0x191c   :  { %v17028_v47 = vrot.slane %v17022_v45, %v18330_v52 }
0x191f   :  { %9971 = vrot.lane.b32.xlu0 %v9926_v40, %s13107_s21  ;;  %9879 = vrot.lane.b32.xlu1 %v9832_v55, %s13102_s19 }
0x1923   :  { %9973 = vrot.lane.b32.xlu0 %v9927_v23, %s13107_s21  ;;  %9975 = vrot.lane.b32.xlu1 %v9928_v25, %s13107_s21  ;;  %v10526_v25 = vld [vmem:[%s17831_s23] sm:$0x3] }
0x1924   :  { %12739 = vmatprep.subr.msk.mxu0 %vm3614_vm3, %v10526_v25 }
0x1925   :  { %12740 = vmatpush3.msk.msra.mxu0 %vm3614_vm3, %v10526_v25 }
0x1927   :  { %10127 = vrot.lane.b32.xlu1 %v17028_v47, %s13108_s7 }
0x192b   :  { %10245 = vrot.lane.b32.xlu1 %v17028_v47, %s13104_s29 }
0x1939   :  { %v9754_v40 = vpop.permute.xlu0 %9753  ;;  %v9756_v55 = vpop.permute.xlu1 %9755 }
0x193a   :  { %v9802_v20 = vadd.f32 %v9756_v55, %v9706_v53  ;;  %v9801_v33 = vadd.f32 %v9754_v40, %v9705_v12  ;;  %v17091_v53 = vsub.f32 %v16617_v13, %v16671_v27 }
0x193c   :  { %v9710_v37 = vmul.f32 %v17091_v53, %v17091_v53 }
0x193d   :  { %v9758_v51 = vpop.permute.xlu0 %9757  ;;  %v9850_v63 = vpop.permute.xlu1 %9849 }
0x193e   :  { %v9803_v61 = vadd.f32 %v9758_v51, %v9707_v6  ;;  %v9897_v55 = vadd.f32 %v9850_v63, %v9801_v33  ;;  %v17101_v6 = vsub.f32 %v16625_v8, %v16671_v27 }
0x1941   :  { %v9852_v4 = vpop.permute.xlu0 %9851  ;;  %v9760_v59 = vpop.permute.xlu1 %9759 }
0x1942   :  { %v9898_v15 = vadd.f32 %v9852_v4, %v9802_v20  ;;  %v9804_v18 = vadd.f32 %v9760_v59, %v9708_v14 }
0x1945   :  { %v9854_v0 = vpop.permute.xlu0 %9853  ;;  %v9946_v23 = vpop.permute.xlu1 %9945 }
0x1946   :  { %v9899_v40 = vadd.f32 %v9854_v0, %v9803_v61  ;;  %v9993_v51 = vadd.f32 %v9946_v23, %v9897_v55  ;;  %v9711_v61 = vmul.f32 %v17095_v38, %v17095_v38 }
0x1948   :  { %v10009_v23 = vsel %vm879_vm2, %v9993_v51, 0.0 }
0x1949   :  { %v9948_v52 = vpop.permute.xlu0 %9947  ;;  %v9762_v58 = vpop.permute.xlu1 %9761 }
0x194a   :  { %v9994_v12 = vadd.f32 %v9948_v52, %v9898_v15  ;;  %v9805_v13 = vadd.f32 %v9762_v58, %v9709_v2  ;;  %v17109_v15 = vsub.f32 %v16637_v62, %v16671_v27  ;;  %v9712_v2 = vmul.f32 %v17101_v6, %v17101_v6 }
0x194b   :  { %v17117_v58 = vsub.f32 %v16633_v50, %v16671_v27 }
0x194c   :  { %v10010_v59 = vsel %vm879_vm2, %v9994_v12, 0.0 }
0x194d   :  { %v9856_v21 = vpop.permute.xlu0 %9855  ;;  %v9950_v34 = vpop.permute.xlu1 %9949  ;;  %v9714_v51 = vmul.f32 %v17117_v58, %v17117_v58 }
0x194e   :  { %v9900_v30 = vadd.f32 %v9856_v21, %v9804_v18  ;;  %v9995_v33 = vadd.f32 %v9950_v34, %v9899_v40  ;;  %v10011_v18 = vadd.f32 %v10010_v59, %v10009_v23 }
0x1950   :  { %v10012_v52 = vsel %vm879_vm2, %v9995_v33, 0.0 }
0x1951   :  { %v9764_v42 = vpop.permute.xlu0 %9763  ;;  %v9858_v43 = vpop.permute.xlu1 %9857  ;;  %v10013_v12 = vadd.f32 %v10012_v52, %v10011_v18 }
0x1952   :  { %v9806_v0 = vadd.f32 %v9764_v42, %v9710_v37  ;;  %v9901_v8 = vadd.f32 %v9858_v43, %v9805_v13  ;;  %v17124_v42 = vsub.f32 %v16645_v56, %v16671_v27  ;;  %v17141_v37 = vsub.f32 %v16653_v57, %v16671_v27 }
0x1955   :  { %v9952_v35 = vpop.permute.xlu0 %9951  ;;  %v9766_v3 = vpop.permute.xlu1 %9765 }
0x1956   :  { %v9996_v63 = vadd.f32 %v9952_v35, %v9900_v30  ;;  %v9807_v62 = vadd.f32 %v9766_v3, %v9711_v61  ;;  %v9713_v30 = vmul.f32 %v17109_v15, %v17109_v15 }
0x1958   :  { %v10014_v43 = vsel %vm879_vm2, %v9996_v63, 0.0 }
0x1959   :  { %v9860_v5 = vpop.permute.xlu0 %9859  ;;  %v9954_v28 = vpop.permute.xlu1 %9953 }
0x195a   :  { %v9902_v14 = vadd.f32 %v9860_v5, %v9806_v0  ;;  %v9997_v55 = vadd.f32 %v9954_v28, %v9901_v8  ;;  %v17131_v28 = vsub.f32 %v16641_v17, %v16671_v27 }
0x195c   :  { %v10016_v13 = vsel %vm879_vm2, %v9997_v55, 0.0 }
0x195d   :  { %v9768_v39 = vpop.permute.xlu0 %9767  ;;  %v9862_v31 = vpop.permute.xlu1 %9861 }
0x195e   :  { %v9808_v35 = vadd.f32 %v9768_v39, %v9712_v2  ;;  %v9903_v50 = vadd.f32 %v9862_v31, %v9807_v62  ;;  %v10015_v31 = vadd.f32 %v10014_v43, %v10013_v12 }
0x1960   :  { %v10017_v0 = vadd.f32 %v10016_v13, %v10015_v31 }
0x1961   :  { %v9956_v10 = vpop.permute.xlu0 %9955  ;;  %v17039_v24 = vpop.permute.xlu1 %9769 }
0x1962   :  { %v9998_v40 = vadd.f32 %v9956_v10, %v9902_v14  ;;  %v9809_v56 = vadd.f32 %v17039_v24, %v9713_v30  ;;  %v9715_v10 = vmul.f32 %v17124_v42, %v17124_v42 }
0x1964   :  { %v10018_v17 = vsel %vm879_vm2, %v9998_v40, 0.0  ;;  %v17169_v40 = vsub.f32 %v16657_v49, %v16671_v27 }
0x1965   :  { %v17041_v46 = vpop.permute.xlu0 %9863  ;;  %v17043_v16 = vpop.permute.xlu1 %9957  ;;  %v10019_v52 = vadd.f32 %v10018_v17, %v10017_v0 }
0x1966   :  { %v9904_v33 = vadd.f32 %v17041_v46, %v9808_v35  ;;  %v9999_v39 = vadd.f32 %v17043_v16, %v9903_v50  ;;  %v9716_v16 = vmul.f32 %v17131_v28, %v17131_v28 }
0x1968   :  { %v10020_v63 = vsel %vm879_vm2, %v9999_v39, 0.0  ;;  %v9720_v39 = vmul.f32 %v17169_v40, %v17169_v40 }
0x1969   :  { %v17045_v41 = vpop.permute.xlu0 %9771  ;;  %v17047_v25 = vpop.permute.xlu1 %9865 }
0x196a   :  { %v9810_v61 = vadd.f32 %v17045_v41, %v9714_v51  ;;  %v9905_v59 = vadd.f32 %v17047_v25, %v9809_v56  ;;  %v9717_v41 = vmul.f32 %v17141_v37, %v17141_v37 }
0x196d   :  { %v17049_v11 = vpop.permute.xlu0 %9959  ;;  %v17051_v7 = vpop.permute.xlu1 %9773 }
0x196e   :  { %v10000_v24 = vadd.f32 %v17049_v11, %v9904_v33  ;;  %v9811_v23 = vadd.f32 %v17051_v7, %v9715_v10  ;;  %v17157_v11 = vsub.f32 %v16649_v36, %v16671_v27  ;;  %v10021_v7 = vadd.f32 %v10020_v63, %v10019_v52 }
0x196f   :  { %v17165_v36 = vsub.f32 %v16661_v32, %v16671_v27 }
0x1970   :  { %v10022_v25 = vsel %vm879_vm2, %v10000_v24, 0.0 }
0x1971   :  { %v17065_v60 = vpop.permute.xlu0 %9867  ;;  %v17067_v29 = vpop.permute.xlu1 %9961  ;;  %v10023_v50 = vadd.f32 %v10022_v25, %v10021_v7  ;;  %v9719_v49 = vmul.f32 %v17165_v36, %v17165_v36 }
0x1972   :  { %v9906_v57 = vadd.f32 %v17065_v60, %v9810_v61  ;;  %v10001_v2 = vadd.f32 %v17067_v29, %v9905_v59 }
0x1974   :  { %v10024_v29 = vsel %vm879_vm2, %v10001_v2, 0.0 }
0x1975   :  { %v17083_v44 = vpop.permute.xlu0 %9775  ;;  %v17085_v19 = vpop.permute.xlu1 %9869  ;;  %v10025_v51 = vadd.f32 %v10024_v29, %v10023_v50 }
0x1976   :  { %v9812_v62 = vadd.f32 %v17083_v44, %v9716_v16  ;;  %v9907_v14 = vadd.f32 %v17085_v19, %v9811_v23  ;;  %v9718_v44 = vmul.f32 %v17157_v11, %v17157_v11 }
0x1979   :  { %v9964_v4 = vpop.permute.xlu0 %9963  ;;  %v9778_v20 = vpop.permute.xlu1 %9777 }
0x197a   :  { %v10002_v55 = vadd.f32 %v9964_v4, %v9906_v57  ;;  %v9813_v30 = vadd.f32 %v9778_v20, %v9717_v41 }
0x197c   :  { %v10026_v19 = vsel %vm879_vm2, %v10002_v55, 0.0 }
0x197d   :  { %v9872_v21 = vpop.permute.xlu0 %9871  ;;  %v9966_v34 = vpop.permute.xlu1 %9965  ;;  %v10027_v32 = vadd.f32 %v10026_v19, %v10025_v51 }
0x197e   :  { %v9908_v43 = vadd.f32 %v9872_v21, %v9812_v62  ;;  %v10003_v35 = vadd.f32 %v9966_v34, %v9907_v14 }
0x1980   :  { %v10028_v34 = vsel %vm879_vm2, %v10003_v35, 0.0 }
0x1981   :  { %v9780_v5 = vpop.permute.xlu0 %9779  ;;  %v9874_v3 = vpop.permute.xlu1 %9873  ;;  %v10029_v31 = vadd.f32 %v10028_v34, %v10027_v32 }
0x1982   :  { %v9909_v4 = vadd.f32 %v9874_v3, %v9813_v30  ;;  %v9814_v13 = vadd.f32 %v9780_v5, %v9718_v44 }
0x1985   :  { %v9968_v46 = vpop.permute.xlu0 %9967  ;;  %v9782_v8 = vpop.permute.xlu1 %9781 }
0x1986   :  { %v10004_v12 = vadd.f32 %v9968_v46, %v9908_v43  ;;  %v9815_v17 = vadd.f32 %v9782_v8, %v9719_v49 }
0x1988   :  { %v10030_v33 = vsel %vm879_vm2, %v10004_v12, 0.0 }
0x1989   :  { %v9876_v18 = vpop.permute.xlu0 %9875  ;;  %v9970_v60 = vpop.permute.xlu1 %9969  ;;  %v10031_v5 = vadd.f32 %v10030_v33, %v10029_v31 }
0x198a   :  { %v10005_v56 = vadd.f32 %v9970_v60, %v9909_v4  ;;  %v9910_v27 = vadd.f32 %v9876_v18, %v9814_v13 }
0x198c   :  { %v10032_v61 = vsel %vm879_vm2, %v10005_v56, 0.0 }
0x198d   :  { %v9784_v20 = vpop.permute.xlu0 %9783  ;;  %v9878_v21 = vpop.permute.xlu1 %9877  ;;  %v10033_v63 = vadd.f32 %v10032_v61, %v10031_v5 }
0x198e   :  { %v9816_v59 = vadd.f32 %v9784_v20, %v9720_v39  ;;  %v9911_v0 = vadd.f32 %v9878_v21, %v9815_v17 }
0x1991   :  { %v9972_v3 = vpop.permute.xlu0 %9971  ;;  %v9880_v10 = vpop.permute.xlu1 %9879 }
0x1992   :  { %v10006_v24 = vadd.f32 %v9972_v3, %v9910_v27  ;;  %v9912_v46 = vadd.f32 %v9880_v10, %v9816_v59 }
0x1994   :  { %v10034_v16 = vsel %vm879_vm2, %v10006_v24, 0.0 }
0x1995   :  { %v9974_v23 = vpop.permute.xlu0 %9973  ;;  %v9976_v57 = vpop.permute.xlu1 %9975  ;;  %v10035_v41 = vadd.f32 %v10034_v16, %v10033_v63 }
0x1996   :  { %v10007_v2 = vadd.f32 %v9974_v23, %v9911_v0  ;;  %v10008_v52 = vadd.f32 %v9976_v57, %v9912_v46 }
0x1998   :  { %v10036_v25 = vsel %vm879_vm2, %v10007_v2, 0.0  ;;  %v10038_v8 = vsel %vm879_vm2, %v10008_v52, 0.0 }
0x1999   :  { %v10037_v62 = vadd.f32 %v10036_v25, %v10035_v41 }
0x199b   :  { %v10039_v14 = vadd.f32 %v10038_v8, %v10037_v62  ;;  %v10128_v62 = vpop.permute.xlu1 %10127  ;;  %v18383_v8 = vld [vmem:[#allocation58_spill] sm:$0xff] }
0x199d   :  { %v10040_v55 = vrot.slane %v10039_v14, 4 }
0x199f   :  { %v10041_v7 = vadd.f32 %v10040_v55, %v10039_v14  ;;  %v18384_v55 = vld [vmem:[#allocation59_spill] sm:$0xff] }
0x19a1   :  { %v10042_v18 = vrot.slane %v10041_v7, 2 }
0x19a3   :  { %v10043_v60 = vadd.f32 %v10042_v18, %v10041_v7 }
0x19a5   :  { %v10044_v29 = vrot.slane %v10043_v60, 1 }
0x19a7   :  { %v10045_v30 = vadd.f32 %v10044_v29, %v10043_v60  ;;  %v18385_v29 = vld [vmem:[#allocation61_spill] sm:$0xff] }
0x19a9   :  { %v10046_v43 = vmul.f32 0.001953125, %v10045_v30 }
0x19ab   :  { %v10047_v35 = vadd.f32 1e-05, %v10046_v43 }
0x19ad   :  { %12949 = vrsqrt.f32 %v10047_v35  ;;  %v18386_v35 = vld [vmem:[#allocation62_spill] sm:$0xff] }
0x19ba   :  { %v12950_v50 = vpop.eup %12949 }
0x19bb   :  { %v10049_v19 = vmul.f32 %v12950_v50, %v17022_v45 }
0x19bd   :  { %v10053_v44 = vrot.slane %v10049_v19, %v18294_v1  ;;  %v18387_v19 = vld [vmem:[#allocation67_spill] sm:$0xff] }
0x19bf   :  { %10107 = vrot.lane.b32.xlu0 %v10053_v44, %s13108_s7  ;;  %v10054_v4 = vmul.f32 %v10053_v44, %v17059_v48  ;;  %v10055_v12 = vmul.f32 %v10053_v44, %v17055_v22  ;;  %v10056_v51 = vmul.f32 %v10053_v44, %v17063_v26  ;;  %v10057_v20 = vmul.f32 %v10053_v44, %v17073_v9 }
0x19c0   :  { %v10058_v21 = vmul.f32 %v10053_v44, %v17081_v54  ;;  %v10059_v34 = vmul.f32 %v10053_v44, %v17091_v53  ;;  %v10060_v13 = vmul.f32 %v10053_v44, %v17095_v38  ;;  %v10061_v45 = vmul.f32 %v10053_v44, %v17101_v6 }
0x19c1   :  { %v10074_v1 = vadd.f32 %v17028_v47, %v10054_v4  ;;  %v10075_v56 = vadd.f32 %v17028_v47, %v10055_v12  ;;  %v10076_v48 = vadd.f32 %v17028_v47, %v10056_v51  ;;  %v10077_v22 = vadd.f32 %v17028_v47, %v10057_v20  ;;  %v18388_v51 = vld [vmem:[#allocation21_spill] sm:$0xff] }
0x19c2   :  { %v10078_v26 = vadd.f32 %v17028_v47, %v10058_v21  ;;  %v10079_v9 = vadd.f32 %v17028_v47, %v10059_v34  ;;  %v10080_v54 = vadd.f32 %v17028_v47, %v10060_v13  ;;  %v10081_v53 = vadd.f32 %v17028_v47, %v10061_v45  ;;  %v18389_v21 = vld [vmem:[#allocation47_spill] sm:$0xff] }
0x19c3   :  { %10226 = vrot.lane.b32.xlu0 %v10053_v44, %s13104_s29  ;;  %10090 = vst.msk [vmem:[#allocation5] sm:$0xff] %vm879_vm2, %v10074_v1  ;;  %10091 = vst.msk [vmem:[#allocation5 + $0x8] sm:$0xff] %vm879_vm2, %v10075_v56  ;;  %v10062_v38 = vmul.f32 %v10053_v44, %v17109_v15  ;;  %v10063_v6 = vmul.f32 %v10053_v44, %v17117_v58  ;;  %v10064_v32 = vmul.f32 %v10053_v44, %v17124_v42  ;;  %v18390_v1 = vld [vmem:[#allocation51_spill] sm:$0xff] }
0x19c4   :  { %10092 = vst.msk [vmem:[#allocation5 + $0x10] sm:$0xff] %vm879_vm2, %v10076_v48  ;;  %10093 = vst.msk [vmem:[#allocation5 + $0x18] sm:$0xff] %vm879_vm2, %v10077_v22  ;;  %v10065_v33 = vmul.f32 %v10053_v44, %v17131_v28  ;;  %v10066_v49 = vmul.f32 %v10053_v44, %v17141_v37  ;;  %v10067_v27 = vmul.f32 %v10053_v44, %v17157_v11  ;;  %v18391_v48 = vld [vmem:[#allocation43_spill] sm:$0xff] }
0x19c5   :  { %10094 = vst.msk [vmem:[#allocation5 + $0x20] sm:$0xff] %vm879_vm2, %v10078_v26  ;;  %10095 = vst.msk [vmem:[#allocation5 + $0x28] sm:$0xff] %vm879_vm2, %v10079_v9  ;;  %v10068_v15 = vmul.f32 %v10053_v44, %v17165_v36  ;;  %v10069_v58 = vmul.f32 %v10053_v44, %v17169_v40  ;;  %v10082_v42 = vadd.f32 %v17028_v47, %v10062_v38  ;;  %v18392_v9 = vld [vmem:[#allocation52_spill] sm:$0xff] }
0x19c6   :  { %10096 = vst.msk [vmem:[#allocation5 + $0x30] sm:$0xff] %vm879_vm2, %v10080_v54  ;;  %10097 = vst.msk [vmem:[#allocation5 + $0x38] sm:$0xff] %vm879_vm2, %v10081_v53  ;;  %v10083_v28 = vadd.f32 %v17028_v47, %v10063_v6  ;;  %v10084_v39 = vadd.f32 %v17028_v47, %v10064_v32  ;;  %v10085_v31 = vadd.f32 %v17028_v47, %v10065_v33  ;;  %v18393_v53 = vld [vmem:[#allocation31_spill] sm:$0xff]  ;;  %v18394_v33 = vld [vmem:[#allocation54_spill] sm:$0xff] }
0x19c7   :  { %v10086_v3 = vadd.f32 %v17028_v47, %v10066_v49  ;;  %v10087_v10 = vadd.f32 %v17028_v47, %v10067_v27  ;;  %v10088_v37 = vadd.f32 %v17028_v47, %v10068_v15  ;;  %v10089_v11 = vadd.f32 %v17028_v47, %v10069_v58  ;;  %10344 = vrot.lane.b32.xlu0 %v10053_v44, %s13109_s3  ;;  %v18395_v27 = vld [vmem:[#allocation42_spill] sm:$0xff] }
0x19c8   :  { %10098 = vst.msk [vmem:[#allocation5 + $0x40] sm:$0xff] %vm879_vm2, %v10082_v42  ;;  %10099 = vst.msk [vmem:[#allocation5 + $0x48] sm:$0xff] %vm879_vm2, %v10083_v28  ;;  %v18396_v28 = vld [vmem:[#allocation25_spill] sm:$0xff] }
0x19c9   :  { %10100 = vst.msk [vmem:[#allocation5 + $0x50] sm:$0xff] %vm879_vm2, %v10084_v39  ;;  %10101 = vst.msk [vmem:[#allocation5 + $0x58] sm:$0xff] %vm879_vm2, %v10085_v31  ;;  %v18397_v31 = vld [vmem:[#allocation23_spill] sm:$0xff] }
0x19ca   :  { %10102 = vst.msk [vmem:[#allocation5 + $0x60] sm:$0xff] %vm879_vm2, %v10086_v3  ;;  %10103 = vst.msk [vmem:[#allocation5 + $0x68] sm:$0xff] %vm879_vm2, %v10087_v10  ;;  %v10462_v36 = vld [vmem:[#allocation5] sm:$0xff]  ;;  %v10463_v40 = vld [vmem:[#allocation5 + $0x8] sm:$0xff] }
0x19cb   :  { %10104 = vst.msk [vmem:[#allocation5 + $0x70] sm:$0xff] %vm879_vm2, %v10088_v37  ;;  %10105 = vst.msk [vmem:[#allocation5 + $0x78] sm:$0xff] %vm879_vm2, %v10089_v11  ;;  %12741 = vmatprep.mubr.msk.f32.mxu0 %vm879_vm2, %v10462_v36  ;;  %v10464_v17 = vld [vmem:[#allocation5 + $0x10] sm:$0xff]  ;;  %v10465_v61 = vld [vmem:[#allocation5 + $0x18] sm:$0xff] }
0x19cc   :  { %12742 = vmatmul.mubr.msk.f32.vlgmr.msra.gmra.mxu0 %vm879_vm2, %v10463_v40  ;;  %v10466_v59 = vld [vmem:[#allocation5 + $0x20] sm:$0xff]  ;;  %v10467_v24 = vld [vmem:[#allocation5 + $0x28] sm:$0xff] }
0x19cd   :  { %12744 = vmatprep.mubr.msk.f32.mxu0 %vm879_vm2, %v10464_v17  ;;  %v10468_v5 = vld [vmem:[#allocation5 + $0x30] sm:$0xff]  ;;  %v10469_v0 = vld [vmem:[#allocation5 + $0x38] sm:$0xff]  ;;  %v18398_v36 = vld [vmem:[#allocation50_spill] sm:$0xff] }
0x19ce   :  { %v18399_v17 = vld [vmem:[#allocation60_spill] sm:$0xff] }
0x19cf   :  { %v10470_v16 = vld [vmem:[#allocation5 + $0x40] sm:$0xff]  ;;  %v10471_v46 = vld [vmem:[#allocation5 + $0x48] sm:$0xff] }
0x19d0   :  { %12745 = vmatmul.mubr.msk.f32.gmra.mxu0 %vm879_vm2, %v10465_v61  ;;  %v10472_v63 = vld [vmem:[#allocation5 + $0x50] sm:$0xff]  ;;  %v10473_v23 = vld [vmem:[#allocation5 + $0x58] sm:$0xff] }
0x19d1   :  { %12747 = vmatprep.mubr.msk.f32.mxu0 %vm879_vm2, %v10466_v59  ;;  %v10474_v57 = vld [vmem:[#allocation5 + $0x60] sm:$0xff]  ;;  %v10475_v2 = vld [vmem:[#allocation5 + $0x68] sm:$0xff]  ;;  %v10246_v59 = vpop.permute.xlu1 %10245 }
0x19d2   :  { %v10476_v52 = vld [vmem:[#allocation5 + $0x70] sm:$0xff]  ;;  %v10477_v41 = vld [vmem:[#allocation5 + $0x78] sm:$0xff] }
0x19d4   :  { %12748 = vmatmul.mubr.msk.f32.gmra.mxu0 %vm879_vm2, %v10467_v24 }
0x19d5   :  { %12750 = vmatprep.mubr.msk.f32.mxu0 %vm879_vm2, %v10468_v5 }
0x19d8   :  { %12751 = vmatmul.mubr.msk.f32.gmra.mxu0 %vm879_vm2, %v10469_v0  ;;  %v18400_v0 = vld [vmem:[#allocation63_spill] sm:$0xff] }
0x19d9   :  { %12753 = vmatprep.mubr.msk.f32.mxu0 %vm879_vm2, %v10470_v16 }
0x19dc   :  { %12754 = vmatmul.mubr.msk.f32.gmra.mxu0 %vm879_vm2, %v10471_v46  ;;  %v18401_v46 = vld [vmem:[#allocation64_spill] sm:$0xff] }
0x19dd   :  { %12756 = vmatprep.mubr.msk.f32.mxu0 %vm879_vm2, %v10472_v63 }
0x19e0   :  { %12757 = vmatmul.mubr.msk.f32.gmra.mxu0 %vm879_vm2, %v10473_v23 }
0x19e1   :  { %12759 = vmatprep.mubr.msk.f32.mxu0 %vm879_vm2, %v10474_v57 }
0x19e4   :  { %12760 = vmatmul.mubr.msk.f32.gmra.mxu0 %vm879_vm2, %v10475_v2  ;;  %v18402_v2 = vld [vmem:[#allocation68_spill] sm:$0xff] }
0x19e5   :  { %12762 = vmatprep.mubr.msk.f32.mxu0 %vm879_vm2, %v10476_v52 }
0x19e8   :  { %12763 = vmatmul.mubr.msk.f32.gmra.mxu0 %vm879_vm2, %v10477_v41  ;;  %v18403_v41 = vld [vmem:[#allocation44_spill] sm:$0xff] }
0x1a31   :  { %v10108_v25 = vpop.permute.xlu0 %10107 }
0x1a32   :  { %v10111_v14 = vmul.f32 %v10108_v25, %v18383_v8  ;;  %v10110_v7 = vmul.f32 %v10108_v25, %v18384_v55  ;;  %v10112_v30 = vmul.f32 %v10108_v25, %v18385_v29  ;;  %v10113_v50 = vmul.f32 %v10108_v25, %v18386_v35  ;;  %v18407_v35 = vld [vmem:[#allocation26_spill] sm:$0xff] }
0x1a33   :  { %v10114_v44 = vmul.f32 %v10108_v25, %v18387_v19  ;;  %v10115_v20 = vmul.f32 %v10108_v25, %v18388_v51  ;;  %v10116_v34 = vmul.f32 %v10108_v25, %v18389_v21  ;;  %v10117_v56 = vmul.f32 %v10108_v25, %v18390_v1  ;;  %v18409_v51 = vld [vmem:[#allocation55_spill] sm:$0xff] }
0x1a34   :  { %v10131_v18 = vadd.f32 %v10128_v62, %v10111_v14  ;;  %v10130_v60 = vadd.f32 %v10128_v62, %v10110_v7  ;;  %v10132_v43 = vadd.f32 %v10128_v62, %v10112_v30  ;;  %v10133_v4 = vadd.f32 %v10128_v62, %v10113_v50  ;;  %v18404_v14 = vld [vmem:[#allocation36_spill] sm:$0xff]  ;;  %v18405_v7 = vld [vmem:[#allocation30_spill] sm:$0xff]  ;;  %v18406_v30 = vld [vmem:[#allocation27_spill] sm:$0xff] }
0x1a35   :  { %v10134_v12 = vadd.f32 %v10128_v62, %v10114_v44  ;;  %v10135_v13 = vadd.f32 %v10128_v62, %v10115_v20  ;;  %v10136_v45 = vadd.f32 %v10128_v62, %v10116_v34  ;;  %v10118_v22 = vmul.f32 %v10108_v25, %v18391_v48  ;;  %v10227_v10 = vpop.permute.xlu0 %10226  ;;  %v18411_v1 = vld [vmem:[#allocation39_spill] sm:$0xff] }
0x1a36   :  { %10164 = vrot.lane.b32.xlu1 %v10131_v18, %s13106_s20  ;;  %10162 = vrot.lane.b32.xlu0 %v10130_v60, %s13106_s20  ;;  %v10119_v54 = vmul.f32 %v10108_v25, %v18392_v9  ;;  %v10120_v38 = vmul.f32 %v10108_v25, %v18393_v53  ;;  %v10121_v49 = vmul.f32 %v10108_v25, %v18394_v33  ;;  %v18413_v9 = vld [vmem:[#allocation38_spill] sm:$0xff] }
0x1a37   :  { %v10138_v26 = vadd.f32 %v10128_v62, %v10118_v22  ;;  %v10122_v15 = vmul.f32 %v10108_v25, %v18395_v27  ;;  %v10123_v39 = vmul.f32 %v10108_v25, %v18396_v28  ;;  %v10124_v3 = vmul.f32 %v10108_v25, %v18397_v31 }
0x1a38   :  { %v10139_v6 = vadd.f32 %v10128_v62, %v10119_v54  ;;  %v10140_v32 = vadd.f32 %v10128_v62, %v10120_v38  ;;  %v10141_v58 = vadd.f32 %v10128_v62, %v10121_v49  ;;  %v10125_v40 = vmul.f32 %v10108_v25, %v18398_v36  ;;  %v17322_v49 = vld [vmem:[%s17832_s24] ss:$0 sm:$0xff] }
0x1a39   :  { %v10142_v42 = vadd.f32 %v10128_v62, %v10122_v15  ;;  %v10143_v37 = vadd.f32 %v10128_v62, %v10123_v39  ;;  %v10144_v11 = vadd.f32 %v10128_v62, %v10124_v3  ;;  %v10229_v61 = vmul.f32 %v10227_v10, %v18399_v17 }
0x1a3a   :  { %10166 = vrot.lane.b32.xlu1 %v10132_v43, %s13106_s20  ;;  %10363 = vrot.lane.b32.xlu0 %v17028_v47, %s13109_s3  ;;  %v10137_v47 = vadd.f32 %v10128_v62, %v10117_v56  ;;  %v10145_v24 = vadd.f32 %v10128_v62, %v10125_v40  ;;  %v10230_v16 = vmul.f32 %v10227_v10, %v18400_v0 }
0x1a3b   :  { %v10248_v5 = vadd.f32 %v10246_v59, %v10229_v61  ;;  %v10231_v63 = vmul.f32 %v10227_v10, %v18401_v46  ;;  %v10232_v52 = vmul.f32 %v10227_v10, %v18402_v2  ;;  %v10233_v25 = vmul.f32 %v10227_v10, %v18403_v41  ;;  %v17380_v2 = vpop.permute.xlu0 %10344 }
0x1a3c   :  { %v10249_v23 = vadd.f32 %v10246_v59, %v10230_v16  ;;  %v10234_v55 = vmul.f32 %v10227_v10, %v18404_v14  ;;  %v10235_v18 = vmul.f32 %v10227_v10, %v18405_v7  ;;  %v10236_v43 = vmul.f32 %v10227_v10, %v18406_v30  ;;  %v18416_v30 = vld [vmem:[#allocation65_spill] sm:$0xff] }
0x1a3d   :  { %v10250_v57 = vadd.f32 %v10246_v59, %v10231_v63  ;;  %v10251_v62 = vadd.f32 %v10246_v59, %v10232_v52  ;;  %v10252_v8 = vadd.f32 %v10246_v59, %v10233_v25  ;;  %v10237_v50 = vmul.f32 %v10227_v10, %v18407_v35 }
0x1a3e   :  { %10168 = vrot.lane.b32.xlu1 %v10133_v4, %s13106_s20  ;;  %10170 = vrot.lane.b32.xlu0 %v10134_v12, %s13106_s20  ;;  %v10253_v60 = vadd.f32 %v10246_v59, %v10234_v55  ;;  %v10254_v29 = vadd.f32 %v10246_v59, %v10235_v18  ;;  %v10255_v19 = vadd.f32 %v10246_v59, %v10236_v43  ;;  %v18408_v4 = vld [vmem:[#allocation20_spill] sm:$0xff] }
0x1a3f   :  { %v10256_v44 = vadd.f32 %v10246_v59, %v10237_v50  ;;  %v10238_v12 = vmul.f32 %v10227_v10, %v18408_v4  ;;  %v10239_v20 = vmul.f32 %v10227_v10, %v18409_v51  ;;  %v10241_v56 = vmul.f32 %v10227_v10, %v18411_v1 }
0x1a40   :  { %v10243_v54 = vmul.f32 %v10227_v10, %v18413_v9  ;;  %v10347_v43 = vmul.f32 %v17380_v2, %v18416_v30 }
0x1a41   :  { %v10257_v21 = vadd.f32 %v10246_v59, %v10238_v12  ;;  %v10258_v34 = vadd.f32 %v10246_v59, %v10239_v20  ;;  %v10260_v22 = vadd.f32 %v10246_v59, %v10241_v56  ;;  %v18417_v12 = vld [vmem:[#allocation35_spill] sm:$0xff]  ;;  %v18418_v20 = vld [vmem:[#allocation69_spill] sm:$0xff] }
0x1a42   :  { %10172 = vrot.lane.b32.xlu1 %v10135_v13, %s13106_s20  ;;  %10174 = vrot.lane.b32.xlu0 %v10136_v45, %s13106_s20  ;;  %v18410_v13 = vld [vmem:[#allocation40_spill] sm:$0xff]  ;;  %v10262_v38 = vadd.f32 %v10246_v59, %v10243_v54  ;;  %v10350_v51 = vmul.f32 %v17380_v2, %v18417_v12  ;;  %v18430_v12 = vld [vmem:[#allocation53_spill] sm:$0xff] }
0x1a43   :  { %v10240_v45 = vmul.f32 %v10227_v10, %v18410_v13 }
0x1a45   :  { %v10259_v48 = vadd.f32 %v10246_v59, %v10240_v45 }
0x1a46   :  { %10176 = vrot.lane.b32.xlu1 %v10137_v47, %s13106_s20  ;;  %10178 = vrot.lane.b32.xlu0 %v10138_v26, %s13106_s20  ;;  %v18412_v47 = vld [vmem:[#allocation22_spill] sm:$0xff] }
0x1a47   :  { %v10242_v26 = vmul.f32 %v10227_v10, %v18412_v47 }
0x1a49   :  { %v10261_v53 = vadd.f32 %v10246_v59, %v10242_v26  ;;  %v18420_v26 = vld [vmem:[#allocation37_spill] sm:$0xff] }
0x1a4a   :  { %10180 = vrot.lane.b32.xlu1 %v10139_v6, %s13106_s20  ;;  %10182 = vrot.lane.b32.xlu0 %v10140_v32, %s13106_s20  ;;  %v18414_v6 = vld [vmem:[#allocation48_spill] sm:$0xff]  ;;  %v10351_v9 = vmul.f32 %v17380_v2, %v18420_v26 }
0x1a4b   :  { %v10244_v32 = vmul.f32 %v10227_v10, %v18414_v6 }
0x1a4d   :  { %v10263_v33 = vadd.f32 %v10246_v59, %v10244_v32 }
0x1a4e   :  { %10184 = vrot.lane.b32.xlu1 %v10141_v58, %s13106_s20  ;;  %10186 = vrot.lane.b32.xlu0 %v10142_v42, %s13106_s20 }
0x1a52   :  { %10188 = vrot.lane.b32.xlu1 %v10143_v37, %s13106_s20  ;;  %10190 = vrot.lane.b32.xlu0 %v10144_v11, %s13106_s20 }
0x1a56   :  { %10192 = vrot.lane.b32.xlu1 %v10145_v24, %s13106_s20  ;;  %10280 = vrot.lane.b32.xlu0 %v10248_v5, %s13102_s19 }
0x1a5a   :  { %10282 = vrot.lane.b32.xlu1 %v10249_v23, %s13102_s19  ;;  %10284 = vrot.lane.b32.xlu0 %v10250_v57, %s13102_s19 }
0x1a5e   :  { %10286 = vrot.lane.b32.xlu1 %v10251_v62, %s13102_s19  ;;  %10288 = vrot.lane.b32.xlu0 %v10252_v8, %s13102_s19 }
0x1a62   :  { %10290 = vrot.lane.b32.xlu1 %v10253_v60, %s13102_s19  ;;  %10292 = vrot.lane.b32.xlu0 %v10254_v29, %s13102_s19  ;;  %v18415_v60 = vld [vmem:[#allocation66_spill] sm:$0xff] }
0x1a63   :  { %v10348_v29 = vmul.f32 %v17380_v2, %v18415_v60 }
0x1a66   :  { %10294 = vrot.lane.b32.xlu1 %v10255_v19, %s13102_s19  ;;  %10296 = vrot.lane.b32.xlu0 %v10256_v44, %s13102_s19 }
0x1a6a   :  { %10298 = vrot.lane.b32.xlu1 %v10257_v21, %s13102_s19  ;;  %10300 = vrot.lane.b32.xlu0 %v10258_v34, %s13102_s19  ;;  %v10349_v21 = vmul.f32 %v17380_v2, %v18418_v20 }
0x1a6e   :  { %10302 = vrot.lane.b32.xlu1 %v10259_v48, %s13102_s19  ;;  %10304 = vrot.lane.b32.xlu0 %v10260_v22, %s13102_s19  ;;  %v18419_v22 = vld [vmem:[#allocation46_spill] sm:$0xff] }
0x1a6f   :  { %v10352_v47 = vmul.f32 %v17380_v2, %v18419_v22 }
0x1a72   :  { %10306 = vrot.lane.b32.xlu1 %v10261_v53, %s13102_s19  ;;  %10308 = vrot.lane.b32.xlu0 %v10262_v38, %s13102_s19 }
0x1a76   :  { %10310 = vrot.lane.b32.xlu1 %v10263_v33, %s13102_s19  ;;  %v18421_v33 = vld [vmem:[#allocation41_spill] sm:$0xff] }
0x1a8c   :  { %v12743_v27 = vpop.f32.mrf.mxu0 }
0x1a8d   :  { %v10801_v15 = vadd.f32 %v12743_v27, %v17322_v49  ;;  %v10354_v27 = vmul.f32 %v17380_v2, %v18421_v33 }
0x1a8e   :  { %v10795_v58 = vpop.f32.mrf.mxu0 }
0x1a8f   :  { %11115 = vst.msk [vmem:[%s17833_s25 + $0x8] sm:$0xff] %vm6858_vm7, %v10801_v15  ;;  %v10796_v42 = vadd.f32 %v17322_v49, %v10795_v58  ;;  %v18422_v15 = vld [vmem:[#allocation45_spill] sm:$0xff] }
0x1a90   :  { %v12746_v28 = vpop.f32.mrf.mxu0  ;;  %v10353_v58 = vmul.f32 %v17380_v2, %v18422_v15 }
0x1a91   :  { %11114 = vst.msk [vmem:[%s17833_s25] sm:$0xff] %vm6858_vm7, %v10796_v42  ;;  %v10811_v39 = vadd.f32 %v12746_v28, %v17322_v49 }
0x1a92   :  { %v10805_v31 = vpop.f32.mrf.mxu0 }
0x1a93   :  { %11117 = vst.msk [vmem:[%s17833_s25 + $0x18] sm:$0xff] %vm6858_vm7, %v10811_v39  ;;  %v10806_v3 = vadd.f32 %v17322_v49, %v10805_v31 }
0x1a94   :  { %v12749_v10 = vpop.f32.mrf.mxu0 }
0x1a95   :  { %11116 = vst.msk [vmem:[%s17833_s25 + $0x10] sm:$0xff] %vm6858_vm7, %v10806_v3  ;;  %v10821_v37 = vadd.f32 %v12749_v10, %v17322_v49 }
0x1a96   :  { %v10815_v11 = vpop.f32.mrf.mxu0 }
0x1a97   :  { %11119 = vst.msk [vmem:[%s17833_s25 + $0x28] sm:$0xff] %vm6858_vm7, %v10821_v37  ;;  %v10816_v36 = vadd.f32 %v17322_v49, %v10815_v11  ;;  %v18423_v37 = vld [vmem:[#allocation28_spill] sm:$0xff] }
0x1a98   :  { %v12752_v40 = vpop.f32.mrf.mxu0  ;;  %v10356_v11 = vmul.f32 %v17380_v2, %v18423_v37 }
0x1a99   :  { %11118 = vst.msk [vmem:[%s17833_s25 + $0x20] sm:$0xff] %vm6858_vm7, %v10816_v36  ;;  %v10831_v17 = vadd.f32 %v12752_v40, %v17322_v49  ;;  %v18424_v36 = vld [vmem:[#allocation29_spill] sm:$0xff] }
0x1a9a   :  { %v10825_v61 = vpop.f32.mrf.mxu0  ;;  %v10355_v40 = vmul.f32 %v17380_v2, %v18424_v36 }
0x1a9b   :  { %11121 = vst.msk [vmem:[%s17833_s25 + $0x38] sm:$0xff] %vm6858_vm7, %v10831_v17  ;;  %v10826_v59 = vadd.f32 %v17322_v49, %v10825_v61 }
0x1a9c   :  { %v12755_v24 = vpop.f32.mrf.mxu0 }
0x1a9d   :  { %11120 = vst.msk [vmem:[%s17833_s25 + $0x30] sm:$0xff] %vm6858_vm7, %v10826_v59  ;;  %v10841_v5 = vadd.f32 %v12755_v24, %v17322_v49 }
0x1a9e   :  { %v10835_v0 = vpop.f32.mrf.mxu0 }
0x1a9f   :  { %11123 = vst.msk [vmem:[%s17833_s25 + $0x48] sm:$0xff] %vm6858_vm7, %v10841_v5  ;;  %v10836_v16 = vadd.f32 %v17322_v49, %v10835_v0 }
0x1aa0   :  { %v12758_v46 = vpop.f32.mrf.mxu0 }
0x1aa1   :  { %11122 = vst.msk [vmem:[%s17833_s25 + $0x40] sm:$0xff] %vm6858_vm7, %v10836_v16  ;;  %v10851_v63 = vadd.f32 %v12758_v46, %v17322_v49  ;;  %v18425_v16 = vld [vmem:[#allocation24_spill] sm:$0xff] }
0x1aa2   :  { %v10845_v23 = vpop.f32.mrf.mxu0  ;;  %v10358_v46 = vmul.f32 %v17380_v2, %v18425_v16 }
0x1aa3   :  { %11125 = vst.msk [vmem:[%s17833_s25 + $0x58] sm:$0xff] %vm6858_vm7, %v10851_v63  ;;  %v10846_v57 = vadd.f32 %v17322_v49, %v10845_v23  ;;  %v18426_v63 = vld [vmem:[#allocation57_spill] sm:$0xff] }
0x1aa4   :  { %v12761_v52 = vpop.f32.mrf.mxu0  ;;  %v10357_v23 = vmul.f32 %v17380_v2, %v18426_v63 }
0x1aa5   :  { %11124 = vst.msk [vmem:[%s17833_s25 + $0x50] sm:$0xff] %vm6858_vm7, %v10846_v57  ;;  %v10861_v41 = vadd.f32 %v12761_v52, %v17322_v49 }
0x1aa6   :  { %v10855_v25 = vpop.f32.mrf.mxu0 }
0x1aa7   :  { %11127 = vst.msk [vmem:[%s17833_s25 + $0x68] sm:$0xff] %vm6858_vm7, %v10861_v41  ;;  %v10856_v62 = vadd.f32 %v17322_v49, %v10855_v25 }
0x1aa8   :  { %v10165_v8 = vpop.permute.xlu1 %10164  ;;  %v10163_v14 = vpop.permute.xlu0 %10162 }
0x1aa9   :  { %11126 = vst.msk [vmem:[%s17833_s25 + $0x60] sm:$0xff] %vm6858_vm7, %v10856_v62  ;;  %v12764_v55 = vpop.f32.mrf.mxu0 }
0x1aaa   :  { %10211 = vst.msk [vmem:[#allocation5 + $0x88] sm:$0xff] %vm879_vm2, %v10165_v8  ;;  %10210 = vst.msk [vmem:[#allocation5 + $0x80] sm:$0xff] %vm879_vm2, %v10163_v14  ;;  %v10871_v7 = vadd.f32 %v12764_v55, %v17322_v49  ;;  %v18427_v14 = vld [vmem:[#allocation32_spill] sm:$0xff] }
0x1aab   :  { %v10865_v18 = vpop.f32.mrf.mxu0  ;;  %v10360_v55 = vmul.f32 %v17380_v2, %v18427_v14 }
0x1aac   :  { %11129 = vst.msk [vmem:[%s17833_s25 + $0x78] sm:$0xff] %vm6858_vm7, %v10871_v7  ;;  %v10866_v35 = vadd.f32 %v17322_v49, %v10865_v18  ;;  %v10167_v50 = vpop.permute.xlu1 %10166  ;;  %v17408_v19 = vpop.permute.xlu0 %10363  ;;  %v18428_v7 = vld [vmem:[#allocation49_spill] sm:$0xff] }
0x1aad   :  { %10212 = vst.msk [vmem:[#allocation5 + $0x90] sm:$0xff] %vm879_vm2, %v10167_v50  ;;  %v10367_v44 = vadd.f32 %v17408_v19, %v10348_v29  ;;  %v10366_v4 = vadd.f32 %v17408_v19, %v10347_v43  ;;  %v10369_v56 = vadd.f32 %v17408_v19, %v10350_v51  ;;  %v10368_v48 = vadd.f32 %v17408_v19, %v10349_v21 }
0x1aae   :  { %11128 = vst.msk [vmem:[%s17833_s25 + $0x70] sm:$0xff] %vm6858_vm7, %v10866_v35  ;;  %v10371_v6 = vadd.f32 %v17408_v19, %v10352_v47  ;;  %v10370_v32 = vadd.f32 %v17408_v19, %v10351_v9  ;;  %v10373_v3 = vadd.f32 %v17408_v19, %v10354_v27  ;;  %v10372_v10 = vadd.f32 %v17408_v19, %v10353_v58 }
0x1aaf   :  { %10400 = vrot.lane.b32.xlu1 %v10367_v44, %s13107_s21  ;;  %10398 = vrot.lane.b32.xlu0 %v10366_v4, %s13107_s21  ;;  %v10375_v5 = vadd.f32 %v17408_v19, %v10356_v11  ;;  %v10374_v0 = vadd.f32 %v17408_v19, %v10355_v40  ;;  %v10377_v62 = vadd.f32 %v17408_v19, %v10358_v46  ;;  %v18429_v44 = vld [vmem:[#allocation56_spill] sm:$0xff] }
0x1ab0   :  { %v10169_v34 = vpop.permute.xlu1 %10168  ;;  %v10171_v13 = vpop.permute.xlu0 %10170  ;;  %v10376_v8 = vadd.f32 %v17408_v19, %v10357_v23  ;;  %v10359_v18 = vmul.f32 %v17380_v2, %v18428_v7  ;;  %v10379_v35 = vadd.f32 %v17408_v19, %v10360_v55  ;;  %v10362_v4 = vmul.f32 %v17380_v2, %v18429_v44 }
0x1ab1   :  { %v10478_v45 = vld [vmem:[#allocation5 + $0x80] sm:$0xff]  ;;  %v10479_v1 = vld [vmem:[#allocation5 + $0x88] sm:$0xff]  ;;  %10213 = vst.msk [vmem:[#allocation5 + $0x98] sm:$0xff] %vm879_vm2, %v10169_v34  ;;  %10214 = vst.msk [vmem:[#allocation5 + $0xa0] sm:$0xff] %vm879_vm2, %v10171_v13  ;;  %v10361_v51 = vmul.f32 %v17380_v2, %v18430_v12 }
0x1ab2   :  { %12765 = vmatprep.mubr.msk.f32.mxu0 %vm879_vm2, %v10478_v45  ;;  %v10378_v50 = vadd.f32 %v17408_v19, %v10359_v18  ;;  %v10381_v45 = vadd.f32 %v17408_v19, %v10362_v4 }
0x1ab3   :  { %12766 = vmatmul.mubr.msk.f32.gmra.mxu0 %vm879_vm2, %v10479_v1  ;;  %10404 = vrot.lane.b32.xlu1 %v10369_v56, %s13107_s21  ;;  %v10380_v1 = vadd.f32 %v17408_v19, %v10361_v51 }
0x1ab4   :  { %10402 = vrot.lane.b32.xlu0 %v10368_v48, %s13107_s21  ;;  %v10173_v54 = vpop.permute.xlu1 %10172  ;;  %v10175_v53 = vpop.permute.xlu0 %10174  ;;  %v10480_v38 = vld [vmem:[#allocation5 + $0x90] sm:$0xff] }
0x1ab5   :  { %10215 = vst.msk [vmem:[#allocation5 + $0xa8] sm:$0xff] %vm879_vm2, %v10173_v54  ;;  %10216 = vst.msk [vmem:[#allocation5 + $0xb0] sm:$0xff] %vm879_vm2, %v10175_v53  ;;  %12768 = vmatprep.mubr.msk.f32.mxu0 %vm879_vm2, %v10480_v38 }
0x1ab7   :  { %10408 = vrot.lane.b32.xlu1 %v10371_v6, %s13107_s21 }
0x1ab8   :  { %10406 = vrot.lane.b32.xlu0 %v10370_v32, %s13107_s21  ;;  %v10177_v42 = vpop.permute.xlu1 %10176  ;;  %v10179_v28 = vpop.permute.xlu0 %10178  ;;  %v10481_v39 = vld [vmem:[#allocation5 + $0x98] sm:$0xff]  ;;  %v10482_v31 = vld [vmem:[#allocation5 + $0xa0] sm:$0xff] }
0x1ab9   :  { %10217 = vst.msk [vmem:[#allocation5 + $0xb8] sm:$0xff] %vm879_vm2, %v10177_v42  ;;  %10218 = vst.msk [vmem:[#allocation5 + $0xc0] sm:$0xff] %vm879_vm2, %v10179_v28  ;;  %12769 = vmatmul.mubr.msk.f32.gmra.mxu0 %vm879_vm2, %v10481_v39 }
0x1aba   :  { %12771 = vmatprep.mubr.msk.f32.mxu0 %vm879_vm2, %v10482_v31 }
0x1abb   :  { %10412 = vrot.lane.b32.xlu1 %v10373_v3, %s13107_s21 }
0x1abc   :  { %10410 = vrot.lane.b32.xlu0 %v10372_v10, %s13107_s21  ;;  %v10181_v17 = vpop.permute.xlu1 %10180  ;;  %v10183_v61 = vpop.permute.xlu0 %10182  ;;  %v10483_v59 = vld [vmem:[#allocation5 + $0xa8] sm:$0xff]  ;;  %v10484_v24 = vld [vmem:[#allocation5 + $0xb0] sm:$0xff] }
0x1abd   :  { %10219 = vst.msk [vmem:[#allocation5 + $0xc8] sm:$0xff] %vm879_vm2, %v10181_v17  ;;  %10220 = vst.msk [vmem:[#allocation5 + $0xd0] sm:$0xff] %vm879_vm2, %v10183_v61  ;;  %12772 = vmatmul.mubr.msk.f32.gmra.mxu0 %vm879_vm2, %v10483_v59 }
0x1abe   :  { %12774 = vmatprep.mubr.msk.f32.mxu0 %vm879_vm2, %v10484_v24 }
0x1abf   :  { %10416 = vrot.lane.b32.xlu1 %v10375_v5, %s13107_s21 }
0x1ac0   :  { %10414 = vrot.lane.b32.xlu0 %v10374_v0, %s13107_s21  ;;  %v10185_v57 = vpop.permute.xlu1 %10184  ;;  %v10187_v52 = vpop.permute.xlu0 %10186  ;;  %v10485_v41 = vld [vmem:[#allocation5 + $0xb8] sm:$0xff]  ;;  %v10486_v25 = vld [vmem:[#allocation5 + $0xc0] sm:$0xff] }
0x1ac1   :  { %10221 = vst.msk [vmem:[#allocation5 + $0xd8] sm:$0xff] %vm879_vm2, %v10185_v57  ;;  %10222 = vst.msk [vmem:[#allocation5 + $0xe0] sm:$0xff] %vm879_vm2, %v10187_v52  ;;  %12775 = vmatmul.mubr.msk.f32.gmra.mxu0 %vm879_vm2, %v10485_v41 }
0x1ac2   :  { %12777 = vmatprep.mubr.msk.f32.mxu0 %vm879_vm2, %v10486_v25 }
0x1ac3   :  { %10420 = vrot.lane.b32.xlu1 %v10377_v62, %s13107_s21 }
0x1ac4   :  { %10418 = vrot.lane.b32.xlu0 %v10376_v8, %s13107_s21  ;;  %v10189_v60 = vpop.permute.xlu1 %10188  ;;  %v10191_v29 = vpop.permute.xlu0 %10190  ;;  %v10487_v30 = vld [vmem:[#allocation5 + $0xc8] sm:$0xff]  ;;  %v10488_v43 = vld [vmem:[#allocation5 + $0xd0] sm:$0xff] }
0x1ac5   :  { %10223 = vst.msk [vmem:[#allocation5 + $0xe8] sm:$0xff] %vm879_vm2, %v10189_v60  ;;  %10224 = vst.msk [vmem:[#allocation5 + $0xf0] sm:$0xff] %vm879_vm2, %v10191_v29  ;;  %12778 = vmatmul.mubr.msk.f32.gmra.mxu0 %vm879_vm2, %v10487_v30 }
0x1ac6   :  { %12780 = vmatprep.mubr.msk.f32.mxu0 %vm879_vm2, %v10488_v43 }
0x1ac7   :  { %10424 = vrot.lane.b32.xlu1 %v10379_v35, %s13107_s21 }
0x1ac8   :  { %10422 = vrot.lane.b32.xlu0 %v10378_v50, %s13107_s21  ;;  %v10193_v20 = vpop.permute.xlu1 %10192  ;;  %v10281_v21 = vpop.permute.xlu0 %10280  ;;  %v10489_v34 = vld [vmem:[#allocation5 + $0xd8] sm:$0xff]  ;;  %v10490_v13 = vld [vmem:[#allocation5 + $0xe0] sm:$0xff] }
0x1ac9   :  { %10225 = vst.msk [vmem:[#allocation5 + $0xf8] sm:$0xff] %vm879_vm2, %v10193_v20  ;;  %10328 = vst.msk [vmem:[#allocation5 + $0x100] sm:$0xff] %vm879_vm2, %v10281_v21  ;;  %12781 = vmatmul.mubr.msk.f32.gmra.mxu0 %vm879_vm2, %v10489_v34 }
0x1aca   :  { %12783 = vmatprep.mubr.msk.f32.mxu0 %vm879_vm2, %v10490_v13 }
0x1acb   :  { %10428 = vrot.lane.b32.xlu1 %v10381_v45, %s13107_s21 }
0x1acc   :  { %10426 = vrot.lane.b32.xlu0 %v10380_v1, %s13107_s21  ;;  %v10283_v2 = vpop.permute.xlu1 %10282  ;;  %v10285_v56 = vpop.permute.xlu0 %10284  ;;  %v10491_v48 = vld [vmem:[#allocation5 + $0xe8] sm:$0xff]  ;;  %v10492_v22 = vld [vmem:[#allocation5 + $0xf0] sm:$0xff] }
0x1acd   :  { %10329 = vst.msk [vmem:[#allocation5 + $0x108] sm:$0xff] %vm879_vm2, %v10283_v2  ;;  %10330 = vst.msk [vmem:[#allocation5 + $0x110] sm:$0xff] %vm879_vm2, %v10285_v56  ;;  %12784 = vmatmul.mubr.msk.f32.gmra.mxu0 %vm879_vm2, %v10491_v48 }
0x1ace   :  { %12786 = vmatprep.mubr.msk.f32.mxu0 %vm879_vm2, %v10492_v22 }
0x1ad0   :  { %v10287_v47 = vpop.permute.xlu1 %10286  ;;  %v10289_v19 = vpop.permute.xlu0 %10288  ;;  %v10493_v26 = vld [vmem:[#allocation5 + $0xf8] sm:$0xff]  ;;  %v10494_v9 = vld [vmem:[#allocation5 + $0x100] sm:$0xff] }
0x1ad1   :  { %10331 = vst.msk [vmem:[#allocation5 + $0x118] sm:$0xff] %vm879_vm2, %v10287_v47  ;;  %10332 = vst.msk [vmem:[#allocation5 + $0x120] sm:$0xff] %vm879_vm2, %v10289_v19  ;;  %12787 = vmatmul.mubr.msk.f32.gmra.mxu0 %vm879_vm2, %v10493_v26 }
0x1ad2   :  { %12789 = vmatprep.mubr.msk.f32.mxu0 %vm879_vm2, %v10494_v9 }
0x1ad4   :  { %v10291_v54 = vpop.permute.xlu1 %10290  ;;  %v10293_v53 = vpop.permute.xlu0 %10292  ;;  %v10495_v38 = vld [vmem:[#allocation5 + $0x108] sm:$0xff]  ;;  %v10496_v6 = vld [vmem:[#allocation5 + $0x110] sm:$0xff] }
0x1ad5   :  { %10333 = vst.msk [vmem:[#allocation5 + $0x128] sm:$0xff] %vm879_vm2, %v10291_v54  ;;  %10334 = vst.msk [vmem:[#allocation5 + $0x130] sm:$0xff] %vm879_vm2, %v10293_v53  ;;  %12790 = vmatmul.mubr.msk.f32.gmra.mxu0 %vm879_vm2, %v10495_v38 }
0x1ad6   :  { %12792 = vmatprep.mubr.msk.f32.mxu0 %vm879_vm2, %v10496_v6 }
0x1ad8   :  { %v10295_v32 = vpop.permute.xlu1 %10294  ;;  %v10297_v33 = vpop.permute.xlu0 %10296  ;;  %v10497_v27 = vld [vmem:[#allocation5 + $0x118] sm:$0xff]  ;;  %v10498_v15 = vld [vmem:[#allocation5 + $0x120] sm:$0xff] }
0x1ad9   :  { %10335 = vst.msk [vmem:[#allocation5 + $0x138] sm:$0xff] %vm879_vm2, %v10295_v32  ;;  %10336 = vst.msk [vmem:[#allocation5 + $0x140] sm:$0xff] %vm879_vm2, %v10297_v33  ;;  %12793 = vmatmul.mubr.msk.f32.gmra.mxu0 %vm879_vm2, %v10497_v27 }
0x1ada   :  { %12795 = vmatprep.mubr.msk.f32.mxu0 %vm879_vm2, %v10498_v15 }
0x1adc   :  { %v10299_v58 = vpop.permute.xlu1 %10298  ;;  %v10301_v42 = vpop.permute.xlu0 %10300  ;;  %v10499_v28 = vld [vmem:[#allocation5 + $0x128] sm:$0xff]  ;;  %v10500_v39 = vld [vmem:[#allocation5 + $0x130] sm:$0xff] }
0x1add   :  { %10337 = vst.msk [vmem:[#allocation5 + $0x148] sm:$0xff] %vm879_vm2, %v10299_v58  ;;  %10338 = vst.msk [vmem:[#allocation5 + $0x150] sm:$0xff] %vm879_vm2, %v10301_v42  ;;  %12796 = vmatmul.mubr.msk.f32.gmra.mxu0 %vm879_vm2, %v10499_v28 }
0x1ade   :  { %12798 = vmatprep.mubr.msk.f32.mxu0 %vm879_vm2, %v10500_v39 }
0x1ae0   :  { %v10303_v31 = vpop.permute.xlu1 %10302  ;;  %v10305_v3 = vpop.permute.xlu0 %10304  ;;  %v10501_v10 = vld [vmem:[#allocation5 + $0x138] sm:$0xff]  ;;  %v10502_v37 = vld [vmem:[#allocation5 + $0x140] sm:$0xff] }
0x1ae1   :  { %10339 = vst.msk [vmem:[#allocation5 + $0x158] sm:$0xff] %vm879_vm2, %v10303_v31  ;;  %10340 = vst.msk [vmem:[#allocation5 + $0x160] sm:$0xff] %vm879_vm2, %v10305_v3  ;;  %12799 = vmatmul.mubr.msk.f32.gmra.mxu0 %vm879_vm2, %v10501_v10 }
0x1ae2   :  { %12801 = vmatprep.mubr.msk.f32.mxu0 %vm879_vm2, %v10502_v37 }
0x1ae4   :  { %v10307_v11 = vpop.permute.xlu1 %10306  ;;  %v10309_v36 = vpop.permute.xlu0 %10308  ;;  %v10503_v40 = vld [vmem:[#allocation5 + $0x148] sm:$0xff]  ;;  %v10504_v17 = vld [vmem:[#allocation5 + $0x150] sm:$0xff] }
0x1ae5   :  { %10341 = vst.msk [vmem:[#allocation5 + $0x168] sm:$0xff] %vm879_vm2, %v10307_v11  ;;  %10342 = vst.msk [vmem:[#allocation5 + $0x170] sm:$0xff] %vm879_vm2, %v10309_v36  ;;  %12802 = vmatmul.mubr.msk.f32.gmra.mxu0 %vm879_vm2, %v10503_v40 }
0x1ae6   :  { %12804 = vmatprep.mubr.msk.f32.mxu0 %vm879_vm2, %v10504_v17 }
0x1ae8   :  { %v10311_v61 = vpop.permute.xlu1 %10310  ;;  %v10505_v59 = vld [vmem:[#allocation5 + $0x158] sm:$0xff]  ;;  %v10506_v24 = vld [vmem:[#allocation5 + $0x160] sm:$0xff] }
0x1ae9   :  { %10343 = vst.msk [vmem:[#allocation5 + $0x178] sm:$0xff] %vm879_vm2, %v10311_v61  ;;  %12805 = vmatmul.mubr.msk.f32.gmra.mxu0 %vm879_vm2, %v10505_v59 }
0x1aea   :  { %12807 = vmatprep.mubr.msk.f32.mxu0 %vm879_vm2, %v10506_v24 }
0x1aec   :  { %v10507_v5 = vld [vmem:[#allocation5 + $0x168] sm:$0xff]  ;;  %v10508_v0 = vld [vmem:[#allocation5 + $0x170] sm:$0xff] }
0x1aed   :  { %12808 = vmatmul.mubr.msk.f32.gmra.mxu0 %vm879_vm2, %v10507_v5 }
0x1aee   :  { %12810 = vmatprep.mubr.msk.f32.mxu0 %vm879_vm2, %v10508_v0 }
0x1af0   :  { %v10509_v16 = vld [vmem:[#allocation5 + $0x178] sm:$0xff] }
0x1af1   :  { %12811 = vmatmul.mubr.msk.f32.gmra.mxu0 %vm879_vm2, %v10509_v16 }
0x1b21   :  { %v10401_v46 = vpop.permute.xlu1 %10400  ;;  %v10399_v63 = vpop.permute.xlu0 %10398 }
0x1b22   :  { %10447 = vst.msk [vmem:[#allocation5 + $0x188] sm:$0xff] %vm879_vm2, %v10401_v46  ;;  %10446 = vst.msk [vmem:[#allocation5 + $0x180] sm:$0xff] %vm879_vm2, %v10399_v63 }
0x1b25   :  { %v10405_v23 = vpop.permute.xlu1 %10404 }
0x1b26   :  { %v10403_v57 = vpop.permute.xlu0 %10402  ;;  %10449 = vst.msk [vmem:[#allocation5 + $0x198] sm:$0xff] %vm879_vm2, %v10405_v23 }
0x1b27   :  { %10448 = vst.msk [vmem:[#allocation5 + $0x190] sm:$0xff] %vm879_vm2, %v10403_v57 }
0x1b29   :  { %v10409_v52 = vpop.permute.xlu1 %10408  ;;  %v10510_v25 = vld [vmem:[#allocation5 + $0x180] sm:$0xff]  ;;  %v10511_v62 = vld [vmem:[#allocation5 + $0x188] sm:$0xff] }
0x1b2a   :  { %v10407_v41 = vpop.permute.xlu0 %10406  ;;  %10451 = vst.msk [vmem:[#allocation5 + $0x1a8] sm:$0xff] %vm879_vm2, %v10409_v52  ;;  %12813 = vmatprep.mubr.msk.f32.mxu0 %vm879_vm2, %v10510_v25 }
0x1b2b   :  { %10450 = vst.msk [vmem:[#allocation5 + $0x1a0] sm:$0xff] %vm879_vm2, %v10407_v41  ;;  %12814 = vmatmul.mubr.msk.f32.gmra.mxu0 %vm879_vm2, %v10511_v62 }
0x1b2d   :  { %v10413_v8 = vpop.permute.xlu1 %10412  ;;  %v10513_v7 = vld [vmem:[#allocation5 + $0x198] sm:$0xff] }
0x1b2e   :  { %v10411_v14 = vpop.permute.xlu0 %10410  ;;  %v10512_v55 = vld [vmem:[#allocation5 + $0x190] sm:$0xff]  ;;  %10453 = vst.msk [vmem:[#allocation5 + $0x1b8] sm:$0xff] %vm879_vm2, %v10413_v8 }
0x1b2f   :  { %10452 = vst.msk [vmem:[#allocation5 + $0x1b0] sm:$0xff] %vm879_vm2, %v10411_v14  ;;  %12816 = vmatprep.mubr.msk.f32.mxu0 %vm879_vm2, %v10512_v55 }
0x1b30   :  { %12817 = vmatmul.mubr.msk.f32.gmra.mxu0 %vm879_vm2, %v10513_v7 }
0x1b31   :  { %v10417_v18 = vpop.permute.xlu1 %10416  ;;  %v10515_v30 = vld [vmem:[#allocation5 + $0x1a8] sm:$0xff] }
0x1b32   :  { %v10415_v60 = vpop.permute.xlu0 %10414  ;;  %v10514_v29 = vld [vmem:[#allocation5 + $0x1a0] sm:$0xff]  ;;  %10455 = vst.msk [vmem:[#allocation5 + $0x1c8] sm:$0xff] %vm879_vm2, %v10417_v18 }
0x1b33   :  { %10454 = vst.msk [vmem:[#allocation5 + $0x1c0] sm:$0xff] %vm879_vm2, %v10415_v60  ;;  %12819 = vmatprep.mubr.msk.f32.mxu0 %vm879_vm2, %v10514_v29 }
0x1b34   :  { %12820 = vmatmul.mubr.msk.f32.gmra.mxu0 %vm879_vm2, %v10515_v30 }
0x1b35   :  { %v10421_v43 = vpop.permute.xlu1 %10420  ;;  %v10517_v44 = vld [vmem:[#allocation5 + $0x1b8] sm:$0xff] }
0x1b36   :  { %v10419_v35 = vpop.permute.xlu0 %10418  ;;  %v10516_v50 = vld [vmem:[#allocation5 + $0x1b0] sm:$0xff]  ;;  %10457 = vst.msk [vmem:[#allocation5 + $0x1d8] sm:$0xff] %vm879_vm2, %v10421_v43 }
0x1b37   :  { %10456 = vst.msk [vmem:[#allocation5 + $0x1d0] sm:$0xff] %vm879_vm2, %v10419_v35  ;;  %12822 = vmatprep.mubr.msk.f32.mxu0 %vm879_vm2, %v10516_v50 }
0x1b38   :  { %12823 = vmatmul.mubr.msk.f32.gmra.mxu0 %vm879_vm2, %v10517_v44 }
0x1b39   :  { %v10425_v4 = vpop.permute.xlu1 %10424  ;;  %v10519_v20 = vld [vmem:[#allocation5 + $0x1c8] sm:$0xff] }
0x1b3a   :  { %v10423_v12 = vpop.permute.xlu0 %10422  ;;  %v10518_v51 = vld [vmem:[#allocation5 + $0x1c0] sm:$0xff]  ;;  %10459 = vst.msk [vmem:[#allocation5 + $0x1e8] sm:$0xff] %vm879_vm2, %v10425_v4 }
0x1b3b   :  { %10458 = vst.msk [vmem:[#allocation5 + $0x1e0] sm:$0xff] %vm879_vm2, %v10423_v12  ;;  %12825 = vmatprep.mubr.msk.f32.mxu0 %vm879_vm2, %v10518_v51 }
0x1b3c   :  { %12826 = vmatmul.mubr.msk.f32.gmra.mxu0 %vm879_vm2, %v10519_v20 }
0x1b3d   :  { %v10429_v21 = vpop.permute.xlu1 %10428  ;;  %v10521_v45 = vld [vmem:[#allocation5 + $0x1d8] sm:$0xff] }
0x1b3e   :  { %v10427_v34 = vpop.permute.xlu0 %10426  ;;  %v10520_v13 = vld [vmem:[#allocation5 + $0x1d0] sm:$0xff]  ;;  %10461 = vst.msk [vmem:[#allocation5 + $0x1f8] sm:$0xff] %vm879_vm2, %v10429_v21 }
0x1b3f   :  { %10460 = vst.msk [vmem:[#allocation5 + $0x1f0] sm:$0xff] %vm879_vm2, %v10427_v34  ;;  %12828 = vmatprep.mubr.msk.f32.mxu0 %vm879_vm2, %v10520_v13 }
0x1b40   :  { %12829 = vmatmul.mubr.msk.f32.gmra.mxu0 %vm879_vm2, %v10521_v45 }
0x1b41   :  { %v10523_v2 = vld [vmem:[#allocation5 + $0x1e8] sm:$0xff] }
0x1b42   :  { %v10522_v1 = vld [vmem:[#allocation5 + $0x1e0] sm:$0xff] }
0x1b43   :  { %12831 = vmatprep.mubr.msk.f32.mxu0 %vm879_vm2, %v10522_v1 }
0x1b44   :  { %12832 = vmatmul.mubr.msk.f32.gmra.mxu0 %vm879_vm2, %v10523_v2 }
0x1b45   :  { %v10525_v48 = vld [vmem:[#allocation5 + $0x1f8] sm:$0xff] }
0x1b46   :  { %v10524_v56 = vld [vmem:[#allocation5 + $0x1f0] sm:$0xff] }
0x1b47   :  { %12834 = vmatprep.mubr.msk.f32.mxu0 %vm879_vm2, %v10524_v56 }
0x1b48   :  { %12835 = vmatmul.mubr.msk.f32.gmra.mxu0 %vm879_vm2, %v10525_v48 }
0x1b73   :  { %v12767_v22 = vpop.f32.mrf.mxu0 }
0x1b74   :  { %v10881_v47 = vadd.f32 %v12767_v22, %v17322_v49 }
0x1b75   :  { %v10875_v19 = vpop.f32.mrf.mxu0 }
0x1b76   :  { %11131 = vst.msk [vmem:[%s17833_s25 + $0x88] sm:$0xff] %vm6858_vm7, %v10881_v47  ;;  %v10876_v26 = vadd.f32 %v17322_v49, %v10875_v19 }
0x1b78   :  { %11130 = vst.msk [vmem:[%s17833_s25 + $0x80] sm:$0xff] %vm6858_vm7, %v10876_v26 }
0x1b79   :  { %v12770_v9 = vpop.f32.mrf.mxu0 }
0x1b7a   :  { %v10891_v54 = vadd.f32 %v12770_v9, %v17322_v49 }
0x1b7b   :  { %v10885_v53 = vpop.f32.mrf.mxu0 }
0x1b7c   :  { %11133 = vst.msk [vmem:[%s17833_s25 + $0x98] sm:$0xff] %vm6858_vm7, %v10891_v54  ;;  %v10886_v38 = vadd.f32 %v17322_v49, %v10885_v53 }
0x1b7d   :  { %v12773_v6 = vpop.f32.mrf.mxu0 }
0x1b7e   :  { %11132 = vst.msk [vmem:[%s17833_s25 + $0x90] sm:$0xff] %vm6858_vm7, %v10886_v38  ;;  %v10901_v32 = vadd.f32 %v12773_v6, %v17322_v49 }
0x1b7f   :  { %v10895_v33 = vpop.f32.mrf.mxu0 }
0x1b80   :  { %11135 = vst.msk [vmem:[%s17833_s25 + $0xa8] sm:$0xff] %vm6858_vm7, %v10901_v32  ;;  %v10896_v27 = vadd.f32 %v17322_v49, %v10895_v33 }
0x1b81   :  { %v12776_v15 = vpop.f32.mrf.mxu0 }
0x1b82   :  { %11134 = vst.msk [vmem:[%s17833_s25 + $0xa0] sm:$0xff] %vm6858_vm7, %v10896_v27  ;;  %v10911_v58 = vadd.f32 %v12776_v15, %v17322_v49 }
0x1b83   :  { %v10905_v42 = vpop.f32.mrf.mxu0 }
0x1b84   :  { %11137 = vst.msk [vmem:[%s17833_s25 + $0xb8] sm:$0xff] %vm6858_vm7, %v10911_v58  ;;  %v10906_v28 = vadd.f32 %v17322_v49, %v10905_v42 }
0x1b85   :  { %v12779_v39 = vpop.f32.mrf.mxu0 }
0x1b86   :  { %11136 = vst.msk [vmem:[%s17833_s25 + $0xb0] sm:$0xff] %vm6858_vm7, %v10906_v28  ;;  %v10921_v31 = vadd.f32 %v12779_v39, %v17322_v49 }
0x1b87   :  { %v10915_v3 = vpop.f32.mrf.mxu0 }
0x1b88   :  { %11139 = vst.msk [vmem:[%s17833_s25 + $0xc8] sm:$0xff] %vm6858_vm7, %v10921_v31  ;;  %v10916_v10 = vadd.f32 %v17322_v49, %v10915_v3 }
0x1b89   :  { %v12782_v37 = vpop.f32.mrf.mxu0 }
0x1b8a   :  { %11138 = vst.msk [vmem:[%s17833_s25 + $0xc0] sm:$0xff] %vm6858_vm7, %v10916_v10  ;;  %v10931_v11 = vadd.f32 %v12782_v37, %v17322_v49 }
0x1b8b   :  { %v10925_v36 = vpop.f32.mrf.mxu0 }
0x1b8c   :  { %11141 = vst.msk [vmem:[%s17833_s25 + $0xd8] sm:$0xff] %vm6858_vm7, %v10931_v11  ;;  %v10926_v40 = vadd.f32 %v17322_v49, %v10925_v36 }
0x1b8d   :  { %v12785_v17 = vpop.f32.mrf.mxu0 }
0x1b8e   :  { %11140 = vst.msk [vmem:[%s17833_s25 + $0xd0] sm:$0xff] %vm6858_vm7, %v10926_v40  ;;  %v10941_v61 = vadd.f32 %v12785_v17, %v17322_v49 }
0x1b8f   :  { %v10935_v59 = vpop.f32.mrf.mxu0 }
0x1b90   :  { %11143 = vst.msk [vmem:[%s17833_s25 + $0xe8] sm:$0xff] %vm6858_vm7, %v10941_v61  ;;  %v10936_v24 = vadd.f32 %v17322_v49, %v10935_v59 }
0x1b91   :  { %v12788_v5 = vpop.f32.mrf.mxu0 }
0x1b92   :  { %11142 = vst.msk [vmem:[%s17833_s25 + $0xe0] sm:$0xff] %vm6858_vm7, %v10936_v24  ;;  %v10951_v0 = vadd.f32 %v12788_v5, %v17322_v49 }
0x1b93   :  { %v10945_v16 = vpop.f32.mrf.mxu0 }
0x1b94   :  { %11145 = vst.msk [vmem:[%s17833_s25 + $0xf8] sm:$0xff] %vm6858_vm7, %v10951_v0  ;;  %v10946_v46 = vadd.f32 %v17322_v49, %v10945_v16 }
0x1b95   :  { %v12791_v63 = vpop.f32.mrf.mxu0 }
0x1b96   :  { %11144 = vst.msk [vmem:[%s17833_s25 + $0xf0] sm:$0xff] %vm6858_vm7, %v10946_v46  ;;  %v10961_v23 = vadd.f32 %v12791_v63, %v17322_v49 }
0x1b97   :  { %v10955_v57 = vpop.f32.mrf.mxu0 }
0x1b98   :  { %11147 = vst.msk [vmem:[%s17833_s25 + $0x108] sm:$0xff] %vm6858_vm7, %v10961_v23  ;;  %v10956_v52 = vadd.f32 %v17322_v49, %v10955_v57 }
0x1b99   :  { %v12794_v41 = vpop.f32.mrf.mxu0 }
0x1b9a   :  { %11146 = vst.msk [vmem:[%s17833_s25 + $0x100] sm:$0xff] %vm6858_vm7, %v10956_v52  ;;  %v10971_v25 = vadd.f32 %v12794_v41, %v17322_v49 }
0x1b9b   :  { %v10965_v62 = vpop.f32.mrf.mxu0 }
0x1b9c   :  { %11149 = vst.msk [vmem:[%s17833_s25 + $0x118] sm:$0xff] %vm6858_vm7, %v10971_v25  ;;  %v10966_v8 = vadd.f32 %v17322_v49, %v10965_v62 }
0x1b9d   :  { %v12797_v14 = vpop.f32.mrf.mxu0 }
0x1b9e   :  { %11148 = vst.msk [vmem:[%s17833_s25 + $0x110] sm:$0xff] %vm6858_vm7, %v10966_v8  ;;  %v10981_v55 = vadd.f32 %v12797_v14, %v17322_v49 }
0x1b9f   :  { %v10975_v7 = vpop.f32.mrf.mxu0 }
0x1ba0   :  { %11151 = vst.msk [vmem:[%s17833_s25 + $0x128] sm:$0xff] %vm6858_vm7, %v10981_v55  ;;  %v10976_v18 = vadd.f32 %v17322_v49, %v10975_v7 }
0x1ba1   :  { %v12800_v60 = vpop.f32.mrf.mxu0 }
0x1ba2   :  { %11150 = vst.msk [vmem:[%s17833_s25 + $0x120] sm:$0xff] %vm6858_vm7, %v10976_v18  ;;  %v10991_v29 = vadd.f32 %v12800_v60, %v17322_v49 }
0x1ba3   :  { %v10985_v30 = vpop.f32.mrf.mxu0 }
0x1ba4   :  { %11153 = vst.msk [vmem:[%s17833_s25 + $0x138] sm:$0xff] %vm6858_vm7, %v10991_v29  ;;  %v10986_v43 = vadd.f32 %v17322_v49, %v10985_v30 }
0x1ba5   :  { %v12803_v35 = vpop.f32.mrf.mxu0 }
0x1ba6   :  { %11152 = vst.msk [vmem:[%s17833_s25 + $0x130] sm:$0xff] %vm6858_vm7, %v10986_v43  ;;  %v11001_v50 = vadd.f32 %v12803_v35, %v17322_v49 }
0x1ba7   :  { %v10995_v44 = vpop.f32.mrf.mxu0 }
0x1ba8   :  { %11155 = vst.msk [vmem:[%s17833_s25 + $0x148] sm:$0xff] %vm6858_vm7, %v11001_v50  ;;  %v10996_v4 = vadd.f32 %v17322_v49, %v10995_v44 }
0x1ba9   :  { %v12806_v12 = vpop.f32.mrf.mxu0 }
0x1baa   :  { %11154 = vst.msk [vmem:[%s17833_s25 + $0x140] sm:$0xff] %vm6858_vm7, %v10996_v4  ;;  %v11011_v51 = vadd.f32 %v12806_v12, %v17322_v49 }
0x1bab   :  { %v11005_v20 = vpop.f32.mrf.mxu0 }
0x1bac   :  { %11157 = vst.msk [vmem:[%s17833_s25 + $0x158] sm:$0xff] %vm6858_vm7, %v11011_v51  ;;  %v11006_v21 = vadd.f32 %v17322_v49, %v11005_v20 }
0x1bad   :  { %v12809_v34 = vpop.f32.mrf.mxu0 }
0x1bae   :  { %11156 = vst.msk [vmem:[%s17833_s25 + $0x150] sm:$0xff] %vm6858_vm7, %v11006_v21  ;;  %v11021_v13 = vadd.f32 %v12809_v34, %v17322_v49 }
0x1baf   :  { %v11015_v45 = vpop.f32.mrf.mxu0 }
0x1bb0   :  { %11159 = vst.msk [vmem:[%s17833_s25 + $0x168] sm:$0xff] %vm6858_vm7, %v11021_v13  ;;  %v11016_v1 = vadd.f32 %v17322_v49, %v11015_v45 }
0x1bb1   :  { %v12812_v2 = vpop.f32.mrf.mxu0 }
0x1bb2   :  { %11158 = vst.msk [vmem:[%s17833_s25 + $0x160] sm:$0xff] %vm6858_vm7, %v11016_v1  ;;  %v11031_v56 = vadd.f32 %v12812_v2, %v17322_v49 }
0x1bb3   :  { %v11025_v48 = vpop.f32.mrf.mxu0 }
0x1bb4   :  { %11161 = vst.msk [vmem:[%s17833_s25 + $0x178] sm:$0xff] %vm6858_vm7, %v11031_v56  ;;  %v11026_v22 = vadd.f32 %v17322_v49, %v11025_v48 }
0x1bb6   :  { %11160 = vst.msk [vmem:[%s17833_s25 + $0x170] sm:$0xff] %vm6858_vm7, %v11026_v22 }
0x1beb   :  { %v12815_v47 = vpop.f32.mrf.mxu0 }
0x1bec   :  { %v11041_v19 = vadd.f32 %v12815_v47, %v17322_v49 }
0x1bed   :  { %v11035_v26 = vpop.f32.mrf.mxu0 }
0x1bee   :  { %11163 = vst.msk [vmem:[%s17833_s25 + $0x188] sm:$0xff] %vm6858_vm7, %v11041_v19  ;;  %v11036_v9 = vadd.f32 %v17322_v49, %v11035_v26 }
0x1bf0   :  { %v12818_v54 = vpop.f32.mrf.mxu0  ;;  %11162 = vst.msk [vmem:[%s17833_s25 + $0x180] sm:$0xff] %vm6858_vm7, %v11036_v9 }
0x1bf1   :  { %v11051_v53 = vadd.f32 %v12818_v54, %v17322_v49 }
0x1bf2   :  { %v11045_v38 = vpop.f32.mrf.mxu0 }
0x1bf3   :  { %11165 = vst.msk [vmem:[%s17833_s25 + $0x198] sm:$0xff] %vm6858_vm7, %v11051_v53  ;;  %v11046_v6 = vadd.f32 %v17322_v49, %v11045_v38 }
0x1bf4   :  { %v12821_v32 = vpop.f32.mrf.mxu0 }
0x1bf5   :  { %11164 = vst.msk [vmem:[%s17833_s25 + $0x190] sm:$0xff] %vm6858_vm7, %v11046_v6  ;;  %v11061_v33 = vadd.f32 %v12821_v32, %v17322_v49 }
0x1bf6   :  { %v11055_v27 = vpop.f32.mrf.mxu0 }
0x1bf7   :  { %11167 = vst.msk [vmem:[%s17833_s25 + $0x1a8] sm:$0xff] %vm6858_vm7, %v11061_v33  ;;  %v11056_v15 = vadd.f32 %v17322_v49, %v11055_v27 }
0x1bf8   :  { %v12824_v58 = vpop.f32.mrf.mxu0 }
0x1bf9   :  { %11166 = vst.msk [vmem:[%s17833_s25 + $0x1a0] sm:$0xff] %vm6858_vm7, %v11056_v15  ;;  %v11071_v42 = vadd.f32 %v12824_v58, %v17322_v49 }
0x1bfa   :  { %v11065_v28 = vpop.f32.mrf.mxu0 }
0x1bfb   :  { %11169 = vst.msk [vmem:[%s17833_s25 + $0x1b8] sm:$0xff] %vm6858_vm7, %v11071_v42  ;;  %v11066_v39 = vadd.f32 %v17322_v49, %v11065_v28 }
0x1bfc   :  { %v12827_v31 = vpop.f32.mrf.mxu0 }
0x1bfd   :  { %11168 = vst.msk [vmem:[%s17833_s25 + $0x1b0] sm:$0xff] %vm6858_vm7, %v11066_v39  ;;  %v11081_v3 = vadd.f32 %v12827_v31, %v17322_v49 }
0x1bfe   :  { %v11075_v10 = vpop.f32.mrf.mxu0 }
0x1bff   :  { %11171 = vst.msk [vmem:[%s17833_s25 + $0x1c8] sm:$0xff] %vm6858_vm7, %v11081_v3  ;;  %v11076_v37 = vadd.f32 %v17322_v49, %v11075_v10 }
0x1c00   :  { %v12830_v11 = vpop.f32.mrf.mxu0 }
0x1c01   :  { %11170 = vst.msk [vmem:[%s17833_s25 + $0x1c0] sm:$0xff] %vm6858_vm7, %v11076_v37  ;;  %v11091_v36 = vadd.f32 %v12830_v11, %v17322_v49 }
0x1c02   :  { %v11085_v40 = vpop.f32.mrf.mxu0 }
0x1c03   :  { %11173 = vst.msk [vmem:[%s17833_s25 + $0x1d8] sm:$0xff] %vm6858_vm7, %v11091_v36  ;;  %v11086_v17 = vadd.f32 %v17322_v49, %v11085_v40 }
0x1c04   :  { %v12833_v61 = vpop.f32.mrf.mxu0 }
0x1c05   :  { %11172 = vst.msk [vmem:[%s17833_s25 + $0x1d0] sm:$0xff] %vm6858_vm7, %v11086_v17  ;;  %v11101_v59 = vadd.f32 %v12833_v61, %v17322_v49 }
0x1c06   :  { %v11095_v24 = vpop.f32.mrf.mxu0 }
0x1c07   :  { %11175 = vst.msk [vmem:[%s17833_s25 + $0x1e8] sm:$0xff] %vm6858_vm7, %v11101_v59  ;;  %v11096_v5 = vadd.f32 %v17322_v49, %v11095_v24 }
0x1c08   :  { %v12836_v0 = vpop.f32.mrf.mxu0 }
0x1c09   :  { %11174 = vst.msk [vmem:[%s17833_s25 + $0x1e0] sm:$0xff] %vm6858_vm7, %v11096_v5  ;;  %v11111_v16 = vadd.f32 %v12836_v0, %v17322_v49 }
0x1c0a   :  { %v11105_v46 = vpop.f32.mrf.mxu0 }
0x1c0b   :  { %11177 = vst.msk [vmem:[%s17833_s25 + $0x1f8] sm:$0xff] %vm6858_vm7, %v11111_v16  ;;  %v11106_v63 = vadd.f32 %v17322_v49, %v11105_v46 }
0x1c0d   :  { %11176 = vst.msk [vmem:[%s17833_s25 + $0x1f0] sm:$0xff] %vm6858_vm7, %v11106_v63 }
0x1c0e   :  { %11182 = vsyncpa [#allocation7], 1 }
0x1c0f   :  { %11183 = vsyncpa [#allocation9], 1 }
0x1c10   :  { %11184 = vsyncpa [#allocation12], 1 }
0x1c11   :  { %11185 = vsyncpa [#allocation15], 1 }

</bundles_post_ra>
